<compile_context>
chip_gen: v5e
topology: v5e:2x2
jax: 0.10.0
libtpu: 0.0.40
codegen_flags: <defaults>
</compile_context>

<pallas_src>
import functools

import jax
import jax.numpy as jnp
from jax import lax
from jax.experimental import pallas as pl
from jax.experimental.pallas import tpu as pltpu


# ----------------------------------------------------------------------------
# Pallas kernel
# ----------------------------------------------------------------------------
def _vargroup_block_kernel(
    x_ref,                                   # (Nb, H, W*C)   f32
    bw1_ref,                                 # (K, W*C, W*Cm) bf16
    bw2_ref, bb2_ref,                        # (W*Cm, W*C) bf16, (1, W*C) f32 (bb1 folded in)
    a1_ref,                                  # (1,) SMEM  -- PReLU alpha inside varG1
    bw3_ref,                                 # (K, W*C, W*Cm) bf16
    bw4_ref, bb4_ref,                        # (W*Cm, W*C) bf16, (1, W*C) f32 (bb3 folded in)
    pfw1_ref, fb1_ref,                       # (W*C, Cr) f32 (pool folded), (1, Cr) f32
    pfw2_ref, fb2_ref,                       # (Cr, W*C) f32 (tile folded), (1, W*C) f32
    a2_ref,                                  # (1,) SMEM  -- final PReLU alpha
    o_ref,                                   # (Nb, H, W*C)   f32
    pad_ref,                                 # VMEM scratch (Nb, H+2p, W*C)  bf16
    *, H, W, C, K, dil,
):
    Nb = x_ref.shape[0]
    WC = W * C
    pd = dil * (K - 1) // 2
    M = Nb * H

    # Zero only the vertical halo rows of the padded plane; the interior is fully
    # overwritten before every use and the horizontal padding lives in the weights.
    # NOTE: this runs every grid step on purpose -- with dimension_semantics
    # ("parallel",) each TensorCore owns its own scratch, so gating this behind
    # program_id == 0 would leave stale halos on the other core.
    if pd > 0:
        zrows = jnp.zeros((Nb, pd, WC), jnp.bfloat16)
        pad_ref[:, pl.ds(0, pd), :] = zrows
        pad_ref[:, pl.ds(pd + H, pd), :] = zrows

    def conv_kxk(bw_ref):
        """Grouped KxK 'same' conv (+ folded BN scale), row-weight form.

        Assumes the bf16 input plane has already been written into pad_ref.
        First tap assigns (no zeros init), remaining taps accumulate.
        """
        acc = None
        for ky in range(K):                               # unrolled, static slices
            win = pad_ref[:, pl.ds(ky * dil, H), :].reshape(M, WC)   # bf16
            part = jnp.dot(win, bw_ref[ky], preferred_element_type=jnp.float32)
            acc = part if acc is None else acc + part
        return acc                                        # (M, W*Cout) f32

    def conv_1x1(act2d, bw_ref, bb_ref):
        return jnp.dot(act2d.astype(jnp.bfloat16), bw_ref[...],
                       preferred_element_type=jnp.float32) + bb_ref[...]

    def prelu(v, alpha):
        return jnp.where(v >= 0, v, alpha * v)

    # varG1_conv: grouped KxK conv + BN, then grouped 1x1 conv + BN + PReLU
    pad_ref[:, pl.ds(pd, H), :] = x_ref[...].astype(jnp.bfloat16)   # one cast per conv
    t = conv_kxk(bw1_ref)                                           # (M, W*Cm)
    h = prelu(conv_1x1(t, bw2_ref, bb2_ref), a1_ref[0])             # (M, W*C)

    # varG2_conv: grouped KxK conv + BN, then grouped 1x1 conv + BN
    pad_ref[:, pl.ds(pd, H), :] = h.reshape(Nb, H, WC).astype(jnp.bfloat16)
    t = conv_kxk(bw3_ref)                                           # (M, W*Cm)
    h = conv_1x1(t, bw4_ref, bb4_ref)                               # (M, W*C)

    # Stage the pre-SE activation in the output VMEM block so it is not carried
    # live (in vregs) across the SE computation.
    o_ref[...] = h.reshape(Nb, H, WC)

    # SE (per image). pool / channel-tiling matrices are folded into the FC
    # weights at wrapper time, so only two tiny matmuls remain.
    summed = jnp.sum(o_ref[...], axis=1)                             # (Nb, WC)
    s = jnp.maximum(
        jnp.dot(summed, pfw1_ref[...], preferred_element_type=jnp.float32)
        + fb1_ref[...], 0.0)                                         # (Nb, Cr)
    gate = jax.nn.sigmoid(
        jnp.dot(s, pfw2_ref[...], preferred_element_type=jnp.float32)
        + fb2_ref[...])                                              # (Nb, WC)

    # identity shortcut (stride == 1): residual re-read from x_ref here, not
    # carried live through the convs; then final PReLU.
    out = prelu(o_ref[...] * gate[:, None, :] + x_ref[...], a2_ref[0])
    o_ref[...] = out.astype(o_ref.dtype)


# ----------------------------------------------------------------------------
# Kernel-layout weight construction (wrapper side, plain XLA)
# ----------------------------------------------------------------------------
def _build_kernel_weights(params, *, H, W, C, K, dil):
    pd = dil * (K - 1) // 2
    f32 = jnp.float32

    def fold(w4d, scale):                          # scale: (1, Cout)
        return w4d * scale.reshape((1,) * (w4d.ndim - 1) + (-1,))

    def big_kxk(w4d, scale):
        # w4d: (K, K, Cin, Cout) dense HWIO (block-diagonal across groups).
        # Output: (K, W*Cin, W*Cout) "row weights"; horizontal taps and horizontal
        # zero-padding are folded in (invalid source columns simply get zero rows).
        w = fold(w4d, scale)
        cin, cout = w.shape[2], w.shape[3]
        kx = jnp.arange(K)[:, None, None]
        src = jnp.arange(W)[None, :, None]
        dst = jnp.arange(W)[None, None, :]
        sel = (src == dst + kx * dil - pd).astype(f32)        # (K, W, W)
        big = jnp.einsum("asx,yaio->ysixo", sel, w)           # (K, W, Cin, W, Cout)
        return big.reshape(K, W * cin, W * cout)

    def big_1x1(w4d, scale):
        w = fold(w4d, scale)[0, 0]                            # (Cin, Cout)
        cin, cout = w.shape
        big = jnp.einsum("xz,io->xizo", jnp.eye(W, dtype=f32), w)
        return big.reshape(W * cin, W * cout)

    def wide_bias(b):                                         # (1, Cout) -> (1, W*Cout)
        return jnp.tile(b.astype(f32), (1, W))

    bw1 = big_kxk(params["w1_4d"], params["s1"])              # f32 for now
    bw3 = big_kxk(params["w3_4d"], params["s3"])
    w2 = big_1x1(params["w2_4d"], params["s2"])
    w4 = big_1x1(params["w4_4d"], params["s4"])

    # Fold the KxK BN shift through the following 1x1 conv (in f32) so the kernel
    # adds a single bias per conv pair:  out = (conv_kxk) @ W2 + (bb1 @ W2 + bb2)
    bb1 = wide_bias(params["b1"]); bb2 = wide_bias(params["b2"])
    bb3 = wide_bias(params["b3"]); bb4 = wide_bias(params["b4"])
    bb2f = bb2 + bb1 @ w2
    bb4f = bb4 + bb3 @ w4

    # Fold SE avg-pool / channel-tiling matrices into the FC weights.
    # tile_m is pure channel replication, so sigmoid/bias commute with it.
    pool_m = jnp.tile(jnp.eye(C, dtype=f32), (W, 1)) / float(H * W)   # (W*C, C)
    tile_m = jnp.tile(jnp.eye(C, dtype=f32), (1, W))                  # (C, W*C)
    pfw1 = pool_m @ params["fw1"]                                     # (W*C, Cr)
    pfw2 = params["fw2"] @ tile_m                                     # (Cr, W*C)
    fb2w = params["fb2"] @ tile_m                                     # (1, W*C)

    return dict(
        bw1=bw1.astype(jnp.bfloat16),
        bw2=w2.astype(jnp.bfloat16), bb2=bb2f,
        bw3=bw3.astype(jnp.bfloat16),
        bw4=w4.astype(jnp.bfloat16), bb4=bb4f,
        pfw1=pfw1, fb1=params["fb1"].astype(f32),
        pfw2=pfw2, fb2=fb2w,
    )


# ----------------------------------------------------------------------------
# Wrapper
# ----------------------------------------------------------------------------
def _pick_batch_block(N, H, target_m):
    """Largest divisor nb of N with nb*H <= target_m, preferring a >=2-step grid."""
    best = 1
    for nb in range(1, N + 1):
        if N % nb == 0 and nb * H <= target_m:
            best = nb
    if N // best < 2:                         # give v7x megacore / pipeliner >= 2 steps
        for nb in range(best - 1, 0, -1):
            if N % nb == 0:
                best = nb
                break
    return best


def vargroup_block_forward(x_nchw, params, *, K, dil, batch_block=None, target_m=256):
    """target_m: matmul rows per grid step (nb*H). 256 fills the v6e/v7x MXU;
    use 128 on v5e (4x128^2 MXU, single vst slot)."""
    N, C, H, W = x_nchw.shape
    WC = W * C
    pd = dil * (K - 1) // 2
    assert K % 2 == 1, "odd kernel sizes only (matches residual-preserving 'same' conv)"
    # Lane-dense layout: every VMEM row is an unmasked 128-lane vreg row.
    assert WC % 128 == 0, "W*C must be a multiple of 128 for the lane-dense layout"
    nb = _pick_batch_block(N, H, target_m) if batch_block is None else batch_block
    assert N % nb == 0, "batch_block must divide N"

    # NCHW -> lane-dense (N, H, W*C).
    # TODO(synk): if the surrounding graph can produce/consume NHWC directly,
    # these two HBM-bound relayouts should be removed.
    x_in = jnp.transpose(x_nchw, (0, 2, 3, 1)).reshape(N, H, WC).astype(jnp.float32)
    kw = _build_kernel_weights(params, H=H, W=W, C=C, K=K, dil=dil)

    args = (
        x_in,
        kw["bw1"], kw["bw2"], kw["bb2"], params["a1"],
        kw["bw3"], kw["bw4"], kw["bb4"],
        kw["pfw1"], kw["fb1"], kw["pfw2"], kw["fb2"],
        params["a2"],
    )

    smem_spec = pl.BlockSpec(memory_space=pltpu.MemorySpace.SMEM)

    def const_spec(a):
        nd = a.ndim
        return pl.BlockSpec(a.shape, lambda b, _nd=nd: (0,) * _nd)

    in_specs = [pl.BlockSpec((nb, H, WC), lambda b: (b, 0, 0))]
    for a in args[1:]:
        in_specs.append(smem_spec if a.ndim == 1 else const_spec(a))

    kernel = functools.partial(_vargroup_block_kernel, H=H, W=W, C=C, K=K, dil=dil)

    # Re-derive the VMEM budget instead of hard-coding 32 MiB: double-buffered
    # in/out activation blocks + (double-buffered) constant weights + bf16 pad
    # scratch + slack, clamped to the v7x physical ceiling (64 MiB).
    def nbytes(a):
        return int(a.size) * a.dtype.itemsize

    block_bytes = nb * H * WC * 4
    weight_bytes = sum(nbytes(a) for a in args[1:])
    scratch_bytes = nb * (H + 2 * pd) * WC * 2
    vmem_budget = 2 * (2 * block_bytes) + 2 * weight_bytes + scratch_bytes + (4 << 20)
    vmem_budget = min(max(vmem_budget, 32 << 20), 64 << 20)

    out = pl.pallas_call(
        kernel,
        out_shape=jax.ShapeDtypeStruct((N, H, WC), jnp.float32),
        grid=(N // nb,),
        in_specs=in_specs,
        out_specs=pl.BlockSpec((nb, H, WC), lambda b: (b, 0, 0)),
        scratch_shapes=[pltpu.VMEM((nb, H + 2 * pd, WC), jnp.bfloat16)],
        compiler_params=pltpu.CompilerParams(
            dimension_semantics=("parallel",),
            vmem_limit_bytes=vmem_budget),
    )(*args)

    return jnp.transpose(out.reshape(N, H, W, C), (0, 3, 1, 2))


# ----------------------------------------------------------------------------
# Deterministic parameter construction
# ----------------------------------------------------------------------------
def init_params(key, C, K, groups_reduce):
    Cm = 2 * C                 # internal_channels
    Cr = max(C // 4, 1)        # SE reduction
    keys = iter(jax.random.split(key, 16))

    def grouped_dense(k, kh, kw, cin, cout):
        """Dense HWIO weight equivalent to a grouped conv (block-diagonal)."""
        groups = cin // groups_reduce
        cin_g, cout_g = cin // groups, cout // groups
        fan_in = float(kh * kw * cin_g)
        w = jax.random.normal(k, (kh, kw, groups, cin_g, cout_g), jnp.float32) / (fan_in ** 0.5)
        dense = jnp.zeros((kh, kw, cin, cout), jnp.float32)
        for g in range(groups):
            dense = dense.at[:, :,
                             g * cin_g:(g + 1) * cin_g,
                             g * cout_g:(g + 1) * cout_g].set(w[:, :, g])
        return dense

    def bn_fold(k, ch):
        kg, kb, km, kv = jax.random.split(k, 4)
        gamma = jax.random.uniform(kg, (ch,), minval=0.5, maxval=1.5)
        beta = 0.1 * jax.random.normal(kb, (ch,))
        mean = 0.1 * jax.random.normal(km, (ch,))
        var = jax.random.uniform(kv, (ch,), minval=0.5, maxval=1.5)
        scale = gamma / jnp.sqrt(var + 1e-5)
        shift = beta - mean * scale
        return (scale.reshape(1, ch).astype(jnp.float32),
                shift.reshape(1, ch).astype(jnp.float32))

    w1 = grouped_dense(next(keys), K, K, C, Cm); s1, b1 = bn_fold(next(keys), Cm)
    w2 = grouped_dense(next(keys), 1, 1, Cm, C); s2, b2 = bn_fold(next(keys), C)
    w3 = grouped_dense(next(keys), K, K, C, Cm); s3, b3 = bn_fold(next(keys), Cm)
    w4 = grouped_dense(next(keys), 1, 1, Cm, C); s4, b4 = bn_fold(next(keys), C)

    fw1 = jax.random.normal(next(keys), (C, Cr), jnp.float32) / (C ** 0.5)
    fb1 = (0.1 * jax.random.normal(next(keys), (1, Cr))).astype(jnp.float32)
    fw2 = jax.random.normal(next(keys), (Cr, C), jnp.float32) / (Cr ** 0.5)
    fb2 = (0.1 * jax.random.normal(next(keys), (1, C))).astype(jnp.float32)

    return dict(
        w1_4d=w1, s1=s1, b1=b1,
        w2_4d=w2, s2=s2, b2=b2,
        w3_4d=w3, s3=s3, b3=b3,
        w4_4d=w4, s4=s4, b4=b4,
        fw1=fw1, fb1=fb1, fw2=fw2, fb2=fb2,
        a1=jnp.array([0.25], jnp.float32),   # PyTorch nn.PReLU() default init
        a2=jnp.array([0.25], jnp.float32),
    )


# ----------------------------------------------------------------------------
# Pure-JAX reference (correctness check only, full f32)
# ----------------------------------------------------------------------------
def reference_forward(x_nchw, p, *, K, dil):
    pad = dil * (K - 1) // 2
    x = jnp.transpose(x_nchw, (0, 2, 3, 1)).astype(jnp.float32)   # NHWC

    def conv(h, w, padding):
        return lax.conv_general_dilated(
            h, w, window_strides=(1, 1),
            padding=((padding, padding), (padding, padding)),
            rhs_dilation=(dil, dil),
            dimension_numbers=("NHWC", "HWIO", "NHWC"))

    def bn(h, s, b):
        return h * s.reshape(1, 1, 1, -1) + b.reshape(1, 1, 1, -1)

    a1 = p["a1"][0]
    a2 = p["a2"][0]

    h = bn(conv(x, p["w1_4d"], pad), p["s1"], p["b1"])
    h = bn(conv(h, p["w2_4d"], 0), p["s2"], p["b2"])
    h = jnp.where(h >= 0, h, a1 * h)
    h = bn(conv(h, p["w3_4d"], pad), p["s3"], p["b3"])
    h = bn(conv(h, p["w4_4d"], 0), p["s4"], p["b4"])

    m = jnp.mean(h, axis=(1, 2))                                   # (N, C)
    s = jnp.maximum(m @ p["fw1"] + p["fb1"], 0.0)
    g = jax.nn.sigmoid(s @ p["fw2"] + p["fb2"])
    h = h * g[:, None, None, :]

    out = h + x
    out = jnp.where(out >= 0, out, a2 * out)
    return jnp.transpose(out, (0, 3, 1, 2))


# ----------------------------------------------------------------------------
if __name__ == "__main__":
    key = jax.random.PRNGKey(0)
    kx, kp = jax.random.split(key)

    # VarGroupBlock(in_channels=16, kernel_size=3, dilation=1, groups_reduce=8)
    # W*C = 128 -> lane-dense layout; N chosen so the auto batch_block gives
    # M = nb*H = 256 rows per conv matmul (fills the v6e/v7x MXU) with a 2-step
    # grid (v7x megacore sharding + pipelined block DMA).
    N, C, H, W = 64, 16, 8, 8
    K, dil, groups_reduce = 3, 1, 8

    x = jax.random.normal(kx, (N, C, H, W), jnp.float32)
    params = init_params(kp, C, K, groups_reduce)

    out = jax.block_until_ready(vargroup_block_forward(x, params, K=K, dil=dil))
    assert out.shape == (N, C, H, W)

    ref = reference_forward(x, params, K=K, dil=dil)
    # Kernel runs conv matmuls with bf16 operands (f32 MXU accumulation) across
    # two KxK+1x1 pairs; per-element tolerance is set accordingly vs the f32 ref.
    err = jnp.abs(out - ref)
    tol = 1e-1 + 5e-2 * jnp.abs(ref)
    if not bool(jnp.all(err <= tol)):
        worst = float(jnp.max(err - tol))
        raise AssertionError(
            f"Pallas output mismatch vs reference: worst excess over tol = {worst:.4e}")

    print("KERNEL_OK")
</pallas_src>

<mosaic_0001>
module attributes {stable_mosaic.version = 11 : i64} {
  func.func @_vargroup_block_kernel(%arg0: i32, %arg1: memref<32x8x128xf32, #tpu.memory_space<vmem>>, %arg2: memref<3x128x256xbf16, #tpu.memory_space<vmem>>, %arg3: memref<256x128xbf16, #tpu.memory_space<vmem>>, %arg4: memref<1x128xf32, #tpu.memory_space<vmem>>, %arg5: memref<1xf32, #tpu.memory_space<smem>>, %arg6: memref<3x128x256xbf16, #tpu.memory_space<vmem>>, %arg7: memref<256x128xbf16, #tpu.memory_space<vmem>>, %arg8: memref<1x128xf32, #tpu.memory_space<vmem>>, %arg9: memref<128x4xf32, #tpu.memory_space<vmem>>, %arg10: memref<1x4xf32, #tpu.memory_space<vmem>>, %arg11: memref<4x128xf32, #tpu.memory_space<vmem>>, %arg12: memref<1x128xf32, #tpu.memory_space<vmem>>, %arg13: memref<1xf32, #tpu.memory_space<smem>>, %arg14: memref<32x8x128xf32, #tpu.memory_space<vmem>>, %arg15: memref<32x10x128xbf16, #tpu.memory_space<vmem>>) attributes {dimension_semantics = [#tpu.dimension_semantics<parallel>], iteration_bounds = array<i64: 2>, scalar_prefetch = 0 : i64, scratch_operands = 1 : i64, tpu.core_type = #tpu.core_type<tc>, window_params = [{transform_indices = @transform_0, window_bounds = array<i64: 32, 8, 128>}, {pipeline_mode = #tpu.pipeline_mode<synchronous>, transform_indices = @transform_1, window_bounds = array<i64: 3, 128, 256>}, {pipeline_mode = #tpu.pipeline_mode<synchronous>, transform_indices = @transform_2, window_bounds = array<i64: 256, 128>}, {pipeline_mode = #tpu.pipeline_mode<synchronous>, transform_indices = @transform_3, window_bounds = array<i64: 1, 128>}, {transform_indices = @transform_4, window_bounds = array<i64: 1>}, {pipeline_mode = #tpu.pipeline_mode<synchronous>, transform_indices = @transform_5, window_bounds = array<i64: 3, 128, 256>}, {pipeline_mode = #tpu.pipeline_mode<synchronous>, transform_indices = @transform_6, window_bounds = array<i64: 256, 128>}, {pipeline_mode = #tpu.pipeline_mode<synchronous>, transform_indices = @transform_7, window_bounds = array<i64: 1, 128>}, {pipeline_mode = #tpu.pipeline_mode<synchronous>, transform_indices = @transform_8, window_bounds = array<i64: 128, 4>}, {pipeline_mode = #tpu.pipeline_mode<synchronous>, transform_indices = @transform_9, window_bounds = array<i64: 1, 4>}, {pipeline_mode = #tpu.pipeline_mode<synchronous>, transform_indices = @transform_10, window_bounds = array<i64: 4, 128>}, {pipeline_mode = #tpu.pipeline_mode<synchronous>, transform_indices = @transform_11, window_bounds = array<i64: 1, 128>}, {transform_indices = @transform_12, window_bounds = array<i64: 1>}, {transform_indices = @transform_13, window_bounds = array<i64: 32, 8, 128>}]} {
    %cst = arith.constant 0.000000e+00 : bf16
    %0 = vector.broadcast %cst : bf16 to vector<32x1x128xbf16>
    %c0 = arith.constant 0 : index
    %c0_0 = arith.constant 0 : index
    %c0_1 = arith.constant 0 : index
    %1 = vector.load %arg15[%c0, %c0_0, %c0_1] : memref<32x10x128xbf16, #tpu.memory_space<vmem>>, vector<32x1x128xbf16>
    tpu.vector_store %arg15[%c0, %c0_0, %c0_1], %0 {strides = array<i32>} : memref<32x10x128xbf16, #tpu.memory_space<vmem>>, vector<32x1x128xbf16>,
    %c0_2 = arith.constant 0 : index
    %c9 = arith.constant 9 : index
    %c0_3 = arith.constant 0 : index
    %2 = vector.load %arg15[%c0_2, %c9, %c0_3] : memref<32x10x128xbf16, #tpu.memory_space<vmem>>, vector<32x1x128xbf16>
    tpu.vector_store %arg15[%c0_2, %c9, %c0_3], %0 {strides = array<i32>} : memref<32x10x128xbf16, #tpu.memory_space<vmem>>, vector<32x1x128xbf16>,
    %c0_4 = arith.constant 0 : index
    %c0_5 = arith.constant 0 : index
    %c0_6 = arith.constant 0 : index
    %3 = vector.load %arg1[%c0_4, %c0_5, %c0_6] : memref<32x8x128xf32, #tpu.memory_space<vmem>>, vector<32x8x128xf32>
    %4 = arith.truncf %3 : vector<32x8x128xf32> to vector<32x8x128xbf16>
    %c0_7 = arith.constant 0 : index
    %c1 = arith.constant 1 : index
    %c0_8 = arith.constant 0 : index
    %5 = vector.load %arg15[%c0_7, %c1, %c0_8] : memref<32x10x128xbf16, #tpu.memory_space<vmem>>, vector<32x8x128xbf16>
    tpu.vector_store %arg15[%c0_7, %c1, %c0_8], %4 {strides = array<i32>} : memref<32x10x128xbf16, #tpu.memory_space<vmem>>, vector<32x8x128xbf16>,
    %c0_9 = arith.constant 0 : index
    %c0_10 = arith.constant 0 : index
    %c0_11 = arith.constant 0 : index
    %6 = vector.load %arg15[%c0_9, %c0_10, %c0_11] : memref<32x10x128xbf16, #tpu.memory_space<vmem>>, vector<32x8x128xbf16>
    %7 = vector.shape_cast %6 : vector<32x8x128xbf16> to vector<256x128xbf16>
    %c0_12 = arith.constant 0 : index
    %c0_13 = arith.constant 0 : index
    %c0_14 = arith.constant 0 : index
    %8 = vector.load %arg2[%c0_12, %c0_13, %c0_14] : memref<3x128x256xbf16, #tpu.memory_space<vmem>>, vector<1x128x256xbf16>
    %9 = vector.shape_cast %8 : vector<1x128x256xbf16> to vector<128x256xbf16>
    %cst_15 = arith.constant dense<0.000000e+00> : vector<256x256xf32>
    %10 = tpu.matmul %7, %9, %cst_15 {dimension_numbers = #tpu.dot_dimension_numbers<[1], [0], [0], [1], [0, 0, 1, 1], [], []>} : vector<256x128xbf16>, vector<128x256xbf16>, vector<256x256xf32> -> vector<256x256xf32>
    %c0_16 = arith.constant 0 : index
    %c1_17 = arith.constant 1 : index
    %c0_18 = arith.constant 0 : index
    %11 = vector.load %arg15[%c0_16, %c1_17, %c0_18] : memref<32x10x128xbf16, #tpu.memory_space<vmem>>, vector<32x8x128xbf16>
    %12 = vector.shape_cast %11 : vector<32x8x128xbf16> to vector<256x128xbf16>
    %c1_19 = arith.constant 1 : index
    %c0_20 = arith.constant 0 : index
    %c0_21 = arith.constant 0 : index
    %13 = vector.load %arg2[%c1_19, %c0_20, %c0_21] : memref<3x128x256xbf16, #tpu.memory_space<vmem>>, vector<1x128x256xbf16>
    %14 = vector.shape_cast %13 : vector<1x128x256xbf16> to vector<128x256xbf16>
    %cst_22 = arith.constant dense<0.000000e+00> : vector<256x256xf32>
    %15 = tpu.matmul %12, %14, %cst_22 {dimension_numbers = #tpu.dot_dimension_numbers<[1], [0], [0], [1], [0, 0, 1, 1], [], []>} : vector<256x128xbf16>, vector<128x256xbf16>, vector<256x256xf32> -> vector<256x256xf32>
    %16 = arith.addf %10, %15 : vector<256x256xf32>
    %c0_23 = arith.constant 0 : index
    %c2 = arith.constant 2 : index
    %c0_24 = arith.constant 0 : index
    %17 = vector.load %arg15[%c0_23, %c2, %c0_24] : memref<32x10x128xbf16, #tpu.memory_space<vmem>>, vector<32x8x128xbf16>
    %18 = vector.shape_cast %17 : vector<32x8x128xbf16> to vector<256x128xbf16>
    %c2_25 = arith.constant 2 : index
    %c0_26 = arith.constant 0 : index
    %c0_27 = arith.constant 0 : index
    %19 = vector.load %arg2[%c2_25, %c0_26, %c0_27] : memref<3x128x256xbf16, #tpu.memory_space<vmem>>, vector<1x128x256xbf16>
    %20 = vector.shape_cast %19 : vector<1x128x256xbf16> to vector<128x256xbf16>
    %cst_28 = arith.constant dense<0.000000e+00> : vector<256x256xf32>
    %21 = tpu.matmul %18, %20, %cst_28 {dimension_numbers = #tpu.dot_dimension_numbers<[1], [0], [0], [1], [0, 0, 1, 1], [], []>} : vector<256x128xbf16>, vector<128x256xbf16>, vector<256x256xf32> -> vector<256x256xf32>
    %22 = arith.addf %16, %21 : vector<256x256xf32>
    %23 = arith.truncf %22 : vector<256x256xf32> to vector<256x256xbf16>
    %c0_29 = arith.constant 0 : index
    %c0_30 = arith.constant 0 : index
    %24 = vector.load %arg3[%c0_29, %c0_30] : memref<256x128xbf16, #tpu.memory_space<vmem>>, vector<256x128xbf16>
    %cst_31 = arith.constant dense<0.000000e+00> : vector<256x128xf32>
    %25 = tpu.matmul %23, %24, %cst_31 {dimension_numbers = #tpu.dot_dimension_numbers<[1], [0], [0], [1], [0, 0, 1, 1], [], []>} : vector<256x256xbf16>, vector<256x128xbf16>, vector<256x128xf32> -> vector<256x128xf32>
    %c0_32 = arith.constant 0 : index
    %c0_33 = arith.constant 0 : index
    %26 = vector.load %arg4[%c0_32, %c0_33] : memref<1x128xf32, #tpu.memory_space<vmem>>, vector<1x128xf32>
    %27 = vector.broadcast %26 : vector<1x128xf32> to vector<256x128xf32>
    %28 = arith.addf %25, %27 : vector<256x128xf32>
    %c0_34 = arith.constant 0 : index
    %29 = memref.load %arg5[%c0_34] : memref<1xf32, #tpu.memory_space<smem>>
    %cst_35 = arith.constant 0.000000e+00 : f32
    %30 = vector.broadcast %cst_35 : f32 to vector<256x128xf32>
    %31 = arith.cmpf oge, %28, %30 : vector<256x128xf32>
    %32 = vector.broadcast %29 : f32 to vector<256x128xf32>
    %33 = arith.mulf %32, %28 : vector<256x128xf32>
    %34 = arith.select %31, %28, %33 : vector<256x128xi1>, vector<256x128xf32>
    %35 = vector.shape_cast %34 : vector<256x128xf32> to vector<32x8x128xf32>
    %36 = arith.truncf %35 : vector<32x8x128xf32> to vector<32x8x128xbf16>
    %c0_36 = arith.constant 0 : index
    %c1_37 = arith.constant 1 : index
    %c0_38 = arith.constant 0 : index
    %37 = vector.load %arg15[%c0_36, %c1_37, %c0_38] : memref<32x10x128xbf16, #tpu.memory_space<vmem>>, vector<32x8x128xbf16>
    tpu.vector_store %arg15[%c0_36, %c1_37, %c0_38], %36 {strides = array<i32>} : memref<32x10x128xbf16, #tpu.memory_space<vmem>>, vector<32x8x128xbf16>,
    %c0_39 = arith.constant 0 : index
    %c0_40 = arith.constant 0 : index
    %c0_41 = arith.constant 0 : index
    %38 = vector.load %arg15[%c0_39, %c0_40, %c0_41] : memref<32x10x128xbf16, #tpu.memory_space<vmem>>, vector<32x8x128xbf16>
    %39 = vector.shape_cast %38 : vector<32x8x128xbf16> to vector<256x128xbf16>
    %c0_42 = arith.constant 0 : index
    %c0_43 = arith.constant 0 : index
    %c0_44 = arith.constant 0 : index
    %40 = vector.load %arg6[%c0_42, %c0_43, %c0_44] : memref<3x128x256xbf16, #tpu.memory_space<vmem>>, vector<1x128x256xbf16>
    %41 = vector.shape_cast %40 : vector<1x128x256xbf16> to vector<128x256xbf16>
    %cst_45 = arith.constant dense<0.000000e+00> : vector<256x256xf32>
    %42 = tpu.matmul %39, %41, %cst_45 {dimension_numbers = #tpu.dot_dimension_numbers<[1], [0], [0], [1], [0, 0, 1, 1], [], []>} : vector<256x128xbf16>, vector<128x256xbf16>, vector<256x256xf32> -> vector<256x256xf32>
    %c0_46 = arith.constant 0 : index
    %c1_47 = arith.constant 1 : index
    %c0_48 = arith.constant 0 : index
    %43 = vector.load %arg15[%c0_46, %c1_47, %c0_48] : memref<32x10x128xbf16, #tpu.memory_space<vmem>>, vector<32x8x128xbf16>
    %44 = vector.shape_cast %43 : vector<32x8x128xbf16> to vector<256x128xbf16>
    %c1_49 = arith.constant 1 : index
    %c0_50 = arith.constant 0 : index
    %c0_51 = arith.constant 0 : index
    %45 = vector.load %arg6[%c1_49, %c0_50, %c0_51] : memref<3x128x256xbf16, #tpu.memory_space<vmem>>, vector<1x128x256xbf16>
    %46 = vector.shape_cast %45 : vector<1x128x256xbf16> to vector<128x256xbf16>
    %cst_52 = arith.constant dense<0.000000e+00> : vector<256x256xf32>
    %47 = tpu.matmul %44, %46, %cst_52 {dimension_numbers = #tpu.dot_dimension_numbers<[1], [0], [0], [1], [0, 0, 1, 1], [], []>} : vector<256x128xbf16>, vector<128x256xbf16>, vector<256x256xf32> -> vector<256x256xf32>
    %48 = arith.addf %42, %47 : vector<256x256xf32>
    %c0_53 = arith.constant 0 : index
    %c2_54 = arith.constant 2 : index
    %c0_55 = arith.constant 0 : index
    %49 = vector.load %arg15[%c0_53, %c2_54, %c0_55] : memref<32x10x128xbf16, #tpu.memory_space<vmem>>, vector<32x8x128xbf16>
    %50 = vector.shape_cast %49 : vector<32x8x128xbf16> to vector<256x128xbf16>
    %c2_56 = arith.constant 2 : index
    %c0_57 = arith.constant 0 : index
    %c0_58 = arith.constant 0 : index
    %51 = vector.load %arg6[%c2_56, %c0_57, %c0_58] : memref<3x128x256xbf16, #tpu.memory_space<vmem>>, vector<1x128x256xbf16>
    %52 = vector.shape_cast %51 : vector<1x128x256xbf16> to vector<128x256xbf16>
    %cst_59 = arith.constant dense<0.000000e+00> : vector<256x256xf32>
    %53 = tpu.matmul %50, %52, %cst_59 {dimension_numbers = #tpu.dot_dimension_numbers<[1], [0], [0], [1], [0, 0, 1, 1], [], []>} : vector<256x128xbf16>, vector<128x256xbf16>, vector<256x256xf32> -> vector<256x256xf32>
    %54 = arith.addf %48, %53 : vector<256x256xf32>
    %55 = arith.truncf %54 : vector<256x256xf32> to vector<256x256xbf16>
    %c0_60 = arith.constant 0 : index
    %c0_61 = arith.constant 0 : index
    %56 = vector.load %arg7[%c0_60, %c0_61] : memref<256x128xbf16, #tpu.memory_space<vmem>>, vector<256x128xbf16>
    %cst_62 = arith.constant dense<0.000000e+00> : vector<256x128xf32>
    %57 = tpu.matmul %55, %56, %cst_62 {dimension_numbers = #tpu.dot_dimension_numbers<[1], [0], [0], [1], [0, 0, 1, 1], [], []>} : vector<256x256xbf16>, vector<256x128xbf16>, vector<256x128xf32> -> vector<256x128xf32>
    %c0_63 = arith.constant 0 : index
    %c0_64 = arith.constant 0 : index
    %58 = vector.load %arg8[%c0_63, %c0_64] : memref<1x128xf32, #tpu.memory_space<vmem>>, vector<1x128xf32>
    %59 = vector.broadcast %58 : vector<1x128xf32> to vector<256x128xf32>
    %60 = arith.addf %57, %59 : vector<256x128xf32>
    %61 = vector.shape_cast %60 : vector<256x128xf32> to vector<32x8x128xf32>
    %c0_65 = arith.constant 0 : index
    %c0_66 = arith.constant 0 : index
    %c0_67 = arith.constant 0 : index
    %62 = vector.load %arg14[%c0_65, %c0_66, %c0_67] : memref<32x8x128xf32, #tpu.memory_space<vmem>>, vector<32x8x128xf32>
    tpu.vector_store %arg14[%c0_65, %c0_66, %c0_67], %61 {strides = array<i32>} : memref<32x8x128xf32, #tpu.memory_space<vmem>>, vector<32x8x128xf32>,
    %c0_68 = arith.constant 0 : index
    %c0_69 = arith.constant 0 : index
    %c0_70 = arith.constant 0 : index
    %63 = vector.load %arg14[%c0_68, %c0_69, %c0_70] : memref<32x8x128xf32, #tpu.memory_space<vmem>>, vector<32x8x128xf32>
    %cst_71 = arith.constant dense<0.000000e+00> : vector<32x128xf32>
    %64 = vector.multi_reduction <add>, %63, %cst_71 [1] : vector<32x8x128xf32> to vector<32x128xf32>
    %c0_72 = arith.constant 0 : index
    %c0_73 = arith.constant 0 : index
    %65 = vector.load %arg9[%c0_72, %c0_73] : memref<128x4xf32, #tpu.memory_space<vmem>>, vector<128x4xf32>
    %cst_74 = arith.constant dense<0.000000e+00> : vector<32x4xf32>
    %66 = tpu.matmul %64, %65, %cst_74 {dimension_numbers = #tpu.dot_dimension_numbers<[1], [0], [0], [1], [0, 0, 1, 1], [], []>} : vector<32x128xf32>, vector<128x4xf32>, vector<32x4xf32> -> vector<32x4xf32>
    %c0_75 = arith.constant 0 : index
    %c0_76 = arith.constant 0 : index
    %67 = vector.load %arg10[%c0_75, %c0_76] : memref<1x4xf32, #tpu.memory_space<vmem>>, vector<1x4xf32>
    %68 = vector.broadcast %67 : vector<1x4xf32> to vector<32x4xf32>
    %69 = arith.addf %66, %68 : vector<32x4xf32>
    %cst_77 = arith.constant 0.000000e+00 : f32
    %70 = vector.broadcast %cst_77 : f32 to vector<32x4xf32>
    %71 = arith.maximumf %69, %70 : vector<32x4xf32>
    %c0_78 = arith.constant 0 : index
    %c0_79 = arith.constant 0 : index
    %72 = vector.load %arg11[%c0_78, %c0_79] : memref<4x128xf32, #tpu.memory_space<vmem>>, vector<4x128xf32>
    %cst_80 = arith.constant dense<0.000000e+00> : vector<32x128xf32>
    %73 = tpu.matmul %71, %72, %cst_80 {dimension_numbers = #tpu.dot_dimension_numbers<[1], [0], [0], [1], [0, 0, 1, 1], [], []>} : vector<32x4xf32>, vector<4x128xf32>, vector<32x128xf32> -> vector<32x128xf32>
    %c0_81 = arith.constant 0 : index
    %c0_82 = arith.constant 0 : index
    %74 = vector.load %arg12[%c0_81, %c0_82] : memref<1x128xf32, #tpu.memory_space<vmem>>, vector<1x128xf32>
    %75 = vector.broadcast %74 : vector<1x128xf32> to vector<32x128xf32>
    %76 = arith.addf %73, %75 : vector<32x128xf32>
    %77 = arith.negf %76 : vector<32x128xf32>
    %78 = math.exp %77 : vector<32x128xf32>
    %cst_83 = arith.constant 1.000000e+00 : f32
    %79 = vector.broadcast %cst_83 : f32 to vector<32x128xf32>
    %80 = arith.addf %79, %78 : vector<32x128xf32>
    %81 = arith.divf %79, %80 : vector<32x128xf32>
    %c0_84 = arith.constant 0 : index
    %c0_85 = arith.constant 0 : index
    %c0_86 = arith.constant 0 : index
    %82 = vector.load %arg14[%c0_84, %c0_85, %c0_86] : memref<32x8x128xf32, #tpu.memory_space<vmem>>, vector<32x8x128xf32>
    %83 = vector.shape_cast %81 : vector<32x128xf32> to vector<32x1x128xf32>
    %84 = vector.broadcast %83 : vector<32x1x128xf32> to vector<32x8x128xf32>
    %85 = arith.mulf %82, %84 : vector<32x8x128xf32>
    %c0_87 = arith.constant 0 : index
    %c0_88 = arith.constant 0 : index
    %c0_89 = arith.constant 0 : index
    %86 = vector.load %arg1[%c0_87, %c0_88, %c0_89] : memref<32x8x128xf32, #tpu.memory_space<vmem>>, vector<32x8x128xf32>
    %87 = arith.addf %85, %86 : vector<32x8x128xf32>
    %c0_90 = arith.constant 0 : index
    %88 = memref.load %arg13[%c0_90] : memref<1xf32, #tpu.memory_space<smem>>
    %cst_91 = arith.constant 0.000000e+00 : f32
    %89 = vector.broadcast %cst_91 : f32 to vector<32x8x128xf32>
    %90 = arith.cmpf oge, %87, %89 : vector<32x8x128xf32>
    %91 = vector.broadcast %88 : f32 to vector<32x8x128xf32>
    %92 = arith.mulf %91, %87 : vector<32x8x128xf32>
    %93 = arith.select %90, %87, %92 : vector<32x8x128xi1>, vector<32x8x128xf32>
    %c0_92 = arith.constant 0 : index
    %c0_93 = arith.constant 0 : index
    %c0_94 = arith.constant 0 : index
    %94 = vector.load %arg14[%c0_92, %c0_93, %c0_94] : memref<32x8x128xf32, #tpu.memory_space<vmem>>, vector<32x8x128xf32>
    tpu.vector_store %arg14[%c0_92, %c0_93, %c0_94], %93 {strides = array<i32>} : memref<32x8x128xf32, #tpu.memory_space<vmem>>, vector<32x8x128xf32>,
    return
  }
  func.func @transform_0(%arg0: i32) -> (i32, i32, i32) {
    %c0_i32 = arith.constant 0 : i32
    %c0_i32_0 = arith.constant 0 : i32
    %c0_i32_1 = arith.constant 0 : i32
    return %arg0, %c0_i32, %c0_i32_0 : i32, i32, i32
  }
  func.func @transform_1(%arg0: i32) -> (i32, i32, i32) {
    %c0_i32 = arith.constant 0 : i32
    %c0_i32_0 = arith.constant 0 : i32
    %c0_i32_1 = arith.constant 0 : i32
    %c0_i32_2 = arith.constant 0 : i32
    return %c0_i32, %c0_i32_0, %c0_i32_1 : i32, i32, i32
  }
  func.func @transform_2(%arg0: i32) -> (i32, i32) {
    %c0_i32 = arith.constant 0 : i32
    %c0_i32_0 = arith.constant 0 : i32
    %c0_i32_1 = arith.constant 0 : i32
    return %c0_i32, %c0_i32_0 : i32, i32
  }
  func.func @transform_3(%arg0: i32) -> (i32, i32) {
    %c0_i32 = arith.constant 0 : i32
    %c0_i32_0 = arith.constant 0 : i32
    %c0_i32_1 = arith.constant 0 : i32
    return %c0_i32, %c0_i32_0 : i32, i32
  }
  func.func @transform_4(%arg0: i32) -> i32 {
    %c0_i32 = arith.constant 0 : i32
    %c0_i32_0 = arith.constant 0 : i32
    return %c0_i32 : i32
  }
  func.func @transform_5(%arg0: i32) -> (i32, i32, i32) {
    %c0_i32 = arith.constant 0 : i32
    %c0_i32_0 = arith.constant 0 : i32
    %c0_i32_1 = arith.constant 0 : i32
    %c0_i32_2 = arith.constant 0 : i32
    return %c0_i32, %c0_i32_0, %c0_i32_1 : i32, i32, i32
  }
  func.func @transform_6(%arg0: i32) -> (i32, i32) {
    %c0_i32 = arith.constant 0 : i32
    %c0_i32_0 = arith.constant 0 : i32
    %c0_i32_1 = arith.constant 0 : i32
    return %c0_i32, %c0_i32_0 : i32, i32
  }
  func.func @transform_7(%arg0: i32) -> (i32, i32) {
    %c0_i32 = arith.constant 0 : i32
    %c0_i32_0 = arith.constant 0 : i32
    %c0_i32_1 = arith.constant 0 : i32
    return %c0_i32, %c0_i32_0 : i32, i32
  }
  func.func @transform_8(%arg0: i32) -> (i32, i32) {
    %c0_i32 = arith.constant 0 : i32
    %c0_i32_0 = arith.constant 0 : i32
    %c0_i32_1 = arith.constant 0 : i32
    return %c0_i32, %c0_i32_0 : i32, i32
  }
  func.func @transform_9(%arg0: i32) -> (i32, i32) {
    %c0_i32 = arith.constant 0 : i32
    %c0_i32_0 = arith.constant 0 : i32
    %c0_i32_1 = arith.constant 0 : i32
    return %c0_i32, %c0_i32_0 : i32, i32
  }
  func.func @transform_10(%arg0: i32) -> (i32, i32) {
    %c0_i32 = arith.constant 0 : i32
    %c0_i32_0 = arith.constant 0 : i32
    %c0_i32_1 = arith.constant 0 : i32
    return %c0_i32, %c0_i32_0 : i32, i32
  }
  func.func @transform_11(%arg0: i32) -> (i32, i32) {
    %c0_i32 = arith.constant 0 : i32
    %c0_i32_0 = arith.constant 0 : i32
    %c0_i32_1 = arith.constant 0 : i32
    return %c0_i32, %c0_i32_0 : i32, i32
  }
  func.func @transform_12(%arg0: i32) -> i32 {
    %c0_i32 = arith.constant 0 : i32
    %c0_i32_0 = arith.constant 0 : i32
    return %c0_i32 : i32
  }
  func.func @transform_13(%arg0: i32) -> (i32, i32, i32) {
    %c0_i32 = arith.constant 0 : i32
    %c0_i32_0 = arith.constant 0 : i32
    %c0_i32_1 = arith.constant 0 : i32
    return %arg0, %c0_i32, %c0_i32_0 : i32, i32, i32
  }
}

</mosaic_0001>

<bundles_post_ra>
// kernel: tpu_custom_call.1
= control target key start
LH: loop header
LB: loop body
LE: loop exit
PB: predicated region body
PF: predicated region fallthrough
CT: control target
= control target key end

     0   :  { %s10974_s0 = inlined_call_operand.hbm [shape: f32[64,8,128], index: 0, kind: input, shape index: {}]   ;;  %s10975_s1 = inlined_call_operand.hbm [shape: bf16[3,128,256], index: 1, kind: input, shape index: {}]   ;;  %s10976_s2 = inlined_call_operand.vmem [shape: bf16[256,128], index: 2, kind: input, shape index: {}]   ;;  %s10977_s3 = inlined_call_operand.vmem [shape: f32[1,128], index: 3, kind: input, shape index: {}]   ;;  %s10978_s4 = inlined_call_operand.<no memory space> [shape: f32[1], index: 4, kind: input, shape index: {}]   ;;  %s10979_s5 = inlined_call_operand.hbm [shape: bf16[3,128,256], index: 5, kind: input, shape index: {}]   ;;  %s10980_s6 = inlined_call_operand.hbm [shape: bf16[256,128], index: 6, kind: input, shape index: {}]   ;;  %s10981_s7 = inlined_call_operand.vmem [shape: f32[1,128], index: 7, kind: input, shape index: {}]   ;;  %s10982_s8 = inlined_call_operand.vmem [shape: f32[128,4], index: 8, kind: input, shape index: {}]   ;;  %s10983_s9 = inlined_call_operand.vmem [shape: f32[1,4], index: 9, kind: input, shape index: {}]   ;;  %s10984_s10 = inlined_call_operand.vmem [shape: f32[4,128], index: 10, kind: input, shape index: {}]   ;;  %s10985_s11 = inlined_call_operand.vmem [shape: f32[1,128], index: 11, kind: input, shape index: {}]   ;;  %s10986_s12 = inlined_call_operand.<no memory space> [shape: f32[1], index: 12, kind: input, shape index: {}]   ;;  %s10987_s13 = inlined_call_operand.hbm [shape: f32[64,8,128], index: 13, kind: output, shape index: {}]  }
   0x1   :  { %10999 = sst [smem:[#allocation77_spill]] %s10975_s1 }
   0x2   :  { %11000 = sst [smem:[#allocation78_spill]] %s10979_s5 }
   0x3   :  { %11001 = sst [smem:[#allocation79_spill]] %s10980_s6 }
   0x4   :  { %18 = sst [smem:[#allocation3]] %s10978_s4 }
   0x5   :  { %19 = sst [smem:[#allocation4]] %s10986_s12 }
   0x6   :  { %20 = vsyncpa [#allocation6], 0 }
   0x7   :  { %22 = vsyncpa [#allocation6 + $0x1], 0 }
   0x8   :  { %23 = vsyncpa [#allocation9], 0 }
   0x9   :  { %24 = vsyncpa [#allocation12], 0 }
   0xa   :  { %25 = vsyncpa [#allocation7], 0 }
   0xb   :  { %27 = vsyncpa [#allocation7 + $0x1], 0  ;;  %s8592_s29 = smov 0   ;;  %s8594_s30 = smov 0  }
   0xc   :  { %s8596_s14 = smov 0   ;;  %s8598_s15 = smov 0  }
   0xd LB: > { %11002 = sst [smem:[#allocation18_spill]] %s8501_s14  ;;  %s8613_s4 = sadd.s32 4294967295, %s8505_s15   ;;  %s8505_s15 = sphi %s8598_s15, %s11246_s15   ;;  %s8501_s14 = sphi %s8596_s14, %s11243_s14   ;;  %s8497_s30 = sphi %s8594_s30, %s11245_s30   ;;  %s8493_s29 = sphi %s8592_s29, %s11244_s29  }
   0xe   : > { %s7265_s12 = sadd.s32 4294967294, %s8505_s15   ;;  %p53_p0 = scmp.ne.s32.totalorder %s8497_s30, %s8493_s29 }
   0xf   : > { %p54_p1 = scmp.eq.s32.totalorder %s8613_s4, 0  ;;  %p329_p2 = scmp.eq.s32.totalorder %s8613_s4, 1 }
  0x10   : > { %p335_p3 = scmp.eq.s32.totalorder %s7265_s12, 1  ;;  %p7266_p5 = scmp.ge.s32.totalorder %s8505_s15, 1 }
  0x11   : > { %p8622_p4 = por %p54_p1, %p53_p0  ;;  %p342_p7 = scmp.lt.s32.totalorder %s8505_s15, 3 }
  0x12   : > { %p8627_p6 = por %p335_p3, %p53_p0  ;;  %s11005_s1 = sld [smem:[#allocation77_spill]] }
  0x13   : > { %p8635_p8 = pnand %p7266_p5, %p342_p7  ;;  %s8507_s22 = smov [#allocation8]  }
  0x14   : > { %s355_s23 = sshll.u32 %s8507_s22, 4  ;;  %s11008_s5 = sld [smem:[#allocation78_spill]]  ;;  %s356_s23 = int_to_ptr.vmem [resolvable:$true] %s355_s23 }
  0x15   : > { %p8193_p9 = pneg %p8635_p8  ;;  %s10988_s28 = smov 128  }
  0x16   : > { %s10989_s12 = smov 8   ;;  %s8510_s18 = smov [#allocation10]  }
  0x17   : > { %p8643_p10 = pnand %p8193_p9, %p54_p1  ;;  %s378_s19 = sshll.u32 %s8510_s18, 4  ;;  %s379_s19 = int_to_ptr.vmem [resolvable:$true] %s378_s19 }
  0x18   : > { %s353_s20 = sshll.u32 %s11005_s1, 4  ;;  %s11009_s6 = sld [smem:[#allocation79_spill]]  ;;  %s354_s20 = int_to_ptr.hbm [resolvable:$true] %s353_s20 }
  0x19   : > { %8196 = dma.hbm_to_vmem [thread:$0]  (!%p8643_p10), %s354_s20, 6144, %s356_s23, [#allocation9], %s10988_s28, %s10988_s28, %s10989_s12  }
  0x1a   : > { %s376_s27 = sshll.u32 %s11008_s5, 4  ;;  %s8511_s20 = smov [#allocation11]   ;;  %s377_s27 = int_to_ptr.hbm [resolvable:$true] %s376_s27 }
  0x1b   : > { %8199 = dma.hbm_to_vmem [thread:$0]  (!%p8643_p10), %s377_s27, 6144, %s379_s19, [#allocation9], %s10988_s28, %s10988_s28, %s10989_s12  }
  0x1c   : > { %s392_s23 = sshll.u32 %s8511_s20, 4  ;;  %s8512_s26 = smov 64   ;;  %s393_s23 = int_to_ptr.vmem [resolvable:$true] %s392_s23 }
  0x1d   : > { %s8513_s18 = smov 4   ;;  %s8667_s1 = sadd.s32 1, %s8505_s15  }
  0x1e   : > { %s390_s25 = sshll.u32 %s11009_s6, 4  ;;  %s37_s22 = ssub.s32 %s8505_s15, %s8667_s1  ;;  %s391_s25 = int_to_ptr.hbm [resolvable:$true] %s390_s25 }
  0x1f   : > { %8202 = dma.hbm_to_vmem [thread:$0]  (!%p8643_p10), %s391_s25, 2048, %s393_s23, [#allocation12], %s8512_s26, %s8512_s26, %s8513_s18  }
  0x20   : > { %s40_s5 = sadd.s32 1, %s8501_s14  ;;  %p38_p12 = scmp.eq.s32.totalorder %s37_s22, 0 }
  0x21   : > { %p47_p13 = scmp.ne.s32.totalorder %s8501_s14, %s8497_s30  ;;  %p48_p0 = scmp.eq.s32.totalorder %s8505_s15, 0 }
  0x22   : > { %s8676_s6 = scalar_select %p38_p12, %s8501_s14, %s40_s5  }
  0x23   : > { %p8680_p3 = por %p329_p2, %p47_p13  ;;  %p8214_p5 = scmp.lt.s32.totalorder %s8505_s15, 2 }
  0x24   : > { %11010 = sst [smem:[#allocation19_spill]] %s8676_s6  ;;  %s424_s19 = sand.u32 1, %s8501_s14  }
  0x25   : > { %s7998_s20 = sshll.u32 %s8505_s15, 8  ;;  %p49_p7 = por %p48_p0, %p47_p13 }
  0x26   : > { %s7271_s24 = sshll.u32 %s424_s19, 8  ;;  %s433_s26 = scalar_lea.hbm %s10974_s0, %s7998_s20 }
  0x27   : > { %s434_s18 = sshll.u32 %s433_s26, 4  ;;  %s428_s22 = scalar_lea.vmem [#allocation5], %s7271_s24  ;;  %s435_s18 = int_to_ptr.hbm [resolvable:$true] %s434_s18 }
  0x28   : > { %s436_s28 = sshll.u32 %s428_s22, 4  ;;  %p8690_p9 = pnand %p8214_p5, %p49_p7  ;;  %s437_s28 = int_to_ptr.vmem [resolvable:$true] %s436_s28 }
  0x29   : > { %s425_s12 = scalar_lea.sflag [#allocation6], %s424_s19  ;;  %s8401_s6 = sshra.s32 %s435_s18, 4  ;;  %s8402_s6 = int_to_ptr.hbm [resolvable:$true] %s8401_s6 }
  0x2a   : > { %s8403_s14 = scalar_lea.hbm %s8402_s6, 256  ;;  %p8405_p10 = pneg %p8690_p9 }
  0x2b   : > { %p8404_p2 = scmp.ne.s32.totalorder %s8402_s6, %s8403_s14  ;;  %s8408_s24 = scalar_lea.hbm %s10974_s0, 512 }
  0x2c   : > { %p8409_p0 = scmp.lt.s32.totalorder %s8402_s6, %s10974_s0  ;;  %p8410_p5 = scmp.lt.s32.totalorder %s8408_s24, %s8403_s14 }
  0x2d   : > { %p8406_p12 = pnand %p8405_p10, %p8404_p2 }
  0x2e   : > { %p8411_p7 = por %p8410_p5, %p8409_p0 }
  0x2f   : > { %p8407_p13 = pneg %p8406_p12 }
  0x31   : > { %p8412_p11 = pnand %p8411_p7, %p8407_p13 }
  0x33   : > { %8415 = shalt.err (!%p8412_p11)
}
  0x34   : > { %s11013_s19 = smov 8   ;;  %s11014_s22 = smov 128  }
  0x35   : > { %8206 = dma.hbm_to_vmem [thread:$0]  (!%p8690_p9), %s435_s18, 4096, %s437_s28, %s425_s12, %s11014_s22, %s11014_s22, %s11013_s19  }
  0x36   : > { %448 = sbr.rel (%p8635_p8) target bundleno = 1813 (0x715), region = 72 }
  0x3b   : > { %s8710_s20 = sand.u32 1, %s8497_s30  }
  0x3c   : > { %s7275_s6 = sshll.u32 %s8710_s20, 8  ;;  %s451_s14 = scalar_lea.sflag [#allocation6], %s8710_s20 }
  0x3d   : > { %s8716_s25 = scalar_lea.vmem [#allocation5], %s7275_s6 }
  0x3e   : > { %8476 = dma.done.wait (%p8622_p4), %s451_s14, 4096  }
  0x3f   : > { %8478 = vsyncadd (%p8622_p4), %s451_s14, 4294963200 }
  0x40   : > { %8480 = dma.done.wait (%p54_p1), [#allocation9], 12288  }
  0x41   : > { %8482 = vsyncadd (%p54_p1), [#allocation9], 4294955008 }
  0x42   : > { %8484 = dma.done.wait (%p54_p1), [#allocation12], 2048  }
  0x43   : > { %8486 = vsyncadd (%p54_p1), [#allocation12], 4294965248  ;;  %v7338_v0 = vld [vmem:[#allocation8 + $0xf0] sm:$0xf]  ;;  %v8046_v1 = vld [vmem:[#allocation8 + $0xf4] sm:$0xf0] }
  0x44   : > { %v8045_v2 = vld [vmem:[#allocation8 + $0xf4] sm:$0xf]  ;;  %v7339_v3 = vor.u32 %v8046_v1, %v7338_v0  ;;  %v7340_v4 = vld [vmem:[#allocation8 + $0xf8] sm:$0xf0]  ;;  %v7466_v5 = vld [vmem:[#allocation8 + $0x70] sm:$0xf] }
  0x45   : > { %v8030_v6 = vld [vmem:[#allocation8 + $0x74] sm:$0xf0]  ;;  %v7343_v7 = vor.u32 %v8045_v2, %v7340_v4  ;;  %v8029_v9 = vld [vmem:[#allocation8 + $0x74] sm:$0xf]  ;;  %v7468_v10 = vld [vmem:[#allocation8 + $0x78] sm:$0xf0] }
  0x46   : > { %v7467_v8 = vor.u32 %v8030_v6, %v7466_v5  ;;  %v7330_v11 = vld [vmem:[#allocation8 + $0xe0] sm:$0xf]  ;;  %1983 = vmatpush.bf16.msra.mxu0 %v7339_v3  ;;  %v7471_v12 = vor.u32 %v8029_v9, %v7468_v10  ;;  %v8044_v13 = vld [vmem:[#allocation8 + $0xe4] sm:$0xf0]  ;;  %v8043_v14 = vld [vmem:[#allocation8 + $0xe4] sm:$0xf] }
  0x47   : > { %v7332_v15 = vld [vmem:[#allocation8 + $0xe8] sm:$0xf0]  ;;  %2072 = vmatpush.bf16.msra.mxu1 %v7343_v7  ;;  %v7331_v16 = vor.u32 %v8044_v13, %v7330_v11  ;;  %v7458_v18 = vld [vmem:[#allocation8 + $0x60] sm:$0xf]  ;;  %v8028_v19 = vld [vmem:[#allocation8 + $0x64] sm:$0xf0] }
  0x48   : > { %2337 = vmatpush.bf16.msra.mxu2 %v7467_v8  ;;  %v7335_v17 = vor.u32 %v8043_v14, %v7332_v15  ;;  %v8027_v20 = vld [vmem:[#allocation8 + $0x64] sm:$0xf]  ;;  %2426 = vmatpush.bf16.msra.mxu3 %v7471_v12  ;;  %v7459_v21 = vor.u32 %v8028_v19, %v7458_v18  ;;  %v7460_v22 = vld [vmem:[#allocation8 + $0x68] sm:$0xf0]  ;;  %v7322_v23 = vld [vmem:[#allocation8 + $0xd0] sm:$0xf] }
  0x49   : > { %v8042_v24 = vld [vmem:[#allocation8 + $0xd4] sm:$0xf0]  ;;  %v7463_v25 = vor.u32 %v8027_v20, %v7460_v22  ;;  %v8041_v26 = vld [vmem:[#allocation8 + $0xd4] sm:$0xf]  ;;  %v7324_v27 = vld [vmem:[#allocation8 + $0xd8] sm:$0xf0] }
  0x4a   : > { %v7450_v28 = vld [vmem:[#allocation8 + $0x50] sm:$0xf]  ;;  %1984 = vmatpush.bf16.msra.mxu0 %v7331_v16  ;;  %v7323_v29 = vor.u32 %v8042_v24, %v7322_v23  ;;  %v8026_v30 = vld [vmem:[#allocation8 + $0x54] sm:$0xf0]  ;;  %v8025_v31 = vld [vmem:[#allocation8 + $0x54] sm:$0xf]  ;;  %v7327_v33 = vor.u32 %v8041_v26, %v7324_v27 }
  0x4b   : > { %v7452_v32 = vld [vmem:[#allocation8 + $0x58] sm:$0xf0]  ;;  %2073 = vmatpush.bf16.msra.mxu1 %v7335_v17  ;;  %v7451_v34 = vor.u32 %v8026_v30, %v7450_v28  ;;  %v7314_v35 = vld [vmem:[#allocation8 + $0xc0] sm:$0xf]  ;;  %v8040_v36 = vld [vmem:[#allocation8 + $0xc4] sm:$0xf0] }
  0x4c   : > { %2338 = vmatpush.bf16.msra.mxu2 %v7459_v21  ;;  %v8039_v37 = vld [vmem:[#allocation8 + $0xc4] sm:$0xf]  ;;  %2427 = vmatpush.bf16.msra.mxu3 %v7463_v25  ;;  %v7455_v38 = vor.u32 %v8025_v31, %v7452_v32  ;;  %v7316_v39 = vld [vmem:[#allocation8 + $0xc8] sm:$0xf0]  ;;  %v7442_v40 = vld [vmem:[#allocation8 + $0x40] sm:$0xf]  ;;  %v7315_v44 = vor.u32 %v8040_v36, %v7314_v35 }
  0x4d   : > { %v8024_v41 = vld [vmem:[#allocation8 + $0x44] sm:$0xf0]  ;;  %v8023_v42 = vld [vmem:[#allocation8 + $0x44] sm:$0xf]  ;;  %v7444_v43 = vld [vmem:[#allocation8 + $0x48] sm:$0xf0]  ;;  %v7319_v45 = vor.u32 %v8039_v37, %v7316_v39 }
  0x4e   : > { %1985 = vmatpush.bf16.msra.mxu0 %v7323_v29  ;;  %vm516_vm0 = vcmask 1040384   ;;  %vm517_vm1 = vsmask.f32 256  ;;  %vm615_vm2 = vsmask.f32 7938  ;;  %v7443_v46 = vor.u32 %v8024_v41, %v7442_v40  ;;  %v714_v35 = vld [vmem:[%s8716_s25 + $0x8] sm:$0xff] }
  0x4f   : > { %2074 = vmatpush.bf16.msra.mxu1 %v7327_v33  ;;  %v7306_v47 = vld [vmem:[#allocation8 + $0xb0] sm:$0xf]  ;;  %v8038_v48 = vld [vmem:[#allocation8 + $0xb4] sm:$0xf0]  ;;  %v8037_v49 = vld [vmem:[#allocation8 + $0xb4] sm:$0xf]  ;;  %v7447_v50 = vor.u32 %v8023_v42, %v7444_v43  ;;  %v746_v40 = vpack.c.bf16 %v714_v35, %v714_v35 }
  0x50   : > { %2339 = vmatpush.bf16.msra.mxu2 %v7451_v34  ;;  %2428 = vmatpush.bf16.msra.mxu3 %v7455_v38  ;;  %v7308_v51 = vld [vmem:[#allocation8 + $0xb8] sm:$0xf0]  ;;  %v7434_v52 = vld [vmem:[#allocation8 + $0x30] sm:$0xf]  ;;  %v8022_v53 = vld [vmem:[#allocation8 + $0x34] sm:$0xf0]  ;;  %v7307_v57 = vor.u32 %v8038_v48, %v7306_v47 }
  0x51   : > { %v8021_v54 = vld [vmem:[#allocation8 + $0x34] sm:$0xf]  ;;  %v7436_v55 = vld [vmem:[#allocation8 + $0x38] sm:$0xf0]  ;;  %vm8732_vm3 = vmand %vm516_vm0, %vm517_vm1  ;;  %v11015_v56 = vmov 0  ;;  %v7311_v59 = vor.u32 %v8037_v49, %v7308_v51  ;;  %v7435_v60 = vor.u32 %v8022_v53, %v7434_v52  ;;  %vm1097_vm5 = vcmask 1043456  }
  0x52   : > { %v11016_v56 = vsel %vm8732_vm3, 4294967295, %v11015_v56  ;;  %1986 = vmatpush.bf16.msra.mxu0 %v7315_v44  ;;  %vm8738_vm4 = vmand %vm516_vm0, %vm615_vm2  ;;  %v7298_v61 = vld [vmem:[#allocation8 + $0xa0] sm:$0xf]  ;;  %v8036_v62 = vld [vmem:[#allocation8 + $0xa4] sm:$0xf0]  ;;  %v7439_v0 = vor.u32 %v8021_v54, %v7436_v55  ;;  %v789_v47 = vshll.u32 %v746_v40, 16 }
  0x53   : > { %11017 = vst [vmem:[#allocation20_spill] sm:$0xff] %v11016_v56  ;;  %2075 = vmatpush.bf16.msra.mxu1 %v7319_v45  ;;  %v8035_v63 = vld [vmem:[#allocation8 + $0xa4] sm:$0xf]  ;;  %v7300_v1 = vld [vmem:[#allocation8 + $0xa8] sm:$0xf0]  ;;  %v7299_v7 = vor.u32 %v8036_v62, %v7298_v61  ;;  %v715_v61 = vld [vmem:[%s8716_s25 + $0x10] sm:$0xff] }
  0x54   : > { %2340 = vmatpush.bf16.msra.mxu2 %v7443_v46  ;;  %2429 = vmatpush.bf16.msra.mxu3 %v7447_v50  ;;  %v7426_v2 = vld [vmem:[#allocation8 + $0x20] sm:$0xf]  ;;  %v8020_v3 = vld [vmem:[#allocation8 + $0x24] sm:$0xf0]  ;;  %v8019_v4 = vld [vmem:[#allocation8 + $0x24] sm:$0xf]  ;;  %v7303_v11 = vor.u32 %v8035_v63, %v7300_v1 }
  0x55   : > { %v7428_v5 = vld [vmem:[#allocation8 + $0x28] sm:$0xf0]  ;;  %v7290_v6 = vld [vmem:[#allocation8 + $0x90] sm:$0xf]  ;;  %v8034_v8 = vld [vmem:[#allocation8 + $0x94] sm:$0xf0]  ;;  %v7427_v12 = vor.u32 %v8020_v3, %v7426_v2 }
  0x56   : > { %1987 = vmatpush.bf16.msra.mxu0 %v7307_v57  ;;  %v8033_v9 = vld [vmem:[#allocation8 + $0x94] sm:$0xf]  ;;  %v7292_v10 = vld [vmem:[#allocation8 + $0x98] sm:$0xf0]  ;;  %v7418_v13 = vld [vmem:[#allocation8 + $0x10] sm:$0xf]  ;;  %v7431_v16 = vor.u32 %v8019_v4, %v7428_v5  ;;  %v7291_v30 = vor.u32 %v8034_v8, %v7290_v6  ;;  %v747_v4 = vpack.c.bf16 %v715_v61, %v715_v61 }
  0x57   : > { %2076 = vmatpush.bf16.msra.mxu1 %v7311_v59  ;;  %v8018_v14 = vld [vmem:[#allocation8 + $0x14] sm:$0xf0]  ;;  %v8017_v15 = vld [vmem:[#allocation8 + $0x14] sm:$0xf]  ;;  %v7420_v17 = vld [vmem:[#allocation8 + $0x18] sm:$0xf0]  ;;  %v7295_v31 = vor.u32 %v8033_v9, %v7292_v10 }
  0x58   : > { %2341 = vmatpush.bf16.msra.mxu2 %v7435_v60  ;;  %2430 = vmatpush.bf16.msra.mxu3 %v7439_v0  ;;  %v519_v18 = vld [vmem:[#allocation2] sm:$0x1]  ;;  %v522_v19 = vld [vmem:[#allocation2 + $0x8] sm:$0x1]  ;;  %v8746_v22 = vld [vmem:[#allocation8 + $0x84] sm:$0xf]  ;;  %v7419_v36 = vor.u32 %v8018_v14, %v7418_v13  ;;  %v7423_v41 = vor.u32 %v8017_v15, %v7420_v17 }
  0x59   : > { %v8742_v20 = vld [vmem:[#allocation8 + $0x80] sm:$0xf]  ;;  %v8744_v21 = vld [vmem:[#allocation8 + $0x84] sm:$0xf0]  ;;  %v8748_v23 = vld [vmem:[#allocation8 + $0x88] sm:$0xf0] }
  0x5a   : > { %v8750_v24 = vld [vmem:[#allocation8] sm:$0xf]  ;;  %v8752_v25 = vld [vmem:[#allocation8 + $0x4] sm:$0xf0]  ;;  %v520_v26 = vsel %vm8732_vm3, 0, %v519_v18  ;;  %v523_v27 = vsel %vm8732_vm3, 0, %v522_v19  ;;  %1988 = vmatpush.bf16.msra.mxu0 %v7299_v7  ;;  %v7283_v48 = vor.u32 %v8744_v21, %v8742_v20  ;;  %v7287_v49 = vor.u32 %v8746_v22, %v8748_v23  ;;  %vm8775_vm6 = vmand %vm1097_vm5, %vm615_vm2 }
  0x5b   : > { %v617_v28 = vld [vmem:[#allocation2 + $0x4] sm:$0x1]  ;;  %v620_v29 = vld [vmem:[#allocation2 + $0xc] sm:$0x1]  ;;  %521 = vst [vmem:[#allocation2] sm:$0x1] %v520_v26  ;;  %2077 = vmatpush.bf16.msra.mxu1 %v7303_v11  ;;  %v7411_v50 = vor.u32 %v8752_v25, %v8750_v24 }
  0x5c   : > { %v618_v32 = vsel %vm8738_vm4, 0, %v617_v28  ;;  %v621_v33 = vsel %vm8738_vm4, 0, %v620_v29  ;;  %v713_v34 = vld [vmem:[%s8716_s25] sm:$0xff]  ;;  %2342 = vmatpush.bf16.msra.mxu2 %v7427_v12  ;;  %v7412_v38 = vld [vmem:[#allocation8 + $0x8] sm:$0xf0]  ;;  %2431 = vmatpush.bf16.msra.mxu3 %v7431_v16  ;;  %v786_v46 = vshrl.u32 %v746_v40, 16 }
  0x5d   : > { %v8015_v37 = vld [vmem:[#allocation8 + $0x4] sm:$0xf]  ;;  %524 = vst [vmem:[#allocation2 + $0x8] sm:$0x1] %v523_v27  ;;  %v745_v39 = vpack.c.bf16 %v713_v34, %v713_v34  ;;  %v7562_v42 = vld [vmem:[#allocation8 + $0x170] sm:$0xf] }
  0x5e   : > { %619 = vst [vmem:[#allocation2 + $0x4] sm:$0x1] %v618_v32  ;;  %v8062_v43 = vld [vmem:[#allocation8 + $0x174] sm:$0xf0]  ;;  %1989 = vmatpush.bf16.msra.mxu0 %v7291_v30  ;;  %v8061_v51 = vld [vmem:[#allocation8 + $0x174] sm:$0xf]  ;;  %v7415_v54 = vor.u32 %v8015_v37, %v7412_v38 }
  0x5f   : > { %622 = vst [vmem:[#allocation2 + $0xc] sm:$0x1] %v621_v33  ;;  %v778_v44 = vshrl.u32 %v745_v39, 16  ;;  %v781_v45 = vshll.u32 %v745_v39, 16  ;;  %v7564_v52 = vld [vmem:[#allocation8 + $0x178] sm:$0xf0]  ;;  %2078 = vmatpush.bf16.msra.mxu1 %v7295_v31  ;;  %v7563_v63 = vor.u32 %v8062_v43, %v7562_v42 }
  0x60   : > { %v525_v53 = vld [vmem:[#allocation2 + $0x10] sm:$0x1]  ;;  %2343 = vmatpush.bf16.msra.mxu2 %v7419_v36  ;;  %v788_v57 = vrot.slane %v786_v46, 7  ;;  %v528_v60 = vld [vmem:[#allocation2 + $0x18] sm:$0x1]  ;;  %2432 = vmatpush.bf16.msra.mxu3 %v7423_v41  ;;  %v11020_v62 = vmov 0  ;;  %v7567_v0 = vor.u32 %v8061_v51, %v7564_v52 }
  0x61   : > { %v780_v55 = vrot.slane %v778_v44, 7  ;;  %v526_v59 = vsel %vm8732_vm3, 0, %v525_v53  ;;  %v11021_v62 = vsel %vm8775_vm6, 4294967295, %v11020_v62  ;;  %v529_v1 = vsel %vm8732_vm3, 0, %v528_v60  ;;  %v623_v2 = vld [vmem:[#allocation2 + $0x14] sm:$0x1] }
  0x62   : > { %11022 = vst [vmem:[#allocation21_spill] sm:$0xff] %v11021_v62  ;;  %v716_v3 = vld [vmem:[%s8716_s25 + $0x18] sm:$0xff]  ;;  %v791_v7 = vor.u32 %v789_v47, %v788_v57  ;;  %v792_v8 = vrot.slane %v788_v57, 4  ;;  %v1099_v9 = vld [vmem:[#allocation2] sm:$0xf]  ;;  %1990 = vmatpush.bf16.msra.mxu0 %v7283_v48  ;;  %v624_v11 = vsel %vm8738_vm4, 0, %v623_v2 }
  0x63   : > { %527 = vst [vmem:[#allocation2 + $0x10] sm:$0x1] %v526_v59  ;;  %v783_v5 = vor.u32 %v781_v45, %v780_v55  ;;  %v784_v6 = vrot.slane %v780_v55, 4  ;;  %v626_v12 = vld [vmem:[#allocation2 + $0x1c] sm:$0x1]  ;;  %v748_v13 = vpack.c.bf16 %v716_v3, %v716_v3  ;;  %v794_v14 = vshrl.u32 %v747_v4, 16  ;;  %2079 = vmatpush.bf16.msra.mxu1 %v7287_v49 }
  0x64   : > { %530 = vst [vmem:[#allocation2 + $0x18] sm:$0x1] %v529_v1  ;;  %v1105_v10 = vld [vmem:[#allocation2 + $0x8] sm:$0xf]  ;;  %2344 = vmatpush.bf16.msra.mxu2 %v7411_v50  ;;  %v797_v18 = vshll.u32 %v747_v4, 16  ;;  %2433 = vmatpush.bf16.msra.mxu3 %v7415_v54  ;;  %v627_v24 = vsel %vm8738_vm4, 0, %v626_v12 }
  0x65   : > { %v1100_v15 = vsel %vm8775_vm6, %v783_v5, %v1099_v9  ;;  %v1102_v16 = vld [vmem:[#allocation2 + $0x4] sm:$0x1]  ;;  %v1106_v17 = vsel %vm8775_vm6, %v791_v7, %v1105_v10  ;;  %625 = vst [vmem:[#allocation2 + $0x14] sm:$0x1] %v624_v11  ;;  %v796_v21 = vrot.slane %v794_v14, 7  ;;  %v802_v22 = vshrl.u32 %v748_v13, 16 }
  0x66   : > { %1101 = vst [vmem:[#allocation2] sm:$0xf] %v1100_v15  ;;  %v1103_v19 = vsel %vm8732_vm3, %v784_v6, %v1102_v16  ;;  %v1108_v20 = vld [vmem:[#allocation2 + $0xc] sm:$0x1]  ;;  %2903 = vmatpush.bf16.msrb.mxu0 %v7563_v63  ;;  %v805_v25 = vshll.u32 %v748_v13, 16  ;;  %v717_v35 = vld [vmem:[%s8716_s25 + $0x20] sm:$0xff] }
  0x67   : > { %1104 = vst [vmem:[#allocation2 + $0x4] sm:$0x1] %v1103_v19  ;;  %v1109_v23 = vsel %vm8732_vm3, %v792_v8, %v1108_v20  ;;  %2992 = vmatpush.bf16.msrb.mxu1 %v7567_v0  ;;  %v531_v26 = vld [vmem:[#allocation2 + $0x20] sm:$0x1]  ;;  %v799_v27 = vor.u32 %v797_v18, %v796_v21  ;;  %v804_v28 = vrot.slane %v802_v22, 7  ;;  %v800_v29 = vrot.slane %v796_v21, 4 }
  0x68   : > { %1107 = vst [vmem:[#allocation2 + $0x8] sm:$0xf] %v1106_v17  ;;  %v532_v31 = vsel %vm8732_vm3, 0, %v531_v26  ;;  %vm1371_vm7 = vsmask.f32 3328  ;;  %v718_v40 = vld [vmem:[%s8716_s25 + $0x28] sm:$0xff]  ;;  %v749_v52 = vpack.c.bf16 %v717_v35, %v717_v35 }
  0x69   : > { %1110 = vst [vmem:[#allocation2 + $0xc] sm:$0x1] %v1109_v23  ;;  %v807_v32 = vor.u32 %v805_v25, %v804_v28  ;;  %vm1372_vm8 = vsmask.f32 7440  ;;  %v808_v36 = vrot.slane %v804_v28, 4  ;;  %v8804_v53 = vpack.c.bf16 %v718_v40, %v718_v40  ;;  %s3487_s26 = sld [smem:[#allocation3]] }
  0x6a   : > { %v1111_v30 = vld [vmem:[#allocation2 + $0x10] sm:$0xf]  ;;  %628 = vst [vmem:[#allocation2 + $0x1c] sm:$0x1] %v627_v24  ;;  %v534_v39 = vld [vmem:[#allocation2 + $0x28] sm:$0x1]  ;;  %vm8812_vm9 = vmor %vm1371_vm7, %vm1372_vm8 }
  0x6b   : > { %v1112_v33 = vsel %vm8775_vm6, %v799_v27, %v1111_v30  ;;  %v1117_v34 = vld [vmem:[#allocation2 + $0x18] sm:$0xf]  ;;  %533 = vst [vmem:[#allocation2 + $0x20] sm:$0x1] %v532_v31  ;;  %v629_v47 = vld [vmem:[#allocation2 + $0x24] sm:$0x1] }
  0x6c   : > { %1113 = vst [vmem:[#allocation2 + $0x10] sm:$0xf] %v1112_v33  ;;  %v1114_v37 = vld [vmem:[#allocation2 + $0x14] sm:$0x1]  ;;  %v1118_v38 = vsel %vm8775_vm6, %v807_v32, %v1117_v34  ;;  %v632_v48 = vld [vmem:[#allocation2 + $0x2c] sm:$0x1] }
  0x6d   : > { %v1291_v41 = vld [vmem:[#allocation2] sm:$0xf]  ;;  %v1115_v43 = vsel %vm8732_vm3, %v800_v29, %v1114_v37  ;;  %1119 = vst [vmem:[#allocation2 + $0x18] sm:$0xf] %v1118_v38  ;;  %v535_v2 = vsel %vm8732_vm3, 0, %v534_v39  ;;  %v11023_v8 = vmov 0 }
  0x6e   : > { %v7346_v42 = vld [vmem:[#allocation2] sm:$0xf]  ;;  %v1339_v44 = vld [vmem:[#allocation2 + $0x4] sm:$0x1]  ;;  %v1375_v45 = vshrl.u32 %v1291_v41, 16  ;;  %v1378_v46 = vshll.u32 %v1291_v41, 16 }
  0x6f   : > { %1116 = vst [vmem:[#allocation2 + $0x14] sm:$0x1] %v1115_v43  ;;  %v1292_v49 = vld [vmem:[#allocation2 + $0x8] sm:$0xf]  ;;  %v1384_v50 = vshll.u32 %v1339_v44, 16  ;;  %v11024_v8 = vsel %vm8812_vm9, 4294967295, %v11023_v8 }
  0x70   : > { %v7999_v51 = vld [vmem:[#allocation2 + $0x4] sm:$0xf0]  ;;  %v1340_v54 = vld [vmem:[#allocation2 + $0xc] sm:$0x1]  ;;  %v1377_v55 = vrot.slane %v1375_v45, 4  ;;  %v1380_v57 = vrot.slane %v1378_v46, 5 }
  0x71   : > { %v1389_v59 = vshrl.u32 %v1292_v49, 16  ;;  %v1392_v60 = vshll.u32 %v1292_v49, 16  ;;  %v1386_v61 = vrot.slane %v1384_v50, 5  ;;  %v1398_v63 = vshll.u32 %v1340_v54, 16  ;;  %v1120_v1 = vld [vmem:[#allocation2 + $0x1c] sm:$0x1] }
  0x72   : > { %v7347_v0 = vor.u32 %v7999_v51, %v7346_v42  ;;  %v1381_v3 = vor.u32 %v1380_v57, %v1377_v55  ;;  %v1121_v6 = vsel %vm8732_vm3, %v808_v36, %v1120_v1  ;;  %11025 = vst [vmem:[#allocation22_spill] sm:$0xff] %v11024_v8  ;;  %v630_v11 = vsel %vm8738_vm4, 0, %v629_v47  ;;  %v537_v31 = vld [vmem:[#allocation2 + $0x30] sm:$0x1]  ;;  %v1123_v43 = vld [vmem:[#allocation2 + $0x20] sm:$0xf] }
  0x73   : > { %v1391_v4 = vrot.slane %v1389_v59, 4  ;;  %v1394_v5 = vrot.slane %v1392_v60, 5  ;;  %v1293_v7 = vld [vmem:[#allocation2 + $0x10] sm:$0xf]  ;;  %1122 = vst [vmem:[#allocation2 + $0x1c] sm:$0x1] %v1121_v6 }
  0x74   : > { %2345 = vmatmul.bf16.vlgmr.msra.gmra.mxu2 %v7347_v0  ;;  %2434 = vmatmul.bf16.vlgmr.msra.gmra.mxu3 %v7347_v0  ;;  %v1403_v9 = vshrl.u32 %v1293_v7, 16  ;;  %v1406_v10 = vshll.u32 %v1293_v7, 16  ;;  %v633_v12 = vsel %vm8738_vm4, 0, %v632_v48  ;;  %v1382_v13 = vrot.slane %v1381_v3, 4  ;;  %v1294_v16 = vld [vmem:[#allocation2 + $0x18] sm:$0xf] }
  0x75   : > { %v1395_v14 = vor.u32 %v1394_v5, %v1391_v4  ;;  %v1400_v15 = vrot.slane %v1398_v63, 5  ;;  %v810_v17 = vshrl.u32 %v749_v52, 16  ;;  %v1417_v21 = vshrl.u32 %v1294_v16, 16  ;;  %536 = vst [vmem:[#allocation2 + $0x28] sm:$0x1] %v535_v2  ;;  %v719_v36 = vld [vmem:[%s8716_s25 + $0x30] sm:$0xff] }
  0x76   : > { %v1341_v18 = vld [vmem:[#allocation2 + $0x14] sm:$0x1]  ;;  %v1405_v19 = vrot.slane %v1403_v9, 4  ;;  %v1408_v20 = vrot.slane %v1406_v10, 5  ;;  %v1420_v22 = vshll.u32 %v1294_v16, 16  ;;  %v1387_v23 = vsel %vm8812_vm9, %v1382_v13, %v1386_v61  ;;  %v720_v50 = vld [vmem:[%s8716_s25 + $0x38] sm:$0xff] }
  0x77   : > { %v1396_v24 = vrot.slane %v1395_v14, 4  ;;  %v1412_v25 = vshll.u32 %v1341_v18, 16  ;;  %v813_v26 = vshll.u32 %v749_v52, 16  ;;  %v1839_v27 = vunpack.c.l.b16 %v1387_v23  ;;  %631 = vst [vmem:[#allocation2 + $0x24] sm:$0x1] %v630_v11  ;;  %s7017_s23 = sld [smem:[#allocation4]] }
  0x78   : > { %v1409_v28 = vor.u32 %v1408_v20, %v1405_v19  ;;  %v1419_v29 = vrot.slane %v1417_v21, 4  ;;  %v1422_v30 = vrot.slane %v1420_v22, 5  ;;  %634 = vst [vmem:[#allocation2 + $0x2c] sm:$0x1] %v633_v12  ;;  %v812_v34 = vrot.slane %v810_v17, 7  ;;  %s7148_s16 = scalar_lea.sflag [#allocation7], %s8710_s20 }
  0x79   : > { %v1401_v32 = vsel %vm8812_vm9, %v1396_v24, %v1400_v15  ;;  %v1414_v33 = vrot.slane %v1412_v25, 5  ;;  %v818_v35 = vshrl.u32 %v8804_v53, 16  ;;  %v7350_v40 = vld [vmem:[#allocation2 + $0x10] sm:$0xf]  ;;  %v8000_v41 = vld [vmem:[#allocation2 + $0x14] sm:$0xf0]  ;;  %v751_v2 = vpack.c.bf16 %v719_v36, %v719_v36 }
  0x7a   : > { %v1840_v37 = vunpack.c.l.b16 %v1401_v32  ;;  %v1410_v38 = vrot.slane %v1409_v28, 4  ;;  %v1423_v39 = vor.u32 %v1422_v30, %v1419_v29  ;;  %v821_v42 = vshll.u32 %v8804_v53, 16  ;;  %v540_v44 = vld [vmem:[#allocation2 + $0x38] sm:$0x1]  ;;  %v1342_v45 = vld [vmem:[#allocation2 + $0x1c] sm:$0x1] }
  0x7b   : > { %v815_v46 = vor.u32 %v813_v26, %v812_v34  ;;  %v816_v47 = vrot.slane %v812_v34, 4  ;;  %v820_v48 = vrot.slane %v818_v35, 7  ;;  %v538_v49 = vsel %vm8732_vm3, 0, %v537_v31  ;;  %v635_v55 = vld [vmem:[#allocation2 + $0x34] sm:$0x1]  ;;  %s8451_s5 = scalar_lea.hbm %s10987_s13, 512 }
  0x7c   : > { %v1871_v51 = vpack.c.b16 %v1840_v37, %v1839_v27  ;;  %v1424_v52 = vrot.slane %v1423_v39, 4  ;;  %v1426_v54 = vshll.u32 %v1342_v45, 16  ;;  %539 = vst [vmem:[#allocation2 + $0x30] sm:$0x1] %v538_v49  ;;  %v638_v57 = vld [vmem:[#allocation2 + $0x3c] sm:$0x1]  ;;  %v1415_v59 = vsel %vm8812_vm9, %v1410_v38, %v1414_v33 }
  0x7d   : > { %v823_v53 = vor.u32 %v821_v42, %v820_v48  ;;  %v824_v60 = vrot.slane %v820_v48, 4  ;;  %v1124_v61 = vsel %vm8775_vm6, %v815_v46, %v1123_v43  ;;  %v1129_v0 = vld [vmem:[#allocation2 + $0x28] sm:$0xf]  ;;  %v541_v1 = vsel %vm8732_vm3, 0, %v540_v44  ;;  %v7554_v7 = vld [vmem:[#allocation8 + $0x160] sm:$0xf] }
  0x7e   : > { %1991 = vmatmul.bf16.vlgmr.msra.gmra.mxu0 %v1871_v51  ;;  %2080 = vmatmul.bf16.vlgmr.msra.gmra.mxu1 %v1871_v51  ;;  %v1428_v63 = vrot.slane %v1426_v54, 5  ;;  %1125 = vst [vmem:[#allocation2 + $0x20] sm:$0xf] %v1124_v61  ;;  %v752_v3 = vpack.c.bf16 %v720_v50, %v720_v50  ;;  %v7351_v4 = vor.u32 %v8000_v41, %v7350_v40  ;;  %v1126_v5 = vld [vmem:[#allocation2 + $0x24] sm:$0x1]  ;;  %v1841_v11 = vunpack.c.l.b16 %v1415_v59  ;;  %v722_v41 = vld [vmem:[%s8716_s25 + $0x48] sm:$0xff] }
  0x7f   : > { %v1130_v6 = vsel %vm8775_vm6, %v823_v53, %v1129_v0  ;;  %v8060_v9 = vld [vmem:[#allocation8 + $0x164] sm:$0xf0]  ;;  %v1127_v12 = vsel %vm8732_vm3, %v816_v47, %v1126_v5  ;;  %v1132_v13 = vld [vmem:[#allocation2 + $0x2c] sm:$0x1]  ;;  %v8059_v15 = vld [vmem:[#allocation8 + $0x164] sm:$0xf]  ;;  %v754_v0 = vpack.c.bf16 %v722_v41, %v722_v41 }
  0x80   : > { %v1429_v10 = vsel %vm8812_vm9, %v1424_v52, %v1428_v63  ;;  %1131 = vst [vmem:[#allocation2 + $0x28] sm:$0xf] %v1130_v6  ;;  %v7555_v14 = vor.u32 %v8060_v9, %v7554_v7  ;;  %v1133_v17 = vsel %vm8732_vm3, %v824_v60, %v1132_v13  ;;  %v7556_v18 = vld [vmem:[#allocation8 + $0x168] sm:$0xf0]  ;;  %v636_v19 = vsel %vm8738_vm4, 0, %v635_v55  ;;  %v721_v27 = vld [vmem:[%s8716_s25 + $0x40] sm:$0xff] }
  0x81   : > { %v1842_v16 = vunpack.c.l.b16 %v1429_v10  ;;  %1128 = vst [vmem:[#allocation2 + $0x24] sm:$0x1] %v1127_v12  ;;  %v639_v20 = vsel %vm8738_vm4, 0, %v638_v57  ;;  %v7559_v21 = vor.u32 %v8059_v15, %v7556_v18  ;;  %v826_v22 = vshrl.u32 %v751_v2, 16  ;;  %v543_v26 = vld [vmem:[#allocation2 + $0x40] sm:$0x1] }
  0x82   : > { %1134 = vst [vmem:[#allocation2 + $0x2c] sm:$0x1] %v1133_v17  ;;  %2904 = vmatpush.bf16.msrb.mxu0 %v7555_v14  ;;  %v829_v23 = vshll.u32 %v751_v2, 16  ;;  %v834_v24 = vshrl.u32 %v752_v3, 16  ;;  %v837_v30 = vshll.u32 %v752_v3, 16  ;;  %v544_v40 = vsel %vm8732_vm3, 0, %v543_v26 }
  0x83   : > { %542 = vst [vmem:[#allocation2 + $0x38] sm:$0x1] %v541_v1  ;;  %v828_v25 = vrot.slane %v826_v22, 7  ;;  %2993 = vmatpush.bf16.msrb.mxu1 %v7559_v21  ;;  %v1872_v31 = vpack.c.b16 %v1842_v16, %v1841_v11  ;;  %v1135_v35 = vld [vmem:[#allocation2 + $0x30] sm:$0xf]  ;;  %v753_v42 = vpack.c.bf16 %v721_v27, %v721_v27  ;;  %v850_v18 = vshrl.u32 %v754_v0, 16 }
  0x84   : > { %2350 = vmatmul.bf16.gmra.mxu2 %v7351_v4  ;;  %2439 = vmatmul.bf16.gmra.mxu3 %v7351_v4  ;;  %637 = vst [vmem:[#allocation2 + $0x34] sm:$0x1] %v636_v19  ;;  %v836_v29 = vrot.slane %v834_v24, 7  ;;  %v546_v36 = vld [vmem:[#allocation2 + $0x48] sm:$0x1]  ;;  %v723_v22 = vld [vmem:[%s8716_s25 + $0x50] sm:$0xff] }
  0x85   : > { %v1295_v28 = vld [vmem:[#allocation2 + $0x20] sm:$0xf]  ;;  %640 = vst [vmem:[#allocation2 + $0x3c] sm:$0x1] %v639_v20  ;;  %v831_v34 = vor.u32 %v829_v23, %v828_v25  ;;  %v832_v38 = vrot.slane %v828_v25, 4  ;;  %v547_v52 = vsel %vm8732_vm3, 0, %v546_v36 }
  0x86   : > { %v1431_v32 = vshrl.u32 %v1295_v28, 16  ;;  %v1434_v33 = vshll.u32 %v1295_v28, 16  ;;  %v840_v39 = vrot.slane %v836_v29, 4  ;;  %v839_v50 = vor.u32 %v837_v30, %v836_v29  ;;  %545 = vst [vmem:[#allocation2 + $0x40] sm:$0x1] %v544_v40 }
  0x87   : > { %v1296_v37 = vld [vmem:[#allocation2 + $0x28] sm:$0xf]  ;;  %v1136_v51 = vsel %vm8775_vm6, %v831_v34, %v1135_v35  ;;  %v7354_v53 = vld [vmem:[#allocation2 + $0x20] sm:$0xf]  ;;  %v842_v1 = vshrl.u32 %v753_v42, 16  ;;  %v845_v17 = vshll.u32 %v753_v42, 16 }
  0x88   : > { %v1343_v43 = vld [vmem:[#allocation2 + $0x24] sm:$0x1]  ;;  %v1433_v44 = vrot.slane %v1431_v32, 4  ;;  %v1436_v45 = vrot.slane %v1434_v33, 5  ;;  %v1445_v46 = vshrl.u32 %v1296_v37, 16  ;;  %v1448_v47 = vshll.u32 %v1296_v37, 16 }
  0x89   : > { %v1344_v48 = vld [vmem:[#allocation2 + $0x2c] sm:$0x1]  ;;  %v1440_v49 = vshll.u32 %v1343_v43, 16  ;;  %1137 = vst [vmem:[#allocation2 + $0x30] sm:$0xf] %v1136_v51  ;;  %v844_v16 = vrot.slane %v842_v1, 7  ;;  %v8873_v33 = vpack.c.bf16 %v723_v22, %v723_v22 }
  0x8a   : > { %v1437_v54 = vor.u32 %v1436_v45, %v1433_v44  ;;  %v1447_v55 = vrot.slane %v1445_v46, 4  ;;  %v1450_v57 = vrot.slane %v1448_v47, 5  ;;  %v1454_v59 = vshll.u32 %v1344_v48, 16  ;;  %v8001_v60 = vld [vmem:[#allocation2 + $0x24] sm:$0xf0]  ;;  %v724_v43 = vld [vmem:[%s8716_s25 + $0x58] sm:$0xff] }
  0x8b   : > { %v1138_v61 = vld [vmem:[#allocation2 + $0x34] sm:$0x1]  ;;  %v1141_v63 = vld [vmem:[#allocation2 + $0x38] sm:$0xf]  ;;  %v1442_v2 = vrot.slane %v1440_v49, 5  ;;  %v7355_v19 = vor.u32 %v8001_v60, %v7354_v53  ;;  %v853_v20 = vshll.u32 %v754_v0, 16  ;;  %v847_v24 = vor.u32 %v845_v17, %v844_v16 }
  0x8c   : > { %v1451_v3 = vor.u32 %v1450_v57, %v1447_v55  ;;  %v1139_v4 = vsel %vm8732_vm3, %v832_v38, %v1138_v61  ;;  %v1144_v5 = vld [vmem:[#allocation2 + $0x3c] sm:$0x1]  ;;  %548 = vst [vmem:[#allocation2 + $0x48] sm:$0x1] %v547_v52  ;;  %v1142_v6 = vsel %vm8775_vm6, %v839_v50, %v1141_v63  ;;  %v641_v9 = vld [vmem:[#allocation2 + $0x44] sm:$0x1]  ;;  %v756_v63 = vpack.c.bf16 %v724_v43, %v724_v43 }
  0x8d   : > { %1140 = vst [vmem:[#allocation2 + $0x34] sm:$0x1] %v1139_v4  ;;  %v1145_v7 = vsel %vm8732_vm3, %v840_v39, %v1144_v5  ;;  %v644_v10 = vld [vmem:[#allocation2 + $0x4c] sm:$0x1]  ;;  %v1438_v11 = vrot.slane %v1437_v54, 4  ;;  %v1456_v12 = vrot.slane %v1454_v59, 5 }
  0x8e   : > { %1996 = vmatmul.bf16.gmra.mxu0 %v1872_v31  ;;  %2085 = vmatmul.bf16.gmra.mxu1 %v1872_v31  ;;  %1143 = vst [vmem:[#allocation2 + $0x38] sm:$0xf] %v1142_v6  ;;  %v642_v13 = vsel %vm8738_vm4, 0, %v641_v9  ;;  %v645_v14 = vsel %vm8738_vm4, 0, %v644_v10  ;;  %v1452_v15 = vrot.slane %v1451_v3, 4  ;;  %v852_v27 = vrot.slane %v850_v18, 7 }
  0x8f   : > { %1146 = vst [vmem:[#allocation2 + $0x3c] sm:$0x1] %v1145_v7  ;;  %v1147_v21 = vld [vmem:[#allocation2 + $0x40] sm:$0xf]  ;;  %v549_v28 = vld [vmem:[#allocation2 + $0x50] sm:$0x1]  ;;  %v1443_v29 = vsel %vm8812_vm9, %v1438_v11, %v1442_v2 }
  0x90   : > { %643 = vst [vmem:[#allocation2 + $0x44] sm:$0x1] %v642_v13  ;;  %v1297_v23 = vld [vmem:[#allocation2 + $0x30] sm:$0xf]  ;;  %v1457_v30 = vsel %vm8812_vm9, %v1452_v15, %v1456_v12  ;;  %v1148_v31 = vsel %vm8775_vm6, %v847_v24, %v1147_v21  ;;  %v848_v35 = vrot.slane %v844_v16, 4  ;;  %v855_v36 = vor.u32 %v853_v20, %v852_v27  ;;  %v725_v43 = vld [vmem:[%s8716_s25 + $0x60] sm:$0xff] }
  0x91   : > { %646 = vst [vmem:[#allocation2 + $0x4c] sm:$0x1] %v645_v14  ;;  %v1459_v25 = vshrl.u32 %v1297_v23, 16  ;;  %v1462_v26 = vshll.u32 %v1297_v23, 16  ;;  %v550_v37 = vsel %vm8732_vm3, 0, %v549_v28  ;;  %v856_v42 = vrot.slane %v852_v27, 4 }
  0x92   : > { %v552_v38 = vld [vmem:[#allocation2 + $0x58] sm:$0x1]  ;;  %v1843_v44 = vunpack.c.l.b16 %v1443_v29  ;;  %v1844_v45 = vunpack.c.l.b16 %v1457_v30  ;;  %1149 = vst [vmem:[#allocation2 + $0x40] sm:$0xf] %v1148_v31  ;;  %v858_v52 = vshrl.u32 %v8873_v33, 16  ;;  %v861_v12 = vshll.u32 %v8873_v33, 16 }
  0x93   : > { %v1153_v32 = vld [vmem:[#allocation2 + $0x48] sm:$0xf]  ;;  %v1461_v40 = vrot.slane %v1459_v25, 4  ;;  %v1464_v41 = vrot.slane %v1462_v26, 5  ;;  %551 = vst [vmem:[#allocation2 + $0x50] sm:$0x1] %v550_v37 }
  0x94   : > { %2355 = vmatmul.bf16.gmra.mxu2 %v7355_v19  ;;  %2444 = vmatmul.bf16.gmra.mxu3 %v7355_v19  ;;  %v1345_v34 = vld [vmem:[#allocation2 + $0x34] sm:$0x1]  ;;  %v1154_v50 = vsel %vm8775_vm6, %v855_v36, %v1153_v32  ;;  %v553_v51 = vsel %vm8732_vm3, 0, %v552_v38  ;;  %v1873_v0 = vpack.c.b16 %v1844_v45, %v1843_v44  ;;  %v7358_v1 = vld [vmem:[#allocation2 + $0x30] sm:$0xf]  ;;  %v860_v11 = vrot.slane %v858_v52, 7 }
  0x95   : > { %v1298_v39 = vld [vmem:[#allocation2 + $0x38] sm:$0xf]  ;;  %v1468_v54 = vshll.u32 %v1345_v34, 16  ;;  %1155 = vst [vmem:[#allocation2 + $0x48] sm:$0xf] %v1154_v50  ;;  %v1465_v53 = vor.u32 %v1464_v41, %v1461_v40  ;;  %v866_v15 = vshrl.u32 %v756_v63, 16 }
  0x96   : > { %v1346_v46 = vld [vmem:[#allocation2 + $0x3c] sm:$0x1]  ;;  %v1473_v47 = vshrl.u32 %v1298_v39, 16  ;;  %v1476_v48 = vshll.u32 %v1298_v39, 16  ;;  %554 = vst [vmem:[#allocation2 + $0x58] sm:$0x1] %v553_v51  ;;  %v863_v27 = vor.u32 %v861_v12, %v860_v11 }
  0x97   : > { %v1150_v49 = vld [vmem:[#allocation2 + $0x44] sm:$0x1]  ;;  %v1482_v60 = vshll.u32 %v1346_v46, 16  ;;  %v647_v3 = vld [vmem:[#allocation2 + $0x54] sm:$0x1]  ;;  %v1470_v10 = vrot.slane %v1468_v54, 5 }
  0x98   : > { %v1475_v55 = vrot.slane %v1473_v47, 4  ;;  %v1478_v57 = vrot.slane %v1476_v48, 5  ;;  %v1151_v59 = vsel %vm8732_vm3, %v848_v35, %v1150_v49  ;;  %v1156_v61 = vld [vmem:[#allocation2 + $0x4c] sm:$0x1]  ;;  %v650_v4 = vld [vmem:[#allocation2 + $0x5c] sm:$0x1] }
  0x99   : > { %1152 = vst [vmem:[#allocation2 + $0x44] sm:$0x1] %v1151_v59  ;;  %v1157_v2 = vsel %vm8732_vm3, %v856_v42, %v1156_v61  ;;  %v8002_v6 = vld [vmem:[#allocation2 + $0x34] sm:$0xf0]  ;;  %v648_v7 = vsel %vm8738_vm4, 0, %v647_v3  ;;  %v651_v9 = vsel %vm8738_vm4, 0, %v650_v4 }
  0x9a   : > { %v1479_v5 = vor.u32 %v1478_v57, %v1475_v55  ;;  %1158 = vst [vmem:[#allocation2 + $0x4c] sm:$0x1] %v1157_v2  ;;  %v1466_v13 = vrot.slane %v1465_v53, 4  ;;  %v1299_v14 = vld [vmem:[#allocation2 + $0x40] sm:$0xf]  ;;  %v1484_v16 = vrot.slane %v1482_v60, 5  ;;  %v7359_v20 = vor.u32 %v8002_v6, %v7358_v1 }
  0x9b   : > { %649 = vst [vmem:[#allocation2 + $0x54] sm:$0x1] %v648_v7  ;;  %v7546_v17 = vld [vmem:[#allocation8 + $0x150] sm:$0xf]  ;;  %v8058_v18 = vld [vmem:[#allocation8 + $0x154] sm:$0xf0] }
  0x9c   : > { %652 = vst [vmem:[#allocation2 + $0x5c] sm:$0x1] %v651_v9  ;;  %v1480_v19 = vrot.slane %v1479_v5, 4  ;;  %v1300_v21 = vld [vmem:[#allocation2 + $0x48] sm:$0xf]  ;;  %v7547_v22 = vor.u32 %v8058_v18, %v7546_v17  ;;  %v869_v24 = vshll.u32 %v756_v63, 16  ;;  %v1471_v29 = vsel %vm8812_vm9, %v1466_v13, %v1470_v10 }
  0x9d   : > { %v8057_v23 = vld [vmem:[#allocation8 + $0x154] sm:$0xf]  ;;  %v1487_v25 = vshrl.u32 %v1299_v14, 16  ;;  %v1490_v26 = vshll.u32 %v1299_v14, 16  ;;  %v864_v28 = vrot.slane %v860_v11, 4  ;;  %v1501_v30 = vshrl.u32 %v1300_v21, 16 }
  0x9e   : > { %2001 = vmatmul.bf16.gmra.mxu0 %v1873_v0  ;;  %2090 = vmatmul.bf16.gmra.mxu1 %v1873_v0  ;;  %v7548_v31 = vld [vmem:[#allocation8 + $0x158] sm:$0xf0]  ;;  %v868_v32 = vrot.slane %v866_v15, 7  ;;  %v1159_v33 = vld [vmem:[#allocation2 + $0x50] sm:$0xf]  ;;  %v1504_v35 = vshll.u32 %v1300_v21, 16  ;;  %v1485_v38 = vsel %vm8812_vm9, %v1480_v19, %v1484_v16  ;;  %v1845_v44 = vunpack.c.l.b16 %v1471_v29 }
  0x9f   : > { %2905 = vmatpush.bf16.msrb.mxu0 %v7547_v22  ;;  %v7551_v36 = vor.u32 %v8057_v23, %v7548_v31  ;;  %v1165_v37 = vld [vmem:[#allocation2 + $0x58] sm:$0xf]  ;;  %v1489_v45 = vrot.slane %v1487_v25, 4  ;;  %v1160_v46 = vsel %vm8775_vm6, %v863_v27, %v1159_v33  ;;  %v555_v49 = vld [vmem:[#allocation2 + $0x60] sm:$0x1]  ;;  %v726_v50 = vld [vmem:[%s8716_s25 + $0x68] sm:$0xff]  ;;  %v1846_v59 = vunpack.c.l.b16 %v1485_v38 }
  0xa0   : > { %v1347_v34 = vld [vmem:[#allocation2 + $0x44] sm:$0x1]  ;;  %v871_v40 = vor.u32 %v869_v24, %v868_v32  ;;  %v872_v41 = vrot.slane %v868_v32, 4  ;;  %v1492_v51 = vrot.slane %v1490_v26, 5  ;;  %v1503_v52 = vrot.slane %v1501_v30, 4 }
  0xa1   : > { %v1348_v39 = vld [vmem:[#allocation2 + $0x4c] sm:$0x1]  ;;  %2994 = vmatpush.bf16.msrb.mxu1 %v7551_v36  ;;  %1161 = vst [vmem:[#allocation2 + $0x50] sm:$0xf] %v1160_v46  ;;  %v558_v57 = vld [vmem:[#allocation2 + $0x68] sm:$0x1]  ;;  %v757_v63 = vpack.c.bf16 %v725_v43, %v725_v43  ;;  %v758_v3 = vpack.c.bf16 %v726_v50, %v726_v50  ;;  %v1874_v12 = vpack.c.b16 %v1846_v59, %v1845_v44 }
  0xa2   : > { %v1162_v42 = vld [vmem:[#allocation2 + $0x54] sm:$0x1]  ;;  %v1166_v54 = vsel %vm8775_vm6, %v871_v40, %v1165_v37  ;;  %v1506_v53 = vrot.slane %v1504_v35, 5  ;;  %v556_v60 = vsel %vm8732_vm3, 0, %v555_v49  ;;  %v653_v61 = vld [vmem:[#allocation2 + $0x64] sm:$0x1]  ;;  %v1493_v9 = vor.u32 %v1492_v51, %v1489_v45 }
  0xa3   : > { %v1163_v47 = vsel %vm8732_vm3, %v864_v28, %v1162_v42  ;;  %v1168_v48 = vld [vmem:[#allocation2 + $0x5c] sm:$0x1]  ;;  %v1496_v0 = vshll.u32 %v1347_v34, 16  ;;  %1167 = vst [vmem:[#allocation2 + $0x58] sm:$0xf] %v1166_v54  ;;  %v559_v1 = vsel %vm8732_vm3, 0, %v558_v57 }
  0xa4   : > { %2360 = vmatmul.bf16.gmra.mxu2 %v7359_v20  ;;  %2449 = vmatmul.bf16.gmra.mxu3 %v7359_v20  ;;  %v1169_v55 = vsel %vm8732_vm3, %v872_v41, %v1168_v48  ;;  %1164 = vst [vmem:[#allocation2 + $0x54] sm:$0x1] %v1163_v47  ;;  %v656_v2 = vld [vmem:[#allocation2 + $0x6c] sm:$0x1]  ;;  %v1510_v4 = vshll.u32 %v1348_v39, 16  ;;  %v654_v5 = vsel %vm8738_vm4, 0, %v653_v61  ;;  %v1507_v13 = vor.u32 %v1506_v53, %v1503_v52 }
  0xa5   : > { %1170 = vst [vmem:[#allocation2 + $0x5c] sm:$0x1] %v1169_v55  ;;  %v657_v6 = vsel %vm8738_vm4, 0, %v656_v2  ;;  %v874_v7 = vshrl.u32 %v757_v63, 16  ;;  %v877_v10 = vshll.u32 %v757_v63, 16  ;;  %v882_v11 = vshrl.u32 %v758_v3, 16 }
  0xa6   : > { %557 = vst [vmem:[#allocation2 + $0x60] sm:$0x1] %v556_v60  ;;  %v885_v15 = vshll.u32 %v758_v3, 16  ;;  %v1494_v17 = vrot.slane %v1493_v9, 4  ;;  %v1498_v18 = vrot.slane %v1496_v0, 5  ;;  %v1508_v22 = vrot.slane %v1507_v13, 4 }
  0xa7   : > { %560 = vst [vmem:[#allocation2 + $0x68] sm:$0x1] %v559_v1  ;;  %v876_v14 = vrot.slane %v874_v7, 7  ;;  %v884_v16 = vrot.slane %v882_v11, 7  ;;  %v7362_v19 = vld [vmem:[#allocation2 + $0x40] sm:$0xf] }
  0xa8   : > { %655 = vst [vmem:[#allocation2 + $0x64] sm:$0x1] %v654_v5  ;;  %v8003_v20 = vld [vmem:[#allocation2 + $0x44] sm:$0xf0]  ;;  %v1512_v23 = vrot.slane %v1510_v4, 5  ;;  %v1499_v32 = vsel %vm8812_vm9, %v1494_v17, %v1498_v18  ;;  %v727_v53 = vld [vmem:[%s8716_s25 + $0x70] sm:$0xff] }
  0xa9   : > { %658 = vst [vmem:[#allocation2 + $0x6c] sm:$0x1] %v657_v6  ;;  %v879_v21 = vor.u32 %v877_v10, %v876_v14  ;;  %v1301_v24 = vld [vmem:[#allocation2 + $0x50] sm:$0xf]  ;;  %v887_v25 = vor.u32 %v885_v15, %v884_v16  ;;  %v880_v27 = vrot.slane %v876_v14, 4  ;;  %v7363_v28 = vor.u32 %v8003_v20, %v7362_v19  ;;  %v728_v0 = vld [vmem:[%s8716_s25 + $0x78] sm:$0xff] }
  0xaa   : > { %v1302_v26 = vld [vmem:[#allocation2 + $0x58] sm:$0xf]  ;;  %v888_v29 = vrot.slane %v884_v16, 4  ;;  %v561_v31 = vld [vmem:[#allocation2 + $0x70] sm:$0x1]  ;;  %v1515_v33 = vshrl.u32 %v1301_v24, 16  ;;  %v1513_v38 = vsel %vm8812_vm9, %v1508_v22, %v1512_v23  ;;  %v1847_v48 = vunpack.c.l.b16 %v1499_v32 }
  0xab   : > { %v1518_v34 = vshll.u32 %v1301_v24, 16  ;;  %v564_v37 = vld [vmem:[#allocation2 + $0x78] sm:$0x1]  ;;  %v1529_v39 = vshrl.u32 %v1302_v26, 16  ;;  %v1532_v40 = vshll.u32 %v1302_v26, 16  ;;  %v562_v46 = vsel %vm8732_vm3, 0, %v561_v31 }
  0xac   : > { %v1349_v43 = vld [vmem:[#allocation2 + $0x54] sm:$0x1]  ;;  %v565_v47 = vsel %vm8732_vm3, 0, %v564_v37  ;;  %v1350_v49 = vld [vmem:[#allocation2 + $0x5c] sm:$0x1]  ;;  %v1848_v54 = vunpack.c.l.b16 %v1513_v38  ;;  %v1517_v55 = vrot.slane %v1515_v33, 4  ;;  %v759_v1 = vpack.c.bf16 %v727_v53, %v727_v53 }
  0xad   : > { %v1171_v30 = vld [vmem:[#allocation2 + $0x60] sm:$0xf]  ;;  %v659_v51 = vld [vmem:[#allocation2 + $0x74] sm:$0x1]  ;;  %v662_v52 = vld [vmem:[#allocation2 + $0x7c] sm:$0x1]  ;;  %v760_v2 = vpack.c.bf16 %v728_v0, %v728_v0 }
  0xae   : > { %2006 = vmatmul.bf16.gmra.mxu0 %v1874_v12  ;;  %2095 = vmatmul.bf16.gmra.mxu1 %v1874_v12  ;;  %v1172_v35 = vsel %vm8775_vm6, %v879_v21, %v1171_v30  ;;  %v1177_v36 = vld [vmem:[#allocation2 + $0x68] sm:$0xf]  ;;  %v1520_v57 = vrot.slane %v1518_v34, 5  ;;  %v660_v59 = vsel %vm8738_vm4, 0, %v659_v51  ;;  %v1531_v60 = vrot.slane %v1529_v39, 4  ;;  %v729_v32 = vld [vmem:[%s8716_s25 + $0x80] sm:$0xff] }
  0xaf   : > { %1173 = vst [vmem:[#allocation2 + $0x60] sm:$0xf] %v1172_v35  ;;  %v1174_v41 = vld [vmem:[#allocation2 + $0x64] sm:$0x1]  ;;  %v1178_v42 = vsel %vm8775_vm6, %v887_v25, %v1177_v36  ;;  %v1534_v61 = vrot.slane %v1532_v40, 5  ;;  %v663_v63 = vsel %vm8738_vm4, 0, %v662_v52  ;;  %v1875_v9 = vpack.c.b16 %v1848_v54, %v1847_v48 }
  0xb0   : > { %v1175_v44 = vsel %vm8732_vm3, %v880_v27, %v1174_v41  ;;  %1179 = vst [vmem:[#allocation2 + $0x68] sm:$0xf] %v1178_v42  ;;  %v1180_v45 = vld [vmem:[#allocation2 + $0x6c] sm:$0x1]  ;;  %v1524_v3 = vshll.u32 %v1349_v43, 16  ;;  %v890_v4 = vshrl.u32 %v759_v1, 16  ;;  %v1521_v5 = vor.u32 %v1520_v57, %v1517_v55 }
  0xb1   : > { %1176 = vst [vmem:[#allocation2 + $0x64] sm:$0x1] %v1175_v44  ;;  %v1181_v50 = vsel %vm8732_vm3, %v888_v29, %v1180_v45  ;;  %v1538_v6 = vshll.u32 %v1350_v49, 16  ;;  %v893_v7 = vshll.u32 %v759_v1, 16  ;;  %v1535_v10 = vor.u32 %v1534_v61, %v1531_v60  ;;  %v7366_v13 = vld [vmem:[#allocation2 + $0x50] sm:$0xf] }
  0xb2   : > { %1182 = vst [vmem:[#allocation2 + $0x6c] sm:$0x1] %v1181_v50  ;;  %v892_v11 = vrot.slane %v890_v4, 7  ;;  %v898_v12 = vshrl.u32 %v760_v2, 16  ;;  %v1526_v14 = vrot.slane %v1524_v3, 5  ;;  %v901_v17 = vshll.u32 %v760_v2, 16 }
  0xb3   : > { %563 = vst [vmem:[#allocation2 + $0x70] sm:$0x1] %v562_v46  ;;  %v8004_v15 = vld [vmem:[#allocation2 + $0x54] sm:$0xf0]  ;;  %v1522_v18 = vrot.slane %v1521_v5, 4  ;;  %v1540_v19 = vrot.slane %v1538_v6, 5  ;;  %v761_v45 = vpack.c.bf16 %v729_v32, %v729_v32 }
  0xb4   : > { %2365 = vmatmul.bf16.gmra.mxu2 %v7363_v28  ;;  %2454 = vmatmul.bf16.gmra.mxu3 %v7363_v28  ;;  %566 = vst [vmem:[#allocation2 + $0x78] sm:$0x1] %v565_v47  ;;  %v895_v21 = vor.u32 %v893_v7, %v892_v11  ;;  %v896_v22 = vrot.slane %v892_v11, 4  ;;  %v1536_v23 = vrot.slane %v1535_v10, 4  ;;  %v7538_v24 = vld [vmem:[#allocation8 + $0x140] sm:$0xf]  ;;  %v7367_v27 = vor.u32 %v8004_v15, %v7366_v13 }
  0xb5   : > { %661 = vst [vmem:[#allocation2 + $0x74] sm:$0x1] %v660_v59  ;;  %v8056_v25 = vld [vmem:[#allocation8 + $0x144] sm:$0xf0]  ;;  %v900_v26 = vrot.slane %v898_v12, 7  ;;  %v1527_v46 = vsel %vm8812_vm9, %v1522_v18, %v1526_v14  ;;  %v906_v61 = vshrl.u32 %v761_v45, 16 }
  0xb6   : > { %664 = vst [vmem:[#allocation2 + $0x7c] sm:$0x1] %v663_v63  ;;  %v1303_v16 = vld [vmem:[#allocation2 + $0x60] sm:$0xf]  ;;  %v7539_v29 = vor.u32 %v8056_v25, %v7538_v24  ;;  %v8055_v30 = vld [vmem:[#allocation8 + $0x144] sm:$0xf]  ;;  %v1541_v51 = vsel %vm8812_vm9, %v1536_v23, %v1540_v19  ;;  %v1849_v63 = vunpack.c.l.b16 %v1527_v46 }
  0xb7   : > { %v1304_v20 = vld [vmem:[#allocation2 + $0x68] sm:$0xf]  ;;  %v1543_v28 = vshrl.u32 %v1303_v16, 16  ;;  %v7540_v31 = vld [vmem:[#allocation8 + $0x148] sm:$0xf0]  ;;  %v1546_v33 = vshll.u32 %v1303_v16, 16  ;;  %v903_v35 = vor.u32 %v901_v17, %v900_v26  ;;  %v1850_v4 = vunpack.c.l.b16 %v1541_v51 }
  0xb8   : > { %v7543_v34 = vor.u32 %v8055_v30, %v7540_v31  ;;  %v904_v36 = vrot.slane %v900_v26, 4  ;;  %v1557_v39 = vshrl.u32 %v1304_v20, 16  ;;  %2906 = vmatpush.bf16.msrb.mxu0 %v7539_v29  ;;  %v730_v44 = vld [vmem:[%s8716_s25 + $0x88] sm:$0xff]  ;;  %v567_v49 = vld [vmem:[#allocation2 + $0x80] sm:$0x1]  ;;  %v1560_v54 = vshll.u32 %v1304_v20, 16 }
  0xb9   : > { %v570_v50 = vld [vmem:[#allocation2 + $0x88] sm:$0x1]  ;;  %v1351_v52 = vld [vmem:[#allocation2 + $0x64] sm:$0x1]  ;;  %v568_v55 = vsel %vm8732_vm3, 0, %v567_v49  ;;  %v762_v60 = vpack.c.bf16 %v730_v44, %v730_v44  ;;  %v1545_v1 = vrot.slane %v1543_v28, 4  ;;  %v1876_v16 = vpack.c.b16 %v1850_v4, %v1849_v63 }
  0xba   : > { %v1183_v37 = vld [vmem:[#allocation2 + $0x70] sm:$0xf]  ;;  %2995 = vmatpush.bf16.msrb.mxu1 %v7543_v34  ;;  %v665_v57 = vld [vmem:[#allocation2 + $0x84] sm:$0x1]  ;;  %v571_v59 = vsel %vm8732_vm3, 0, %v570_v50  ;;  %v1548_v2 = vrot.slane %v1546_v33, 5 }
  0xbb   : > { %v1184_v40 = vsel %vm8775_vm6, %v895_v21, %v1183_v37  ;;  %v1189_v42 = vld [vmem:[#allocation2 + $0x78] sm:$0xf]  ;;  %v668_v53 = vld [vmem:[#allocation2 + $0x8c] sm:$0x1]  ;;  %v666_v3 = vsel %vm8738_vm4, 0, %v665_v57  ;;  %v1559_v5 = vrot.slane %v1557_v39, 4 }
  0xbc   : > { %v1186_v38 = vld [vmem:[#allocation2 + $0x74] sm:$0x1]  ;;  %1185 = vst [vmem:[#allocation2 + $0x70] sm:$0xf] %v1184_v40  ;;  %v1190_v47 = vsel %vm8775_vm6, %v903_v35, %v1189_v42  ;;  %v1352_v0 = vld [vmem:[#allocation2 + $0x6c] sm:$0x1]  ;;  %v1549_v15 = vor.u32 %v1548_v2, %v1545_v1 }
  0xbd   : > { %v1187_v41 = vsel %vm8732_vm3, %v896_v22, %v1186_v38  ;;  %v1192_v43 = vld [vmem:[#allocation2 + $0x7c] sm:$0x1]  ;;  %1191 = vst [vmem:[#allocation2 + $0x78] sm:$0xf] %v1190_v47  ;;  %v669_v6 = vsel %vm8738_vm4, 0, %v668_v53  ;;  %v914_v7 = vshrl.u32 %v762_v60, 16 }
  0xbe   : > { %2011 = vmatmul.bf16.gmra.mxu0 %v1875_v9  ;;  %2100 = vmatmul.bf16.gmra.mxu1 %v1875_v9  ;;  %v1193_v48 = vsel %vm8732_vm3, %v904_v36, %v1192_v43  ;;  %1188 = vst [vmem:[#allocation2 + $0x74] sm:$0x1] %v1187_v41  ;;  %v1562_v9 = vrot.slane %v1560_v54, 5  ;;  %v908_v10 = vrot.slane %v906_v61, 7  ;;  %v909_v11 = vshll.u32 %v761_v45, 16  ;;  %v731_v49 = vld [vmem:[%s8716_s25 + $0x90] sm:$0xff] }
  0xbf   : > { %1194 = vst [vmem:[#allocation2 + $0x7c] sm:$0x1] %v1193_v48  ;;  %v917_v12 = vshll.u32 %v762_v60, 16  ;;  %v1552_v13 = vshll.u32 %v1351_v52, 16  ;;  %v916_v14 = vrot.slane %v914_v7, 7  ;;  %v1566_v17 = vshll.u32 %v1352_v0, 16 }
  0xc0   : > { %569 = vst [vmem:[#allocation2 + $0x80] sm:$0x1] %v568_v55  ;;  %v1563_v18 = vor.u32 %v1562_v9, %v1559_v5  ;;  %v911_v20 = vor.u32 %v909_v11, %v908_v10  ;;  %v7370_v23 = vld [vmem:[#allocation2 + $0x60] sm:$0xf]  ;;  %v8005_v24 = vld [vmem:[#allocation2 + $0x64] sm:$0xf0]  ;;  %v763_v57 = vpack.c.bf16 %v731_v49, %v731_v49 }
  0xc1   : > { %572 = vst [vmem:[#allocation2 + $0x88] sm:$0x1] %v571_v59  ;;  %v919_v21 = vor.u32 %v917_v12, %v916_v14  ;;  %v1554_v22 = vrot.slane %v1552_v13, 5  ;;  %v912_v25 = vrot.slane %v908_v10, 4  ;;  %v1550_v26 = vrot.slane %v1549_v15, 4  ;;  %v732_v50 = vld [vmem:[%s8716_s25 + $0x98] sm:$0xff] }
  0xc2   : > { %667 = vst [vmem:[#allocation2 + $0x84] sm:$0x1] %v666_v3  ;;  %v920_v28 = vrot.slane %v916_v14, 4  ;;  %v1568_v30 = vrot.slane %v1566_v17, 5  ;;  %v573_v33 = vld [vmem:[#allocation2 + $0x90] sm:$0x1]  ;;  %v7371_v40 = vor.u32 %v8005_v24, %v7370_v23  ;;  %v764_v59 = vpack.c.bf16 %v732_v50, %v732_v50 }
  0xc3   : > { %670 = vst [vmem:[#allocation2 + $0x8c] sm:$0x1] %v669_v6  ;;  %v1305_v19 = vld [vmem:[#allocation2 + $0x70] sm:$0xf]  ;;  %v1564_v34 = vrot.slane %v1563_v18, 4  ;;  %v1555_v45 = vsel %vm8812_vm9, %v1550_v26, %v1554_v22  ;;  %v574_v48 = vsel %vm8732_vm3, 0, %v573_v33 }
  0xc4   : > { %2370 = vmatmul.bf16.gmra.mxu2 %v7367_v27  ;;  %2459 = vmatmul.bf16.gmra.mxu3 %v7367_v27  ;;  %v1306_v27 = vld [vmem:[#allocation2 + $0x78] sm:$0xf]  ;;  %v1571_v31 = vshrl.u32 %v1305_v19, 16  ;;  %v1574_v35 = vshll.u32 %v1305_v19, 16  ;;  %v671_v55 = vld [vmem:[#allocation2 + $0x94] sm:$0x1]  ;;  %v1851_v4 = vunpack.c.l.b16 %v1555_v45 }
  0xc5   : > { %v576_v39 = vld [vmem:[#allocation2 + $0x98] sm:$0x1]  ;;  %v1585_v41 = vshrl.u32 %v1306_v27, 16  ;;  %v1588_v42 = vshll.u32 %v1306_v27, 16  ;;  %v1353_v46 = vld [vmem:[#allocation2 + $0x74] sm:$0x1]  ;;  %v1569_v53 = vsel %vm8812_vm9, %v1564_v34, %v1568_v30 }
  0xc6   : > { %v1354_v51 = vld [vmem:[#allocation2 + $0x7c] sm:$0x1]  ;;  %v1573_v52 = vrot.slane %v1571_v31, 4  ;;  %v577_v54 = vsel %vm8732_vm3, 0, %v576_v39  ;;  %v1576_v60 = vrot.slane %v1574_v35, 5  ;;  %v672_v61 = vsel %vm8738_vm4, 0, %v671_v55 }
  0xc7   : > { %v1195_v29 = vld [vmem:[#allocation2 + $0x80] sm:$0xf]  ;;  %v674_v63 = vld [vmem:[#allocation2 + $0x9c] sm:$0x1]  ;;  %v1587_v0 = vrot.slane %v1585_v41, 4  ;;  %v1590_v1 = vrot.slane %v1588_v42, 5  ;;  %v1852_v7 = vunpack.c.l.b16 %v1569_v53 }
  0xc8   : > { %v1201_v32 = vld [vmem:[#allocation2 + $0x88] sm:$0xf]  ;;  %v1196_v36 = vsel %vm8775_vm6, %v911_v20, %v1195_v29  ;;  %575 = vst [vmem:[#allocation2 + $0x90] sm:$0x1] %v574_v48  ;;  %v675_v2 = vsel %vm8738_vm4, 0, %v674_v63  ;;  %v922_v3 = vshrl.u32 %v763_v57, 16  ;;  %v1577_v12 = vor.u32 %v1576_v60, %v1573_v52 }
  0xc9   : > { %v1198_v37 = vld [vmem:[#allocation2 + $0x84] sm:$0x1]  ;;  %v1202_v38 = vsel %vm8775_vm6, %v919_v21, %v1201_v32  ;;  %1197 = vst [vmem:[#allocation2 + $0x80] sm:$0xf] %v1196_v36  ;;  %v925_v5 = vshll.u32 %v763_v57, 16  ;;  %v930_v6 = vshrl.u32 %v764_v59, 16  ;;  %v1877_v20 = vpack.c.b16 %v1852_v7, %v1851_v4 }
  0xca   : > { %v1199_v43 = vsel %vm8732_vm3, %v912_v25, %v1198_v37  ;;  %v1204_v44 = vld [vmem:[#allocation2 + $0x8c] sm:$0x1]  ;;  %1203 = vst [vmem:[#allocation2 + $0x88] sm:$0xf] %v1202_v38  ;;  %v1580_v9 = vshll.u32 %v1353_v46, 16  ;;  %v924_v10 = vrot.slane %v922_v3, 7 }
  0xcb   : > { %1200 = vst [vmem:[#allocation2 + $0x84] sm:$0x1] %v1199_v43  ;;  %v1205_v47 = vsel %vm8732_vm3, %v920_v28, %v1204_v44  ;;  %v933_v11 = vshll.u32 %v764_v59, 16  ;;  %v1594_v13 = vshll.u32 %v1354_v51, 16  ;;  %v932_v15 = vrot.slane %v930_v6, 7  ;;  %v734_v7 = vld [vmem:[%s8716_s25 + $0xa8] sm:$0xff] }
  0xcc   : > { %1206 = vst [vmem:[#allocation2 + $0x8c] sm:$0x1] %v1205_v47  ;;  %v927_v19 = vor.u32 %v925_v5, %v924_v10  ;;  %v8980_v24 = vrot.slane %v1577_v12, 4  ;;  %v8982_v25 = vrot.slane %v1580_v9, 5  ;;  %v7374_v27 = vld [vmem:[#allocation2 + $0x70] sm:$0xf]  ;;  %v766_v12 = vpack.c.bf16 %v734_v7, %v734_v7 }
  0xcd   : > { %578 = vst [vmem:[#allocation2 + $0x98] sm:$0x1] %v577_v54  ;;  %v935_v23 = vor.u32 %v933_v11, %v932_v15  ;;  %v8984_v26 = vrot.slane %v1594_v13, 5  ;;  %v8006_v28 = vld [vmem:[#allocation2 + $0x74] sm:$0xf0]  ;;  %v928_v34 = vrot.slane %v924_v10, 4 }
  0xce   : > { %2016 = vmatmul.bf16.gmra.mxu0 %v1876_v16  ;;  %2105 = vmatmul.bf16.gmra.mxu1 %v1876_v16  ;;  %673 = vst [vmem:[#allocation2 + $0x94] sm:$0x1] %v672_v61  ;;  %v1591_v16 = vor.u32 %v1590_v1, %v1587_v0  ;;  %v936_v35 = vrot.slane %v932_v15, 4  ;;  %v8054_v41 = vld [vmem:[#allocation8 + $0x134] sm:$0xf0]  ;;  %v7375_v47 = vor.u32 %v8006_v28, %v7374_v27  ;;  %v733_v54 = vld [vmem:[%s8716_s25 + $0xa0] sm:$0xff] }
  0xcf   : > { %676 = vst [vmem:[#allocation2 + $0x9c] sm:$0x1] %v675_v2  ;;  %v1207_v31 = vld [vmem:[#allocation2 + $0x90] sm:$0xf]  ;;  %v8053_v44 = vld [vmem:[#allocation8 + $0x134] sm:$0xf]  ;;  %v765_v53 = vpack.c.bf16 %v733_v54, %v733_v54  ;;  %v1583_v0 = vsel %vm8812_vm9, %v8980_v24, %v8982_v25 }
  0xd0   : > { %v1307_v14 = vld [vmem:[#allocation2 + $0x80] sm:$0xf]  ;;  %v1592_v29 = vrot.slane %v1591_v16, 4  ;;  %v1208_v36 = vsel %vm8775_vm6, %v927_v19, %v1207_v31  ;;  %v7532_v45 = vld [vmem:[#allocation8 + $0x138] sm:$0xf0]  ;;  %v946_v19 = vshrl.u32 %v766_v12, 16 }
  0xd1   : > { %v1308_v17 = vld [vmem:[#allocation2 + $0x88] sm:$0xf]  ;;  %v1599_v18 = vshrl.u32 %v1307_v14, 16  ;;  %v1602_v21 = vshll.u32 %v1307_v14, 16  ;;  %1209 = vst [vmem:[#allocation2 + $0x90] sm:$0xf] %v1208_v36  ;;  %v7535_v51 = vor.u32 %v8053_v44, %v7532_v45  ;;  %v1853_v14 = vunpack.c.l.b16 %v1583_v0 }
  0xd2   : > { %v1613_v22 = vshrl.u32 %v1308_v17, 16  ;;  %v1616_v30 = vshll.u32 %v1308_v17, 16  ;;  %v1355_v48 = vld [vmem:[#allocation2 + $0x84] sm:$0x1]  ;;  %v579_v57 = vld [vmem:[#allocation2 + $0xa0] sm:$0x1]  ;;  %v1597_v1 = vsel %vm8812_vm9, %v1592_v29, %v8984_v26 }
  0xd3   : > { %v8986_v33 = vrot.slane %v1599_v18, 4  ;;  %v8990_v38 = vrot.slane %v1602_v21, 5  ;;  %v1356_v49 = vld [vmem:[#allocation2 + $0x8c] sm:$0x1]  ;;  %v582_v59 = vld [vmem:[#allocation2 + $0xa8] sm:$0x1]  ;;  %2996 = vmatpush.bf16.msrb.mxu1 %v7535_v51  ;;  %v1854_v15 = vunpack.c.l.b16 %v1597_v1 }
  0xd4   : > { %2375 = vmatmul.bf16.gmra.mxu2 %v7371_v40  ;;  %2464 = vmatmul.bf16.gmra.mxu3 %v7371_v40  ;;  %v1213_v32 = vld [vmem:[#allocation2 + $0x98] sm:$0xf]  ;;  %v8992_v39 = vrot.slane %v1613_v22, 4  ;;  %v7530_v40 = vld [vmem:[#allocation8 + $0x130] sm:$0xf]  ;;  %v1618_v50 = vrot.slane %v1616_v30, 5 }
  0xd5   : > { %v1210_v37 = vld [vmem:[#allocation2 + $0x94] sm:$0x1]  ;;  %v1214_v42 = vsel %vm8775_vm6, %v935_v23, %v1213_v32  ;;  %v7531_v43 = vor.u32 %v8054_v41, %v7530_v40  ;;  %v580_v60 = vsel %vm8732_vm3, 0, %v579_v57  ;;  %v583_v61 = vsel %vm8732_vm3, 0, %v582_v59  ;;  %v677_v63 = vld [vmem:[#allocation2 + $0xa4] sm:$0x1] }
  0xd6   : > { %v1211_v46 = vsel %vm8732_vm3, %v928_v34, %v1210_v37  ;;  %v1216_v52 = vld [vmem:[#allocation2 + $0x9c] sm:$0x1]  ;;  %1215 = vst [vmem:[#allocation2 + $0x98] sm:$0xf] %v1214_v42  ;;  %v678_v3 = vsel %vm8738_vm4, 0, %v677_v63  ;;  %v938_v9 = vshrl.u32 %v765_v53, 16  ;;  %v1605_v17 = vor.u32 %v8990_v38, %v8986_v33 }
  0xd7   : > { %1212 = vst [vmem:[#allocation2 + $0x94] sm:$0x1] %v1211_v46  ;;  %2907 = vmatpush.bf16.msrb.mxu0 %v7531_v43  ;;  %v1217_v55 = vsel %vm8732_vm3, %v936_v35, %v1216_v52  ;;  %v8070_v2 = vld [vmem:[%s10976_s2 + $0x38] sm:$0xff]  ;;  %v680_v4 = vld [vmem:[#allocation2 + $0xac] sm:$0x1]  ;;  %v1608_v10 = vshll.u32 %v1355_v48, 16  ;;  %v1619_v18 = vor.u32 %v1618_v50, %v8992_v39  ;;  %v1878_v25 = vpack.c.b16 %v1854_v15, %v1853_v14 }
  0xd8   : > { %1218 = vst [vmem:[#allocation2 + $0x9c] sm:$0x1] %v1217_v55  ;;  %v8078_v5 = vld [vmem:[%s10976_s2 + $0x78] sm:$0xff]  ;;  %v681_v6 = vsel %vm8738_vm4, 0, %v680_v4  ;;  %v1622_v11 = vshll.u32 %v1356_v49, 16  ;;  %3309 = vmatpush.bf16.msrb.mxu2 %v8070_v2  ;;  %v941_v13 = vshll.u32 %v765_v53, 16 }
  0xd9   : > { %581 = vst [vmem:[#allocation2 + $0xa0] sm:$0x1] %v580_v60  ;;  %3398 = vmatpush.bf16.msrb.mxu3 %v8078_v5  ;;  %v940_v16 = vrot.slane %v938_v9, 7  ;;  %v949_v22 = vshll.u32 %v766_v12, 16  ;;  %v9026_v23 = vrot.slane %v1608_v10, 5  ;;  %v948_v28 = vrot.slane %v946_v19, 7 }
  0xda   : > { %584 = vst [vmem:[#allocation2 + $0xa8] sm:$0x1] %v583_v61  ;;  %v9028_v24 = vrot.slane %v1622_v11, 5  ;;  %v1606_v30 = vrot.slane %v1605_v17, 4  ;;  %v1620_v31 = vrot.slane %v1619_v18, 4  ;;  %v735_v51 = vld [vmem:[%s8716_s25 + $0xb0] sm:$0xff] }
  0xdb   : > { %679 = vst [vmem:[#allocation2 + $0xa4] sm:$0x1] %v678_v3  ;;  %v943_v21 = vor.u32 %v941_v13, %v940_v16  ;;  %v944_v27 = vrot.slane %v940_v16, 4  ;;  %v7378_v32 = vld [vmem:[#allocation2 + $0x80] sm:$0xf]  ;;  %v951_v37 = vor.u32 %v949_v22, %v948_v28  ;;  %v952_v38 = vrot.slane %v948_v28, 4 }
  0xdc   : > { %682 = vst [vmem:[#allocation2 + $0xac] sm:$0x1] %v681_v6  ;;  %v8007_v34 = vld [vmem:[#allocation2 + $0x84] sm:$0xf0]  ;;  %v588_v48 = vld [vmem:[#allocation2 + $0xb8] sm:$0x1]  ;;  %v767_v59 = vpack.c.bf16 %v735_v51, %v735_v51  ;;  %v1611_v0 = vsel %vm8812_vm9, %v1606_v30, %v9026_v23  ;;  %v1625_v1 = vsel %vm8812_vm9, %v1620_v31, %v9028_v24 }
  0xdd   : > { %v1310_v26 = vld [vmem:[#allocation2 + $0x98] sm:$0xf]  ;;  %v589_v50 = vsel %vm8732_vm3, 0, %v588_v48  ;;  %v7379_v52 = vor.u32 %v8007_v34, %v7378_v32  ;;  %v683_v2 = vld [vmem:[#allocation2 + $0xb4] sm:$0x1]  ;;  %v1855_v14 = vunpack.c.l.b16 %v1611_v0  ;;  %v1856_v15 = vunpack.c.l.b16 %v1625_v1 }
  0xde   : > { %2021 = vmatmul.bf16.gmra.mxu0 %v1877_v20  ;;  %2110 = vmatmul.bf16.gmra.mxu1 %v1877_v20  ;;  %v1309_v20 = vld [vmem:[#allocation2 + $0x90] sm:$0xf]  ;;  %v1641_v40 = vshrl.u32 %v1310_v26, 16  ;;  %v1644_v41 = vshll.u32 %v1310_v26, 16  ;;  %v1357_v54 = vld [vmem:[#allocation2 + $0x94] sm:$0x1] }
  0xdf   : > { %v1627_v33 = vshrl.u32 %v1309_v20, 16  ;;  %v1630_v36 = vshll.u32 %v1309_v20, 16  ;;  %v736_v57 = vld [vmem:[%s8716_s25 + $0xb8] sm:$0xff]  ;;  %590 = vst [vmem:[#allocation2 + $0xb8] sm:$0x1] %v589_v50  ;;  %v684_v4 = vsel %vm8738_vm4, 0, %v683_v2 }
  0xe0   : > { %v1219_v29 = vld [vmem:[#allocation2 + $0xa0] sm:$0xf]  ;;  %v1643_v60 = vrot.slane %v1641_v40, 4  ;;  %v1646_v61 = vrot.slane %v1644_v41, 5  ;;  %v768_v63 = vpack.c.bf16 %v736_v57, %v736_v57  ;;  %v686_v3 = vld [vmem:[#allocation2 + $0xbc] sm:$0x1] }
  0xe1   : > { %v1220_v35 = vsel %vm8775_vm6, %v943_v21, %v1219_v29  ;;  %v1225_v43 = vld [vmem:[#allocation2 + $0xa8] sm:$0xf]  ;;  %v1629_v55 = vrot.slane %v1627_v33, 4  ;;  %v1632_v53 = vrot.slane %v1630_v36, 5  ;;  %v687_v5 = vsel %vm8738_vm4, 0, %v686_v3  ;;  %v737_v2 = vld [vmem:[%s8716_s25 + $0xc0] sm:$0xff] }
  0xe2   : > { %1221 = vst [vmem:[#allocation2 + $0xa0] sm:$0xf] %v1220_v35  ;;  %v1222_v39 = vld [vmem:[#allocation2 + $0xa4] sm:$0x1]  ;;  %v1226_v45 = vsel %vm8775_vm6, %v951_v37, %v1225_v43  ;;  %v954_v6 = vshrl.u32 %v767_v59, 16  ;;  %v962_v7 = vshrl.u32 %v768_v63, 16  ;;  %v1647_v20 = vor.u32 %v1646_v61, %v1643_v60 }
  0xe3   : > { %v1223_v42 = vsel %vm8732_vm3, %v944_v27, %v1222_v39  ;;  %v1228_v44 = vld [vmem:[#allocation2 + $0xac] sm:$0x1]  ;;  %1227 = vst [vmem:[#allocation2 + $0xa8] sm:$0xf] %v1226_v45  ;;  %v1358_v9 = vld [vmem:[#allocation2 + $0x9c] sm:$0x1]  ;;  %v1633_v19 = vor.u32 %v1632_v53, %v1629_v55  ;;  %v1879_v29 = vpack.c.b16 %v1856_v15, %v1855_v14 }
  0xe4   : > { %2380 = vmatmul.bf16.gmra.mxu2 %v7375_v47  ;;  %2469 = vmatmul.bf16.gmra.mxu3 %v7375_v47  ;;  %1224 = vst [vmem:[#allocation2 + $0xa4] sm:$0x1] %v1223_v42  ;;  %v1229_v46 = vsel %vm8732_vm3, %v952_v38, %v1228_v44  ;;  %v585_v47 = vld [vmem:[#allocation2 + $0xb0] sm:$0x1]  ;;  %v957_v10 = vshll.u32 %v767_v59, 16  ;;  %v1636_v11 = vshll.u32 %v1357_v54, 16 }
  0xe5   : > { %v586_v49 = vsel %vm8732_vm3, 0, %v585_v47  ;;  %1230 = vst [vmem:[#allocation2 + $0xac] sm:$0x1] %v1229_v46  ;;  %v956_v12 = vrot.slane %v954_v6, 7  ;;  %v964_v13 = vrot.slane %v962_v7, 7  ;;  %v965_v16 = vshll.u32 %v768_v63, 16 }
  0xe6   : > { %587 = vst [vmem:[#allocation2 + $0xb0] sm:$0x1] %v586_v49  ;;  %v1650_v21 = vshll.u32 %v1358_v9, 16  ;;  %v1237_v28 = vld [vmem:[#allocation2 + $0xb8] sm:$0xf]  ;;  %v9058_v35 = vrot.slane %v1633_v19, 4  ;;  %v769_v6 = vpack.c.bf16 %v737_v2, %v737_v2 }
  0xe7   : > { %685 = vst [vmem:[#allocation2 + $0xb4] sm:$0x1] %v684_v4  ;;  %v959_v22 = vor.u32 %v957_v10, %v956_v12  ;;  %v967_v23 = vor.u32 %v965_v16, %v964_v13  ;;  %v960_v31 = vrot.slane %v956_v12, 4  ;;  %v968_v32 = vrot.slane %v964_v13, 4  ;;  %v7382_v45 = vld [vmem:[#allocation2 + $0x90] sm:$0xf] }
  0xe8   : > { %688 = vst [vmem:[#allocation2 + $0xbc] sm:$0x1] %v687_v5  ;;  %v9060_v36 = vrot.slane %v1647_v20, 4  ;;  %v9062_v37 = vrot.slane %v1650_v21, 5  ;;  %v8008_v46 = vld [vmem:[#allocation2 + $0x94] sm:$0xf0] }
  0xe9   : > { %v1311_v26 = vld [vmem:[#allocation2 + $0xa0] sm:$0xf]  ;;  %v1238_v39 = vsel %vm8775_vm6, %v967_v23, %v1237_v28  ;;  %v8051_v54 = vld [vmem:[#allocation8 + $0x124] sm:$0xf]  ;;  %v7524_v53 = vld [vmem:[#allocation8 + $0x128] sm:$0xf0]  ;;  %v7383_v61 = vor.u32 %v8008_v46, %v7382_v45 }
  0xea   : > { %v1312_v30 = vld [vmem:[#allocation2 + $0xa8] sm:$0xf]  ;;  %v1655_v42 = vshrl.u32 %v1311_v26, 16  ;;  %v1658_v43 = vshll.u32 %v1311_v26, 16  ;;  %1239 = vst [vmem:[#allocation2 + $0xb8] sm:$0xf] %v1238_v39  ;;  %v7527_v63 = vor.u32 %v8051_v54, %v7524_v53  ;;  %v1653_v15 = vsel %vm8812_vm9, %v9060_v36, %v9062_v37 }
  0xeb   : > { %v1669_v47 = vshrl.u32 %v1312_v30, 16  ;;  %v1672_v48 = vshll.u32 %v1312_v30, 16  ;;  %v7522_v51 = vld [vmem:[#allocation8 + $0x120] sm:$0xf]  ;;  %v594_v1 = vld [vmem:[#allocation2 + $0xc8] sm:$0x1] }
  0xec   : > { %v591_v60 = vld [vmem:[#allocation2 + $0xc0] sm:$0x1]  ;;  %v1359_v3 = vld [vmem:[#allocation2 + $0xa4] sm:$0x1]  ;;  %v595_v4 = vsel %vm8732_vm3, 0, %v594_v1  ;;  %v738_v5 = vld [vmem:[%s8716_s25 + $0xc8] sm:$0xff]  ;;  %2997 = vmatpush.bf16.msrb.mxu1 %v7527_v63 }
  0xed   : > { %v1231_v24 = vld [vmem:[#allocation2 + $0xb0] sm:$0xf]  ;;  %v592_v0 = vsel %vm8732_vm3, 0, %v591_v60  ;;  %v1657_v9 = vrot.slane %v1655_v42, 4  ;;  %v1660_v10 = vrot.slane %v1658_v43, 5  ;;  %v770_v12 = vpack.c.bf16 %v738_v5, %v738_v5 }
  0xee   : > { %2026 = vmatmul.bf16.gmra.mxu0 %v1878_v25  ;;  %2115 = vmatmul.bf16.gmra.mxu1 %v1878_v25  ;;  %v9054_v25 = vrot.slane %v1636_v11, 5  ;;  %v1232_v27 = vsel %vm8775_vm6, %v959_v22, %v1231_v24  ;;  %v1234_v38 = vld [vmem:[#allocation2 + $0xb4] sm:$0x1]  ;;  %593 = vst [vmem:[#allocation2 + $0xc0] sm:$0x1] %v592_v0  ;;  %v1671_v16 = vrot.slane %v1669_v47, 4 }
  0xef   : > { %1233 = vst [vmem:[#allocation2 + $0xb0] sm:$0xf] %v1232_v27  ;;  %v1240_v44 = vld [vmem:[#allocation2 + $0xbc] sm:$0x1]  ;;  %v1235_v49 = vsel %vm8732_vm3, %v960_v31, %v1234_v38  ;;  %v689_v11 = vld [vmem:[#allocation2 + $0xc4] sm:$0x1] }
  0xf0   : > { %v1241_v50 = vsel %vm8732_vm3, %v968_v32, %v1240_v44  ;;  %1236 = vst [vmem:[#allocation2 + $0xb4] sm:$0x1] %v1235_v49  ;;  %v1639_v7 = vsel %vm8812_vm9, %v9058_v35, %v9054_v25  ;;  %v690_v19 = vsel %vm8738_vm4, 0, %v689_v11  ;;  %v692_v20 = vld [vmem:[#allocation2 + $0xcc] sm:$0x1]  ;;  %v8077_v24 = vld [vmem:[%s10976_s2 + $0x70] sm:$0xff] }
  0xf1   : > { %1242 = vst [vmem:[#allocation2 + $0xbc] sm:$0x1] %v1241_v50  ;;  %v1360_v23 = vld [vmem:[#allocation2 + $0xac] sm:$0x1]  ;;  %v1664_v25 = vshll.u32 %v1359_v3, 16  ;;  %v693_v26 = vsel %vm8738_vm4, 0, %v692_v20  ;;  %v1857_v28 = vunpack.c.l.b16 %v1639_v7  ;;  %3399 = vmatpush.bf16.msrb.mxu3 %v8077_v24 }
  0xf2   : > { %596 = vst [vmem:[#allocation2 + $0xc8] sm:$0x1] %v595_v4  ;;  %v970_v27 = vshrl.u32 %v769_v6, 16  ;;  %v973_v30 = vshll.u32 %v769_v6, 16  ;;  %v978_v31 = vshrl.u32 %v770_v12, 16  ;;  %v1678_v36 = vshll.u32 %v1360_v23, 16 }
  0xf3   : > { %691 = vst [vmem:[#allocation2 + $0xc4] sm:$0x1] %v690_v19  ;;  %v981_v39 = vshll.u32 %v770_v12, 16  ;;  %v9102_v43 = vrot.slane %v1664_v25, 5  ;;  %v1314_v47 = vld [vmem:[#allocation2 + $0xb8] sm:$0xf] }
  0xf4   : > { %2385 = vmatmul.bf16.gmra.mxu2 %v7379_v52  ;;  %2474 = vmatmul.bf16.gmra.mxu3 %v7379_v52  ;;  %v8052_v52 = vld [vmem:[#allocation8 + $0x124] sm:$0xf0]  ;;  %694 = vst [vmem:[#allocation2 + $0xcc] sm:$0x1] %v693_v26  ;;  %v972_v37 = vrot.slane %v970_v27, 7  ;;  %v980_v38 = vrot.slane %v978_v31, 7 }
  0xf5   : > { %v7523_v59 = vor.u32 %v8052_v52, %v7522_v51  ;;  %v1243_v42 = vld [vmem:[#allocation2 + $0xc0] sm:$0xf]  ;;  %v8009_v3 = vld [vmem:[#allocation2 + $0xa4] sm:$0xf0]  ;;  %v1697_v4 = vshrl.u32 %v1314_v47, 16  ;;  %v1700_v5 = vshll.u32 %v1314_v47, 16 }
  0xf6   : > { %v1313_v44 = vld [vmem:[#allocation2 + $0xb0] sm:$0xf]  ;;  %v975_v45 = vor.u32 %v973_v30, %v972_v37  ;;  %v983_v49 = vor.u32 %v981_v39, %v980_v38  ;;  %v984_v50 = vrot.slane %v980_v38, 4  ;;  %v7386_v53 = vld [vmem:[#allocation2 + $0xa0] sm:$0xf]  ;;  %vm2611_vm10 = vcmask 1042432  }
  0xf7   : > { %v2346_v17 = vpop.f32.mrf.mxu2  ;;  %v2435_v18 = vpop.f32.mrf.mxu3  ;;  %2908 = vmatpush.bf16.msrb.mxu0 %v7523_v59  ;;  %v1680_v59 = vrot.slane %v1678_v36, 5  ;;  %v1683_v0 = vshrl.u32 %v1313_v44, 16  ;;  %v1686_v1 = vshll.u32 %v1313_v44, 16  ;;  %v597_v11 = vld [vmem:[#allocation2 + $0xd0] sm:$0x1]  ;;  %v7387_v19 = vor.u32 %v8009_v3, %v7386_v53 }
  0xf8   : > { %v1244_v60 = vsel %vm8775_vm6, %v975_v45, %v1243_v42  ;;  %v600_v12 = vld [vmem:[#allocation2 + $0xd8] sm:$0x1]  ;;  %v1699_v26 = vrot.slane %v1697_v4, 4  ;;  %v1702_v27 = vrot.slane %v1700_v5, 5  ;;  %v695_v30 = vld [vmem:[#allocation2 + $0xd4] sm:$0x1] }
  0xf9   : > { %v1249_v51 = vld [vmem:[#allocation2 + $0xc8] sm:$0xf]  ;;  %1245 = vst [vmem:[#allocation2 + $0xc0] sm:$0xf] %v1244_v60  ;;  %v1685_v24 = vrot.slane %v1683_v0, 4  ;;  %v1688_v25 = vrot.slane %v1686_v1, 5 }
  0xfa   : > { %v1246_v2 = vld [vmem:[#allocation2 + $0xc4] sm:$0x1]  ;;  %v1250_v7 = vsel %vm8775_vm6, %v983_v49, %v1249_v51  ;;  %v698_v31 = vld [vmem:[#allocation2 + $0xdc] sm:$0x1]  ;;  %vm2612_vm11 = vcmask 1046532  }
  0xfb   : > { %v1992_v34 = vpop.f32.mrf.mxu0  ;;  %v2081_v33 = vpop.f32.mrf.mxu1  ;;  %1251 = vst [vmem:[#allocation2 + $0xc8] sm:$0xf] %v1250_v7  ;;  %v699_v36 = vsel %vm8738_vm4, 0, %v698_v31  ;;  %v1689_v44 = vor.u32 %v1688_v25, %v1685_v24  ;;  %v8010_v24 = vld [vmem:[#allocation2 + $0xb4] sm:$0xf0]  ;;  %vm9305_vm12 = vmor %vm2611_vm10, %vm2612_vm11 }
  0xfc   : > { %v9066_v40 = vadd.f32 %v2346_v17, %v1992_v34  ;;  %v9068_v41 = vadd.f32 %v2435_v18, %v2081_v33  ;;  %v1674_v17 = vrot.slane %v1672_v48, 5  ;;  %v8069_v18 = vld [vmem:[%s10976_s2 + $0x30] sm:$0xff]  ;;  %v1661_v33 = vor.u32 %v1660_v10, %v1657_v9  ;;  %v1252_v9 = vld [vmem:[#allocation2 + $0xcc] sm:$0x1]  ;;  %700 = vst [vmem:[#allocation2 + $0xdc] sm:$0x1] %v699_v36 }
  0xfd   : > { %3310 = vmatpush.bf16.msrb.mxu2 %v8069_v18  ;;  %v976_v48 = vrot.slane %v972_v37, 4  ;;  %v1253_v10 = vsel %vm8732_vm3, %v984_v50, %v1252_v9  ;;  %v740_v18 = vld [vmem:[%s8716_s25 + $0xd8] sm:$0xff]  ;;  %v9135_v60 = vrot.slane %v1689_v44, 4  ;;  %v8049_v31 = vld [vmem:[#allocation8 + $0x114] sm:$0xf] }
  0xfe   : > { %2031 = vmatmul.bf16.gmra.mxu0 %v1879_v29  ;;  %2120 = vmatmul.bf16.gmra.mxu1 %v1879_v29  ;;  %v1858_v29 = vunpack.c.l.b16 %v1653_v15  ;;  %v1675_v35 = vor.u32 %v1674_v17, %v1671_v16  ;;  %v598_v15 = vsel %vm8732_vm3, 0, %v597_v11  ;;  %v601_v16 = vsel %vm8732_vm3, 0, %v600_v12  ;;  %v739_v17 = vld [vmem:[%s8716_s25 + $0xd0] sm:$0xff]  ;;  %1254 = vst [vmem:[#allocation2 + $0xcc] sm:$0x1] %v1253_v10 }
  0xff   : > { %v2348_v55 = vpop.f32.mrf.mxu2  ;;  %v2437_v57 = vpop.f32.mrf.mxu3  ;;  %v1247_v6 = vsel %vm8732_vm3, %v976_v48, %v1246_v2  ;;  %v771_v20 = vpack.c.bf16 %v739_v17, %v739_v17  ;;  %v772_v23 = vpack.c.bf16 %v740_v18, %v740_v18  ;;  %599 = vst [vmem:[#allocation2 + $0xd0] sm:$0x1] %v598_v15  ;;  %v603_v36 = vld [vmem:[#allocation2 + $0xe0] sm:$0x1]  ;;  %v606_v44 = vld [vmem:[#allocation2 + $0xe8] sm:$0x1] }
 0x100   : > { %v1880_v46 = vpack.c.b16 %v1858_v29, %v1857_v28  ;;  %1248 = vst [vmem:[#allocation2 + $0xc4] sm:$0x1] %v1247_v6  ;;  %v1315_v0 = vld [vmem:[#allocation2 + $0xc0] sm:$0xf]  ;;  %v2518_v8 = vld [vmem:[#allocation2 + $0x18] sm:$0xe] }
 0x101   : > { %602 = vst [vmem:[#allocation2 + $0xd8] sm:$0x1] %v601_v16  ;;  %v986_v37 = vshrl.u32 %v771_v20, 16  ;;  %v994_v38 = vshrl.u32 %v772_v23, 16  ;;  %v1711_v18 = vshrl.u32 %v1315_v0, 16 }
 0x102   : > { %v9139_v5 = vld [vmem:[#allocation2 + $0xc8] sm:$0xf] }
 0x103   : > { %v1994_v13 = vpop.f32.mrf.mxu0  ;;  %v2083_v14 = vpop.f32.mrf.mxu1  ;;  %v988_v45 = vrot.slane %v986_v37, 7  ;;  %v996_v50 = vrot.slane %v994_v38, 7  ;;  %v1725_v25 = vshrl.u32 %v9139_v5, 16 }
 0x104   : > { %v9093_v21 = vadd.f32 %v2348_v55, %v1994_v13  ;;  %v9095_v22 = vadd.f32 %v2437_v57, %v2083_v14  ;;  %2390 = vmatmul.bf16.gmra.mxu2 %v7383_v61  ;;  %2479 = vmatmul.bf16.gmra.mxu3 %v7383_v61  ;;  %v1662_v55 = vrot.slane %v1661_v33, 4  ;;  %v1676_v57 = vrot.slane %v1675_v35, 4  ;;  %v1361_v33 = vld [vmem:[#allocation2 + $0xb4] sm:$0x1] }
 0x105   : > { %v696_v35 = vsel %vm8738_vm4, 0, %v695_v30  ;;  %v1692_v49 = vshll.u32 %v1361_v33, 16  ;;  %v992_v6 = vrot.slane %v988_v45, 4  ;;  %v1000_v7 = vrot.slane %v996_v50, 4  ;;  %v8050_v30 = vld [vmem:[#allocation8 + $0x114] sm:$0xf0] }
 0x106   : > { %v1667_v28 = vsel %vm8812_vm9, %v1662_v55, %v9102_v43  ;;  %v1681_v29 = vsel %vm8812_vm9, %v1676_v57, %v1680_v59  ;;  %v1362_v43 = vld [vmem:[#allocation2 + $0xbc] sm:$0x1]  ;;  %697 = vst [vmem:[#allocation2 + $0xd4] sm:$0x1] %v696_v35  ;;  %v997_v59 = vshll.u32 %v772_v23, 16 }
 0x107   : > { %v2351_v32 = vpop.f32.mrf.mxu2  ;;  %v2440_v34 = vpop.f32.mrf.mxu3  ;;  %v1859_v47 = vunpack.c.l.b16 %v1667_v28  ;;  %v1860_v48 = vunpack.c.l.b16 %v1681_v29  ;;  %v1706_v55 = vshll.u32 %v1362_v43, 16  ;;  %v1255_v53 = vld [vmem:[#allocation2 + $0xd0] sm:$0xf]  ;;  %v9141_v11 = vrot.slane %v1692_v49, 5  ;;  %v7516_v35 = vld [vmem:[#allocation8 + $0x118] sm:$0xf0] }
 0x108   : > { %v999_v1 = vor.u32 %v997_v59, %v996_v50  ;;  %v1261_v3 = vld [vmem:[#allocation2 + $0xd8] sm:$0xf]  ;;  %v7390_v23 = vld [vmem:[#allocation2 + $0xb0] sm:$0xf]  ;;  %v7519_v38 = vor.u32 %v8049_v31, %v7516_v35  ;;  %v604_v43 = vsel %vm8732_vm3, 0, %v603_v36  ;;  %v1713_v59 = vrot.slane %v1711_v18, 4 }
 0x109   : > { %v1881_v4 = vpack.c.b16 %v1860_v48, %v1859_v47  ;;  %v7514_v29 = vld [vmem:[#allocation8 + $0x110] sm:$0xf]  ;;  %v7391_v37 = vor.u32 %v8010_v24, %v7390_v23  ;;  %605 = vst [vmem:[#allocation2 + $0xe0] sm:$0x1] %v604_v43  ;;  %v742_v47 = vld [vmem:[%s8716_s25 + $0xe8] sm:$0xff]  ;;  %v1695_v49 = vsel %vm8812_vm9, %v9135_v60, %v9141_v11 }
 0x10a   : > { %v1262_v15 = vsel %vm8775_vm6, %v999_v1, %v1261_v3  ;;  %v7515_v33 = vor.u32 %v8050_v30, %v7514_v29  ;;  %v1363_v50 = vld [vmem:[#allocation2 + $0xc4] sm:$0x1]  ;;  %2998 = vmatpush.bf16.msrb.mxu1 %v7519_v38  ;;  %v704_v1 = vld [vmem:[#allocation2 + $0xec] sm:$0x1]  ;;  %v1861_v11 = vunpack.c.l.b16 %v1695_v49 }
 0x10b   : > { %v1997_v52 = vpop.f32.mrf.mxu0  ;;  %v2086_v54 = vpop.f32.mrf.mxu1  ;;  %1263 = vst [vmem:[#allocation2 + $0xd8] sm:$0xf] %v1262_v15 }
 0x10c   : > { %v9106_v61 = vadd.f32 %v2351_v32, %v1997_v52  ;;  %v9108_v63 = vadd.f32 %v2440_v34, %v2086_v54  ;;  %v1703_v54 = vor.u32 %v1702_v27, %v1699_v26  ;;  %v1728_v26 = vshll.u32 %v9139_v5, 16  ;;  %2909 = vmatpush.bf16.msrb.mxu0 %v7515_v33 }
 0x10e   : > { %2036 = vmatmul.bf16.gmra.mxu0 %v1880_v46  ;;  %2125 = vmatmul.bf16.gmra.mxu1 %v1880_v46  ;;  %v989_v46 = vshll.u32 %v771_v20, 16  ;;  %v9143_v12 = vrot.slane %v1703_v54, 4  ;;  %v1264_v20 = vld [vmem:[#allocation2 + $0xdc] sm:$0x1]  ;;  %v1730_v5 = vrot.slane %v1728_v26, 5 }
 0x10f   : > { %v2353_v13 = vpop.f32.mrf.mxu2  ;;  %v2442_v14 = vpop.f32.mrf.mxu3  ;;  %v1265_v28 = vsel %vm8732_vm3, %v1000_v7, %v1264_v20  ;;  %v1364_v7 = vld [vmem:[#allocation2 + $0xcc] sm:$0x1]  ;;  %v1720_v20 = vshll.u32 %v1363_v50, 16 }
 0x110   : > { %v991_v57 = vor.u32 %v989_v46, %v988_v45  ;;  %1266 = vst [vmem:[#allocation2 + $0xdc] sm:$0x1] %v1265_v28  ;;  %v741_v45 = vld [vmem:[%s8716_s25 + $0xe0] sm:$0xff]  ;;  %v607_v46 = vsel %vm8732_vm3, 0, %v606_v44 }
 0x111   : > { %v773_v48 = vpack.c.bf16 %v741_v45, %v741_v45  ;;  %608 = vst [vmem:[#allocation2 + $0xe8] sm:$0x1] %v607_v46  ;;  %v1267_v28 = vld [vmem:[#allocation2 + $0xe0] sm:$0xf]  ;;  %v1722_v43 = vrot.slane %v1720_v20, 5 }
 0x112   : > { %v1256_v2 = vsel %vm8775_vm6, %v991_v57, %v1255_v53  ;;  %v7394_v44 = vld [vmem:[#allocation2 + $0xc0] sm:$0xf]  ;;  %v8011_v45 = vld [vmem:[#allocation2 + $0xc4] sm:$0xf0] }
 0x113   : > { %v1999_v32 = vpop.f32.mrf.mxu0  ;;  %v2088_v34 = vpop.f32.mrf.mxu1  ;;  %1257 = vst [vmem:[#allocation2 + $0xd0] sm:$0xf] %v1256_v2 }
 0x114   : > { %v9131_v39 = vadd.f32 %v2353_v13, %v1999_v32  ;;  %v9133_v42 = vadd.f32 %v2442_v14, %v2088_v34  ;;  %2395 = vmatmul.bf16.gmra.mxu2 %v7387_v19  ;;  %2484 = vmatmul.bf16.gmra.mxu3 %v7387_v19  ;;  %v9145_v13 = vrot.slane %v1706_v55, 5  ;;  %v1258_v14 = vld [vmem:[#allocation2 + $0xd4] sm:$0x1]  ;;  %v1714_v19 = vshll.u32 %v1315_v0, 16  ;;  %v8068_v0 = vld [vmem:[%s10976_s2 + $0x28] sm:$0xff] }
 0x115   : > { %v1259_v27 = vsel %vm8732_vm3, %v992_v6, %v1258_v14  ;;  %v8076_v6 = vld [vmem:[%s10976_s2 + $0x68] sm:$0xff]  ;;  %3311 = vmatpush.bf16.msrb.mxu2 %v8068_v0 }
 0x116   : > { %1260 = vst [vmem:[#allocation2 + $0xd4] sm:$0x1] %v1259_v27  ;;  %v1709_v57 = vsel %vm8812_vm9, %v9143_v12, %v9145_v13  ;;  %v1716_v53 = vrot.slane %v1714_v19, 5  ;;  %3400 = vmatpush.bf16.msrb.mxu3 %v8076_v6  ;;  %v1005_v13 = vshll.u32 %v773_v48, 16  ;;  %v7395_v6 = vor.u32 %v8011_v45, %v7394_v44 }
 0x117   : > { %v2356_v51 = vpop.f32.mrf.mxu2  ;;  %v2445_v52 = vpop.f32.mrf.mxu3  ;;  %v1862_v12 = vunpack.c.l.b16 %v1709_v57 }
 0x118   : > { %v1717_v19 = vor.u32 %v1716_v53, %v1713_v59  ;;  %v1273_v35 = vld [vmem:[#allocation2 + $0xe8] sm:$0xf] }
 0x119   : > { %v1882_v30 = vpack.c.b16 %v1862_v12, %v1861_v11  ;;  %v744_v11 = vld [vmem:[%s8716_s25 + $0xf8] sm:$0xff] }
 0x11a   : > { %v1317_v31 = vld [vmem:[#allocation2 + $0xd0] sm:$0xf]  ;;  %v1718_v38 = vrot.slane %v1717_v19, 4 }
 0x11b   : > { %v2002_v9 = vpop.f32.mrf.mxu0  ;;  %v2091_v10 = vpop.f32.mrf.mxu1 }
 0x11c   : > { %v9149_v16 = vadd.f32 %v2356_v51, %v2002_v9  ;;  %v9151_v17 = vadd.f32 %v2445_v52, %v2091_v10  ;;  %v701_v51 = vld [vmem:[#allocation2 + $0xe4] sm:$0x1]  ;;  %v774_v52 = vpack.c.bf16 %v742_v47, %v742_v47  ;;  %v705_v9 = vsel %vm8738_vm4, 0, %v704_v1  ;;  %v612_v1 = vld [vmem:[#allocation2 + $0xf8] sm:$0x1] }
 0x11d   : > { %v702_v60 = vsel %vm8738_vm4, 0, %v701_v51  ;;  %v1002_v10 = vshrl.u32 %v773_v48, 16  ;;  %706 = vst [vmem:[#allocation2 + $0xec] sm:$0x1] %v705_v9  ;;  %v613_v9 = vsel %vm8732_vm3, 0, %v612_v1  ;;  %v1723_v20 = vsel %vm8812_vm9, %v1718_v38, %v1722_v43 }
 0x11e   : > { %2041 = vmatmul.bf16.gmra.mxu0 %v1881_v4  ;;  %2130 = vmatmul.bf16.gmra.mxu1 %v1881_v4  ;;  %v1727_v4 = vrot.slane %v1725_v25, 4  ;;  %703 = vst [vmem:[#allocation2 + $0xe4] sm:$0x1] %v702_v60  ;;  %v1010_v14 = vshrl.u32 %v774_v52, 16  ;;  %v1734_v25 = vshll.u32 %v1364_v7, 16  ;;  %v1013_v27 = vshll.u32 %v774_v52, 16 }
 0x11f   : > { %v2358_v32 = vpop.f32.mrf.mxu2  ;;  %v2447_v34 = vpop.f32.mrf.mxu3  ;;  %v1004_v23 = vrot.slane %v1002_v10, 7  ;;  %v1318_v52 = vld [vmem:[#allocation2 + $0xd8] sm:$0xf]  ;;  %v609_v60 = vld [vmem:[#allocation2 + $0xf0] sm:$0x1]  ;;  %v1863_v44 = vunpack.c.l.b16 %v1723_v20 }
 0x120   : > { %v1731_v24 = vor.u32 %v1730_v5, %v1727_v4  ;;  %v1012_v26 = vrot.slane %v1010_v14, 7  ;;  %v1736_v50 = vrot.slane %v1734_v25, 5  ;;  %v610_v7 = vsel %vm8732_vm3, 0, %v609_v60  ;;  %v743_v10 = vld [vmem:[%s8716_s25 + $0xf0] sm:$0xff]  ;;  %614 = vst [vmem:[#allocation2 + $0xf8] sm:$0x1] %v613_v9 }
 0x121   : > { %v1007_v29 = vor.u32 %v1005_v13, %v1004_v23  ;;  %v1753_v12 = vshrl.u32 %v1318_v52, 16  ;;  %v1756_v13 = vshll.u32 %v1318_v52, 16  ;;  %v775_v14 = vpack.c.bf16 %v743_v10, %v743_v10  ;;  %611 = vst [vmem:[#allocation2 + $0xf0] sm:$0x1] %v610_v7  ;;  %v710_v25 = vld [vmem:[#allocation2 + $0xfc] sm:$0x1] }
 0x122   : > { %v1016_v33 = vrot.slane %v1012_v26, 4  ;;  %v1732_v49 = vrot.slane %v1731_v24, 4  ;;  %v707_v24 = vld [vmem:[#allocation2 + $0xf4] sm:$0x1]  ;;  %v7398_v20 = vld [vmem:[#allocation2 + $0xd0] sm:$0xf] }
 0x123   : > { %v2004_v54 = vpop.f32.mrf.mxu0  ;;  %v2093_v55 = vpop.f32.mrf.mxu1  ;;  %v1268_v46 = vsel %vm8775_vm6, %v1007_v29, %v1267_v28  ;;  %v708_v28 = vsel %vm8738_vm4, 0, %v707_v24  ;;  %v711_v29 = vsel %vm8738_vm4, 0, %v710_v25  ;;  %v1021_v43 = vshll.u32 %v775_v14, 16 }
 0x124   : > { %v9178_v2 = vadd.f32 %v2358_v32, %v2004_v54  ;;  %v9180_v3 = vadd.f32 %v2447_v34, %v2093_v55  ;;  %2400 = vmatmul.bf16.gmra.mxu2 %v7391_v37  ;;  %2489 = vmatmul.bf16.gmra.mxu3 %v7391_v37  ;;  %v1008_v32 = vrot.slane %v1004_v23, 4  ;;  %v1015_v34 = vor.u32 %v1013_v27, %v1012_v26  ;;  %v1276_v53 = vld [vmem:[#allocation2 + $0xec] sm:$0x1] }
 0x125   : > { %1269 = vst [vmem:[#allocation2 + $0xe0] sm:$0xf] %v1268_v46  ;;  %v1270_v51 = vld [vmem:[#allocation2 + $0xe4] sm:$0x1]  ;;  %v1739_v54 = vshrl.u32 %v1317_v31, 16  ;;  %v1742_v55 = vshll.u32 %v1317_v31, 16  ;;  %v1277_v0 = vsel %vm8732_vm3, %v1016_v33, %v1276_v53  ;;  %v1737_v23 = vsel %vm8812_vm9, %v1732_v49, %v1736_v50 }
 0x126   : > { %v1271_v57 = vsel %vm8732_vm3, %v1008_v32, %v1270_v51  ;;  %v1274_v59 = vsel %vm8775_vm6, %v1015_v34, %v1273_v35  ;;  %1278 = vst [vmem:[#allocation2 + $0xec] sm:$0x1] %v1277_v0  ;;  %v1365_v33 = vld [vmem:[#allocation2 + $0xd4] sm:$0x1]  ;;  %v1755_v35 = vrot.slane %v1753_v12, 4  ;;  %v1864_v45 = vunpack.c.l.b16 %v1737_v23 }
 0x127   : > { %v2361_v15 = vpop.f32.mrf.mxu2  ;;  %v2450_v18 = vpop.f32.mrf.mxu3  ;;  %1272 = vst [vmem:[#allocation2 + $0xe4] sm:$0x1] %v1271_v57  ;;  %v1744_v19 = vrot.slane %v1742_v55, 5  ;;  %v1748_v51 = vshll.u32 %v1365_v33, 16  ;;  %v1285_v60 = vld [vmem:[#allocation2 + $0xf8] sm:$0xf] }
 0x128   : > { %1275 = vst [vmem:[#allocation2 + $0xe8] sm:$0xf] %v1274_v59  ;;  %v1279_v59 = vld [vmem:[#allocation2 + $0xf0] sm:$0xf]  ;;  %v1883_v1 = vpack.c.b16 %v1864_v45, %v1863_v44  ;;  %v8012_v23 = vld [vmem:[#allocation2 + $0xd4] sm:$0xf0] }
 0x129   : > { %709 = vst [vmem:[#allocation2 + $0xf4] sm:$0x1] %v708_v28  ;;  %v1750_v10 = vrot.slane %v1748_v51, 5  ;;  %v8048_v28 = vld [vmem:[#allocation8 + $0x104] sm:$0xf0] }
 0x12a   : > { %712 = vst [vmem:[#allocation2 + $0xfc] sm:$0x1] %v711_v29  ;;  %v8047_v29 = vld [vmem:[#allocation8 + $0x104] sm:$0xf] }
 0x12b   : > { %v2007_v36 = vpop.f32.mrf.mxu0  ;;  %v2096_v37 = vpop.f32.mrf.mxu1 }
 0x12c   : > { %v9189_v47 = vadd.f32 %v2361_v15, %v2007_v36  ;;  %v9191_v48 = vadd.f32 %v2450_v18, %v2096_v37  ;;  %v776_v15 = vpack.c.bf16 %v744_v11, %v744_v11  ;;  %v1741_v18 = vrot.slane %v1739_v54, 4  ;;  %v1366_v37 = vld [vmem:[#allocation2 + $0xdc] sm:$0x1]  ;;  %v1319_v24 = vld [vmem:[#allocation2 + $0xe0] sm:$0xf] }
 0x12d   : > { %v1758_v36 = vrot.slane %v1756_v13, 5  ;;  %v1762_v57 = vshll.u32 %v1366_v37, 16  ;;  %v7399_v37 = vor.u32 %v8012_v23, %v7398_v20  ;;  %v1767_v45 = vshrl.u32 %v1319_v24, 16  ;;  %v7402_v23 = vld [vmem:[#allocation2 + $0xe0] sm:$0xf] }
 0x12e   : > { %2046 = vmatmul.bf16.gmra.mxu0 %v1882_v30  ;;  %2135 = vmatmul.bf16.gmra.mxu1 %v1882_v30  ;;  %v1018_v30 = vshrl.u32 %v775_v14, 16  ;;  %v1026_v31 = vshrl.u32 %v776_v15, 16  ;;  %v1745_v50 = vor.u32 %v1744_v19, %v1741_v18  ;;  %v1029_v54 = vshll.u32 %v776_v15, 16 }
 0x12f   : > { %v2363_v4 = vpop.f32.mrf.mxu2  ;;  %v2452_v5 = vpop.f32.mrf.mxu3  ;;  %v1759_v55 = vor.u32 %v1758_v36, %v1755_v35  ;;  %v1764_v18 = vrot.slane %v1762_v57, 5  ;;  %v1320_v33 = vld [vmem:[#allocation2 + $0xe8] sm:$0xf]  ;;  %v7508_v36 = vld [vmem:[#allocation8 + $0x108] sm:$0xf0] }
 0x130   : > { %v1020_v38 = vrot.slane %v1018_v30, 7  ;;  %v1028_v58 = vrot.slane %v1026_v31, 7  ;;  %v1746_v9 = vrot.slane %v1745_v50, 4  ;;  %v1282_v11 = vld [vmem:[#allocation2 + $0xf4] sm:$0x1] }
 0x131   : > { %v1760_v15 = vrot.slane %v1759_v55, 4  ;;  %v1288_v19 = vld [vmem:[#allocation2 + $0xfc] sm:$0x1] }
 0x132   : > { %v1023_v52 = vor.u32 %v1021_v43, %v1020_v38  ;;  %v1031_v53 = vor.u32 %v1029_v54, %v1028_v58  ;;  %v1751_v43 = vsel %vm8812_vm9, %v1746_v9, %v1750_v10  ;;  %v8075_v54 = vld [vmem:[%s10976_s2 + $0x60] sm:$0xff] }
 0x133   : > { %v2009_v26 = vpop.f32.mrf.mxu0  ;;  %v2098_v27 = vpop.f32.mrf.mxu1  ;;  %v1765_v44 = vsel %vm8812_vm9, %v1760_v15, %v1764_v18  ;;  %v1865_v55 = vunpack.c.l.b16 %v1751_v43  ;;  %3401 = vmatpush.bf16.msrb.mxu3 %v8075_v54 }
 0x134   : > { %v9213_v32 = vadd.f32 %v2363_v4, %v2009_v26  ;;  %v9215_v34 = vadd.f32 %v2452_v5, %v2098_v27  ;;  %2405 = vmatmul.bf16.gmra.mxu2 %v7395_v6  ;;  %2494 = vmatmul.bf16.gmra.mxu3 %v7395_v6  ;;  %v1280_v0 = vsel %vm8775_vm6, %v1023_v52, %v1279_v59  ;;  %v1024_v4 = vrot.slane %v1020_v38, 4  ;;  %v7506_v27 = vld [vmem:[#allocation8 + $0x100] sm:$0xf] }
 0x135   : > { %v1032_v5 = vrot.slane %v1028_v58, 4  ;;  %1281 = vst [vmem:[#allocation2 + $0xf0] sm:$0xf] %v1280_v0  ;;  %v1286_v12 = vsel %vm8775_vm6, %v1031_v53, %v1285_v60  ;;  %v7507_v35 = vor.u32 %v8048_v28, %v7506_v27  ;;  %v7511_v38 = vor.u32 %v8047_v29, %v7508_v36  ;;  %v8067_v52 = vld [vmem:[%s10976_s2 + $0x20] sm:$0xff] }
 0x136   : > { %1287 = vst [vmem:[#allocation2 + $0xf8] sm:$0xf] %v1286_v12  ;;  %v1283_v25 = vsel %vm8732_vm3, %v1024_v4, %v1282_v11  ;;  %v1770_v58 = vshll.u32 %v1319_v24, 16  ;;  %v1866_v57 = vunpack.c.l.b16 %v1765_v44  ;;  %3312 = vmatpush.bf16.msrb.mxu2 %v8067_v52  ;;  %v1769_v59 = vrot.slane %v1767_v45, 4  ;;  %v8013_v24 = vld [vmem:[#allocation2 + $0xe4] sm:$0xf0] }
 0x137   : > { %v2366_v46 = vpop.f32.mrf.mxu2  ;;  %v2455_v49 = vpop.f32.mrf.mxu3  ;;  %v1289_v26 = vsel %vm8732_vm3, %v1032_v5, %v1288_v19  ;;  %1284 = vst [vmem:[#allocation2 + $0xf4] sm:$0x1] %v1283_v25  ;;  %2910 = vmatpush.bf16.msrb.mxu0 %v7507_v35  ;;  %2999 = vmatpush.bf16.msrb.mxu1 %v7511_v38  ;;  %v9247_v5 = vld [vmem:[#allocation2 + $0xe4] sm:$0x1]  ;;  %v7403_v35 = vor.u32 %v8013_v24, %v7402_v23 }
 0x138   : > { %1290 = vst [vmem:[#allocation2 + $0xfc] sm:$0x1] %v1289_v26  ;;  %v1772_v53 = vrot.slane %v1770_v58, 5  ;;  %v1776_v10 = vshll.u32 %v9247_v5, 16 }
 0x13a   : > { %v1773_v9 = vor.u32 %v1772_v53, %v1769_v59  ;;  %v1778_v26 = vrot.slane %v1776_v10, 5 }
 0x13b   : > { %v2012_v6 = vpop.f32.mrf.mxu0  ;;  %v2101_v7 = vpop.f32.mrf.mxu1 }
 0x13c   : > { %v9221_v13 = vadd.f32 %v2366_v46, %v2012_v6  ;;  %v9223_v14 = vadd.f32 %v2455_v49, %v2101_v7  ;;  %v1781_v46 = vshrl.u32 %v1320_v33, 16  ;;  %v1784_v49 = vshll.u32 %v1320_v33, 16  ;;  %v9249_v6 = vld [vmem:[#allocation2 + $0xec] sm:$0x1]  ;;  %v1321_v36 = vld [vmem:[#allocation2 + $0xf0] sm:$0xf] }
 0x13d   : > { %v1884_v7 = vpack.c.b16 %v1866_v57, %v1865_v55  ;;  %v1790_v12 = vshll.u32 %v9249_v6, 16  ;;  %v1774_v25 = vrot.slane %v1773_v9, 4  ;;  %v1795_v58 = vshrl.u32 %v1321_v36, 16 }
 0x13e   : > { %2051 = vmatmul.bf16.gmra.mxu0 %v1883_v1  ;;  %2140 = vmatmul.bf16.gmra.mxu1 %v1883_v1  ;;  %v1783_v0 = vrot.slane %v1781_v46, 4  ;;  %v1786_v60 = vrot.slane %v1784_v49, 5  ;;  %v1798_v46 = vshll.u32 %v1321_v36, 16 }
 0x13f   : > { %v9229_v30 = vpop.f32.mrf.mxu2  ;;  %v9231_v31 = vpop.f32.mrf.mxu3  ;;  %v1792_v28 = vrot.slane %v1790_v12, 5  ;;  %v1779_v38 = vsel %vm8812_vm9, %v1774_v25, %v1778_v26  ;;  %v1797_v53 = vrot.slane %v1795_v58, 4  ;;  %v7406_v26 = vld [vmem:[#allocation2 + $0xf0] sm:$0xf] }
 0x140   : > { %v1787_v11 = vor.u32 %v1786_v60, %v1783_v0  ;;  %v1867_v54 = vunpack.c.l.b16 %v1779_v38  ;;  %v1800_v0 = vrot.slane %v1798_v46, 5 }
 0x142   : > { %v1788_v27 = vrot.slane %v1787_v11, 4  ;;  %v1801_v12 = vor.u32 %v1800_v0, %v1797_v53 }
 0x143   : > { %v9237_v50 = vpop.f32.mrf.mxu0  ;;  %v9239_v51 = vpop.f32.mrf.mxu1 }
 0x144   : > { %2410 = vmatmul.bf16.gmra.mxu2 %v7399_v37  ;;  %2499 = vmatmul.bf16.gmra.mxu3 %v7399_v37  ;;  %v1322_v37 = vld [vmem:[#allocation2 + $0xf8] sm:$0xf]  ;;  %v1793_v43 = vsel %vm8812_vm9, %v1788_v27, %v1792_v28  ;;  %v1802_v36 = vrot.slane %v1801_v12, 4 }
 0x145   : > { %v1809_v49 = vshrl.u32 %v1322_v37, 16  ;;  %v1812_v52 = vshll.u32 %v1322_v37, 16  ;;  %v1868_v55 = vunpack.c.l.b16 %v1793_v43  ;;  %v8014_v27 = vld [vmem:[#allocation2 + $0xf4] sm:$0xf0] }
 0x146   : > { %v7407_v58 = vor.u32 %v8014_v27, %v7406_v26  ;;  %v8281_v27 = vld [vmem:[#allocation2 + $0xc] sm:$0x1] }
 0x147   : > { %v2371_v1 = vpop.f32.mrf.mxu2  ;;  %v2460_v4 = vpop.f32.mrf.mxu3  ;;  %v1811_v60 = vrot.slane %v1809_v49, 4  ;;  %v1885_v9 = vpack.c.b16 %v1868_v55, %v1867_v54  ;;  %v8066_v55 = vld [vmem:[%s10976_s2 + $0x18] sm:$0xff] }
 0x148   : > { %3313 = vmatpush.bf16.msrb.mxu2 %v8066_v55 }
 0x14b   : > { %v2017_v15 = vpop.f32.mrf.mxu0  ;;  %v2106_v18 = vpop.f32.mrf.mxu1 }
 0x14c   : > { %v9253_v19 = vadd.f32 %v2371_v1, %v2017_v15  ;;  %v9255_v20 = vadd.f32 %v2460_v4, %v2106_v18  ;;  %v1814_v1 = vrot.slane %v1812_v52, 5  ;;  %v9269_v4 = vld [vmem:[#allocation2 + $0xf4] sm:$0x1] }
 0x14d   : > { %v1804_v15 = vshll.u32 %v9269_v4, 16 }
 0x14e   : > { %2056 = vmatmul.bf16.gmra.mxu0 %v1884_v7  ;;  %2145 = vmatmul.bf16.gmra.mxu1 %v1884_v7  ;;  %v9271_v7 = vld [vmem:[#allocation2 + $0xfc] sm:$0x1]  ;;  %v1815_v18 = vor.u32 %v1814_v1, %v1811_v60 }
 0x14f   : > { %v9257_v29 = vpop.f32.mrf.mxu2  ;;  %v9259_v33 = vpop.f32.mrf.mxu3  ;;  %v1818_v23 = vshll.u32 %v9271_v7, 16  ;;  %v1806_v37 = vrot.slane %v1804_v15, 5  ;;  %v2515_v15 = vld [vmem:[#allocation2] sm:$0xe] }
 0x150   : > { %v1816_v38 = vrot.slane %v1815_v18, 4  ;;  %v2516_v18 = vld [vmem:[#allocation2 + $0x8] sm:$0xe] }
 0x151   : > { %v1820_v43 = vrot.slane %v1818_v23, 5  ;;  %v1807_v52 = vsel %vm8812_vm9, %v1802_v36, %v1806_v37  ;;  %v8280_v23 = vld [vmem:[#allocation2 + $0x4] sm:$0x1]  ;;  %v2620_v36 = vrot.slane %v8281_v27, 5  ;;  %v2517_v27 = vld [vmem:[#allocation2 + $0x10] sm:$0xe] }
 0x152   : > { %v2616_v26 = vrot.slane %v8280_v23, 5 }
 0x153   : > { %v9265_v44 = vpop.f32.mrf.mxu0  ;;  %v9267_v45 = vpop.f32.mrf.mxu1  ;;  %v1821_v54 = vsel %vm8812_vm9, %v1816_v38, %v1820_v43  ;;  %v7472_v43 = vrot.slane %v2515_v15, 9 }
 0x154   : > { %2415 = vmatmul.bf16.gmra.mxu2 %v7403_v35  ;;  %2504 = vmatmul.bf16.gmra.mxu3 %v7403_v35  ;;  %v1870_v53 = vunpack.c.l.b16 %v1821_v54 }
 0x157   : > { %v2376_v57 = vpop.f32.mrf.mxu2  ;;  %v2465_v59 = vpop.f32.mrf.mxu3 }
 0x15b   : > { %v2022_v10 = vpop.f32.mrf.mxu0  ;;  %v2111_v11 = vpop.f32.mrf.mxu1 }
 0x15c   : > { %v9275_v24 = vadd.f32 %v2376_v57, %v2022_v10  ;;  %v9277_v25 = vadd.f32 %v2465_v59, %v2111_v11  ;;  %v8074_v57 = vld [vmem:[%s10976_s2 + $0x58] sm:$0xff]  ;;  %v1869_v59 = vunpack.c.l.b16 %v1807_v52 }
 0x15d   : > { %3402 = vmatpush.bf16.msrb.mxu3 %v8074_v57  ;;  %v2617_v57 = vsel %vm9305_vm12, %v7472_v43, %v2616_v26  ;;  %v8282_v43 = vld [vmem:[#allocation2 + $0x14] sm:$0x1] }
 0x15e   : > { %2061 = vmatmul.bf16.gmra.mxu0 %v1885_v9  ;;  %2150 = vmatmul.bf16.gmra.mxu1 %v1885_v9  ;;  %v1886_v1 = vpack.c.b16 %v1870_v53, %v1869_v59  ;;  %v2759_v53 = vunpack.c.l.b16 %v2617_v57  ;;  %v7475_v57 = vrot.slane %v2518_v8, 9  ;;  %v8073_v8 = vld [vmem:[%s10976_s2 + $0x50] sm:$0xff] }
 0x15f   : > { %v9279_v28 = vpop.f32.mrf.mxu2  ;;  %v9281_v35 = vpop.f32.mrf.mxu3 }
 0x161   : > { %3403 = vmatpush.bf16.msrb.mxu3 %v8073_v8 }
 0x163   : > { %v9283_v46 = vpop.f32.mrf.mxu0  ;;  %v9285_v49 = vpop.f32.mrf.mxu1 }
 0x164   : > { %2420 = vmatmul.bf16.gmra.mxu2 %v7407_v58  ;;  %2509 = vmatmul.bf16.gmra.mxu3 %v7407_v58  ;;  %v7473_v58 = vrot.slane %v2516_v18, 9 }
 0x166   : > { %v2621_v59 = vsel %vm9305_vm12, %v7473_v58, %v2620_v36  ;;  %v7474_v36 = vrot.slane %v2517_v27, 9  ;;  %v2624_v58 = vrot.slane %v8282_v43, 5 }
 0x167   : > { %v2381_v0 = vpop.f32.mrf.mxu2  ;;  %v2470_v60 = vpop.f32.mrf.mxu3 }
 0x16b   : > { %v2027_v9 = vpop.f32.mrf.mxu0  ;;  %v2116_v10 = vpop.f32.mrf.mxu1 }
 0x16c   : > { %v9297_v11 = vadd.f32 %v2381_v0, %v2027_v9  ;;  %v9299_v12 = vadd.f32 %v2470_v60, %v2116_v10  ;;  %v2760_v0 = vunpack.c.l.b16 %v2621_v59  ;;  %v8283_v59 = vld [vmem:[#allocation2 + $0x1c] sm:$0x1] }
 0x16e   : > { %11026 = vst [vmem:[#allocation23_spill] sm:$0xff] %v9297_v11  ;;  %2066 = vmatmul.bf16.gmra.mxu0 %v1886_v1  ;;  %2155 = vmatmul.bf16.gmra.mxu1 %v1886_v1  ;;  %v2791_v9 = vpack.c.b16 %v2760_v0, %v2759_v53  ;;  %v2628_v53 = vrot.slane %v8283_v59, 5  ;;  %v2536_v11 = vld [vmem:[#allocation2 + $0xa8] sm:$0xe] }
 0x16f   : > { %11027 = vst [vmem:[#allocation24_spill] sm:$0xff] %v9299_v12  ;;  %v9301_v37 = vpop.f32.mrf.mxu2  ;;  %v9303_v38 = vpop.f32.mrf.mxu3 }
 0x173   : > { %v9309_v54 = vpop.f32.mrf.mxu0  ;;  %v9311_v55 = vpop.f32.mrf.mxu1 }
 0x177   : > { %v2386_v60 = vpop.f32.mrf.mxu2  ;;  %v2475_v1 = vpop.f32.mrf.mxu3 }
 0x17b   : > { %v2032_v10 = vpop.f32.mrf.mxu0  ;;  %v2121_v15 = vpop.f32.mrf.mxu1 }
 0x17c   : > { %v9317_v18 = vadd.f32 %v2386_v60, %v2032_v10  ;;  %v9319_v23 = vadd.f32 %v2475_v1, %v2121_v15  ;;  %v2625_v1 = vsel %vm9305_vm12, %v7474_v36, %v2624_v58  ;;  %v8065_v10 = vld [vmem:[%s10976_s2 + $0x10] sm:$0xff] }
 0x17d   : > { %3314 = vmatpush.bf16.msrb.mxu2 %v8065_v10  ;;  %v2761_v15 = vunpack.c.l.b16 %v2625_v1 }
 0x17e   : > { %11030 = vst [vmem:[#allocation25_spill] sm:$0xff] %v9317_v18  ;;  %2911 = vmatmul.bf16.vlgmr.msrb.gmra.mxu0 %v2791_v9  ;;  %3000 = vmatmul.bf16.vlgmr.msrb.gmra.mxu1 %v2791_v9  ;;  %v2629_v9 = vsel %vm9305_vm12, %v7475_v57, %v2628_v53  ;;  %v2519_v53 = vld [vmem:[#allocation2 + $0x20] sm:$0xe]  ;;  %v2520_v18 = vld [vmem:[#allocation2 + $0x28] sm:$0xe] }
 0x17f   : > { %11031 = vst [vmem:[#allocation26_spill] sm:$0xff] %v9319_v23  ;;  %v9321_v56 = vpop.f32.mrf.mxu2  ;;  %v9323_v26 = vpop.f32.mrf.mxu3  ;;  %v2762_v27 = vunpack.c.l.b16 %v2629_v9  ;;  %v7476_v1 = vrot.slane %v2519_v53, 9  ;;  %v8284_v9 = vld [vmem:[#allocation2 + $0x24] sm:$0x1]  ;;  %v7477_v8 = vrot.slane %v2520_v18, 9 }
 0x180   : > { %11032 = vst [vmem:[#allocation27_spill] sm:$0xff] %v9321_v56  ;;  %v2632_v10 = vrot.slane %v8284_v9, 5  ;;  %v8285_v56 = vld [vmem:[#allocation2 + $0x2c] sm:$0x1] }
 0x181   : > { %11033 = vst [vmem:[#allocation28_spill] sm:$0xff] %v9323_v26  ;;  %v2792_v62 = vpack.c.b16 %v2762_v27, %v2761_v15  ;;  %v2636_v15 = vrot.slane %v8285_v56, 5 }
 0x183   : > { %v9325_v0 = vpop.f32.mrf.mxu0  ;;  %v9327_v60 = vpop.f32.mrf.mxu1 }
 0x184   : > { %11034 = vst [vmem:[#allocation29_spill] sm:$0xff] %v9325_v0  ;;  %v7692_v0 = vld [vmem:[#allocation10 + $0xf8] sm:$0xf0] }
 0x185   : > { %11035 = vst [vmem:[#allocation30_spill] sm:$0xff] %v9327_v60 }
 0x187   : > { %v2391_v43 = vpop.f32.mrf.mxu2  ;;  %v2480_v59 = vpop.f32.mrf.mxu3 }
 0x18b   : > { %v2037_v23 = vpop.f32.mrf.mxu0  ;;  %v2126_v36 = vpop.f32.mrf.mxu1 }
 0x18c   : > { %v9339_v58 = vadd.f32 %v2391_v43, %v2037_v23  ;;  %v9341_v57 = vadd.f32 %v2480_v59, %v2126_v36  ;;  %v2633_v43 = vsel %vm9305_vm12, %v7476_v1, %v2632_v10  ;;  %v7690_v59 = vld [vmem:[#allocation10 + $0xf0] sm:$0xf]  ;;  %v8126_v36 = vld [vmem:[#allocation10 + $0xf4] sm:$0xf0] }
 0x18d   : > { %v2521_v1 = vld [vmem:[#allocation2 + $0x30] sm:$0xe]  ;;  %v2522_v10 = vld [vmem:[#allocation2 + $0x38] sm:$0xe] }
 0x18e   : > { %11036 = vst [vmem:[#allocation31_spill] sm:$0xff] %v9339_v58  ;;  %2916 = vmatmul.bf16.gmra.mxu0 %v2792_v62  ;;  %3005 = vmatmul.bf16.gmra.mxu1 %v2792_v62  ;;  %v2637_v62 = vsel %vm9305_vm12, %v7477_v8, %v2636_v15  ;;  %v2763_v58 = vunpack.c.l.b16 %v2633_v43 }
 0x18f   : > { %11037 = vst [vmem:[#allocation32_spill] sm:$0xff] %v9341_v57  ;;  %v9343_v26 = vpop.f32.mrf.mxu2  ;;  %v9345_v60 = vpop.f32.mrf.mxu3  ;;  %v7691_v57 = vor.u32 %v8126_v36, %v7690_v59  ;;  %v2764_v53 = vunpack.c.l.b16 %v2637_v62  ;;  %v7478_v62 = vrot.slane %v2521_v1, 9  ;;  %v7479_v59 = vrot.slane %v2522_v10, 9  ;;  %v8287_v36 = vld [vmem:[#allocation2 + $0x3c] sm:$0x1] }
 0x190   : > { %11038 = vst [vmem:[#allocation33_spill] sm:$0xff] %v9343_v26 }
 0x191   : > { %11039 = vst [vmem:[#allocation34_spill] sm:$0xff] %v9345_v60  ;;  %4817 = vmatpush.bf16.msra.mxu0 %v7691_v57  ;;  %v2793_v18 = vpack.c.b16 %v2764_v53, %v2763_v58  ;;  %v8286_v57 = vld [vmem:[#allocation2 + $0x34] sm:$0x1]  ;;  %v2644_v53 = vrot.slane %v8287_v36, 5 }
 0x192   : > { %v2640_v58 = vrot.slane %v8286_v57, 5 }
 0x193   : > { %v9347_v27 = vpop.f32.mrf.mxu0  ;;  %v9349_v23 = vpop.f32.mrf.mxu1 }
 0x194   : > { %11040 = vst [vmem:[#allocation35_spill] sm:$0xff] %v9347_v27  ;;  %v8125_v27 = vld [vmem:[#allocation10 + $0xf4] sm:$0xf] }
 0x195   : > { %11041 = vst [vmem:[#allocation36_spill] sm:$0xff] %v9349_v23  ;;  %v7695_v8 = vor.u32 %v8125_v27, %v7692_v0  ;;  %v2641_v0 = vsel %vm9305_vm12, %v7478_v62, %v2640_v58  ;;  %v2645_v27 = vsel %vm9305_vm12, %v7479_v59, %v2644_v53  ;;  %v2523_v53 = vld [vmem:[#allocation2 + $0x40] sm:$0xe] }
 0x196   : > { %v2766_v1 = vunpack.c.l.b16 %v2645_v27  ;;  %v8288_v27 = vld [vmem:[#allocation2 + $0x44] sm:$0x1] }
 0x197   : > { %v2396_v60 = vpop.f32.mrf.mxu2  ;;  %v2485_v9 = vpop.f32.mrf.mxu3  ;;  %4906 = vmatpush.bf16.msra.mxu1 %v7695_v8 }
 0x19b   : > { %v2042_v56 = vpop.f32.mrf.mxu0  ;;  %v2131_v26 = vpop.f32.mrf.mxu1 }
 0x19c   : > { %v9355_v23 = vadd.f32 %v2396_v60, %v2042_v56  ;;  %v9357_v12 = vadd.f32 %v2485_v9, %v2131_v26  ;;  %v8064_v9 = vld [vmem:[%s10976_s2 + $0x8] sm:$0xff]  ;;  %v2765_v56 = vunpack.c.l.b16 %v2641_v0  ;;  %v7480_v0 = vrot.slane %v2523_v53, 9 }
 0x19d   : > { %3315 = vmatpush.bf16.msrb.mxu2 %v8064_v9  ;;  %v2648_v9 = vrot.slane %v8288_v27, 5 }
 0x19e   : > { %11042 = vst [vmem:[#allocation37_spill] sm:$0xff] %v9355_v23  ;;  %2921 = vmatmul.bf16.gmra.mxu0 %v2793_v18  ;;  %3010 = vmatmul.bf16.gmra.mxu1 %v2793_v18  ;;  %v8072_v18 = vld [vmem:[%s10976_s2 + $0x48] sm:$0xff]  ;;  %v2794_v57 = vpack.c.b16 %v2766_v1, %v2765_v56 }
 0x19f   : > { %11043 = vst [vmem:[#allocation38_spill] sm:$0xff] %v9357_v12  ;;  %v9359_v15 = vpop.f32.mrf.mxu2  ;;  %v9361_v43 = vpop.f32.mrf.mxu3  ;;  %3404 = vmatpush.bf16.msrb.mxu3 %v8072_v18  ;;  %v2524_v12 = vld [vmem:[#allocation2 + $0x48] sm:$0xe] }
 0x1a0   : > { %11044 = vst [vmem:[#allocation39_spill] sm:$0xff] %v9359_v15  ;;  %v7481_v18 = vrot.slane %v2524_v12, 9  ;;  %v7684_v15 = vld [vmem:[#allocation10 + $0xe8] sm:$0xf0] }
 0x1a1   : > { %11045 = vst [vmem:[#allocation40_spill] sm:$0xff] %v9361_v43 }
 0x1a3   : > { %v9363_v60 = vpop.f32.mrf.mxu0  ;;  %v9365_v26 = vpop.f32.mrf.mxu1 }
 0x1a4   : > { %11046 = vst [vmem:[#allocation41_spill] sm:$0xff] %v9363_v60 }
 0x1a5   : > { %11047 = vst [vmem:[#allocation42_spill] sm:$0xff] %v9365_v26  ;;  %v8289_v26 = vld [vmem:[#allocation2 + $0x4c] sm:$0x1] }
 0x1a6   : > { %v2652_v56 = vrot.slane %v8289_v26, 5 }
 0x1a7   : > { %v2401_v10 = vpop.f32.mrf.mxu2  ;;  %v2490_v8 = vpop.f32.mrf.mxu3 }
 0x1ab   : > { %v2047_v36 = vpop.f32.mrf.mxu0  ;;  %v2136_v62 = vpop.f32.mrf.mxu1 }
 0x1ac   : > { %v9377_v58 = vadd.f32 %v2401_v10, %v2047_v36  ;;  %v9379_v59 = vadd.f32 %v2490_v8, %v2136_v62  ;;  %v2649_v8 = vsel %vm9305_vm12, %v7480_v0, %v2648_v9  ;;  %v7682_v36 = vld [vmem:[#allocation10 + $0xe0] sm:$0xf]  ;;  %v8124_v62 = vld [vmem:[#allocation10 + $0xe4] sm:$0xf0]  ;;  %v2525_v0 = vld [vmem:[#allocation2 + $0x50] sm:$0xe] }
 0x1ad   : > { %v2526_v9 = vld [vmem:[#allocation2 + $0x58] sm:$0xe] }
 0x1ae   : > { %11048 = vst [vmem:[#allocation43_spill] sm:$0xff] %v9377_v58  ;;  %2926 = vmatmul.bf16.gmra.mxu0 %v2794_v57  ;;  %3015 = vmatmul.bf16.gmra.mxu1 %v2794_v57  ;;  %v2653_v57 = vsel %vm9305_vm12, %v7481_v18, %v2652_v56  ;;  %v2767_v58 = vunpack.c.l.b16 %v2649_v8 }
 0x1af   : > { %11049 = vst [vmem:[#allocation44_spill] sm:$0xff] %v9379_v59  ;;  %v9381_v23 = vpop.f32.mrf.mxu2  ;;  %v9383_v43 = vpop.f32.mrf.mxu3  ;;  %v7683_v59 = vor.u32 %v8124_v62, %v7682_v36  ;;  %v2768_v53 = vunpack.c.l.b16 %v2653_v57  ;;  %v7482_v57 = vrot.slane %v2525_v0, 9  ;;  %v7483_v36 = vrot.slane %v2526_v9, 9  ;;  %v8291_v62 = vld [vmem:[#allocation2 + $0x5c] sm:$0x1] }
 0x1b0   : > { %11050 = vst [vmem:[#allocation45_spill] sm:$0xff] %v9381_v23 }
 0x1b1   : > { %11051 = vst [vmem:[#allocation46_spill] sm:$0xff] %v9383_v43  ;;  %4818 = vmatpush.bf16.msra.mxu0 %v7683_v59  ;;  %v2795_v12 = vpack.c.b16 %v2768_v53, %v2767_v58  ;;  %v8290_v59 = vld [vmem:[#allocation2 + $0x54] sm:$0x1]  ;;  %v2660_v53 = vrot.slane %v8291_v62, 5 }
 0x1b2   : > { %v2656_v58 = vrot.slane %v8290_v59, 5 }
 0x1b3   : > { %v9385_v1 = vpop.f32.mrf.mxu0  ;;  %v9387_v10 = vpop.f32.mrf.mxu1 }
 0x1b4   : > { %11052 = vst [vmem:[#allocation47_spill] sm:$0xff] %v9385_v1  ;;  %v8123_v1 = vld [vmem:[#allocation10 + $0xe4] sm:$0xf] }
 0x1b5   : > { %11053 = vst [vmem:[#allocation48_spill] sm:$0xff] %v9387_v10  ;;  %v7687_v18 = vor.u32 %v8123_v1, %v7684_v15  ;;  %v2657_v15 = vsel %vm9305_vm12, %v7482_v57, %v2656_v58  ;;  %v2661_v1 = vsel %vm9305_vm12, %v7483_v36, %v2660_v53  ;;  %v2527_v53 = vld [vmem:[#allocation2 + $0x60] sm:$0xe] }
 0x1b6   : > { %v2770_v0 = vunpack.c.l.b16 %v2661_v1  ;;  %v8292_v1 = vld [vmem:[#allocation2 + $0x64] sm:$0x1] }
 0x1b7   : > { %v2406_v43 = vpop.f32.mrf.mxu2  ;;  %v2495_v27 = vpop.f32.mrf.mxu3  ;;  %4907 = vmatpush.bf16.msra.mxu1 %v7687_v18 }
 0x1bb   : > { %v2052_v26 = vpop.f32.mrf.mxu0  ;;  %v2141_v23 = vpop.f32.mrf.mxu1 }
 0x1bc   : > { %v9393_v10 = vadd.f32 %v2406_v43, %v2052_v26  ;;  %v9395_v60 = vadd.f32 %v2495_v27, %v2141_v23  ;;  %v8063_v27 = vld [vmem:[%s10976_s2] sm:$0xff]  ;;  %v2769_v26 = vunpack.c.l.b16 %v2657_v15  ;;  %v7484_v15 = vrot.slane %v2527_v53, 9 }
 0x1bd   : > { %3316 = vmatpush.bf16.msrb.mxu2 %v8063_v27  ;;  %v2664_v27 = vrot.slane %v8292_v1, 5 }
 0x1be   : > { %11054 = vst [vmem:[#allocation49_spill] sm:$0xff] %v9393_v10  ;;  %2931 = vmatmul.bf16.gmra.mxu0 %v2795_v12  ;;  %3020 = vmatmul.bf16.gmra.mxu1 %v2795_v12  ;;  %v8071_v12 = vld [vmem:[%s10976_s2 + $0x40] sm:$0xff]  ;;  %v2796_v59 = vpack.c.b16 %v2770_v0, %v2769_v26 }
 0x1bf   : > { %11055 = vst [vmem:[#allocation50_spill] sm:$0xff] %v9395_v60  ;;  %v9397_v56 = vpop.f32.mrf.mxu2  ;;  %v9399_v8 = vpop.f32.mrf.mxu3  ;;  %3405 = vmatpush.bf16.msrb.mxu3 %v8071_v12  ;;  %v2528_v60 = vld [vmem:[#allocation2 + $0x68] sm:$0xe] }
 0x1c0   : > { %11056 = vst [vmem:[#allocation51_spill] sm:$0xff] %v9397_v56  ;;  %v7485_v12 = vrot.slane %v2528_v60, 9 }
 0x1c1   : > { %11057 = vst [vmem:[#allocation52_spill] sm:$0xff] %v9399_v8 }
 0x1c3   : > { %v9401_v43 = vpop.f32.mrf.mxu0  ;;  %v9403_v23 = vpop.f32.mrf.mxu1 }
 0x1c4   : > { %11058 = vst [vmem:[#allocation53_spill] sm:$0xff] %v9401_v43  ;;  %v7676_v43 = vld [vmem:[#allocation10 + $0xd8] sm:$0xf0] }
 0x1c5   : > { %11059 = vst [vmem:[#allocation54_spill] sm:$0xff] %v9403_v23  ;;  %v8293_v23 = vld [vmem:[#allocation2 + $0x6c] sm:$0x1] }
 0x1c6   : > { %v2668_v26 = vrot.slane %v8293_v23, 5 }
 0x1c7   : > { %v2411_v9 = vpop.f32.mrf.mxu2  ;;  %v2500_v18 = vpop.f32.mrf.mxu3 }
 0x1cb   : > { %v2057_v62 = vpop.f32.mrf.mxu0  ;;  %v2146_v57 = vpop.f32.mrf.mxu1 }
 0x1cc   : > { %v9415_v58 = vadd.f32 %v2411_v9, %v2057_v62  ;;  %v9417_v36 = vadd.f32 %v2500_v18, %v2146_v57  ;;  %v2665_v18 = vsel %vm9305_vm12, %v7484_v15, %v2664_v27  ;;  %v7674_v62 = vld [vmem:[#allocation10 + $0xd0] sm:$0xf]  ;;  %v8122_v57 = vld [vmem:[#allocation10 + $0xd4] sm:$0xf0]  ;;  %v8121_v27 = vld [vmem:[#allocation10 + $0xd4] sm:$0xf] }
 0x1cd   : > { %v2530_v15 = vld [vmem:[#allocation2 + $0x78] sm:$0xe] }
 0x1ce   : > { %11060 = vst [vmem:[#allocation55_spill] sm:$0xff] %v9415_v58  ;;  %2936 = vmatmul.bf16.gmra.mxu0 %v2796_v59  ;;  %3025 = vmatmul.bf16.gmra.mxu1 %v2796_v59  ;;  %v2669_v59 = vsel %vm9305_vm12, %v7485_v12, %v2668_v26  ;;  %v2771_v58 = vunpack.c.l.b16 %v2665_v18  ;;  %v7679_v12 = vor.u32 %v8121_v27, %v7676_v43 }
 0x1cf   : > { %11061 = vst [vmem:[#allocation56_spill] sm:$0xff] %v9417_v36  ;;  %v9419_v10 = vpop.f32.mrf.mxu2  ;;  %v9421_v8 = vpop.f32.mrf.mxu3  ;;  %v7675_v36 = vor.u32 %v8122_v57, %v7674_v62  ;;  %v2772_v53 = vunpack.c.l.b16 %v2669_v59  ;;  %v7487_v62 = vrot.slane %v2530_v15, 9  ;;  %v8295_v57 = vld [vmem:[#allocation2 + $0x7c] sm:$0x1] }
 0x1d0   : > { %11062 = vst [vmem:[#allocation57_spill] sm:$0xff] %v9419_v10  ;;  %4908 = vmatpush.bf16.msra.mxu1 %v7679_v12 }
 0x1d1   : > { %11063 = vst [vmem:[#allocation58_spill] sm:$0xff] %v9421_v8  ;;  %4819 = vmatpush.bf16.msra.mxu0 %v7675_v36  ;;  %v2797_v60 = vpack.c.b16 %v2772_v53, %v2771_v58  ;;  %v8294_v36 = vld [vmem:[#allocation2 + $0x74] sm:$0x1]  ;;  %v2676_v53 = vrot.slane %v8295_v57, 5  ;;  %v2531_v57 = vld [vmem:[#allocation2 + $0x80] sm:$0xe] }
 0x1d2   : > { %v2672_v58 = vrot.slane %v8294_v36, 5 }
 0x1d3   : > { %v9423_v0 = vpop.f32.mrf.mxu0  ;;  %v9425_v9 = vpop.f32.mrf.mxu1 }
 0x1d4   : > { %11064 = vst [vmem:[#allocation59_spill] sm:$0xff] %v9423_v0  ;;  %v2529_v0 = vld [vmem:[#allocation2 + $0x70] sm:$0xe] }
 0x1d5   : > { %11065 = vst [vmem:[#allocation60_spill] sm:$0xff] %v9425_v9  ;;  %v7486_v59 = vrot.slane %v2529_v0, 9 }
 0x1d7   : > { %v2416_v8 = vpop.f32.mrf.mxu2  ;;  %v2505_v1 = vpop.f32.mrf.mxu3  ;;  %v2673_v43 = vsel %vm9305_vm12, %v7486_v59, %v2672_v58  ;;  %v8296_v59 = vld [vmem:[#allocation2 + $0x84] sm:$0x1] }
 0x1d8   : > { %v2680_v58 = vrot.slane %v8296_v59, 5 }
 0x1db   : > { %v2062_v23 = vpop.f32.mrf.mxu0  ;;  %v2151_v10 = vpop.f32.mrf.mxu1 }
 0x1dc   : > { %v9431_v56 = vadd.f32 %v2416_v8, %v2062_v23  ;;  %v9433_v9 = vadd.f32 %v2505_v1, %v2151_v10  ;;  %v2677_v1 = vsel %vm9305_vm12, %v7487_v62, %v2676_v53  ;;  %v8297_v62 = vld [vmem:[#allocation2 + $0x8c] sm:$0x1] }
 0x1dd   : > { %v2774_v23 = vunpack.c.l.b16 %v2677_v1  ;;  %v2684_v53 = vrot.slane %v8297_v62, 5  ;;  %v2534_v62 = vld [vmem:[#allocation2 + $0x98] sm:$0xe] }
 0x1de   : > { %11066 = vst [vmem:[#allocation61_spill] sm:$0xff] %v9431_v56  ;;  %2941 = vmatmul.bf16.gmra.mxu0 %v2797_v60  ;;  %3030 = vmatmul.bf16.gmra.mxu1 %v2797_v60  ;;  %v2773_v60 = vunpack.c.l.b16 %v2673_v43 }
 0x1df   : > { %11067 = vst [vmem:[#allocation62_spill] sm:$0xff] %v9433_v9  ;;  %v9435_v26 = vpop.f32.mrf.mxu2  ;;  %v9437_v18 = vpop.f32.mrf.mxu3 }
 0x1e0   : > { %11068 = vst [vmem:[#allocation63_spill] sm:$0xff] %v9435_v26  ;;  %v2798_v9 = vpack.c.b16 %v2774_v23, %v2773_v60 }
 0x1e1   : > { %11069 = vst [vmem:[#allocation64_spill] sm:$0xff] %v9437_v18  ;;  %v2532_v18 = vld [vmem:[#allocation2 + $0x88] sm:$0xe] }
 0x1e2   : > { %v7489_v26 = vrot.slane %v2532_v18, 9 }
 0x1e3   : > { %v9439_v8 = vpop.f32.mrf.mxu0  ;;  %v9441_v10 = vpop.f32.mrf.mxu1 }
 0x1e4   : > { %11070 = vst [vmem:[#allocation65_spill] sm:$0xff] %v9439_v8  ;;  %v2685_v23 = vsel %vm9305_vm12, %v7489_v26, %v2684_v53  ;;  %v7491_v26 = vrot.slane %v2534_v62, 9  ;;  %v8299_v53 = vld [vmem:[#allocation2 + $0x9c] sm:$0x1] }
 0x1e5   : > { %11071 = vst [vmem:[#allocation66_spill] sm:$0xff] %v9441_v10  ;;  %v7488_v10 = vrot.slane %v2531_v57, 9 }
 0x1e7   : > { %v2421_v27 = vpop.f32.mrf.mxu2  ;;  %v2510_v0 = vpop.f32.mrf.mxu3  ;;  %v2681_v60 = vsel %vm9305_vm12, %v7488_v10, %v2680_v58  ;;  %v8298_v58 = vld [vmem:[#allocation2 + $0x94] sm:$0x1] }
 0x1e8   : > { %v2688_v8 = vrot.slane %v8298_v58, 5 }
 0x1eb   : > { %v2067_v36 = vpop.f32.mrf.mxu0  ;;  %v2156_v15 = vpop.f32.mrf.mxu1 }
 0x1ec   : > { %v9447_v56 = vadd.f32 %v2421_v27, %v2067_v36  ;;  %v9449_v12 = vadd.f32 %v2510_v0, %v2156_v15  ;;  %v2775_v27 = vunpack.c.l.b16 %v2681_v60  ;;  %v2776_v0 = vunpack.c.l.b16 %v2685_v23  ;;  %v7666_v36 = vld [vmem:[#allocation10 + $0xc0] sm:$0xf] }
 0x1ed   : > { %v2692_v60 = vrot.slane %v8299_v53, 5 }
 0x1ee   : > { %11072 = vst [vmem:[#allocation67_spill] sm:$0xff] %v9447_v56  ;;  %2946 = vmatmul.bf16.gmra.mxu0 %v2798_v9  ;;  %3035 = vmatmul.bf16.gmra.mxu1 %v2798_v9  ;;  %v8120_v9 = vld [vmem:[#allocation10 + $0xc4] sm:$0xf0]  ;;  %v2799_v57 = vpack.c.b16 %v2776_v0, %v2775_v27  ;;  %v8119_v56 = vld [vmem:[#allocation10 + $0xc4] sm:$0xf] }
 0x1ef   : > { %11073 = vst [vmem:[#allocation68_spill] sm:$0xff] %v9449_v12  ;;  %v7667_v15 = vor.u32 %v8120_v9, %v7666_v36  ;;  %v2533_v12 = vld [vmem:[#allocation2 + $0x90] sm:$0xe]  ;;  %v2693_v0 = vsel %vm9305_vm12, %v7491_v26, %v2692_v60 }
 0x1f0   : > { %v7490_v10 = vrot.slane %v2533_v12, 9 }
 0x1f1   : > { %4820 = vmatpush.bf16.msra.mxu0 %v7667_v15 }
 0x1f2   : > { %v2689_v27 = vsel %vm9305_vm12, %v7490_v10, %v2688_v8  ;;  %v2535_v10 = vld [vmem:[#allocation2 + $0xa0] sm:$0xe] }
 0x1f3   : > { %v9451_v43 = vpop.f32.mrf.mxu0  ;;  %v9453_v1 = vpop.f32.mrf.mxu1  ;;  %v2777_v62 = vunpack.c.l.b16 %v2689_v27 }
 0x1f4   : > { %11074 = vst [vmem:[#allocation69_spill] sm:$0xff] %v9451_v43  ;;  %v7668_v43 = vld [vmem:[#allocation10 + $0xc8] sm:$0xf0] }
 0x1f5   : > { %11075 = vst [vmem:[#allocation70_spill] sm:$0xff] %v9453_v1  ;;  %v7671_v1 = vor.u32 %v8119_v56, %v7668_v43 }
 0x1f7   : > { %4909 = vmatpush.bf16.msra.mxu1 %v7671_v1  ;;  %v2778_v1 = vunpack.c.l.b16 %v2693_v0 }
 0x1f9   : > { %v2800_v58 = vpack.c.b16 %v2778_v1, %v2777_v62  ;;  %v8118_v62 = vld [vmem:[#allocation10 + $0xb4] sm:$0xf0] }
 0x1fb   : > { %v2912_v59 = vpop.f32.mrf.mxu0  ;;  %v3001_v18 = vpop.f32.mrf.mxu1 }
 0x1fc   : > { %v3081_v9 = vadd.f32 %v2912_v59, %v9066_v40  ;;  %v3082_v56 = vadd.f32 %v3001_v18, %v9068_v41  ;;  %v7492_v40 = vrot.slane %v2535_v10, 9  ;;  %v8300_v59 = vld [vmem:[#allocation2 + $0xa4] sm:$0x1]  ;;  %v7493_v18 = vrot.slane %v2536_v11, 9 }
 0x1fd   : > { %v2696_v41 = vrot.slane %v8300_v59, 5  ;;  %v2537_v59 = vld [vmem:[#allocation2 + $0xb0] sm:$0xe] }
 0x1fe   : > { %2951 = vmatmul.bf16.gmra.mxu0 %v2799_v57  ;;  %3040 = vmatmul.bf16.gmra.mxu1 %v2799_v57 }
 0x203   : > { %v2914_v23 = vpop.f32.mrf.mxu0  ;;  %v3003_v36 = vpop.f32.mrf.mxu1 }
 0x204   : > { %v3083_v12 = vadd.f32 %v2914_v23, %v9093_v21  ;;  %v3084_v43 = vadd.f32 %v3003_v36, %v9095_v22  ;;  %v8301_v21 = vld [vmem:[#allocation2 + $0xac] sm:$0x1]  ;;  %v2697_v23 = vsel %vm9305_vm12, %v7492_v40, %v2696_v41 }
 0x205   : > { %v2700_v26 = vrot.slane %v8301_v21, 5  ;;  %v8303_v21 = vld [vmem:[#allocation2 + $0xbc] sm:$0x1] }
 0x206   : > { %v3145_v15 = vpack.c.bf16 %v3083_v12, %v3081_v9  ;;  %v3146_v57 = vpack.c.bf16 %v3084_v43, %v3082_v56  ;;  %v2779_v43 = vunpack.c.l.b16 %v2697_v23 }
 0x207   : > { %v2701_v36 = vsel %vm9305_vm12, %v7493_v18, %v2700_v26  ;;  %v2708_v26 = vrot.slane %v8303_v21, 5 }
 0x208   : > { %3317 = vmatmul.bf16.vlgmr.msrb.gmra.mxu2 %v3145_v15  ;;  %3406 = vmatmul.bf16.vlgmr.msrb.gmra.mxu3 %v3146_v57  ;;  %v2780_v15 = vunpack.c.l.b16 %v2701_v36  ;;  %v7658_v57 = vld [vmem:[#allocation10 + $0xb0] sm:$0xf] }
 0x209   : > { %v7659_v1 = vor.u32 %v8118_v62, %v7658_v57  ;;  %v7818_v57 = vld [vmem:[#allocation10 + $0x70] sm:$0xf]  ;;  %v8110_v62 = vld [vmem:[#allocation10 + $0x74] sm:$0xf0] }
 0x20b   : > { %v2917_v53 = vpop.f32.mrf.mxu0  ;;  %v3006_v8 = vpop.f32.mrf.mxu1  ;;  %4821 = vmatpush.bf16.msra.mxu0 %v7659_v1  ;;  %v8109_v1 = vld [vmem:[#allocation10 + $0x74] sm:$0xf] }
 0x20c   : > { %v3085_v27 = vadd.f32 %v2917_v53, %v9106_v61  ;;  %v3086_v0 = vadd.f32 %v3006_v8, %v9108_v63  ;;  %v2538_v61 = vld [vmem:[#allocation2 + $0xb8] sm:$0xe]  ;;  %v8117_v63 = vld [vmem:[#allocation10 + $0xb4] sm:$0xf]  ;;  %v7660_v53 = vld [vmem:[#allocation10 + $0xb8] sm:$0xf0] }
 0x20d   : > { %v8302_v8 = vld [vmem:[#allocation2 + $0xb4] sm:$0x1]  ;;  %v7495_v18 = vrot.slane %v2538_v61, 9 }
 0x20e   : > { %2956 = vmatmul.bf16.gmra.mxu0 %v2800_v58  ;;  %3045 = vmatmul.bf16.gmra.mxu1 %v2800_v58  ;;  %v2801_v58 = vpack.c.b16 %v2780_v15, %v2779_v43  ;;  %v2704_v41 = vrot.slane %v8302_v8, 5 }
 0x20f   : > { %v2709_v36 = vsel %vm9305_vm12, %v7495_v18, %v2708_v26 }
 0x210   : > { %v2782_v15 = vunpack.c.l.b16 %v2709_v36 }
 0x213   : > { %v2919_v22 = vpop.f32.mrf.mxu0  ;;  %v3008_v60 = vpop.f32.mrf.mxu1 }
 0x214   : > { %v3087_v9 = vadd.f32 %v2919_v22, %v9131_v39  ;;  %v3088_v56 = vadd.f32 %v3008_v60, %v9133_v42  ;;  %v7663_v39 = vor.u32 %v8117_v63, %v7660_v53  ;;  %v7494_v42 = vrot.slane %v2537_v59, 9  ;;  %v7820_v59 = vld [vmem:[#allocation10 + $0x78] sm:$0xf0]  ;;  %v8304_v63 = vld [vmem:[#allocation2 + $0xc4] sm:$0x1] }
 0x215   : > { %v7823_v61 = vor.u32 %v8109_v1, %v7820_v59  ;;  %v2712_v53 = vrot.slane %v8304_v63, 5  ;;  %v2541_v1 = vld [vmem:[#allocation2 + $0xd0] sm:$0xe]  ;;  %v8306_v59 = vld [vmem:[#allocation2 + $0xd4] sm:$0x1] }
 0x216   : > { %v3147_v12 = vpack.c.bf16 %v3087_v9, %v3085_v27  ;;  %v3148_v11 = vpack.c.bf16 %v3088_v56, %v3086_v0  ;;  %4910 = vmatpush.bf16.msra.mxu1 %v7663_v39  ;;  %v2705_v23 = vsel %vm9305_vm12, %v7494_v42, %v2704_v41  ;;  %v8305_v42 = vld [vmem:[#allocation2 + $0xcc] sm:$0x1] }
 0x217   : > { %v2781_v43 = vunpack.c.l.b16 %v2705_v23  ;;  %5260 = vmatpush.bf16.msra.mxu3 %v7823_v61  ;;  %v2716_v8 = vrot.slane %v8305_v42, 5  ;;  %v2720_v61 = vrot.slane %v8306_v59, 5 }
 0x218   : > { %3322 = vmatmul.bf16.gmra.mxu2 %v3147_v12  ;;  %3411 = vmatmul.bf16.gmra.mxu3 %v3148_v11 }
 0x21b   : > { %v2922_v10 = vpop.f32.mrf.mxu0  ;;  %v3011_v40 = vpop.f32.mrf.mxu1 }
 0x21c   : > { %v3089_v27 = vadd.f32 %v2922_v10, %v9149_v16  ;;  %v3090_v0 = vadd.f32 %v3011_v40, %v9151_v17  ;;  %v2802_v16 = vpack.c.b16 %v2782_v15, %v2781_v43  ;;  %v2540_v40 = vld [vmem:[#allocation2 + $0xc8] sm:$0xe] }
 0x21d   : > { %v7497_v39 = vrot.slane %v2540_v40, 9  ;;  %v2458_v40 = vadd.f32 %v9231_v31, %v9239_v51  ;;  %v8108_v31 = vld [vmem:[#allocation10 + $0x64] sm:$0xf0]  ;;  %v8107_v51 = vld [vmem:[#allocation10 + $0x64] sm:$0xf] }
 0x21e   : > { %2961 = vmatmul.bf16.gmra.mxu0 %v2801_v58  ;;  %3050 = vmatmul.bf16.gmra.mxu1 %v2801_v58  ;;  %v7819_v58 = vor.u32 %v8110_v62, %v7818_v57 }
 0x21f   : > { %v2717_v26 = vsel %vm9305_vm12, %v7497_v39, %v2716_v8 }
 0x220   : > { %5171 = vmatpush.bf16.msra.mxu2 %v7819_v58  ;;  %v7652_v58 = vld [vmem:[#allocation10 + $0xa8] sm:$0xf0] }
 0x223   : > { %v2924_v22 = vpop.f32.mrf.mxu0  ;;  %v3013_v60 = vpop.f32.mrf.mxu1 }
 0x224   : > { %v3091_v9 = vadd.f32 %v2924_v22, %v9178_v2  ;;  %v3092_v56 = vadd.f32 %v3013_v60, %v9180_v3  ;;  %v2539_v2 = vld [vmem:[#allocation2 + $0xc0] sm:$0xe] }
 0x225   : > { %v7496_v3 = vrot.slane %v2539_v2, 9  ;;  %v2369_v2 = vadd.f32 %v9229_v30, %v9237_v50 }
 0x226   : > { %v3149_v12 = vpack.c.bf16 %v3091_v9, %v3089_v27  ;;  %v3150_v11 = vpack.c.bf16 %v3092_v56, %v3090_v0  ;;  %v2784_v56 = vunpack.c.l.b16 %v2717_v26 }
 0x227   : > { %v2713_v21 = vsel %vm9305_vm12, %v7496_v3, %v2712_v53 }
 0x228   : > { %3327 = vmatmul.bf16.gmra.mxu2 %v3149_v12  ;;  %3416 = vmatmul.bf16.gmra.mxu3 %v3150_v11  ;;  %v2783_v9 = vunpack.c.l.b16 %v2713_v21  ;;  %v7650_v12 = vld [vmem:[#allocation10 + $0xa0] sm:$0xf]  ;;  %v8116_v11 = vld [vmem:[#allocation10 + $0xa4] sm:$0xf0] }
 0x229   : > { %v7651_v43 = vor.u32 %v8116_v11, %v7650_v12  ;;  %v2728_v12 = vrot.slane %v9247_v5, 5 }
 0x22a   : > { %v2803_v15 = vpack.c.b16 %v2784_v56, %v2783_v9  ;;  %v2544_v9 = vld [vmem:[#allocation2 + $0xe8] sm:$0xe] }
 0x22b   : > { %v2927_v17 = vpop.f32.mrf.mxu0  ;;  %v3016_v10 = vpop.f32.mrf.mxu1  ;;  %4822 = vmatpush.bf16.msra.mxu0 %v7651_v43  ;;  %v7501_v11 = vrot.slane %v2544_v9, 9  ;;  %v2732_v43 = vrot.slane %v9249_v6, 5 }
 0x22c   : > { %v3093_v22 = vadd.f32 %v2927_v17, %v9189_v47  ;;  %v3094_v60 = vadd.f32 %v3016_v10, %v9191_v48  ;;  %v2542_v47 = vld [vmem:[#allocation2 + $0xd8] sm:$0xe]  ;;  %v8115_v48 = vld [vmem:[#allocation10 + $0xa4] sm:$0xf]  ;;  %v8307_v17 = vld [vmem:[#allocation2 + $0xdc] sm:$0x1] }
 0x22d   : > { %v2724_v10 = vrot.slane %v8307_v17, 5 }
 0x22e   : > { %2966 = vmatmul.bf16.gmra.mxu0 %v2802_v16  ;;  %3055 = vmatmul.bf16.gmra.mxu1 %v2802_v16  ;;  %v7499_v16 = vrot.slane %v2542_v47, 9 }
 0x230   : > { %v2725_v39 = vsel %vm9305_vm12, %v7499_v16, %v2724_v10 }
 0x231   : > { %v2786_v50 = vunpack.c.l.b16 %v2725_v39 }
 0x233   : > { %v2929_v41 = vpop.f32.mrf.mxu0  ;;  %v3018_v18 = vpop.f32.mrf.mxu1 }
 0x234   : > { %v3095_v23 = vadd.f32 %v2929_v41, %v9213_v32  ;;  %v3096_v36 = vadd.f32 %v3018_v18, %v9215_v34  ;;  %v7655_v32 = vor.u32 %v8115_v48, %v7652_v58  ;;  %v7498_v34 = vrot.slane %v2541_v1, 9 }
 0x235   : > { %v2733_v48 = vsel %vm9305_vm12, %v7501_v11, %v2732_v43  ;;  %v11077_v43 = vld [vmem:[#allocation24_spill] sm:$0xff] }
 0x236   : > { %v3151_v27 = vpack.c.bf16 %v3095_v23, %v3093_v22  ;;  %v3152_v0 = vpack.c.bf16 %v3096_v36, %v3094_v60  ;;  %4911 = vmatpush.bf16.msra.mxu1 %v7655_v32  ;;  %v2721_v53 = vsel %vm9305_vm12, %v7498_v34, %v2720_v61  ;;  %v7810_v22 = vld [vmem:[#allocation10 + $0x60] sm:$0xf]  ;;  %v7812_v23 = vld [vmem:[#allocation10 + $0x68] sm:$0xf0] }
 0x237   : > { %v2785_v30 = vunpack.c.l.b16 %v2721_v53  ;;  %v7811_v60 = vor.u32 %v8108_v31, %v7810_v22  ;;  %v7815_v36 = vor.u32 %v8107_v51, %v7812_v23  ;;  %v2736_v53 = vrot.slane %v9269_v4, 5 }
 0x238   : > { %3332 = vmatmul.bf16.gmra.mxu2 %v3151_v27  ;;  %3421 = vmatmul.bf16.gmra.mxu3 %v3152_v0 }
 0x239   : > { %5172 = vmatpush.bf16.msra.mxu2 %v7811_v60  ;;  %v2804_v27 = vpack.c.b16 %v2786_v50, %v2785_v30  ;;  %5261 = vmatpush.bf16.msra.mxu3 %v7815_v36  ;;  %v7802_v60 = vld [vmem:[#allocation10 + $0x50] sm:$0xf]  ;;  %v7804_v36 = vld [vmem:[#allocation10 + $0x58] sm:$0xf0] }
 0x23b   : > { %v2932_v57 = vpop.f32.mrf.mxu0  ;;  %v3021_v62 = vpop.f32.mrf.mxu1 }
 0x23c   : > { %v3097_v42 = vadd.f32 %v2932_v57, %v9221_v13  ;;  %v3098_v8 = vadd.f32 %v3021_v62, %v9223_v14  ;;  %v2543_v14 = vld [vmem:[#allocation2 + $0xe0] sm:$0xe]  ;;  %v2463_v57 = vadd.f32 %v9259_v33, %v9267_v45  ;;  %v7642_v33 = vld [vmem:[#allocation10 + $0x90] sm:$0xf]  ;;  %v8114_v45 = vld [vmem:[#allocation10 + $0x94] sm:$0xf0] }
 0x23d   : > { %v7500_v56 = vrot.slane %v2543_v14, 9  ;;  %v7643_v61 = vor.u32 %v8114_v45, %v7642_v33  ;;  %v2473_v14 = vadd.f32 %v9303_v38, %v9311_v55  ;;  %v11083_v45 = vld [vmem:[#allocation26_spill] sm:$0xff] }
 0x23e   : > { %2971 = vmatmul.bf16.gmra.mxu0 %v2803_v15  ;;  %3060 = vmatmul.bf16.gmra.mxu1 %v2803_v15  ;;  %v2374_v15 = vadd.f32 %v9257_v29, %v9265_v44  ;;  %v2788_v44 = vunpack.c.l.b16 %v2733_v48 }
 0x23f   : > { %v2729_v47 = vsel %vm9305_vm12, %v7500_v56, %v2728_v12  ;;  %4823 = vmatpush.bf16.msra.mxu0 %v7643_v61  ;;  %v11076_v12 = vld [vmem:[#allocation23_spill] sm:$0xff] }
 0x240   : > { %v2787_v29 = vunpack.c.l.b16 %v2729_v47 }
 0x242   : > { %v2805_v16 = vpack.c.b16 %v2788_v44, %v2787_v29  ;;  %v9537_v29 = vpop.f32.mrf.mxu3  ;;  %v11082_v44 = vld [vmem:[#allocation25_spill] sm:$0xff] }
 0x243   : > { %v2934_v3 = vpop.f32.mrf.mxu0  ;;  %v3023_v63 = vpop.f32.mrf.mxu1 }
 0x244   : > { %v3099_v41 = vadd.f32 %v2934_v3, %v2369_v2  ;;  %v3100_v18 = vadd.f32 %v3023_v63, %v2458_v40  ;;  %v2545_v2 = vld [vmem:[#allocation2 + $0xf0] sm:$0xe]  ;;  %v2546_v40 = vld [vmem:[#allocation2 + $0xf8] sm:$0xe]  ;;  %v7644_v3 = vld [vmem:[#allocation10 + $0x98] sm:$0xf0] }
 0x245   : > { %v7502_v63 = vrot.slane %v2545_v2, 9  ;;  %v7503_v39 = vrot.slane %v2546_v40, 9  ;;  %v7634_v40 = vld [vmem:[#allocation10 + $0x80] sm:$0xf] }
 0x246   : > { %v3153_v21 = vpack.c.bf16 %v3099_v41, %v3097_v42  ;;  %v3154_v26 = vpack.c.bf16 %v3100_v18, %v3098_v8  ;;  %v2740_v42 = vrot.slane %v9271_v7, 5  ;;  %v2379_v8 = vadd.f32 %v9279_v28, %v9283_v46 }
 0x247   : > { %v2468_v41 = vadd.f32 %v9281_v35, %v9285_v49  ;;  %v8106_v35 = vld [vmem:[#allocation10 + $0x54] sm:$0xf0]  ;;  %v8105_v49 = vld [vmem:[#allocation10 + $0x54] sm:$0xf] }
 0x248   : > { %3337 = vmatmul.bf16.gmra.mxu2 %v3153_v21  ;;  %3426 = vmatmul.bf16.gmra.mxu3 %v3154_v26  ;;  %v2737_v26 = vsel %vm9305_vm12, %v7502_v63, %v2736_v53  ;;  %v2741_v30 = vsel %vm9305_vm12, %v7503_v39, %v2740_v42  ;;  %v7803_v23 = vor.u32 %v8106_v35, %v7802_v60 }
 0x249   : > { %v2789_v28 = vunpack.c.l.b16 %v2737_v26  ;;  %v2790_v46 = vunpack.c.l.b16 %v2741_v30 }
 0x24a   : > { %5173 = vmatpush.bf16.msra.mxu2 %v7803_v23 }
 0x24b   : > { %v2937_v13 = vpop.f32.mrf.mxu0  ;;  %v3026_v0 = vpop.f32.mrf.mxu1 }
 0x24c   : > { %v3101_v58 = vadd.f32 %v2937_v13, %v9253_v19  ;;  %v3102_v5 = vadd.f32 %v3026_v0, %v9255_v20  ;;  %v8113_v19 = vld [vmem:[#allocation10 + $0x94] sm:$0xf]  ;;  %v2806_v13 = vpack.c.b16 %v2790_v46, %v2789_v28  ;;  %v11088_v46 = vld [vmem:[#allocation31_spill] sm:$0xff] }
 0x24d   : > { %v7647_v20 = vor.u32 %v8113_v19, %v7644_v3  ;;  %v8112_v19 = vld [vmem:[#allocation10 + $0x84] sm:$0xf0] }
 0x24e   : > { %2976 = vmatmul.bf16.gmra.mxu0 %v2804_v27  ;;  %3065 = vmatmul.bf16.gmra.mxu1 %v2804_v27  ;;  %v7807_v27 = vor.u32 %v8105_v49, %v7804_v36  ;;  %v7635_v3 = vor.u32 %v8112_v19, %v7634_v40  ;;  %v11089_v36 = vld [vmem:[#allocation32_spill] sm:$0xff] }
 0x24f   : > { %4912 = vmatpush.bf16.msra.mxu1 %v7647_v20  ;;  %v9544_v20 = vld [vmem:[%s10977_s3] ss:$0 sm:$0xff] }
 0x250   : > { %5262 = vmatpush.bf16.msra.mxu3 %v7807_v27  ;;  %4824 = vmatpush.bf16.msra.mxu0 %v7635_v3 }
 0x253   : > { %v2939_v62 = vpop.f32.mrf.mxu0  ;;  %v3028_v1 = vpop.f32.mrf.mxu1 }
 0x254   : > { %v3103_v32 = vadd.f32 %v2939_v62, %v2374_v15  ;;  %v3104_v6 = vadd.f32 %v3028_v1, %v2463_v57 }
 0x256   : > { %v3155_v34 = vpack.c.bf16 %v3103_v32, %v3101_v58  ;;  %v3156_v59 = vpack.c.bf16 %v3104_v6, %v3102_v5  ;;  %v11078_v5 = vld [vmem:[#allocation29_spill] sm:$0xff]  ;;  %v11079_v32 = vld [vmem:[#allocation27_spill] sm:$0xff]  ;;  %v11081_v6 = vld [vmem:[#allocation28_spill] sm:$0xff] }
 0x258   : > { %3342 = vmatmul.bf16.gmra.mxu2 %v3155_v34  ;;  %3431 = vmatmul.bf16.gmra.mxu3 %v3156_v59  ;;  %v9535_v59 = vpop.f32.mrf.mxu2 }
 0x25b   : > { %v2942_v17 = vpop.f32.mrf.mxu0  ;;  %v3031_v10 = vpop.f32.mrf.mxu1 }
 0x25c   : > { %v3105_v4 = vadd.f32 %v2942_v17, %v9275_v24  ;;  %v3106_v50 = vadd.f32 %v3031_v10, %v9277_v25  ;;  %v2384_v25 = vadd.f32 %v9301_v37, %v9309_v54  ;;  %v2389_v37 = vadd.f32 %v11079_v32, %v11078_v5  ;;  %v11080_v54 = vld [vmem:[#allocation30_spill] sm:$0xff]  ;;  %v3939_v32 = vld [vmem:[#allocation2 + $0x4] sm:$0x1] }
 0x25d   : > { %v2478_v38 = vadd.f32 %v11081_v6, %v11080_v54 }
 0x25e   : > { %2981 = vmatmul.bf16.gmra.mxu0 %v2805_v16  ;;  %3070 = vmatmul.bf16.gmra.mxu1 %v2805_v16 }
 0x263   : > { %v2944_v18 = vpop.f32.mrf.mxu0  ;;  %v3033_v21 = vpop.f32.mrf.mxu1 }
 0x264   : > { %v3107_v7 = vadd.f32 %v2944_v18, %v2379_v8  ;;  %v3108_v22 = vadd.f32 %v3033_v21, %v2468_v41  ;;  %v9547_v41 = vstv %s3487_s26  ;;  %v8111_v18 = vld [vmem:[#allocation10 + $0x84] sm:$0xf]  ;;  %v7636_v21 = vld [vmem:[#allocation10 + $0x88] sm:$0xf0]  ;;  %s10817_s26 = scalar_lea.vmem [#allocation13], %s7275_s6  ;;  %s8159_s6 = sshll.u32 %s8613_s4, 8 }
 0x265   : > { %v7639_v30 = vor.u32 %v8111_v18, %v7636_v21  ;;  %v11092_v18 = vld [vmem:[#allocation41_spill] sm:$0xff]  ;;  %v11093_v21 = vld [vmem:[#allocation39_spill] sm:$0xff]  ;;  %s7159_s19 = scalar_lea.hbm %s10987_s13, %s8159_s6  ;;  %s7160_s22 = sshll.u32 %s10817_s26, 4  ;;  %s7161_s22 = int_to_ptr.vmem [resolvable:$true] %s7160_s22 }
 0x266   : > { %v3157_v31 = vpack.c.bf16 %v3107_v7, %v3105_v4  ;;  %v3158_v51 = vpack.c.bf16 %v3108_v22, %v3106_v50  ;;  %v11084_v50 = vld [vmem:[#allocation35_spill] sm:$0xff]  ;;  %v11085_v7 = vld [vmem:[#allocation33_spill] sm:$0xff]  ;;  %s7162_s14 = sshll.u32 %s7159_s19, 4  ;;  %s7163_s14 = int_to_ptr.hbm [resolvable:$true] %s7162_s14 }
 0x267   : > { %4913 = vmatpush.bf16.msra.mxu1 %v7639_v30  ;;  %v2394_v22 = vadd.f32 %v11085_v7, %v11084_v50  ;;  %v11094_v50 = vld [vmem:[#allocation42_spill] sm:$0xff]  ;;  %v11095_v7 = vld [vmem:[#allocation40_spill] sm:$0xff]  ;;  %s8445_s21 = sshra.s32 %s7163_s14, 4  ;;  %s8446_s21 = int_to_ptr.hbm [resolvable:$true] %s8445_s21 }
 0x268   : > { %3347 = vmatmul.bf16.gmra.mxu2 %v3157_v31  ;;  %3436 = vmatmul.bf16.gmra.mxu3 %v3158_v51  ;;  %v11086_v31 = vld [vmem:[#allocation36_spill] sm:$0xff]  ;;  %v11087_v51 = vld [vmem:[#allocation34_spill] sm:$0xff]  ;;  %s8447_s28 = scalar_lea.hbm %s8446_s21, 256  ;;  %p8452_p11 = scmp.lt.s32.totalorder %s8446_s21, %s10987_s13 }
 0x269   : > { %v2483_v28 = vadd.f32 %v11087_v51, %v11086_v31  ;;  %v11096_v31 = vld [vmem:[#allocation37_spill] sm:$0xff]  ;;  %p8448_p1 = scmp.ne.s32.totalorder %s8446_s21, %s8447_s28  ;;  %p8453_p9 = scmp.lt.s32.totalorder %s8451_s5, %s8447_s28 }
 0x26b   : > { %v2947_v24 = vpop.f32.mrf.mxu0  ;;  %v3036_v0 = vpop.f32.mrf.mxu1  ;;  %p8449_p4 = pnand %p8448_p1, %p8680_p3  ;;  %p8454_p2 = por %p8453_p9, %p8452_p11 }
 0x26c   : > { %v3109_v11 = vadd.f32 %v2947_v24, %v11076_v12  ;;  %v3110_v15 = vadd.f32 %v3036_v0, %v11077_v43  ;;  %v7794_v43 = vld [vmem:[#allocation10 + $0x40] sm:$0xf] }
 0x26d   : > { %p8450_p8 = pneg %p8449_p4 }
 0x26e   : > { %2986 = vmatmul.bf16.gmra.mxu0 %v2806_v13  ;;  %3075 = vmatmul.bf16.gmra.mxu1 %v2806_v13 }
 0x26f   : > { %p8455_p10 = pnand %p8454_p2, %p8450_p8 }
 0x273   : > { %v2949_v9 = vpop.f32.mrf.mxu0  ;;  %v3038_v56 = vpop.f32.mrf.mxu1 }
 0x274   : > { %v3111_v57 = vadd.f32 %v2949_v9, %v2384_v25  ;;  %v3112_v62 = vadd.f32 %v3038_v56, %v2473_v14 }
 0x276   : > { %v3159_v1 = vpack.c.bf16 %v3111_v57, %v3109_v11  ;;  %v3160_v47 = vpack.c.bf16 %v3112_v62, %v3110_v15  ;;  %v8104_v15 = vld [vmem:[#allocation10 + $0x44] sm:$0xf0] }
 0x277   : > { %v7795_v62 = vor.u32 %v8104_v15, %v7794_v43  ;;  %v11099_v43 = vld [vmem:[#allocation45_spill] sm:$0xff] }
 0x278   : > { %3352 = vmatmul.bf16.gmra.mxu2 %v3159_v1  ;;  %3441 = vmatmul.bf16.gmra.mxu3 %v3160_v47  ;;  %v8103_v1 = vld [vmem:[#allocation10 + $0x44] sm:$0xf]  ;;  %v7796_v47 = vld [vmem:[#allocation10 + $0x48] sm:$0xf0] }
 0x279   : > { %v7799_v5 = vor.u32 %v8103_v1, %v7796_v47  ;;  %5174 = vmatpush.bf16.msra.mxu2 %v7795_v62 }
 0x27b   : > { %v2952_v48 = vpop.f32.mrf.mxu0  ;;  %v3041_v58 = vpop.f32.mrf.mxu1  ;;  %5263 = vmatpush.bf16.msra.mxu3 %v7799_v5 }
 0x27c   : > { %v3113_v33 = vadd.f32 %v2952_v48, %v11082_v44  ;;  %v3114_v61 = vadd.f32 %v3041_v58, %v11083_v45  ;;  %v8308_v44 = vld [vmem:[#allocation2] sm:$0xf] }
 0x283   : > { %v2954_v55 = vpop.f32.mrf.mxu0  ;;  %v3043_v34 = vpop.f32.mrf.mxu1 }
 0x284   : > { %v3115_v16 = vadd.f32 %v2954_v55, %v2389_v37  ;;  %v3116_v17 = vadd.f32 %v3043_v34, %v2478_v38 }
 0x286   : > { %v3161_v10 = vpack.c.bf16 %v3115_v16, %v3113_v33  ;;  %v3162_v2 = vpack.c.bf16 %v3116_v17, %v3114_v61 }
 0x288   : > { %3357 = vmatmul.bf16.gmra.mxu2 %v3161_v10  ;;  %3446 = vmatmul.bf16.gmra.mxu3 %v3162_v2 }
 0x28b   : > { %v2957_v63 = vpop.f32.mrf.mxu0  ;;  %v3046_v53 = vpop.f32.mrf.mxu1 }
 0x28c   : > { %v3318_v39 = vpop.f32.mrf.mxu2  ;;  %v3407_v42 = vpop.f32.mrf.mxu3  ;;  %v3117_v60 = vadd.f32 %v2957_v63, %v11088_v46  ;;  %v3118_v27 = vadd.f32 %v3046_v53, %v11089_v36 }
 0x28d   : > { %v3319_v8 = vadd.f32 %v9544_v20, %v3318_v39  ;;  %v3942_v39 = vld [vmem:[#allocation2 + $0x8] sm:$0xf] }
 0x28f   : > { %v3408_v26 = vadd.f32 %v3407_v42, %v3319_v8  ;;  %v3945_v42 = vld [vmem:[#allocation2 + $0xc] sm:$0x1] }
 0x291   : > { %vm3488_vm13 = vcmp.ge.f32.partialorder %v3408_v26, 0.0  ;;  %v3521_v4 = vmul.f32 %v9547_v41, %v3408_v26 }
 0x293   : > { %v3553_v35 = vsel %vm3488_vm13, %v3408_v26, %v3521_v4  ;;  %v2959_v49 = vpop.f32.mrf.mxu0  ;;  %v3048_v23 = vpop.f32.mrf.mxu1  ;;  %v2399_v26 = vadd.f32 %v11093_v21, %v11092_v18  ;;  %v11104_v18 = vld [vmem:[#allocation54_spill] sm:$0xff]  ;;  %v11105_v21 = vld [vmem:[#allocation52_spill] sm:$0xff] }
 0x294   : > { %v3585_v13 = vpack.c.bf16 %v3553_v35, %v3553_v35  ;;  %v3119_v24 = vadd.f32 %v2959_v49, %v2394_v22  ;;  %v3120_v0 = vadd.f32 %v3048_v23, %v2483_v28  ;;  %v3320_v25 = vpop.f32.mrf.mxu2  ;;  %v3409_v14 = vpop.f32.mrf.mxu3  ;;  %v2488_v22 = vadd.f32 %v11095_v7, %v11094_v50  ;;  %v11097_v28 = vld [vmem:[#allocation38_spill] sm:$0xff] }
 0x295   : > { %v3321_v9 = vadd.f32 %v9544_v20, %v3320_v25 }
 0x296   : > { %v3618_v56 = vshrl.u32 %v3585_v13, 16  ;;  %v3163_v12 = vpack.c.bf16 %v3119_v24, %v3117_v60  ;;  %v3164_v11 = vpack.c.bf16 %v3120_v0, %v3118_v27  ;;  %v3621_v58 = vshll.u32 %v3585_v13, 16 }
 0x297   : > { %v3410_v57 = vadd.f32 %v3409_v14, %v3321_v9 }
 0x298   : > { %v3620_v48 = vrot.slane %v3618_v56, 7  ;;  %3362 = vmatmul.bf16.gmra.mxu2 %v3163_v12  ;;  %3451 = vmatmul.bf16.gmra.mxu3 %v3164_v11  ;;  %v11098_v11 = vld [vmem:[#allocation47_spill] sm:$0xff] }
 0x299   : > { %vm3489_vm14 = vcmp.ge.f32.partialorder %v3410_v57, 0.0  ;;  %v3522_v37 = vmul.f32 %v9547_v41, %v3410_v57  ;;  %v9577_v15 = vadd.f32 %v11099_v43, %v11098_v11 }
 0x29a   : > { %v3623_v54 = vor.u32 %v3621_v58, %v3620_v48  ;;  %v3624_v6 = vrot.slane %v3620_v48, 4 }
 0x29b   : > { %v3554_v38 = vsel %vm3489_vm14, %v3410_v57, %v3522_v37  ;;  %v2962_v55 = vpop.f32.mrf.mxu0  ;;  %v3051_v34 = vpop.f32.mrf.mxu1  ;;  %v8142_v37 = vld [vmem:[#allocation10 + $0x174] sm:$0xf0] }
 0x29c   : > { %v3937_v45 = vsel %vm8775_vm6, %v3623_v54, %v8308_v44  ;;  %v3940_v16 = vsel %vm8732_vm3, %v3624_v6, %v3939_v32  ;;  %v3586_v17 = vpack.c.bf16 %v3554_v38, %v3554_v38  ;;  %v3323_v10 = vpop.f32.mrf.mxu2  ;;  %v3412_v2 = vpop.f32.mrf.mxu3  ;;  %v3121_v51 = vadd.f32 %v2962_v55, %v11096_v31  ;;  %v7914_v32 = vld [vmem:[#allocation10 + $0x170] sm:$0xf]  ;;  %v11100_v54 = vld [vmem:[#allocation48_spill] sm:$0xff]  ;;  %v11107_v31 = vld [vmem:[#allocation57_spill] sm:$0xff] }
 0x29d   : > { %3938 = vst [vmem:[#allocation2] sm:$0xf] %v3937_v45  ;;  %v3324_v40 = vadd.f32 %v9544_v20, %v3323_v10  ;;  %v3122_v46 = vadd.f32 %v3051_v34, %v11097_v28  ;;  %v11101_v6 = vld [vmem:[#allocation46_spill] sm:$0xff]  ;;  %v7915_v44 = vor.u32 %v8142_v37, %v7914_v32 }
 0x29e   : > { %3941 = vst [vmem:[#allocation2 + $0x4] sm:$0x1] %v3940_v16  ;;  %v3626_v19 = vshrl.u32 %v3586_v17, 16  ;;  %v3629_v53 = vshll.u32 %v3586_v17, 16  ;;  %v9581_v38 = vadd.f32 %v11101_v6, %v11100_v54  ;;  %v3948_v16 = vld [vmem:[#allocation2 + $0x10] sm:$0xf] }
 0x29f   : > { %v3413_v3 = vadd.f32 %v3412_v2, %v3324_v40  ;;  %v3951_v17 = vld [vmem:[#allocation2 + $0x14] sm:$0x1]  ;;  %5734 = vmatpush.bf16.msrb.mxu0 %v7915_v44  ;;  %v7916_v6 = vld [vmem:[#allocation10 + $0x178] sm:$0xf0] }
 0x2a0   : > { %v3628_v63 = vrot.slane %v3626_v19, 7  ;;  %v3957_v44 = vld [vmem:[#allocation2 + $0x1c] sm:$0x1] }
 0x2a1   : > { %vm3490_vm15 = vcmp.ge.f32.partialorder %v3413_v3, 0.0  ;;  %v3523_v8 = vmul.f32 %v9547_v41, %v3413_v3 }
 0x2a2   : > { %v3631_v30 = vor.u32 %v3629_v53, %v3628_v63  ;;  %v3632_v4 = vrot.slane %v3628_v63, 4 }
 0x2a3   : > { %v3555_v60 = vsel %vm3490_vm15, %v3413_v3, %v3523_v8  ;;  %v2964_v35 = vpop.f32.mrf.mxu0  ;;  %v3053_v49 = vpop.f32.mrf.mxu1 }
 0x2a4   : > { %v3943_v23 = vsel %vm8775_vm6, %v3631_v30, %v3942_v39  ;;  %v3946_v36 = vsel %vm8732_vm3, %v3632_v4, %v3945_v42  ;;  %v3587_v27 = vpack.c.bf16 %v3555_v60, %v3555_v60  ;;  %v3123_v13 = vadd.f32 %v2964_v35, %v2399_v26  ;;  %v3325_v24 = vpop.f32.mrf.mxu2  ;;  %v3414_v0 = vpop.f32.mrf.mxu3  ;;  %v4128_v25 = vld [vmem:[#allocation2] sm:$0xf]  ;;  %v11102_v39 = vld [vmem:[#allocation53_spill] sm:$0xff]  ;;  %v11103_v42 = vld [vmem:[#allocation51_spill] sm:$0xff] }
 0x2a5   : > { %3944 = vst [vmem:[#allocation2 + $0x8] sm:$0xf] %v3943_v23  ;;  %v3124_v14 = vadd.f32 %v3053_v49, %v2488_v22  ;;  %v3326_v9 = vadd.f32 %v9544_v20, %v3325_v24  ;;  %v4209_v56 = vshrl.u32 %v4128_v25, 16  ;;  %v4212_v12 = vshll.u32 %v4128_v25, 16  ;;  %v4176_v1 = vld [vmem:[#allocation2 + $0x4] sm:$0x1] }
 0x2a6   : > { %3947 = vst [vmem:[#allocation2 + $0xc] sm:$0x1] %v3946_v36  ;;  %v3634_v57 = vshrl.u32 %v3587_v27, 16  ;;  %v3165_v62 = vpack.c.bf16 %v3123_v13, %v3121_v51  ;;  %v3637_v34 = vshll.u32 %v3587_v27, 16  ;;  %v5349_v45 = vld [vmem:[#allocation2] sm:$0xe]  ;;  %v9586_v8 = vadd.f32 %v11103_v42, %v11102_v39 }
 0x2a7   : > { %v3166_v47 = vpack.c.bf16 %v3124_v14, %v3122_v46  ;;  %v3415_v48 = vadd.f32 %v3414_v0, %v3326_v9  ;;  %v4211_v58 = vrot.slane %v4209_v56, 4  ;;  %v4214_v5 = vrot.slane %v4212_v12, 5  ;;  %v11106_v22 = vld [vmem:[#allocation59_spill] sm:$0xff]  ;;  %v11108_v27 = vld [vmem:[#allocation60_spill] sm:$0xff]  ;;  %v11109_v13 = vld [vmem:[#allocation58_spill] sm:$0xff] }
 0x2a8   : > { %v3636_v55 = vrot.slane %v3634_v57, 7  ;;  %3367 = vmatmul.bf16.gmra.mxu2 %v3165_v62  ;;  %v4218_v40 = vshll.u32 %v4176_v1, 16  ;;  %v7824_v63 = vrot.slane %v5349_v45, 9  ;;  %v5447_v53 = vrot.slane %v4176_v1, 5  ;;  %v11110_v12 = vld [vmem:[#allocation43_spill] sm:$0xff] }
 0x2a9   : > { %vm3491_vm0 = vcmp.ge.f32.partialorder %v3415_v48, 0.0  ;;  %v3524_v10 = vmul.f32 %v9547_v41, %v3415_v48  ;;  %3456 = vmatmul.bf16.gmra.mxu3 %v3166_v47  ;;  %v4215_v2 = vor.u32 %v4214_v5, %v4211_v58  ;;  %v9590_v26 = vadd.f32 %v11105_v21, %v11104_v18  ;;  %v8141_v5 = vld [vmem:[#allocation10 + $0x174] sm:$0xf] }
 0x2aa   : > { %v3639_v19 = vor.u32 %v3637_v34, %v3636_v55  ;;  %v3640_v3 = vrot.slane %v3636_v55, 4  ;;  %v9594_v51 = vadd.f32 %v11107_v31, %v11106_v22  ;;  %v9602_v24 = vadd.f32 %v11109_v13, %v11108_v27  ;;  %v3954_v34 = vld [vmem:[#allocation2 + $0x18] sm:$0xf]  ;;  %v7786_v13 = vld [vmem:[#allocation10 + $0x30] sm:$0xf] }
 0x2ab   : > { %v3556_v30 = vsel %vm3491_vm0, %v3415_v48, %v3524_v10  ;;  %v2967_v4 = vpop.f32.mrf.mxu0  ;;  %v3056_v50 = vpop.f32.mrf.mxu1  ;;  %v4216_v7 = vrot.slane %v4215_v2, 4  ;;  %v4220_v14 = vrot.slane %v4218_v40, 5  ;;  %v9608_v57 = vsel %vm9305_vm12, %v7824_v63, %v5447_v53  ;;  %v11112_v40 = vld [vmem:[#allocation44_spill] sm:$0xff] }
 0x2ac   : > { %v3949_v28 = vsel %vm8775_vm6, %v3639_v19, %v3948_v16  ;;  %v3952_v46 = vsel %vm8732_vm3, %v3640_v3, %v3951_v17  ;;  %v3588_v60 = vpack.c.bf16 %v3556_v30, %v3556_v30  ;;  %v3328_v35 = vpop.f32.mrf.mxu2  ;;  %v3417_v49 = vpop.f32.mrf.mxu3  ;;  %v4129_v23 = vld [vmem:[#allocation2 + $0x8] sm:$0xf]  ;;  %v3125_v11 = vadd.f32 %v2967_v4, %v11110_v12  ;;  %v7788_v12 = vld [vmem:[#allocation10 + $0x38] sm:$0xf0] }
 0x2ad   : > { %v5350_v36 = vld [vmem:[#allocation2 + $0x8] sm:$0xe]  ;;  %3950 = vst [vmem:[#allocation2 + $0x10] sm:$0xf] %v3949_v28  ;;  %v3329_v0 = vadd.f32 %v9544_v20, %v3328_v35  ;;  %v4177_v25 = vld [vmem:[#allocation2 + $0xc] sm:$0x1]  ;;  %v4221_v47 = vsel %vm8812_vm9, %v4216_v7, %v4220_v14  ;;  %v7919_v16 = vor.u32 %v8141_v5, %v7916_v6  ;;  %v3126_v19 = vadd.f32 %v3056_v50, %v11112_v40 }
 0x2ae   : > { %v4223_v9 = vshrl.u32 %v4129_v23, 16  ;;  %3953 = vst [vmem:[#allocation2 + $0x14] sm:$0x1] %v3952_v46  ;;  %v3642_v56 = vshrl.u32 %v3588_v60, 16  ;;  %v4226_v43 = vshll.u32 %v4129_v23, 16  ;;  %v4232_v58 = vshll.u32 %v4177_v25, 16 }
 0x2af   : > { %v3418_v62 = vadd.f32 %v3417_v49, %v3329_v0  ;;  %v3645_v37 = vshll.u32 %v3588_v60, 16  ;;  %v7825_v55 = vrot.slane %v5350_v36, 9  ;;  %v5451_v17 = vrot.slane %v4177_v25, 5  ;;  %5823 = vmatpush.bf16.msrb.mxu1 %v7919_v16  ;;  %v11114_v16 = vld [vmem:[#allocation63_spill] sm:$0xff] }
 0x2b0   : > { %v4225_v48 = vrot.slane %v4223_v9, 4  ;;  %v3644_v32 = vrot.slane %v3642_v56, 7  ;;  %v4228_v54 = vrot.slane %v4226_v43, 5  ;;  %v4234_v42 = vrot.slane %v4232_v58, 5  ;;  %v8102_v9 = vld [vmem:[#allocation10 + $0x34] sm:$0xf0] }
 0x2b1   : > { %vm3492_vm1 = vcmp.ge.f32.partialorder %v3418_v62, 0.0  ;;  %v3525_v45 = vmul.f32 %v9547_v41, %v3418_v62  ;;  %v4673_v18 = vunpack.c.l.b16 %v4221_v47  ;;  %v5452_v21 = vsel %vm9305_vm12, %v7825_v55, %v5451_v17  ;;  %v8101_v56 = vld [vmem:[#allocation10 + $0x34] sm:$0xf] }
 0x2b2   : > { %v3647_v10 = vor.u32 %v3645_v37, %v3644_v32  ;;  %v3648_v2 = vrot.slane %v3644_v32, 4  ;;  %v4229_v3 = vor.u32 %v4228_v54, %v4225_v48  ;;  %v5590_v0 = vunpack.c.l.b16 %v9608_v57 }
 0x2b3   : > { %v3557_v63 = vsel %vm3492_vm1, %v3418_v62, %v3525_v45  ;;  %v2969_v53 = vpop.f32.mrf.mxu0  ;;  %v3058_v39 = vpop.f32.mrf.mxu1  ;;  %v3960_v62 = vld [vmem:[#allocation2 + $0x20] sm:$0xf]  ;;  %v7787_v48 = vor.u32 %v8102_v9, %v7786_v13  ;;  %v7791_v58 = vor.u32 %v8101_v56, %v7788_v12  ;;  %v11113_v45 = vld [vmem:[#allocation65_spill] sm:$0xff] }
 0x2b4   : > { %v3955_v30 = vsel %vm8775_vm6, %v3647_v10, %v3954_v34  ;;  %v3958_v4 = vsel %vm8732_vm3, %v3648_v2, %v3957_v44  ;;  %v3589_v7 = vpack.c.bf16 %v3557_v63, %v3557_v63  ;;  %v3127_v22 = vadd.f32 %v2969_v53, %v9577_v15  ;;  %v3330_v50 = vpop.f32.mrf.mxu2  ;;  %v3419_v31 = vpop.f32.mrf.mxu3  ;;  %v4130_v28 = vld [vmem:[#allocation2 + $0x10] sm:$0xf]  ;;  %v3966_v12 = vld [vmem:[#allocation2 + $0x28] sm:$0xf] }
 0x2b5   : > { %3956 = vst [vmem:[#allocation2 + $0x18] sm:$0xf] %v3955_v30  ;;  %v3128_v46 = vadd.f32 %v3058_v39, %v9581_v38  ;;  %v3331_v60 = vadd.f32 %v9544_v20, %v3330_v50  ;;  %v4230_v35 = vrot.slane %v4229_v3, 4  ;;  %v4237_v49 = vshrl.u32 %v4130_v28, 16  ;;  %v9626_v5 = vld [vmem:[#allocation2 + $0x14] sm:$0x1]  ;;  %5175 = vmatpush.bf16.msra.mxu2 %v7787_v48  ;;  %5264 = vmatpush.bf16.msra.mxu3 %v7791_v58 }
 0x2b6   : > { %3959 = vst [vmem:[#allocation2 + $0x1c] sm:$0x1] %v3958_v4  ;;  %v3650_v23 = vshrl.u32 %v3589_v7, 16  ;;  %v3653_v36 = vshll.u32 %v3589_v7, 16  ;;  %v3167_v27 = vpack.c.bf16 %v3127_v22, %v3125_v11  ;;  %v5591_v38 = vunpack.c.l.b16 %v5452_v21  ;;  %v3963_v11 = vld [vmem:[#allocation2 + $0x24] sm:$0x1] }
 0x2b7   : > { %v3168_v25 = vpack.c.bf16 %v3128_v46, %v3126_v19  ;;  %v3420_v14 = vadd.f32 %v3419_v31, %v3331_v60  ;;  %v4235_v15 = vsel %vm8812_vm9, %v4230_v35, %v4234_v42  ;;  %v4239_v32 = vrot.slane %v4237_v49, 4  ;;  %v9630_v44 = vld [vmem:[#allocation2 + $0x10] sm:$0xe]  ;;  %v11116_v4 = vld [vmem:[#allocation64_spill] sm:$0xff] }
 0x2b8   : > { %v3652_v43 = vrot.slane %v3650_v23, 7  ;;  %3372 = vmatmul.bf16.gmra.mxu2 %v3167_v27  ;;  %v4674_v47 = vunpack.c.l.b16 %v4235_v15  ;;  %v4240_v37 = vshll.u32 %v4130_v28, 16  ;;  %v4246_v34 = vshll.u32 %v9626_v5, 16  ;;  %v11115_v30 = vld [vmem:[#allocation66_spill] sm:$0xff]  ;;  %v11117_v23 = vld [vmem:[#allocation49_spill] sm:$0xff] }
 0x2b9   : > { %vm3493_vm2 = vcmp.ge.f32.partialorder %v3420_v14, 0.0  ;;  %v3526_v57 = vmul.f32 %v9547_v41, %v3420_v14  ;;  %3461 = vmatmul.bf16.gmra.mxu3 %v3168_v25  ;;  %v9634_v17 = vadd.f32 %v11114_v16, %v11113_v45  ;;  %v9636_v3 = vpack.c.b16 %v5591_v38, %v5590_v0  ;;  %v3969_v38 = vld [vmem:[#allocation2 + $0x2c] sm:$0x1] }
 0x2ba   : > { %v3655_v54 = vor.u32 %v3653_v36, %v3652_v43  ;;  %v3656_v6 = vrot.slane %v3652_v43, 4  ;;  %v4705_v55 = vpack.c.b16 %v4674_v47, %v4673_v18  ;;  %v4242_v19 = vrot.slane %v4240_v37, 5  ;;  %v11118_v43 = vld [vmem:[#allocation50_spill] sm:$0xff] }
 0x2bb   : > { %v3558_v10 = vsel %vm3493_vm2, %v3420_v14, %v3526_v57  ;;  %v2972_v2 = vpop.f32.mrf.mxu0  ;;  %v3061_v40 = vpop.f32.mrf.mxu1  ;;  %v9644_v7 = vadd.f32 %v11116_v4, %v11115_v30  ;;  %v7826_v28 = vrot.slane %v9630_v44, 9  ;;  %v4248_v60 = vrot.slane %v4246_v34, 5 }
 0x2bc   : > { %v3961_v63 = vsel %vm8775_vm6, %v3655_v54, %v3960_v62  ;;  %v3964_v53 = vsel %vm8732_vm3, %v3656_v6, %v3963_v11  ;;  %v3590_v39 = vpack.c.bf16 %v3558_v10, %v3558_v10  ;;  %4825 = vmatmul.bf16.vlgmr.msra.gmra.mxu0 %v4705_v55  ;;  %4914 = vmatmul.bf16.vlgmr.msra.gmra.mxu1 %v4705_v55  ;;  %v3333_v42 = vpop.f32.mrf.mxu2  ;;  %v3422_v18 = vpop.f32.mrf.mxu3  ;;  %v4131_v21 = vld [vmem:[#allocation2 + $0x18] sm:$0xf] }
 0x2bd   : > { %3962 = vst [vmem:[#allocation2 + $0x20] sm:$0xf] %v3961_v63  ;;  %v3334_v22 = vadd.f32 %v9544_v20, %v3333_v42  ;;  %v9647_v50 = vld [vmem:[#allocation2 + $0x1c] sm:$0x1]  ;;  %v4243_v31 = vor.u32 %v4242_v19, %v4239_v32  ;;  %v4251_v35 = vshrl.u32 %v4131_v21, 16  ;;  %v4254_v49 = vshll.u32 %v4131_v21, 16 }
 0x2be   : > { %3965 = vst [vmem:[#allocation2 + $0x24] sm:$0x1] %v3964_v53  ;;  %v3658_v46 = vshrl.u32 %v3590_v39, 16  ;;  %v3129_v36 = vadd.f32 %v2972_v2, %v11117_v23  ;;  %v4260_v0 = vshll.u32 %v9647_v50, 16  ;;  %v3661_v14 = vshll.u32 %v3590_v39, 16 }
 0x2bf   : > { %v3423_v27 = vadd.f32 %v3422_v18, %v3334_v22  ;;  %v4244_v13 = vrot.slane %v4243_v31, 4  ;;  %v4253_v15 = vrot.slane %v4251_v35, 4  ;;  %v4256_v9 = vrot.slane %v4254_v49, 5  ;;  %v9652_v56 = vld [vmem:[#allocation2 + $0x18] sm:$0xe] }
 0x2c0   : > { %v3660_v25 = vrot.slane %v3658_v46, 7  ;;  %v3130_v62 = vadd.f32 %v3061_v40, %v11118_v43  ;;  %v5455_v32 = vrot.slane %v9626_v5, 5  ;;  %v4262_v55 = vrot.slane %v4260_v0, 5  ;;  %v8140_v35 = vld [vmem:[#allocation10 + $0x164] sm:$0xf0] }
 0x2c1   : > { %vm3494_vm4 = vcmp.ge.f32.partialorder %v3423_v27, 0.0  ;;  %v3527_v47 = vmul.f32 %v9547_v41, %v3423_v27  ;;  %v4249_v48 = vsel %vm8812_vm9, %v4244_v13, %v4248_v60  ;;  %v4257_v57 = vor.u32 %v4256_v9, %v4253_v15  ;;  %v7906_v60 = vld [vmem:[#allocation10 + $0x160] sm:$0xf]  ;;  %v3972_v13 = vld [vmem:[#allocation2 + $0x30] sm:$0xf] }
 0x2c2   : > { %v3663_v58 = vor.u32 %v3661_v14, %v3660_v25  ;;  %v3664_v11 = vrot.slane %v3660_v25, 4  ;;  %v4675_v34 = vunpack.c.l.b16 %v4249_v48  ;;  %v7827_v44 = vrot.slane %v9652_v56, 9  ;;  %v3975_v0 = vld [vmem:[#allocation2 + $0x34] sm:$0x1] }
 0x2c3   : > { %v3559_v37 = vsel %vm3494_vm4, %v3423_v27, %v3527_v47  ;;  %v2974_v54 = vpop.f32.mrf.mxu0  ;;  %v3063_v6 = vpop.f32.mrf.mxu1  ;;  %v4258_v39 = vrot.slane %v4257_v57, 4  ;;  %v9671_v4 = vsel %vm9305_vm12, %v7826_v28, %v5455_v32  ;;  %v7907_v25 = vor.u32 %v8140_v35, %v7906_v60  ;;  %v11121_v60 = vld [vmem:[#allocation55_spill] sm:$0xff] }
 0x2c4   : > { %v3967_v45 = vsel %vm8775_vm6, %v3663_v58, %v3966_v12  ;;  %v3970_v16 = vsel %vm8732_vm3, %v3664_v11, %v3969_v38  ;;  %v3591_v10 = vpack.c.bf16 %v3559_v37, %v3559_v37  ;;  %v3131_v2 = vadd.f32 %v2974_v54, %v9586_v8  ;;  %v3335_v40 = vpop.f32.mrf.mxu2  ;;  %v3424_v19 = vpop.f32.mrf.mxu3  ;;  %v4132_v63 = vld [vmem:[#allocation2 + $0x20] sm:$0xf]  ;;  %v11119_v38 = vld [vmem:[#allocation69_spill] sm:$0xff] }
 0x2c5   : > { %3968 = vst [vmem:[#allocation2 + $0x28] sm:$0xf] %v3967_v45  ;;  %v3132_v5 = vadd.f32 %v3063_v6, %v9590_v26  ;;  %v3336_v53 = vadd.f32 %v9544_v20, %v3335_v40  ;;  %v4265_v42 = vshrl.u32 %v4132_v63, 16  ;;  %v9667_v30 = vld [vmem:[#allocation2 + $0x24] sm:$0x1]  ;;  %v5459_v8 = vrot.slane %v9647_v50, 5  ;;  %5735 = vmatpush.bf16.msrb.mxu0 %v7907_v25 }
 0x2c6   : > { %3971 = vst [vmem:[#allocation2 + $0x2c] sm:$0x1] %v3970_v16  ;;  %v3666_v18 = vshrl.u32 %v3591_v10, 16  ;;  %v3169_v21 = vpack.c.bf16 %v3131_v2, %v3129_v36  ;;  %v3669_v22 = vshll.u32 %v3591_v10, 16  ;;  %v4263_v26 = vsel %vm8812_vm9, %v4258_v39, %v4262_v55  ;;  %v9678_v12 = vld [vmem:[#allocation2 + $0x20] sm:$0xe] }
 0x2c7   : > { %v3170_v31 = vpack.c.bf16 %v3132_v5, %v3130_v62  ;;  %v3425_v46 = vadd.f32 %v3424_v19, %v3336_v53  ;;  %v4676_v23 = vunpack.c.l.b16 %v4263_v26  ;;  %v4267_v36 = vrot.slane %v4265_v42, 4  ;;  %v11120_v62 = vld [vmem:[#allocation70_spill] sm:$0xff]  ;;  %v8139_v42 = vld [vmem:[#allocation10 + $0x164] sm:$0xf]  ;;  %v3981_v26 = vld [vmem:[#allocation2 + $0x3c] sm:$0x1] }
 0x2c8   : > { %v3668_v49 = vrot.slane %v3666_v18, 7  ;;  %3377 = vmatmul.bf16.gmra.mxu2 %v3169_v21  ;;  %v4268_v27 = vshll.u32 %v4132_v63, 16  ;;  %v4274_v50 = vshll.u32 %v9667_v30, 16  ;;  %v9682_v43 = vadd.f32 %v9535_v59, %v11119_v38  ;;  %v7908_v18 = vld [vmem:[#allocation10 + $0x168] sm:$0xf0] }
 0x2c9   : > { %vm3495_vm7 = vcmp.ge.f32.partialorder %v3425_v46, 0.0  ;;  %v3528_v28 = vmul.f32 %v9547_v41, %v3425_v46  ;;  %3466 = vmatmul.bf16.gmra.mxu3 %v3170_v31  ;;  %v4706_v9 = vpack.c.b16 %v4676_v23, %v4675_v34  ;;  %v9686_v47 = vadd.f32 %v9537_v29, %v11120_v62 }
 0x2ca   : > { %v3671_v14 = vor.u32 %v3669_v22, %v3668_v49  ;;  %v3672_v15 = vrot.slane %v3668_v49, 4  ;;  %v4270_v56 = vrot.slane %v4268_v27, 5  ;;  %v5460_v57 = vsel %vm9305_vm12, %v7827_v44, %v5459_v8  ;;  %v11122_v49 = vld [vmem:[#allocation56_spill] sm:$0xff] }
 0x2cb   : > { %v3560_v48 = vsel %vm3495_vm7, %v3425_v46, %v3528_v28  ;;  %v2977_v58 = vpop.f32.mrf.mxu0  ;;  %v3066_v11 = vpop.f32.mrf.mxu1  ;;  %v5592_v55 = vunpack.c.l.b16 %v9671_v4  ;;  %v4276_v16 = vrot.slane %v4274_v50, 5  ;;  %v7828_v10 = vrot.slane %v9678_v12, 9  ;;  %v3978_v46 = vld [vmem:[#allocation2 + $0x38] sm:$0xf] }
 0x2cc   : > { %v3973_v32 = vsel %vm8775_vm6, %v3671_v14, %v3972_v13  ;;  %v3976_v37 = vsel %vm8732_vm3, %v3672_v15, %v3975_v0  ;;  %v3592_v54 = vpack.c.bf16 %v3560_v48, %v3560_v48  ;;  %4830 = vmatmul.bf16.gmra.mxu0 %v4706_v9  ;;  %4919 = vmatmul.bf16.gmra.mxu1 %v4706_v9  ;;  %v3338_v59 = vpop.f32.mrf.mxu2  ;;  %v3427_v6 = vpop.f32.mrf.mxu3  ;;  %v4133_v29 = vld [vmem:[#allocation2 + $0x28] sm:$0xf]  ;;  %v5593_v21 = vunpack.c.l.b16 %v5460_v57 }
 0x2cd   : > { %3974 = vst [vmem:[#allocation2 + $0x30] sm:$0xf] %v3973_v32  ;;  %v3339_v34 = vadd.f32 %v9544_v20, %v3338_v59  ;;  %v9696_v45 = vld [vmem:[#allocation2 + $0x2c] sm:$0x1]  ;;  %v4271_v44 = vor.u32 %v4270_v56, %v4267_v36  ;;  %v4279_v19 = vshrl.u32 %v4133_v29, 16  ;;  %v4282_v63 = vshll.u32 %v4133_v29, 16 }
 0x2ce   : > { %3977 = vst [vmem:[#allocation2 + $0x34] sm:$0x1] %v3976_v37  ;;  %v3674_v2 = vshrl.u32 %v3592_v54, 16  ;;  %v3677_v40 = vshll.u32 %v3592_v54, 16  ;;  %v4288_v39 = vshll.u32 %v9696_v45, 16  ;;  %v7911_v31 = vor.u32 %v8139_v42, %v7908_v18 }
 0x2cf   : > { %v3428_v5 = vadd.f32 %v3427_v6, %v3339_v34  ;;  %v4272_v53 = vrot.slane %v4271_v44, 4  ;;  %v4281_v8 = vrot.slane %v4279_v19, 4  ;;  %v4284_v22 = vrot.slane %v4282_v63, 5  ;;  %v7778_v34 = vld [vmem:[#allocation10 + $0x20] sm:$0xf] }
 0x2d0   : > { %v3676_v4 = vrot.slane %v3674_v2, 7  ;;  %v3133_v35 = vadd.f32 %v2977_v58, %v11121_v60  ;;  %v3134_v23 = vadd.f32 %v3066_v11, %v11122_v49  ;;  %5824 = vmatpush.bf16.msrb.mxu1 %v7911_v31  ;;  %v4290_v15 = vrot.slane %v4288_v39, 5  ;;  %v3984_v44 = vld [vmem:[#allocation2 + $0x40] sm:$0xf]  ;;  %v8099_v19 = vld [vmem:[#allocation10 + $0x24] sm:$0xf] }
 0x2d1   : > { %vm3496_vm8 = vcmp.ge.f32.partialorder %v3428_v5, 0.0  ;;  %v3529_v36 = vmul.f32 %v9547_v41, %v3428_v5  ;;  %v4277_v0 = vsel %vm8812_vm9, %v4272_v53, %v4276_v16  ;;  %v4285_v28 = vor.u32 %v4284_v22, %v4281_v8  ;;  %v7780_v63 = vld [vmem:[#allocation10 + $0x28] sm:$0xf0] }
 0x2d2   : > { %v3679_v27 = vor.u32 %v3677_v40, %v3676_v4  ;;  %v3680_v13 = vrot.slane %v3676_v4, 4  ;;  %v9705_v9 = vpack.c.b16 %v5593_v21, %v5592_v55  ;;  %v5463_v56 = vrot.slane %v9667_v30, 5  ;;  %v8100_v40 = vld [vmem:[#allocation10 + $0x24] sm:$0xf0]  ;;  %v3987_v4 = vld [vmem:[#allocation2 + $0x44] sm:$0x1] }
 0x2d3   : > { %v3561_v50 = vsel %vm3496_vm8, %v3428_v5, %v3529_v36  ;;  %v2979_v25 = vpop.f32.mrf.mxu0  ;;  %v3068_v14 = vpop.f32.mrf.mxu1  ;;  %v4286_v54 = vrot.slane %v4285_v28, 4  ;;  %v4677_v55 = vunpack.c.l.b16 %v4277_v0  ;;  %v7779_v39 = vor.u32 %v8100_v40, %v7778_v34  ;;  %v5354_v21 = vld [vmem:[#allocation2 + $0x28] sm:$0xe]  ;;  %v11124_v40 = vld [vmem:[#allocation62_spill] sm:$0xff] }
 0x2d4   : > { %v3979_v12 = vsel %vm8775_vm6, %v3679_v27, %v3978_v46  ;;  %v3982_v38 = vsel %vm8732_vm3, %v3680_v13, %v3981_v26  ;;  %v3593_v62 = vpack.c.bf16 %v3561_v50, %v3561_v50  ;;  %v3135_v48 = vadd.f32 %v2979_v25, %v9594_v51  ;;  %v3340_v58 = vpop.f32.mrf.mxu2  ;;  %v3429_v11 = vpop.f32.mrf.mxu3  ;;  %v4134_v57 = vld [vmem:[#allocation2 + $0x30] sm:$0xf] }
 0x2d5   : > { %3980 = vst [vmem:[#allocation2 + $0x38] sm:$0xf] %v3979_v12  ;;  %v3136_v32 = vadd.f32 %v3068_v14, %v9602_v24  ;;  %v3341_v37 = vadd.f32 %v9544_v20, %v3340_v58  ;;  %v4293_v59 = vshrl.u32 %v4134_v57, 16  ;;  %v4291_v51 = vsel %vm8812_vm9, %v4286_v54, %v4290_v15  ;;  %v9721_v18 = vld [vmem:[#allocation2 + $0x34] sm:$0x1]  ;;  %5176 = vmatpush.bf16.msra.mxu2 %v7779_v39 }
 0x2d6   : > { %3983 = vst [vmem:[#allocation2 + $0x3c] sm:$0x1] %v3982_v38  ;;  %v3682_v30 = vshrl.u32 %v3593_v62, 16  ;;  %v3685_v6 = vshll.u32 %v3593_v62, 16  ;;  %v3171_v29 = vpack.c.bf16 %v3135_v48, %v3133_v35  ;;  %v9719_v24 = vsel %vm9305_vm12, %v7828_v10, %v5463_v56  ;;  %v9725_v35 = vld [vmem:[#allocation2 + $0x30] sm:$0xe] }
 0x2d7   : > { %v3172_v16 = vpack.c.bf16 %v3136_v32, %v3134_v23  ;;  %v3430_v2 = vadd.f32 %v3429_v11, %v3341_v37  ;;  %v4678_v53 = vunpack.c.l.b16 %v4291_v51  ;;  %v7783_v42 = vor.u32 %v8099_v19, %v7780_v63  ;;  %v11123_v32 = vld [vmem:[#allocation61_spill] sm:$0xff] }
 0x2d8   : > { %v3684_v5 = vrot.slane %v3682_v30, 7  ;;  %3382 = vmatmul.bf16.gmra.mxu2 %v3171_v29  ;;  %v4295_v22 = vrot.slane %v4293_v59, 4  ;;  %v4296_v31 = vshll.u32 %v4134_v57, 16  ;;  %v4302_v10 = vshll.u32 %v9721_v18, 16  ;;  %v3993_v51 = vld [vmem:[#allocation2 + $0x4c] sm:$0x1] }
 0x2d9   : > { %vm3497_vm10 = vcmp.ge.f32.partialorder %v3430_v2, 0.0  ;;  %v3530_v8 = vmul.f32 %v9547_v41, %v3430_v2  ;;  %3471 = vmatmul.bf16.gmra.mxu3 %v3172_v16  ;;  %v4707_v60 = vpack.c.b16 %v4678_v53, %v4677_v55  ;;  %v7829_v13 = vrot.slane %v5354_v21, 9 }
 0x2da   : > { %v3687_v46 = vor.u32 %v3685_v6, %v3684_v5  ;;  %v3688_v26 = vrot.slane %v3684_v5, 4  ;;  %5265 = vmatpush.bf16.msra.mxu3 %v7783_v42  ;;  %v4298_v27 = vrot.slane %v4296_v31, 5  ;;  %v5594_v0 = vunpack.c.l.b16 %v9719_v24 }
 0x2db   : > { %v3562_v49 = vsel %vm3497_vm10, %v3430_v2, %v3530_v8  ;;  %v2982_v23 = vpop.f32.mrf.mxu0  ;;  %v3071_v36 = vpop.f32.mrf.mxu1  ;;  %v5467_v12 = vrot.slane %v9696_v45, 5  ;;  %v4304_v58 = vrot.slane %v4302_v10, 5  ;;  %v7830_v11 = vrot.slane %v9725_v35, 9  ;;  %v3990_v2 = vld [vmem:[#allocation2 + $0x48] sm:$0xf] }
 0x2dc   : > { %v3985_v28 = vsel %vm8775_vm6, %v3687_v46, %v3984_v44  ;;  %v3988_v50 = vsel %vm8732_vm3, %v3688_v26, %v3987_v4  ;;  %v3594_v25 = vpack.c.bf16 %v3562_v49, %v3562_v49  ;;  %4835 = vmatmul.bf16.gmra.mxu0 %v4707_v60  ;;  %4924 = vmatmul.bf16.gmra.mxu1 %v4707_v60  ;;  %v3343_v14 = vpop.f32.mrf.mxu2  ;;  %v3432_v15 = vpop.f32.mrf.mxu3  ;;  %v4135_v56 = vld [vmem:[#allocation2 + $0x38] sm:$0xf]  ;;  %v5471_v26 = vrot.slane %v9721_v18, 5 }
 0x2dd   : > { %3986 = vst [vmem:[#allocation2 + $0x40] sm:$0xf] %v3985_v28  ;;  %v3344_v38 = vadd.f32 %v9544_v20, %v3343_v14  ;;  %v9734_v62 = vld [vmem:[#allocation2 + $0x3c] sm:$0x1]  ;;  %v4299_v48 = vor.u32 %v4298_v27, %v4295_v22  ;;  %v3137_v37 = vadd.f32 %v2982_v23, %v11123_v32  ;;  %v4307_v54 = vshrl.u32 %v4135_v56, 16 }
 0x2de   : > { %3989 = vst [vmem:[#allocation2 + $0x44] sm:$0x1] %v3988_v50  ;;  %v3690_v57 = vshrl.u32 %v3594_v25, 16  ;;  %v4310_v59 = vshll.u32 %v4135_v56, 16  ;;  %v3693_v30 = vshll.u32 %v3594_v25, 16  ;;  %v4316_v45 = vshll.u32 %v9734_v62, 16 }
 0x2df   : > { %v3433_v6 = vadd.f32 %v3432_v15, %v3344_v38  ;;  %v4300_v29 = vrot.slane %v4299_v48, 4  ;;  %v4309_v34 = vrot.slane %v4307_v54, 4  ;;  %v5468_v16 = vsel %vm9305_vm12, %v7829_v13, %v5467_v12  ;;  %v7770_v28 = vld [vmem:[#allocation10 + $0x10] sm:$0xf]  ;;  %v8098_v50 = vld [vmem:[#allocation10 + $0x14] sm:$0xf0] }
 0x2e0   : > { %v3692_v55 = vrot.slane %v3690_v57, 7  ;;  %v4312_v44 = vrot.slane %v4310_v59, 5  ;;  %v3138_v19 = vadd.f32 %v3071_v36, %v11124_v40  ;;  %v4318_v21 = vrot.slane %v4316_v45, 5  ;;  %v3996_v32 = vld [vmem:[#allocation2 + $0x50] sm:$0xf] }
 0x2e1   : > { %vm3498_vm11 = vcmp.ge.f32.partialorder %v3433_v6, 0.0  ;;  %v3531_v63 = vmul.f32 %v9547_v41, %v3433_v6  ;;  %v4305_v5 = vsel %vm8812_vm9, %v4300_v29, %v4304_v58  ;;  %v5595_v46 = vunpack.c.l.b16 %v5468_v16  ;;  %v3999_v54 = vld [vmem:[#allocation2 + $0x54] sm:$0x1]  ;;  %v8138_v29 = vld [vmem:[#allocation10 + $0x154] sm:$0xf0] }
 0x2e2   : > { %v3695_v53 = vor.u32 %v3693_v30, %v3692_v55  ;;  %v3696_v39 = vrot.slane %v3692_v55, 4  ;;  %v4313_v42 = vor.u32 %v4312_v44, %v4309_v34  ;;  %v4679_v31 = vunpack.c.l.b16 %v4305_v5  ;;  %v8097_v44 = vld [vmem:[#allocation10 + $0x14] sm:$0xf]  ;;  %v7762_v40 = vld [vmem:[#allocation10] sm:$0xf] }
 0x2e3   : > { %v3563_v4 = vsel %vm3498_vm11, %v3433_v6, %v3531_v63  ;;  %v2984_v8 = vpop.f32.mrf.mxu0  ;;  %v3073_v22 = vpop.f32.mrf.mxu1  ;;  %v7771_v57 = vor.u32 %v8098_v50, %v7770_v28  ;;  %v9776_v50 = vld [vmem:[%s10977_s3] ss:$0 sm:$0xff] }
 0x2e4   : > { %v3991_v60 = vsel %vm8775_vm6, %v3695_v53, %v3990_v2  ;;  %v3994_v10 = vsel %vm8732_vm3, %v3696_v39, %v3993_v51  ;;  %v3595_v49 = vpack.c.bf16 %v3563_v4, %v3563_v4  ;;  %v3139_v23 = vadd.f32 %v2984_v8, %v9634_v17  ;;  %v3345_v36 = vpop.f32.mrf.mxu2  ;;  %v3434_v27 = vpop.f32.mrf.mxu3  ;;  %v4136_v13 = vld [vmem:[#allocation2 + $0x40] sm:$0xf]  ;;  %v9755_v17 = vld [vmem:[#allocation2 + $0x38] sm:$0xe]  ;;  %v7772_v51 = vld [vmem:[#allocation10 + $0x18] sm:$0xf0] }
 0x2e5   : > { %3992 = vst [vmem:[#allocation2 + $0x48] sm:$0xf] %v3991_v60  ;;  %v3140_v25 = vadd.f32 %v3073_v22, %v9644_v7  ;;  %v3346_v14 = vadd.f32 %v9544_v20, %v3345_v36  ;;  %v4314_v15 = vrot.slane %v4313_v42, 4  ;;  %v4321_v56 = vshrl.u32 %v4136_v13, 16  ;;  %v9753_v58 = vld [vmem:[#allocation2 + $0x44] sm:$0x1]  ;;  %5177 = vmatpush.bf16.msra.mxu2 %v7771_v57 }
 0x2e6   : > { %3995 = vst [vmem:[#allocation2 + $0x4c] sm:$0x1] %v3994_v10  ;;  %v3698_v12 = vshrl.u32 %v3595_v49, 16  ;;  %v3701_v38 = vshll.u32 %v3595_v49, 16  ;;  %v3173_v48 = vpack.c.bf16 %v3139_v23, %v3137_v37  ;;  %v7898_v20 = vld [vmem:[#allocation10 + $0x150] sm:$0xf]  ;;  %v7775_v22 = vor.u32 %v8097_v44, %v7772_v51 }
 0x2e7   : > { %v3174_v59 = vpack.c.bf16 %v3140_v25, %v3138_v19  ;;  %v3435_v30 = vadd.f32 %v3434_v27, %v3346_v14  ;;  %v4319_v7 = vsel %vm8812_vm9, %v4314_v15, %v4318_v21  ;;  %v4323_v6 = vrot.slane %v4321_v56, 4  ;;  %v8096_v42 = vld [vmem:[#allocation10 + $0x4] sm:$0xf0]  ;;  %v8095_v36 = vld [vmem:[#allocation10 + $0x4] sm:$0xf] }
 0x2e8   : > { %v3700_v45 = vrot.slane %v3698_v12, 7  ;;  %3387 = vmatmul.bf16.gmra.mxu2 %v3173_v48  ;;  %v4680_v55 = vunpack.c.l.b16 %v4319_v7  ;;  %v4324_v34 = vshll.u32 %v4136_v13, 16  ;;  %v4330_v37 = vshll.u32 %v9753_v58, 16  ;;  %v7764_v27 = vld [vmem:[#allocation10 + $0x8] sm:$0xf0]  ;;  %v11125_v13 = vld [vmem:[#allocation67_spill] sm:$0xff]  ;;  %5266 = vmatpush.bf16.msra.mxu3 %v7775_v22 }
 0x2e9   : > { %vm3499_vm13 = vcmp.ge.f32.partialorder %v3435_v30, 0.0  ;;  %v3532_v16 = vmul.f32 %v9547_v41, %v3435_v30  ;;  %3476 = vmatmul.bf16.gmra.mxu3 %v3174_v59  ;;  %v7899_v2 = vor.u32 %v8138_v29, %v7898_v20  ;;  %v9763_v19 = vpack.c.b16 %v5595_v46, %v5594_v0  ;;  %v7900_v7 = vld [vmem:[#allocation10 + $0x158] sm:$0xf0]  ;;  %v11126_v44 = vld [vmem:[#allocation68_spill] sm:$0xff] }
 0x2ea   : > { %v3703_v63 = vor.u32 %v3701_v38, %v3700_v45  ;;  %v3704_v5 = vrot.slane %v3700_v45, 4  ;;  %v4708_v53 = vpack.c.b16 %v4680_v55, %v4679_v31  ;;  %v4326_v39 = vrot.slane %v4324_v34, 5 }
 0x2eb   : > { %v3564_v21 = vsel %vm3499_vm13, %v3435_v30, %v3532_v16  ;;  %v2987_v4 = vpop.f32.mrf.mxu0  ;;  %v3076_v8 = vpop.f32.mrf.mxu1  ;;  %5736 = vmatpush.bf16.msrb.mxu0 %v7899_v2  ;;  %v7763_v60 = vor.u32 %v8096_v42, %v7762_v40  ;;  %v7831_v10 = vrot.slane %v9755_v17, 9  ;;  %v4332_v56 = vrot.slane %v4330_v37, 5  ;;  %v8137_v30 = vld [vmem:[#allocation10 + $0x154] sm:$0xf]  ;;  %v4005_v37 = vld [vmem:[#allocation2 + $0x5c] sm:$0x1] }
 0x2ec   : > { %v3997_v49 = vsel %vm8775_vm6, %v3703_v63, %v3996_v32  ;;  %v4000_v24 = vsel %vm8732_vm3, %v3704_v5, %v3999_v54  ;;  %v3596_v0 = vpack.c.bf16 %v3564_v21, %v3564_v21  ;;  %4840 = vmatmul.bf16.gmra.mxu0 %v4708_v53  ;;  %4929 = vmatmul.bf16.gmra.mxu1 %v4708_v53  ;;  %v3348_v31 = vpop.f32.mrf.mxu2  ;;  %v3437_v46 = vpop.f32.mrf.mxu3  ;;  %v4137_v23 = vld [vmem:[#allocation2 + $0x48] sm:$0xf]  ;;  %v5475_v22 = vrot.slane %v9734_v62, 5 }
 0x2ed   : > { %3998 = vst [vmem:[#allocation2 + $0x50] sm:$0xf] %v3997_v49  ;;  %v9771_v28 = vadd.f32 %v2987_v4, %v11125_v13  ;;  %v3349_v25 = vadd.f32 %v9776_v50, %v3348_v31  ;;  %v9779_v14 = vld [vmem:[#allocation2 + $0x4c] sm:$0x1]  ;;  %v4327_v15 = vor.u32 %v4326_v39, %v4323_v6  ;;  %v4335_v48 = vshrl.u32 %v4137_v23, 16  ;;  %5178 = vmatpush.bf16.msra.mxu2 %v7763_v60 }
 0x2ee   : > { %4001 = vst [vmem:[#allocation2 + $0x54] sm:$0x1] %v4000_v24  ;;  %v3706_v12 = vshrl.u32 %v3596_v0, 16  ;;  %v3709_v38 = vshll.u32 %v3596_v0, 16  ;;  %v4338_v57 = vshll.u32 %v4137_v23, 16  ;;  %v4344_v59 = vshll.u32 %v9779_v14, 16 }
 0x2ef   : > { %v3438_v32 = vadd.f32 %v3437_v46, %v3349_v25  ;;  %v4328_v54 = vrot.slane %v4327_v15, 4  ;;  %v7767_v20 = vor.u32 %v8095_v36, %v7764_v27  ;;  %v4337_v45 = vrot.slane %v4335_v48, 4  ;;  %v4002_v6 = vld [vmem:[#allocation2 + $0x58] sm:$0xf] }
 0x2f0   : > { %v3708_v29 = vrot.slane %v3706_v12, 7  ;;  %v4340_v55 = vrot.slane %v4338_v57, 5  ;;  %v7903_v34 = vor.u32 %v8137_v30, %v7900_v7  ;;  %v3142_v16 = vadd.f32 %v3076_v8, %v11126_v44 }
 0x2f1   : > { %vm3500_vm14 = vcmp.ge.f32.partialorder %v3438_v32, 0.0  ;;  %v3533_v2 = vmul.f32 %v9547_v41, %v3438_v32  ;;  %v4333_v51 = vsel %vm8812_vm9, %v4328_v54, %v4332_v56  ;;  %v4346_v53 = vrot.slane %v4344_v59, 5  ;;  %5267 = vmatpush.bf16.msra.mxu3 %v7767_v20 }
 0x2f2   : > { %v3711_v40 = vor.u32 %v3709_v38, %v3708_v29  ;;  %v3712_v63 = vrot.slane %v3708_v29, 4  ;;  %v4341_v5 = vor.u32 %v4340_v55, %v4337_v45  ;;  %5825 = vmatpush.bf16.msrb.mxu1 %v7903_v34  ;;  %v4681_v4 = vunpack.c.l.b16 %v4333_v51  ;;  %v8079_v45 = vld [vmem:[#allocation2 + $0x4] sm:$0xf0]  ;;  %v5357_v34 = vld [vmem:[#allocation2 + $0x40] sm:$0xe] }
 0x2f3   : > { %v3565_v39 = vsel %vm3500_vm14, %v3438_v32, %v3533_v2  ;;  %v2989_v42 = vpop.f32.mrf.mxu0  ;;  %v3078_v21 = vpop.f32.mrf.mxu1  ;;  %v5472_v8 = vsel %vm9305_vm12, %v7830_v11, %v5471_v26  ;;  %v4011_v32 = vld [vmem:[#allocation2 + $0x64] sm:$0x1] }
 0x2f4   : > { %v4003_v60 = vsel %vm8775_vm6, %v3711_v40, %v4002_v6  ;;  %v4006_v49 = vsel %vm8732_vm3, %v3712_v63, %v4005_v37  ;;  %v3597_v24 = vpack.c.bf16 %v3565_v39, %v3565_v39  ;;  %v3143_v0 = vadd.f32 %v2989_v42, %v9682_v43  ;;  %v3350_v31 = vpop.f32.mrf.mxu2  ;;  %v3439_v46 = vpop.f32.mrf.mxu3  ;;  %v4138_v23 = vld [vmem:[#allocation2 + $0x50] sm:$0xf]  ;;  %v5358_v63 = vld [vmem:[#allocation2 + $0x48] sm:$0xe] }
 0x2f5   : > { %4004 = vst [vmem:[#allocation2 + $0x58] sm:$0xf] %v4003_v60  ;;  %v3144_v18 = vadd.f32 %v3078_v21, %v9686_v47  ;;  %v3351_v35 = vadd.f32 %v9776_v50, %v3350_v31  ;;  %v4342_v11 = vrot.slane %v4341_v5, 4  ;;  %v4349_v26 = vshrl.u32 %v4138_v23, 16  ;;  %v9801_v13 = vld [vmem:[#allocation2 + $0x54] sm:$0x1] }
 0x2f6   : > { %4007 = vst [vmem:[#allocation2 + $0x5c] sm:$0x1] %v4006_v49  ;;  %v3714_v62 = vshrl.u32 %v3597_v24, 16  ;;  %v3717_v36 = vshll.u32 %v3597_v24, 16  ;;  %v3175_v27 = vpack.c.bf16 %v3143_v0, %v9771_v28  ;;  %v5476_v43 = vsel %vm9305_vm12, %v7831_v10, %v5475_v22  ;;  %v4008_v28 = vld [vmem:[#allocation2 + $0x60] sm:$0xf] }
 0x2f7   : > { %v3176_v25 = vpack.c.bf16 %v3144_v18, %v3142_v16  ;;  %v3440_v15 = vadd.f32 %v3439_v46, %v3351_v35  ;;  %v4347_v47 = vsel %vm8812_vm9, %v4342_v11, %v4346_v53  ;;  %v4351_v56 = vrot.slane %v4349_v26, 4  ;;  %v7698_v24 = vld [vmem:[#allocation2] sm:$0xf]  ;;  %v4014_v26 = vld [vmem:[#allocation2 + $0x68] sm:$0xf] }
 0x2f8   : > { %v3716_v12 = vrot.slane %v3714_v62, 7  ;;  %3392 = vmatmul.bf16.gmra.mxu2 %v3175_v27  ;;  %v4682_v38 = vunpack.c.l.b16 %v4347_v47  ;;  %v4352_v48 = vshll.u32 %v4138_v23, 16  ;;  %v4358_v57 = vshll.u32 %v9801_v13, 16  ;;  %v4017_v62 = vld [vmem:[#allocation2 + $0x6c] sm:$0x1] }
 0x2f9   : > { %vm3501_vm15 = vcmp.ge.f32.partialorder %v3440_v15, 0.0  ;;  %v3534_v17 = vmul.f32 %v9547_v41, %v3440_v15  ;;  %3481 = vmatmul.bf16.gmra.mxu3 %v3176_v25  ;;  %v5596_v54 = vunpack.c.l.b16 %v5472_v8  ;;  %v5597_v10 = vunpack.c.l.b16 %v5476_v43 }
 0x2fa   : > { %v3719_v59 = vor.u32 %v3717_v36, %v3716_v12  ;;  %v3720_v30 = vrot.slane %v3716_v12, 4  ;;  %v4709_v7 = vpack.c.b16 %v4682_v38, %v4681_v4  ;;  %v4354_v20 = vrot.slane %v4352_v48, 5 }
 0x2fb   : > { %v3566_v29 = vsel %vm3501_vm15, %v3440_v15, %v3534_v17  ;;  %v9811_v55 = vpack.c.b16 %v5597_v10, %v5596_v54  ;;  %v4360_v40 = vrot.slane %v4358_v57, 5  ;;  %v7832_v22 = vrot.slane %v5357_v34, 9 }
 0x2fc   : > { %v4009_v6 = vsel %vm8775_vm6, %v3719_v59, %v4008_v28  ;;  %v4012_v37 = vsel %vm8732_vm3, %v3720_v30, %v4011_v32  ;;  %v3598_v44 = vpack.c.bf16 %v3566_v29, %v3566_v29  ;;  %4845 = vmatmul.bf16.gmra.mxu0 %v4709_v7  ;;  %4934 = vmatmul.bf16.gmra.mxu1 %v4709_v7  ;;  %v3353_v16 = vpop.f32.mrf.mxu2  ;;  %v3442_v2 = vpop.f32.mrf.mxu3  ;;  %v4139_v51 = vld [vmem:[#allocation2 + $0x58] sm:$0xf]  ;;  %v5479_v60 = vrot.slane %v9753_v58, 5 }
 0x2fd   : > { %4010 = vst [vmem:[#allocation2 + $0x60] sm:$0xf] %v4009_v6  ;;  %v3354_v5 = vadd.f32 %v9776_v50, %v3353_v16  ;;  %v9818_v53 = vld [vmem:[#allocation2 + $0x5c] sm:$0x1]  ;;  %v4355_v39 = vor.u32 %v4354_v20, %v4351_v56  ;;  %v4363_v42 = vshrl.u32 %v4139_v51, 16  ;;  %v4366_v21 = vshll.u32 %v4139_v51, 16 }
 0x2fe   : > { %4013 = vst [vmem:[#allocation2 + $0x64] sm:$0x1] %v4012_v37  ;;  %v3722_v4 = vshrl.u32 %v3598_v44, 16  ;;  %v4372_v8 = vshll.u32 %v9818_v53, 16  ;;  %v3725_v18 = vshll.u32 %v3598_v44, 16  ;;  %v7699_v35 = vor.u32 %v8079_v45, %v7698_v24 }
 0x2ff   : > { %v3443_v49 = vadd.f32 %v3442_v2, %v3354_v5  ;;  %v4356_v0 = vrot.slane %v4355_v39, 4  ;;  %v4365_v31 = vrot.slane %v4363_v42, 4  ;;  %v4368_v46 = vrot.slane %v4366_v21, 5  ;;  %v9839_v45 = vld [vmem:[#allocation2 + $0x50] sm:$0xe] }
 0x300   : > { %v3724_v23 = vrot.slane %v3722_v4, 7  ;;  %v7833_v11 = vrot.slane %v5358_v63, 9  ;;  %v5480_v15 = vsel %vm9305_vm12, %v7832_v22, %v5479_v60  ;;  %v5483_v47 = vrot.slane %v9779_v14, 5  ;;  %v8136_v63 = vld [vmem:[#allocation10 + $0x144] sm:$0xf0] }
 0x301   : > { %vm3502_vm0 = vcmp.ge.f32.partialorder %v3443_v49, 0.0  ;;  %v3535_v36 = vmul.f32 %v9547_v41, %v3443_v49  ;;  %v4361_v27 = vsel %vm8812_vm9, %v4356_v0, %v4360_v40  ;;  %v4369_v43 = vor.u32 %v4368_v46, %v4365_v31  ;;  %v7890_v40 = vld [vmem:[#allocation10 + $0x140] sm:$0xf]  ;;  %v4020_v42 = vld [vmem:[#allocation2 + $0x70] sm:$0xf] }
 0x302   : > { %v3727_v25 = vor.u32 %v3725_v18, %v3724_v23  ;;  %v3728_v58 = vrot.slane %v3724_v23, 4  ;;  %v4374_v38 = vrot.slane %v4372_v8, 5  ;;  %v4683_v48 = vunpack.c.l.b16 %v4361_v27  ;;  %v4023_v22 = vld [vmem:[#allocation2 + $0x74] sm:$0x1]  ;;  %v5360_v24 = vld [vmem:[#allocation2 + $0x58] sm:$0xe] }
 0x303   : > { %v3567_v56 = vsel %vm3502_vm0, %v3443_v49, %v3535_v36  ;;  %v4370_v12 = vrot.slane %v4369_v43, 4  ;;  %v5484_v59 = vsel %vm9305_vm12, %v7833_v11, %v5483_v47  ;;  %v5598_v20 = vunpack.c.l.b16 %v5480_v15 }
 0x304   : > { %v4015_v57 = vsel %vm8775_vm6, %v3727_v25, %v4014_v26  ;;  %v4018_v28 = vsel %vm8732_vm3, %v3728_v58, %v4017_v62  ;;  %v3599_v32 = vpack.c.bf16 %v3567_v56, %v3567_v56  ;;  %v3355_v17 = vpop.f32.mrf.mxu2  ;;  %v3444_v54 = vpop.f32.mrf.mxu3  ;;  %v4140_v10 = vld [vmem:[#allocation2 + $0x60] sm:$0xf]  ;;  %v5599_v29 = vunpack.c.l.b16 %v5484_v59 }
 0x305   : > { %4016 = vst [vmem:[#allocation2 + $0x68] sm:$0xf] %v4015_v57  ;;  %v3356_v14 = vadd.f32 %v9776_v50, %v3355_v17  ;;  %v4375_v30 = vsel %vm8812_vm9, %v4370_v12, %v4374_v38  ;;  %v9837_v7 = vld [vmem:[#allocation2 + $0x64] sm:$0x1]  ;;  %v4377_v44 = vshrl.u32 %v4140_v10, 16  ;;  %v4380_v2 = vshll.u32 %v4140_v10, 16 }
 0x306   : > { %4019 = vst [vmem:[#allocation2 + $0x6c] sm:$0x1] %v4018_v28  ;;  %v3730_v34 = vshrl.u32 %v3599_v32, 16  ;;  %v3733_v6 = vshll.u32 %v3599_v32, 16  ;;  %v4684_v37 = vunpack.c.l.b16 %v4375_v30  ;;  %v4386_v51 = vshll.u32 %v9837_v7, 16 }
 0x307   : > { %v3445_v16 = vadd.f32 %v3444_v54, %v3356_v14  ;;  %v9842_v5 = vpack.c.b16 %v5599_v29, %v5598_v20  ;;  %v4379_v4 = vrot.slane %v4377_v44, 4  ;;  %v7891_v8 = vor.u32 %v8136_v63, %v7890_v40  ;;  %v9847_v62 = vld [vmem:[#allocation2 + $0x60] sm:$0xe]  ;;  %v8135_v10 = vld [vmem:[#allocation10 + $0x144] sm:$0xf] }
 0x308   : > { %v3732_v39 = vrot.slane %v3730_v34, 7  ;;  %5179 = vmatmul.bf16.vlgmr.msra.gmra.mxu2 %v7699_v35  ;;  %v4710_v21 = vpack.c.b16 %v4684_v37, %v4683_v48  ;;  %v4382_v49 = vrot.slane %v4380_v2, 5  ;;  %v7834_v46 = vrot.slane %v9839_v45, 9  ;;  %v7892_v29 = vld [vmem:[#allocation10 + $0x148] sm:$0xf0] }
 0x309   : > { %vm3503_vm1 = vcmp.ge.f32.partialorder %v3445_v16, 0.0  ;;  %v3536_v60 = vmul.f32 %v9547_v41, %v3445_v16  ;;  %5268 = vmatmul.bf16.vlgmr.msra.gmra.mxu3 %v7699_v35  ;;  %5737 = vmatpush.bf16.msrb.mxu0 %v7891_v8  ;;  %v4388_v11 = vrot.slane %v4386_v51, 5  ;;  %v5487_v26 = vrot.slane %v9801_v13, 5  ;;  %v4026_v45 = vld [vmem:[#allocation2 + $0x78] sm:$0xf] }
 0x30a   : > { %v3735_v0 = vor.u32 %v3733_v6, %v3732_v39  ;;  %v3736_v31 = vrot.slane %v3732_v39, 4  ;;  %v4383_v18 = vor.u32 %v4382_v49, %v4379_v4  ;;  %v7835_v15 = vrot.slane %v5360_v24, 9  ;;  %v4029_v34 = vld [vmem:[#allocation2 + $0x7c] sm:$0x1]  ;;  %v8080_v51 = vld [vmem:[#allocation2 + $0x14] sm:$0xf0] }
 0x30b   : > { %v3568_v23 = vsel %vm3503_vm1, %v3445_v16, %v3536_v60  ;;  %v5491_v12 = vrot.slane %v9818_v53, 5  ;;  %v7836_v28 = vrot.slane %v9847_v62, 9  ;;  %v5495_v59 = vrot.slane %v9837_v7, 5 }
 0x30c   : > { %v4021_v36 = vsel %vm8775_vm6, %v3735_v0, %v4020_v42  ;;  %v4024_v35 = vsel %vm8732_vm3, %v3736_v31, %v4023_v22  ;;  %v3600_v27 = vpack.c.bf16 %v3568_v23, %v3568_v23  ;;  %4850 = vmatmul.bf16.gmra.mxu0 %v4710_v21  ;;  %4939 = vmatmul.bf16.gmra.mxu1 %v4710_v21  ;;  %v3358_v43 = vpop.f32.mrf.mxu2  ;;  %v3447_v25 = vpop.f32.mrf.mxu3  ;;  %v4141_v58 = vld [vmem:[#allocation2 + $0x68] sm:$0xf]  ;;  %v4384_v48 = vrot.slane %v4383_v18, 4  ;;  %v7702_v0 = vld [vmem:[#allocation2 + $0x10] sm:$0xf] }
 0x30d   : > { %4022 = vst [vmem:[#allocation2 + $0x70] sm:$0xf] %v4021_v36  ;;  %v3359_v47 = vadd.f32 %v9776_v50, %v3358_v43  ;;  %v9854_v56 = vld [vmem:[#allocation2 + $0x6c] sm:$0x1]  ;;  %v4391_v13 = vshrl.u32 %v4141_v58, 16  ;;  %v4394_v57 = vshll.u32 %v4141_v58, 16  ;;  %v5488_v53 = vsel %vm9305_vm12, %v7834_v46, %v5487_v26 }
 0x30e   : > { %4025 = vst [vmem:[#allocation2 + $0x74] sm:$0x1] %v4024_v35  ;;  %v3738_v38 = vshrl.u32 %v3600_v27, 16  ;;  %v4400_v54 = vshll.u32 %v9854_v56, 16  ;;  %v3741_v30 = vshll.u32 %v3600_v27, 16  ;;  %v7895_v37 = vor.u32 %v8135_v10, %v7892_v29 }
 0x30f   : > { %v3448_v32 = vadd.f32 %v3447_v25, %v3359_v47  ;;  %v4393_v17 = vrot.slane %v4391_v13, 4  ;;  %v4396_v20 = vrot.slane %v4394_v57, 5  ;;  %v5492_v44 = vsel %vm9305_vm12, %v7835_v15, %v5491_v12  ;;  %v5362_v4 = vld [vmem:[#allocation2 + $0x68] sm:$0xe] }
 0x310   : > { %v3740_v14 = vrot.slane %v3738_v38, 7  ;;  %v4389_v7 = vsel %vm8812_vm9, %v4384_v48, %v4388_v11  ;;  %v4402_v39 = vrot.slane %v4400_v54, 5  ;;  %5826 = vmatpush.bf16.msrb.mxu1 %v7895_v37  ;;  %v5600_v42 = vunpack.c.l.b16 %v5488_v53  ;;  %v4032_v38 = vld [vmem:[#allocation2 + $0x80] sm:$0xf] }
 0x311   : > { %vm3504_vm2 = vcmp.ge.f32.partialorder %v3448_v32, 0.0  ;;  %v3537_v6 = vmul.f32 %v9547_v41, %v3448_v32  ;;  %v4397_v40 = vor.u32 %v4396_v20, %v4393_v17  ;;  %v5601_v21 = vunpack.c.l.b16 %v5492_v44 }
 0x312   : > { %v3743_v16 = vor.u32 %v3741_v30, %v3740_v14  ;;  %v3744_v2 = vrot.slane %v3740_v14, 4  ;;  %v7703_v18 = vor.u32 %v8080_v51, %v7702_v0  ;;  %v4685_v11 = vunpack.c.l.b16 %v4389_v7 }
 0x313   : > { %v3569_v63 = vsel %vm3504_vm2, %v3448_v32, %v3537_v6  ;;  %v4398_v31 = vrot.slane %v4397_v40, 4  ;;  %v9872_v26 = vpack.c.b16 %v5601_v21, %v5600_v42  ;;  %v7837_v27 = vrot.slane %v5362_v4, 9  ;;  %v4035_v32 = vld [vmem:[#allocation2 + $0x84] sm:$0x1] }
 0x314   : > { %v4027_v8 = vsel %vm8775_vm6, %v3743_v16, %v4026_v45  ;;  %v4030_v22 = vsel %vm8732_vm3, %v3744_v2, %v4029_v34  ;;  %v3601_v60 = vpack.c.bf16 %v3569_v63, %v3569_v63  ;;  %v3360_v49 = vpop.f32.mrf.mxu2  ;;  %v3449_v24 = vpop.f32.mrf.mxu3  ;;  %v4142_v46 = vld [vmem:[#allocation2 + $0x70] sm:$0xf]  ;;  %v5496_v47 = vsel %vm9305_vm12, %v7836_v28, %v5495_v59 }
 0x315   : > { %4028 = vst [vmem:[#allocation2 + $0x78] sm:$0xf] %v4027_v8  ;;  %v3361_v23 = vadd.f32 %v9776_v50, %v3360_v49  ;;  %v4403_v36 = vsel %vm8812_vm9, %v4398_v31, %v4402_v39  ;;  %v4405_v35 = vshrl.u32 %v4142_v46, 16  ;;  %v9876_v58 = vld [vmem:[#allocation2 + $0x74] sm:$0x1]  ;;  %v4408_v15 = vshll.u32 %v4142_v46, 16 }
 0x316   : > { %4031 = vst [vmem:[#allocation2 + $0x7c] sm:$0x1] %v4030_v22  ;;  %v3746_v62 = vshrl.u32 %v3601_v60, 16  ;;  %v4686_v25 = vunpack.c.l.b16 %v4403_v36  ;;  %v3749_v12 = vshll.u32 %v3601_v60, 16  ;;  %v5499_v57 = vrot.slane %v9854_v56, 5 }
 0x317   : > { %v3450_v43 = vadd.f32 %v3449_v24, %v3361_v23  ;;  %v4407_v48 = vrot.slane %v4405_v35, 4  ;;  %v4410_v10 = vrot.slane %v4408_v15, 5  ;;  %v5363_v14 = vld [vmem:[#allocation2 + $0x70] sm:$0xe]  ;;  %v4414_v29 = vshll.u32 %v9876_v58, 16 }
 0x318   : > { %v3748_v13 = vrot.slane %v3746_v62, 7  ;;  %5184 = vmatmul.bf16.gmra.mxu2 %v7703_v18  ;;  %v4711_v54 = vpack.c.b16 %v4686_v25, %v4685_v11  ;;  %v5500_v28 = vsel %vm9305_vm12, %v7837_v27, %v5499_v57  ;;  %v7838_v2 = vrot.slane %v5363_v14, 9  ;;  %v4041_v11 = vld [vmem:[#allocation2 + $0x8c] sm:$0x1]  ;;  %v8081_v25 = vld [vmem:[#allocation2 + $0x24] sm:$0xf0] }
 0x319   : > { %vm3505_vm4 = vcmp.ge.f32.partialorder %v3450_v43, 0.0  ;;  %v3538_v17 = vmul.f32 %v9547_v41, %v3450_v43  ;;  %5273 = vmatmul.bf16.gmra.mxu3 %v7703_v18  ;;  %v4411_v53 = vor.u32 %v4410_v10, %v4407_v48  ;;  %v5603_v45 = vunpack.c.l.b16 %v5500_v28  ;;  %v4038_v18 = vld [vmem:[#allocation2 + $0x88] sm:$0xf] }
 0x31a   : > { %v3751_v30 = vor.u32 %v3749_v12, %v3748_v13  ;;  %v3752_v20 = vrot.slane %v3748_v13, 4  ;;  %v5602_v39 = vunpack.c.l.b16 %v5496_v47  ;;  %v4416_v21 = vrot.slane %v4414_v29, 5 }
 0x31b   : > { %v3570_v59 = vsel %vm3505_vm4, %v3450_v43, %v3538_v17  ;;  %v4412_v40 = vrot.slane %v4411_v53, 4  ;;  %v5503_v8 = vrot.slane %v9876_v58, 5 }
 0x31c   : > { %v4033_v56 = vsel %vm8775_vm6, %v3751_v30, %v4032_v38  ;;  %v4036_v34 = vsel %vm8732_vm3, %v3752_v20, %v4035_v32  ;;  %v3602_v6 = vpack.c.bf16 %v3570_v59, %v3570_v59  ;;  %4855 = vmatmul.bf16.gmra.mxu0 %v4711_v54  ;;  %4944 = vmatmul.bf16.gmra.mxu1 %v4711_v54  ;;  %v3363_v37 = vpop.f32.mrf.mxu2  ;;  %v3452_v44 = vpop.f32.mrf.mxu3  ;;  %v4143_v16 = vld [vmem:[#allocation2 + $0x78] sm:$0xf]  ;;  %v7706_v54 = vld [vmem:[#allocation2 + $0x20] sm:$0xf] }
 0x31d   : > { %4034 = vst [vmem:[#allocation2 + $0x80] sm:$0xf] %v4033_v56  ;;  %v3364_v51 = vadd.f32 %v9776_v50, %v3363_v37  ;;  %v4191_v7 = vld [vmem:[#allocation2 + $0x7c] sm:$0x1]  ;;  %v4419_v63 = vshrl.u32 %v4143_v16, 16  ;;  %v4422_v4 = vshll.u32 %v4143_v16, 16  ;;  %v9891_v24 = vpack.c.b16 %v5603_v45, %v5602_v39 }
 0x31e   : > { %4037 = vst [vmem:[#allocation2 + $0x84] sm:$0x1] %v4036_v34  ;;  %v3754_v42 = vshrl.u32 %v3602_v6, 16  ;;  %v4428_v49 = vshll.u32 %v4191_v7, 16  ;;  %v5364_v0 = vld [vmem:[#allocation2 + $0x78] sm:$0xe]  ;;  %v4417_v36 = vsel %vm8812_vm9, %v4412_v40, %v4416_v21  ;;  %v5504_v12 = vsel %vm9305_vm12, %v7838_v2, %v5503_v8 }
 0x31f   : > { %v3453_v22 = vadd.f32 %v3452_v44, %v3364_v51  ;;  %v4421_v60 = vrot.slane %v4419_v63, 4  ;;  %v3757_v46 = vshll.u32 %v3602_v6, 16  ;;  %v4424_v23 = vrot.slane %v4422_v4, 5  ;;  %v7882_v2 = vld [vmem:[#allocation10 + $0x130] sm:$0xf] }
 0x320   : > { %v3756_v31 = vrot.slane %v3754_v42, 7  ;;  %v7839_v35 = vrot.slane %v5364_v0, 9  ;;  %v5507_v15 = vrot.slane %v4191_v7, 5  ;;  %v4430_v13 = vrot.slane %v4428_v49, 5  ;;  %v8134_v51 = vld [vmem:[#allocation10 + $0x134] sm:$0xf0] }
 0x321   : > { %vm3506_vm7 = vcmp.ge.f32.partialorder %v3453_v22, 0.0  ;;  %v3539_v62 = vmul.f32 %v9547_v41, %v3453_v22  ;;  %v4425_v58 = vor.u32 %v4424_v23, %v4421_v60  ;;  %v7707_v20 = vor.u32 %v8081_v25, %v7706_v54  ;;  %v4044_v42 = vld [vmem:[#allocation2 + $0x90] sm:$0xf]  ;;  %v4047_v21 = vld [vmem:[#allocation2 + $0x94] sm:$0x1] }
 0x322   : > { %v3759_v27 = vor.u32 %v3757_v46, %v3756_v31  ;;  %v3760_v43 = vrot.slane %v3756_v31, 4  ;;  %v4687_v29 = vunpack.c.l.b16 %v4417_v36  ;;  %v5508_v28 = vsel %vm9305_vm12, %v7839_v35, %v5507_v15 }
 0x323   : > { %v3571_v47 = vsel %vm3506_vm7, %v3453_v22, %v3539_v62  ;;  %v4426_v10 = vrot.slane %v4425_v58, 4  ;;  %v5604_v34 = vunpack.c.l.b16 %v5504_v12  ;;  %v7883_v63 = vor.u32 %v8134_v51, %v7882_v2  ;;  %v8082_v2 = vld [vmem:[#allocation2 + $0x34] sm:$0xf0] }
 0x324   : > { %v4039_v38 = vsel %vm8775_vm6, %v3759_v27, %v4038_v18  ;;  %v4042_v48 = vsel %vm8732_vm3, %v3760_v43, %v4041_v11  ;;  %v3603_v57 = vpack.c.bf16 %v3571_v47, %v3571_v47  ;;  %v3365_v32 = vpop.f32.mrf.mxu2  ;;  %v3454_v17 = vpop.f32.mrf.mxu3  ;;  %v4144_v14 = vld [vmem:[#allocation2 + $0x80] sm:$0xf]  ;;  %v5605_v39 = vunpack.c.l.b16 %v5508_v28 }
 0x325   : > { %4040 = vst [vmem:[#allocation2 + $0x88] sm:$0xf] %v4039_v38  ;;  %v3366_v30 = vadd.f32 %v9776_v50, %v3365_v32  ;;  %v4431_v53 = vsel %vm8812_vm9, %v4426_v10, %v4430_v13  ;;  %v9907_v45 = vld [vmem:[#allocation2 + $0x84] sm:$0x1]  ;;  %v4433_v56 = vshrl.u32 %v4144_v14, 16  ;;  %v4436_v16 = vshll.u32 %v4144_v14, 16  ;;  %5738 = vmatpush.bf16.msrb.mxu0 %v7883_v63 }
 0x326   : > { %4043 = vst [vmem:[#allocation2 + $0x8c] sm:$0x1] %v4042_v48  ;;  %v3762_v59 = vshrl.u32 %v3603_v57, 16  ;;  %v3765_v6 = vshll.u32 %v3603_v57, 16  ;;  %v4688_v44 = vunpack.c.l.b16 %v4431_v53  ;;  %v4442_v0 = vshll.u32 %v9907_v45, 16 }
 0x327   : > { %v3455_v37 = vadd.f32 %v3454_v17, %v3366_v30  ;;  %v4435_v40 = vrot.slane %v4433_v56, 4  ;;  %v4438_v22 = vrot.slane %v4436_v16, 5  ;;  %v9911_v31 = vpack.c.b16 %v5605_v39, %v5604_v34  ;;  %v5365_v18 = vld [vmem:[#allocation2 + $0x80] sm:$0xe]  ;;  %v4050_v57 = vld [vmem:[#allocation2 + $0x98] sm:$0xf] }
 0x328   : > { %v3764_v7 = vrot.slane %v3762_v59, 7  ;;  %5189 = vmatmul.bf16.gmra.mxu2 %v7707_v20  ;;  %v4712_v8 = vpack.c.b16 %v4688_v44, %v4687_v29  ;;  %v4444_v12 = vrot.slane %v4442_v0, 5  ;;  %v7840_v48 = vrot.slane %v5365_v18, 9  ;;  %v8133_v10 = vld [vmem:[#allocation10 + $0x134] sm:$0xf] }
 0x329   : > { %vm3507_vm8 = vcmp.ge.f32.partialorder %v3455_v37, 0.0  ;;  %v3540_v4 = vmul.f32 %v9547_v41, %v3455_v37  ;;  %5278 = vmatmul.bf16.gmra.mxu3 %v7707_v20  ;;  %v4439_v23 = vor.u32 %v4438_v22, %v4435_v40  ;;  %v5511_v14 = vrot.slane %v9907_v45, 5  ;;  %v7884_v59 = vld [vmem:[#allocation10 + $0x138] sm:$0xf0]  ;;  %v7710_v22 = vld [vmem:[#allocation2 + $0x30] sm:$0xf] }
 0x32a   : > { %v3767_v60 = vor.u32 %v3765_v6, %v3764_v7  ;;  %v3768_v49 = vrot.slane %v3764_v7, 4  ;;  %v4053_v53 = vld [vmem:[#allocation2 + $0x9c] sm:$0x1]  ;;  %v7887_v34 = vor.u32 %v8133_v10, %v7884_v59 }
 0x32b   : > { %v3572_v46 = vsel %vm3507_vm8, %v3455_v37, %v3540_v4  ;;  %v4440_v15 = vrot.slane %v4439_v23, 4  ;;  %v5512_v63 = vsel %vm9305_vm12, %v7840_v48, %v5511_v14 }
 0x32c   : > { %v4045_v11 = vsel %vm8775_vm6, %v3767_v60, %v4044_v42  ;;  %v4048_v62 = vsel %vm8732_vm3, %v3768_v49, %v4047_v21  ;;  %v3604_v36 = vpack.c.bf16 %v3572_v46, %v3572_v46  ;;  %4860 = vmatmul.bf16.gmra.mxu0 %v4712_v8  ;;  %4949 = vmatmul.bf16.gmra.mxu1 %v4712_v8  ;;  %v3368_v35 = vpop.f32.mrf.mxu2  ;;  %v3457_v27 = vpop.f32.mrf.mxu3  ;;  %v4145_v43 = vld [vmem:[#allocation2 + $0x88] sm:$0xf] }
 0x32d   : > { %4046 = vst [vmem:[#allocation2 + $0x90] sm:$0xf] %v4045_v11  ;;  %v3369_v25 = vadd.f32 %v9776_v50, %v3368_v35  ;;  %v4193_v58 = vld [vmem:[#allocation2 + $0x8c] sm:$0x1]  ;;  %v4447_v47 = vshrl.u32 %v4145_v43, 16  ;;  %v4450_v38 = vshll.u32 %v4145_v43, 16  ;;  %v4445_v29 = vsel %vm8812_vm9, %v4440_v15, %v4444_v12  ;;  %5827 = vmatpush.bf16.msrb.mxu1 %v7887_v34 }
 0x32e   : > { %4049 = vst [vmem:[#allocation2 + $0x94] sm:$0x1] %v4048_v62  ;;  %v3770_v13 = vshrl.u32 %v3604_v36, 16  ;;  %v4456_v54 = vshll.u32 %v4193_v58, 16  ;;  %v3773_v20 = vshll.u32 %v3604_v36, 16  ;;  %v5515_v37 = vrot.slane %v4193_v58, 5 }
 0x32f   : > { %v3458_v32 = vadd.f32 %v3457_v27, %v3369_v25  ;;  %v4449_v17 = vrot.slane %v4447_v47, 4  ;;  %v4452_v28 = vrot.slane %v4450_v38, 5  ;;  %v5366_v6 = vld [vmem:[#allocation2 + $0x88] sm:$0xe]  ;;  %v7711_v46 = vor.u32 %v8082_v2, %v7710_v22  ;;  %v8150_v36 = vld [vmem:[#allocation11 + $0x38] sm:$0xff] }
 0x330   : > { %v3772_v30 = vrot.slane %v3770_v13, 7  ;;  %v7841_v7 = vrot.slane %v5366_v6, 9  ;;  %v4458_v40 = vrot.slane %v4456_v54, 5  ;;  %v4689_v23 = vunpack.c.l.b16 %v4445_v29  ;;  %v8158_v35 = vld [vmem:[#allocation11 + $0x78] sm:$0xff]  ;;  %v4056_v38 = vld [vmem:[#allocation2 + $0xa0] sm:$0xf]  ;;  %6140 = vmatpush.bf16.msrb.mxu2 %v8150_v36 }
 0x331   : > { %vm3508_vm10 = vcmp.ge.f32.partialorder %v3458_v32, 0.0  ;;  %v3541_v56 = vmul.f32 %v9547_v41, %v3458_v32  ;;  %v4453_v51 = vor.u32 %v4452_v28, %v4449_v17  ;;  %v5606_v27 = vunpack.c.l.b16 %v5512_v63  ;;  %6229 = vmatpush.bf16.msrb.mxu3 %v8158_v35  ;;  %v4062_v35 = vld [vmem:[#allocation2 + $0xa8] sm:$0xf] }
 0x332   : > { %v3775_v44 = vor.u32 %v3773_v20, %v3772_v30  ;;  %v3776_v16 = vrot.slane %v3772_v30, 4  ;;  %v5516_v18 = vsel %vm9305_vm12, %v7841_v7, %v5515_v37 }
 0x333   : > { %v3573_v45 = vsel %vm3508_vm10, %v3458_v32, %v3541_v56  ;;  %v4454_v60 = vrot.slane %v4453_v51, 4  ;;  %v5607_v43 = vunpack.c.l.b16 %v5516_v18 }
 0x334   : > { %v4051_v39 = vsel %vm8775_vm6, %v3775_v44, %v4050_v57  ;;  %v4054_v42 = vsel %vm8732_vm3, %v3776_v16, %v4053_v53  ;;  %v3605_v21 = vpack.c.bf16 %v3573_v45, %v3573_v45  ;;  %v3370_v4 = vpop.f32.mrf.mxu2  ;;  %v3459_v8 = vpop.f32.mrf.mxu3  ;;  %v4146_v49 = vld [vmem:[#allocation2 + $0x90] sm:$0xf]  ;;  %v4059_v57 = vld [vmem:[#allocation2 + $0xa4] sm:$0x1]  ;;  %v8083_v16 = vld [vmem:[#allocation2 + $0x44] sm:$0xf0] }
 0x335   : > { %4052 = vst [vmem:[#allocation2 + $0x98] sm:$0xf] %v4051_v39  ;;  %v3371_v0 = vadd.f32 %v9776_v50, %v3370_v4  ;;  %v4459_v62 = vsel %vm8812_vm9, %v4454_v60, %v4458_v40  ;;  %v4461_v15 = vshrl.u32 %v4146_v49, 16  ;;  %v4464_v47 = vshll.u32 %v4146_v49, 16  ;;  %v4194_v14 = vld [vmem:[#allocation2 + $0x94] sm:$0x1] }
 0x336   : > { %4055 = vst [vmem:[#allocation2 + $0x9c] sm:$0x1] %v4054_v42  ;;  %v3778_v11 = vshrl.u32 %v3605_v21, 16  ;;  %v4690_v58 = vunpack.c.l.b16 %v4459_v62  ;;  %v3781_v12 = vshll.u32 %v3605_v21, 16  ;;  %v9933_v48 = vpack.c.b16 %v5607_v43, %v5606_v27  ;;  %v5367_v53 = vld [vmem:[#allocation2 + $0x90] sm:$0xe] }
 0x337   : > { %v3460_v25 = vadd.f32 %v3459_v8, %v3371_v0  ;;  %v4463_v30 = vrot.slane %v4461_v15, 4  ;;  %v4466_v28 = vrot.slane %v4464_v47, 5  ;;  %v4470_v51 = vshll.u32 %v4194_v14, 16  ;;  %v7714_v60 = vld [vmem:[#allocation2 + $0x40] sm:$0xf] }
 0x338   : > { %v3780_v13 = vrot.slane %v3778_v11, 7  ;;  %5194 = vmatmul.bf16.gmra.mxu2 %v7711_v46  ;;  %v4713_v10 = vpack.c.b16 %v4690_v58, %v4689_v23  ;;  %v7842_v4 = vrot.slane %v5367_v53, 9  ;;  %v5519_v8 = vrot.slane %v4194_v14, 5  ;;  %v4065_v27 = vld [vmem:[#allocation2 + $0xac] sm:$0x1] }
 0x339   : > { %vm3509_vm11 = vcmp.ge.f32.partialorder %v3460_v25, 0.0  ;;  %v3542_v32 = vmul.f32 %v9547_v41, %v3460_v25  ;;  %v9936_v17 = vpop.f32.mrf.mxu0  ;;  %v9938_v54 = vpop.f32.mrf.mxu1  ;;  %5283 = vmatmul.bf16.gmra.mxu3 %v7711_v46  ;;  %v4467_v40 = vor.u32 %v4466_v28, %v4463_v30  ;;  %v7715_v11 = vor.u32 %v8083_v16, %v7714_v60 }
 0x33a   : > { %v3783_v20 = vor.u32 %v3781_v12, %v3780_v13  ;;  %v3784_v29 = vrot.slane %v3780_v13, 4  ;;  %v4472_v15 = vrot.slane %v4470_v51, 5 }
 0x33b   : > { %v3574_v59 = vsel %vm3509_vm11, %v3460_v25, %v3542_v32  ;;  %v4468_v49 = vrot.slane %v4467_v40, 4  ;;  %vm6634_vm11 = vcmask 1045509  }
 0x33c   : > { %v4057_v56 = vsel %vm8775_vm6, %v3783_v20, %v4056_v38  ;;  %v4060_v34 = vsel %vm8732_vm3, %v3784_v29, %v4059_v57  ;;  %v3606_v6 = vpack.c.bf16 %v3574_v59, %v3574_v59  ;;  %4865 = vmatmul.bf16.gmra.mxu0 %v4713_v10  ;;  %4954 = vmatmul.bf16.gmra.mxu1 %v4713_v10  ;;  %v3373_v37 = vpop.f32.mrf.mxu2  ;;  %v3462_v44 = vpop.f32.mrf.mxu3  ;;  %v4147_v2 = vld [vmem:[#allocation2 + $0x98] sm:$0xf] }
 0x33d   : > { %4058 = vst [vmem:[#allocation2 + $0xa0] sm:$0xf] %v4057_v56  ;;  %v3374_v7 = vadd.f32 %v9776_v50, %v3373_v37  ;;  %v4195_v45 = vld [vmem:[#allocation2 + $0x9c] sm:$0x1]  ;;  %v4475_v63 = vshrl.u32 %v4147_v2, 16  ;;  %v4478_v39 = vshll.u32 %v4147_v2, 16  ;;  %v5520_v38 = vsel %vm9305_vm12, %v7842_v4, %v5519_v8 }
 0x33e   : > { %4061 = vst [vmem:[#allocation2 + $0xa4] sm:$0x1] %v4060_v34  ;;  %v3786_v42 = vshrl.u32 %v3606_v6, 16  ;;  %v4484_v21 = vshll.u32 %v4195_v45, 16  ;;  %v3789_v18 = vshll.u32 %v3606_v6, 16  ;;  %v5523_v36 = vrot.slane %v4195_v45, 5 }
 0x33f   : > { %v3463_v22 = vadd.f32 %v3462_v44, %v3374_v7  ;;  %v4477_v0 = vrot.slane %v4475_v63, 4  ;;  %v4480_v46 = vrot.slane %v4478_v39, 5  ;;  %v5368_v62 = vld [vmem:[#allocation2 + $0x98] sm:$0xe]  ;;  %v4473_v10 = vsel %vm8812_vm9, %v4468_v49, %v4472_v15  ;;  %v8132_v4 = vld [vmem:[#allocation10 + $0x124] sm:$0xf0] }
 0x340   : > { %v3788_v23 = vrot.slane %v3786_v42, 7  ;;  %v7843_v57 = vrot.slane %v5368_v62, 9  ;;  %v4486_v30 = vrot.slane %v4484_v21, 5  ;;  %v5608_v44 = vunpack.c.l.b16 %v5520_v38  ;;  %v7874_v21 = vld [vmem:[#allocation10 + $0x120] sm:$0xf] }
 0x341   : > { %vm3510_vm13 = vcmp.ge.f32.partialorder %v3463_v22, 0.0  ;;  %v3543_v43 = vmul.f32 %v9547_v41, %v3463_v22  ;;  %v9946_v25 = vpop.f32.mrf.mxu0  ;;  %v9948_v58 = vpop.f32.mrf.mxu1  ;;  %v4481_v47 = vor.u32 %v4480_v46, %v4477_v0  ;;  %v4691_v51 = vunpack.c.l.b16 %v4473_v10  ;;  %v4068_v0 = vld [vmem:[#allocation2 + $0xb0] sm:$0xf]  ;;  %v4071_v46 = vld [vmem:[#allocation2 + $0xb4] sm:$0x1] }
 0x342   : > { %v3791_v13 = vor.u32 %v3789_v18, %v3788_v23  ;;  %v3792_v12 = vrot.slane %v3788_v23, 4  ;;  %v5524_v34 = vsel %vm9305_vm12, %v7843_v57, %v5523_v36  ;;  %v7875_v49 = vor.u32 %v8132_v4, %v7874_v21  ;;  %v4077_v21 = vld [vmem:[#allocation2 + $0xbc] sm:$0x1] }
 0x343   : > { %v3575_v32 = vsel %vm3510_vm13, %v3463_v22, %v3543_v43  ;;  %v4482_v14 = vrot.slane %v4481_v47, 4  ;;  %v5609_v16 = vunpack.c.l.b16 %v5524_v34  ;;  %vm6636_vm13 = vcmask 1046534  }
 0x344   : > { %v4063_v20 = vsel %vm8775_vm6, %v3791_v13, %v4062_v35  ;;  %v4066_v29 = vsel %vm8732_vm3, %v3792_v12, %v4065_v27  ;;  %v3607_v28 = vpack.c.bf16 %v3575_v32, %v3575_v32  ;;  %v3375_v59 = vpop.f32.mrf.mxu2  ;;  %v3464_v53 = vpop.f32.mrf.mxu3  ;;  %v4148_v56 = vld [vmem:[#allocation2 + $0xa0] sm:$0xf]  ;;  %5739 = vmatpush.bf16.msrb.mxu0 %v7875_v49 }
 0x345   : > { %4064 = vst [vmem:[#allocation2 + $0xa8] sm:$0xf] %v4063_v20  ;;  %v3376_v6 = vadd.f32 %v9776_v50, %v3375_v59  ;;  %v4487_v37 = vsel %vm8812_vm9, %v4482_v14, %v4486_v30  ;;  %v9963_v45 = vld [vmem:[#allocation2 + $0xa4] sm:$0x1]  ;;  %v4489_v40 = vshrl.u32 %v4148_v56, 16  ;;  %v4492_v42 = vshll.u32 %v4148_v56, 16 }
 0x346   : > { %4067 = vst [vmem:[#allocation2 + $0xac] sm:$0x1] %v4066_v29  ;;  %v3794_v2 = vshrl.u32 %v3607_v28, 16  ;;  %v4692_v7 = vunpack.c.l.b16 %v4487_v37  ;;  %v3797_v63 = vshll.u32 %v3607_v28, 16  ;;  %v9965_v8 = vpack.c.b16 %v5609_v16, %v5608_v44  ;;  %v5369_v13 = vld [vmem:[#allocation2 + $0xa0] sm:$0xe] }
 0x347   : > { %v3465_v39 = vadd.f32 %v3464_v53, %v3376_v6  ;;  %v4491_v60 = vrot.slane %v4489_v40, 4  ;;  %v4494_v36 = vrot.slane %v4492_v42, 5  ;;  %v4498_v43 = vshll.u32 %v9963_v45, 16  ;;  %v9980_v14 = vld [vmem:[%s10977_s3] ss:$0 sm:$0xff] }
 0x348   : > { %v3796_v50 = vrot.slane %v3794_v2, 7  ;;  %5199 = vmatmul.bf16.gmra.mxu2 %v7715_v11  ;;  %v4714_v22 = vpack.c.b16 %v4692_v7, %v4691_v51  ;;  %v7844_v34 = vrot.slane %v5369_v13, 9  ;;  %v4074_v6 = vld [vmem:[#allocation2 + $0xb8] sm:$0xf]  ;;  %v8131_v2 = vld [vmem:[#allocation10 + $0x124] sm:$0xf] }
 0x349   : > { %vm3511_vm14 = vcmp.ge.f32.partialorder %v3465_v39, 0.0  ;;  %v3544_v23 = vmul.f32 %v9547_v41, %v3465_v39  ;;  %v9968_v18 = vpop.f32.mrf.mxu0  ;;  %v9970_v62 = vpop.f32.mrf.mxu1  ;;  %5288 = vmatmul.bf16.gmra.mxu3 %v7715_v11  ;;  %v4495_v47 = vor.u32 %v4494_v36, %v4491_v60  ;;  %v4500_v53 = vrot.slane %v4498_v43, 5  ;;  %v7876_v42 = vld [vmem:[#allocation10 + $0x128] sm:$0xf0] }
 0x34a   : > { %v3799_v35 = vor.u32 %v3797_v63, %v3796_v50  ;;  %v3800_v27 = vrot.slane %v3796_v50, 4  ;;  %v5527_v51 = vrot.slane %v9963_v45, 5  ;;  %v7879_v60 = vor.u32 %v8131_v2, %v7876_v42  ;;  %v4083_v42 = vld [vmem:[#allocation2 + $0xc4] sm:$0x1] }
 0x34b   : > { %v3576_v15 = vsel %vm3511_vm14, %v3465_v39, %v3544_v23  ;;  %v4496_v29 = vrot.slane %v4495_v47, 4  ;;  %v8084_v23 = vld [vmem:[#allocation2 + $0x54] sm:$0xf0]  ;;  %vm6638_vm14 = vcmask 1047559  }
 0x34c   : > { %v4069_v12 = vsel %vm8775_vm6, %v3799_v35, %v4068_v0  ;;  %v4072_v38 = vsel %vm8732_vm3, %v3800_v27, %v4071_v46  ;;  %v3608_v57 = vpack.c.bf16 %v3576_v15, %v3576_v15  ;;  %4870 = vmatmul.bf16.gmra.mxu0 %v4714_v22  ;;  %4959 = vmatmul.bf16.gmra.mxu1 %v4714_v22  ;;  %v3378_v32 = vpop.f32.mrf.mxu2  ;;  %v3467_v11 = vpop.f32.mrf.mxu3  ;;  %v4149_v10 = vld [vmem:[#allocation2 + $0xa8] sm:$0xf] }
 0x34d   : > { %4070 = vst [vmem:[#allocation2 + $0xb0] sm:$0xf] %v4069_v12  ;;  %v3379_v30 = vadd.f32 %v9980_v14, %v3378_v32  ;;  %v4197_v20 = vld [vmem:[#allocation2 + $0xac] sm:$0x1]  ;;  %v4503_v28 = vshrl.u32 %v4149_v10, 16  ;;  %v4506_v56 = vshll.u32 %v4149_v10, 16  ;;  %v4501_v63 = vsel %vm8812_vm9, %v4496_v29, %v4500_v53  ;;  %5828 = vmatpush.bf16.msrb.mxu1 %v7879_v60 }
 0x34e   : > { %4073 = vst [vmem:[#allocation2 + $0xb4] sm:$0x1] %v4072_v38  ;;  %v3802_v59 = vshrl.u32 %v3608_v57, 16  ;;  %v4512_v16 = vshll.u32 %v4197_v20, 16  ;;  %v3805_v40 = vshll.u32 %v3608_v57, 16  ;;  %v5531_v0 = vrot.slane %v4197_v20, 5 }
 0x34f   : > { %v3468_v37 = vadd.f32 %v3467_v11, %v3379_v30  ;;  %v4505_v44 = vrot.slane %v4503_v28, 4  ;;  %v4508_v39 = vrot.slane %v4506_v56, 5  ;;  %v5370_v49 = vld [vmem:[#allocation2 + $0xa8] sm:$0xe]  ;;  %v5528_v15 = vsel %vm9305_vm12, %v7844_v34, %v5527_v51  ;;  %v7718_v32 = vld [vmem:[#allocation2 + $0x50] sm:$0xf] }
 0x350   : > { %v3804_v7 = vrot.slane %v3802_v59, 7  ;;  %v7845_v35 = vrot.slane %v5370_v49, 9  ;;  %v4514_v43 = vrot.slane %v4512_v16, 5  ;;  %v7719_v20 = vor.u32 %v8084_v23, %v7718_v32  ;;  %v8149_v56 = vld [vmem:[#allocation11 + $0x30] sm:$0xff] }
 0x351   : > { %vm3512_vm15 = vcmp.ge.f32.partialorder %v3468_v37, 0.0  ;;  %v3545_v4 = vmul.f32 %v9547_v41, %v3468_v37  ;;  %v9987_v50 = vpop.f32.mrf.mxu0  ;;  %v9989_v22 = vpop.f32.mrf.mxu1  ;;  %v4509_v36 = vor.u32 %v4508_v39, %v4505_v44  ;;  %v4693_v29 = vunpack.c.l.b16 %v4501_v63  ;;  %v8157_v34 = vld [vmem:[#allocation11 + $0x70] sm:$0xff]  ;;  %v4080_v39 = vld [vmem:[#allocation2 + $0xc0] sm:$0xf]  ;;  %6141 = vmatpush.bf16.msrb.mxu2 %v8149_v56 }
 0x352   : > { %v3807_v46 = vor.u32 %v3805_v40, %v3804_v7  ;;  %v3808_v45 = vrot.slane %v3804_v7, 4  ;;  %v5532_v28 = vsel %vm9305_vm12, %v7845_v35, %v5531_v0  ;;  %6230 = vmatpush.bf16.msrb.mxu3 %v8157_v34 }
 0x353   : > { %v3577_v27 = vsel %vm3512_vm15, %v3468_v37, %v3545_v4  ;;  %v4510_v11 = vrot.slane %v4509_v36, 4  ;;  %v5611_v37 = vunpack.c.l.b16 %v5532_v28 }
 0x354   : > { %v4075_v47 = vsel %vm8775_vm6, %v3807_v46, %v4074_v6  ;;  %v4078_v13 = vsel %vm8732_vm3, %v3808_v45, %v4077_v21  ;;  %v3609_v12 = vpack.c.bf16 %v3577_v27, %v3577_v27  ;;  %v3380_v38 = vpop.f32.mrf.mxu2  ;;  %v3469_v57 = vpop.f32.mrf.mxu3  ;;  %v4150_v10 = vld [vmem:[#allocation2 + $0xb0] sm:$0xf]  ;;  %v5610_v6 = vunpack.c.l.b16 %v5528_v15 }
 0x355   : > { %4076 = vst [vmem:[#allocation2 + $0xb8] sm:$0xf] %v4075_v47  ;;  %v3381_v30 = vadd.f32 %v9980_v14, %v3380_v38  ;;  %v4515_v53 = vsel %vm8812_vm9, %v4510_v11, %v4514_v43  ;;  %v4517_v2 = vshrl.u32 %v4150_v10, 16  ;;  %v4520_v51 = vshll.u32 %v4150_v10, 16  ;;  %v4198_v0 = vld [vmem:[#allocation2 + $0xb4] sm:$0x1] }
 0x356   : > { %4079 = vst [vmem:[#allocation2 + $0xbc] sm:$0x1] %v4078_v13  ;;  %v3810_v59 = vshrl.u32 %v3609_v12, 16  ;;  %v4694_v16 = vunpack.c.l.b16 %v4515_v53  ;;  %v3813_v40 = vshll.u32 %v3609_v12, 16  ;;  %v10002_v63 = vpack.c.b16 %v5611_v37, %v5610_v6  ;;  %v5371_v27 = vld [vmem:[#allocation2 + $0xb0] sm:$0xe] }
 0x357   : > { %v3470_v44 = vadd.f32 %v3469_v57, %v3381_v30  ;;  %v4519_v46 = vrot.slane %v4517_v2, 4  ;;  %v4522_v36 = vrot.slane %v4520_v51, 5  ;;  %v8085_v38 = vld [vmem:[#allocation2 + $0x64] sm:$0xf0]  ;;  %v4526_v32 = vshll.u32 %v4198_v0, 16 }
 0x358   : > { %v3812_v7 = vrot.slane %v3810_v59, 7  ;;  %5204 = vmatmul.bf16.gmra.mxu2 %v7719_v20  ;;  %v4715_v49 = vpack.c.b16 %v4694_v16, %v4693_v29  ;;  %v7846_v53 = vrot.slane %v5371_v27, 9  ;;  %v5535_v56 = vrot.slane %v4198_v0, 5  ;;  %v7722_v6 = vld [vmem:[#allocation2 + $0x60] sm:$0xf] }
 0x359   : > { %vm3513_vm0 = vcmp.ge.f32.partialorder %v3470_v44, 0.0  ;;  %v3546_v21 = vmul.f32 %v9547_v41, %v3470_v44  ;;  %v10005_v4 = vpop.f32.mrf.mxu0  ;;  %v10007_v60 = vpop.f32.mrf.mxu1  ;;  %5293 = vmatmul.bf16.gmra.mxu3 %v7719_v20  ;;  %v4523_v30 = vor.u32 %v4522_v36, %v4519_v46  ;;  %v4528_v0 = vrot.slane %v4526_v32, 5 }
 0x35a   : > { %v3815_v45 = vor.u32 %v3813_v40, %v3812_v7  ;;  %v3816_v23 = vrot.slane %v3812_v7, 4  ;;  %v7723_v7 = vor.u32 %v8085_v38, %v7722_v6  ;;  %v5536_v27 = vsel %vm9305_vm12, %v7846_v53, %v5535_v56 }
 0x35b   : > { %v3578_v35 = vsel %vm3513_vm0, %v3470_v44, %v3546_v21  ;;  %v4524_v37 = vrot.slane %v4523_v30, 4  ;;  %v4089_v21 = vld [vmem:[#allocation2 + $0xcc] sm:$0x1] }
 0x35c   : > { %v4081_v43 = vsel %vm8775_vm6, %v3815_v45, %v4080_v39  ;;  %v4084_v15 = vsel %vm8732_vm3, %v3816_v23, %v4083_v42  ;;  %v3610_v47 = vpack.c.bf16 %v3578_v35, %v3578_v35  ;;  %4875 = vmatmul.bf16.gmra.mxu0 %v4715_v49  ;;  %4964 = vmatmul.bf16.gmra.mxu1 %v4715_v49  ;;  %v3383_v13 = vpop.f32.mrf.mxu2  ;;  %v3472_v12 = vpop.f32.mrf.mxu3  ;;  %v4151_v57 = vld [vmem:[#allocation2 + $0xb8] sm:$0xf]  ;;  %v4086_v42 = vld [vmem:[#allocation2 + $0xc8] sm:$0xf] }
 0x35d   : > { %4082 = vst [vmem:[#allocation2 + $0xc0] sm:$0xf] %v4081_v43  ;;  %v3384_v11 = vadd.f32 %v9980_v14, %v3383_v13  ;;  %v4199_v10 = vld [vmem:[#allocation2 + $0xbc] sm:$0x1]  ;;  %v4531_v20 = vshrl.u32 %v4151_v57, 16  ;;  %v4534_v29 = vshll.u32 %v4151_v57, 16 }
 0x35e   : > { %4085 = vst [vmem:[#allocation2 + $0xc4] sm:$0x1] %v4084_v15  ;;  %v3818_v28 = vshrl.u32 %v3610_v47, 16  ;;  %v4540_v59 = vshll.u32 %v4199_v10, 16  ;;  %v3821_v51 = vshll.u32 %v3610_v47, 16  ;;  %v5539_v39 = vrot.slane %v4199_v10, 5 }
 0x35f   : > { %v3473_v34 = vadd.f32 %v3472_v12, %v3384_v11  ;;  %v4533_v44 = vrot.slane %v4531_v20, 4  ;;  %v4536_v16 = vrot.slane %v4534_v29, 5  ;;  %v5372_v40 = vld [vmem:[#allocation2 + $0xb8] sm:$0xe]  ;;  %v4529_v47 = vsel %vm8812_vm9, %v4524_v37, %v4528_v0 }
 0x360   : > { %v3820_v2 = vrot.slane %v3818_v28, 7  ;;  %v7847_v43 = vrot.slane %v5372_v40, 9  ;;  %v4542_v12 = vrot.slane %v4540_v59, 5  ;;  %v5612_v59 = vunpack.c.l.b16 %v5536_v27  ;;  %v7866_v40 = vld [vmem:[#allocation10 + $0x110] sm:$0xf] }
 0x361   : > { %vm3514_vm1 = vcmp.ge.f32.partialorder %v3473_v34, 0.0  ;;  %v3547_v49 = vmul.f32 %v9547_v41, %v3473_v34  ;;  %v10015_v46 = vpop.f32.mrf.mxu0  ;;  %v10017_v45 = vpop.f32.mrf.mxu1  ;;  %v4537_v23 = vor.u32 %v4536_v16, %v4533_v44 }
 0x362   : > { %v3823_v36 = vor.u32 %v3821_v51, %v3820_v2  ;;  %v3824_v35 = vrot.slane %v3820_v2, 4  ;;  %v5540_v20 = vsel %vm9305_vm12, %v7847_v43, %v5539_v39  ;;  %v8130_v39 = vld [vmem:[#allocation10 + $0x114] sm:$0xf0] }
 0x363   : > { %v3579_v15 = vsel %vm3514_vm1, %v3473_v34, %v3547_v49  ;;  %v4538_v13 = vrot.slane %v4537_v23, 4  ;;  %v5613_v53 = vunpack.c.l.b16 %v5540_v20  ;;  %v4695_v34 = vunpack.c.l.b16 %v4529_v47 }
 0x364   : > { %v4087_v38 = vsel %vm8775_vm6, %v3823_v36, %v4086_v42  ;;  %v4090_v57 = vsel %vm8732_vm3, %v3824_v35, %v4089_v21  ;;  %v3611_v32 = vpack.c.bf16 %v3579_v15, %v3579_v15  ;;  %v3385_v11 = vpop.f32.mrf.mxu2  ;;  %v3474_v10 = vpop.f32.mrf.mxu3  ;;  %v4152_v30 = vld [vmem:[#allocation2 + $0xc0] sm:$0xf]  ;;  %v7867_v23 = vor.u32 %v8130_v39, %v7866_v40  ;;  %v4092_v36 = vld [vmem:[#allocation2 + $0xd0] sm:$0xf]  ;;  %v4095_v35 = vld [vmem:[#allocation2 + $0xd4] sm:$0x1] }
 0x365   : > { %4088 = vst [vmem:[#allocation2 + $0xc8] sm:$0xf] %v4087_v38  ;;  %v3386_v29 = vadd.f32 %v9980_v14, %v3385_v11  ;;  %v4543_v28 = vsel %vm8812_vm9, %v4538_v13, %v4542_v12  ;;  %v10032_v37 = vld [vmem:[#allocation2 + $0xc4] sm:$0x1]  ;;  %v4545_v44 = vshrl.u32 %v4152_v30, 16  ;;  %v4548_v51 = vshll.u32 %v4152_v30, 16 }
 0x366   : > { %4091 = vst [vmem:[#allocation2 + $0xcc] sm:$0x1] %v4090_v57  ;;  %v3826_v56 = vshrl.u32 %v3611_v32, 16  ;;  %v4696_v6 = vunpack.c.l.b16 %v4543_v28  ;;  %v3829_v16 = vshll.u32 %v3611_v32, 16  ;;  %v10034_v42 = vpack.c.b16 %v5613_v53, %v5612_v59  ;;  %5740 = vmatpush.bf16.msrb.mxu0 %v7867_v23  ;;  %v5373_v11 = vld [vmem:[#allocation2 + $0xc0] sm:$0xe] }
 0x367   : > { %v3475_v2 = vadd.f32 %v3474_v10, %v3386_v29  ;;  %v4547_v0 = vrot.slane %v4545_v44, 4  ;;  %v4550_v47 = vrot.slane %v4548_v51, 5  ;;  %v4554_v38 = vshll.u32 %v10032_v37, 16  ;;  %v4098_v51 = vld [vmem:[#allocation2 + $0xd8] sm:$0xf] }
 0x368   : > { %v3828_v21 = vrot.slane %v3826_v56, 7  ;;  %5209 = vmatmul.bf16.gmra.mxu2 %v7723_v7  ;;  %v4716_v49 = vpack.c.b16 %v4696_v6, %v4695_v34 }
 0x369   : > { %vm3515_vm2 = vcmp.ge.f32.partialorder %v3475_v2, 0.0  ;;  %v3548_v27 = vmul.f32 %v9547_v41, %v3475_v2  ;;  %v10037_v43 = vpop.f32.mrf.mxu0  ;;  %v10039_v15 = vpop.f32.mrf.mxu1  ;;  %5298 = vmatmul.bf16.gmra.mxu3 %v7723_v7  ;;  %v4551_v32 = vor.u32 %v4550_v47, %v4547_v0  ;;  %v4556_v44 = vrot.slane %v4554_v38, 5  ;;  %v8129_v0 = vld [vmem:[#allocation10 + $0x114] sm:$0xf]  ;;  %v7868_v47 = vld [vmem:[#allocation10 + $0x118] sm:$0xf0] }
 0x36a   : > { %v3831_v13 = vor.u32 %v3829_v16, %v3828_v21  ;;  %v3832_v12 = vrot.slane %v3828_v21, 4 }
 0x36b   : > { %v3580_v57 = vsel %vm3515_vm2, %v3475_v2, %v3548_v27  ;;  %v4552_v56 = vrot.slane %v4551_v32, 4  ;;  %v7848_v2 = vrot.slane %v5373_v11, 9  ;;  %v7871_v32 = vor.u32 %v8129_v0, %v7868_v47  ;;  %v7726_v0 = vld [vmem:[#allocation2 + $0x70] sm:$0xf]  ;;  %v8156_v47 = vld [vmem:[#allocation11 + $0x68] sm:$0xff] }
 0x36c   : > { %v4093_v10 = vsel %vm8775_vm6, %v3831_v13, %v4092_v36  ;;  %v4096_v30 = vsel %vm8732_vm3, %v3832_v12, %v4095_v35  ;;  %v3612_v20 = vpack.c.bf16 %v3580_v57, %v3580_v57  ;;  %4880 = vmatmul.bf16.gmra.mxu0 %v4716_v49  ;;  %4969 = vmatmul.bf16.gmra.mxu1 %v4716_v49  ;;  %v3388_v29 = vpop.f32.mrf.mxu2  ;;  %v3477_v7 = vpop.f32.mrf.mxu3  ;;  %v4153_v28 = vld [vmem:[#allocation2 + $0xc8] sm:$0xf]  ;;  %v5543_v49 = vrot.slane %v10032_v37, 5  ;;  %v4101_v13 = vld [vmem:[#allocation2 + $0xdc] sm:$0x1] }
 0x36d   : > { %4094 = vst [vmem:[#allocation2 + $0xd0] sm:$0xf] %v4093_v10  ;;  %v3389_v59 = vadd.f32 %v9980_v14, %v3388_v29  ;;  %v4201_v53 = vld [vmem:[#allocation2 + $0xcc] sm:$0x1]  ;;  %v4559_v34 = vshrl.u32 %v4153_v28, 16  ;;  %v4562_v16 = vshll.u32 %v4153_v28, 16  ;;  %v4557_v35 = vsel %vm8812_vm9, %v4552_v56, %v4556_v44  ;;  %5829 = vmatpush.bf16.msrb.mxu1 %v7871_v32  ;;  %6231 = vmatpush.bf16.msrb.mxu3 %v8156_v47 }
 0x36e   : > { %4097 = vst [vmem:[#allocation2 + $0xd4] sm:$0x1] %v4096_v30  ;;  %v3834_v6 = vshrl.u32 %v3612_v20, 16  ;;  %v4568_v21 = vshll.u32 %v4201_v53, 16  ;;  %v3837_v36 = vshll.u32 %v3612_v20, 16  ;;  %v5547_v10 = vrot.slane %v4201_v53, 5 }
 0x36f   : > { %v3478_v40 = vadd.f32 %v3477_v7, %v3389_v59  ;;  %v4561_v39 = vrot.slane %v4559_v34, 4  ;;  %v4564_v27 = vrot.slane %v4562_v16, 5  ;;  %v5374_v11 = vld [vmem:[#allocation2 + $0xc8] sm:$0xe]  ;;  %v8086_v29 = vld [vmem:[#allocation2 + $0x74] sm:$0xf0]  ;;  %v5544_v56 = vsel %vm9305_vm12, %v7848_v2, %v5543_v49 }
 0x370   : > { %v3836_v23 = vrot.slane %v3834_v6, 7  ;;  %v7849_v7 = vrot.slane %v5374_v11, 9  ;;  %v4570_v59 = vrot.slane %v4568_v21, 5  ;;  %v4697_v21 = vunpack.c.l.b16 %v4557_v35 }
 0x371   : > { %vm3516_vm4 = vcmp.ge.f32.partialorder %v3478_v40, 0.0  ;;  %v3549_v12 = vmul.f32 %v9547_v41, %v3478_v40  ;;  %v10051_v38 = vpop.f32.mrf.mxu0  ;;  %v10053_v57 = vpop.f32.mrf.mxu1  ;;  %v4565_v20 = vor.u32 %v4564_v27, %v4561_v39  ;;  %v7727_v39 = vor.u32 %v8086_v29, %v7726_v0  ;;  %v8148_v27 = vld [vmem:[#allocation11 + $0x28] sm:$0xff]  ;;  %v4104_v29 = vld [vmem:[#allocation2 + $0xe0] sm:$0xf] }
 0x372   : > { %11127 = vst [vmem:[#allocation23_spill] sm:$0xff] %v10051_v38  ;;  %v3839_v30 = vor.u32 %v3837_v36, %v3836_v23  ;;  %v3840_v37 = vrot.slane %v3836_v23, 4  ;;  %v5548_v2 = vsel %vm9305_vm12, %v7849_v7, %v5547_v10  ;;  %v4107_v7 = vld [vmem:[#allocation2 + $0xe4] sm:$0x1]  ;;  %6142 = vmatpush.bf16.msrb.mxu2 %v8148_v27 }
 0x373   : > { %11128 = vst [vmem:[#allocation24_spill] sm:$0xff] %v10053_v57  ;;  %v3581_v28 = vsel %vm3516_vm4, %v3478_v40, %v3549_v12  ;;  %v4566_v23 = vrot.slane %v4565_v20, 4  ;;  %v5615_v12 = vunpack.c.l.b16 %v5548_v2 }
 0x374   : > { %v4099_v34 = vsel %vm8775_vm6, %v3839_v30, %v4098_v51  ;;  %v4102_v6 = vsel %vm8732_vm3, %v3840_v37, %v4101_v13  ;;  %v3613_v44 = vpack.c.bf16 %v3581_v28, %v3581_v28  ;;  %v3390_v16 = vpop.f32.mrf.mxu2  ;;  %v3479_v53 = vpop.f32.mrf.mxu3  ;;  %v4154_v36 = vld [vmem:[#allocation2 + $0xd0] sm:$0xf]  ;;  %v5614_v13 = vunpack.c.l.b16 %v5544_v56 }
 0x375   : > { %4100 = vst [vmem:[#allocation2 + $0xd8] sm:$0xf] %v4099_v34  ;;  %v3391_v40 = vadd.f32 %v9980_v14, %v3390_v16  ;;  %v4571_v51 = vsel %vm8812_vm9, %v4566_v23, %v4570_v59  ;;  %v4573_v30 = vshrl.u32 %v4154_v36, 16  ;;  %v4576_v37 = vshll.u32 %v4154_v36, 16  ;;  %v10066_v35 = vld [vmem:[#allocation2 + $0xd4] sm:$0x1] }
 0x376   : > { %4103 = vst [vmem:[#allocation2 + $0xdc] sm:$0x1] %v4102_v6  ;;  %v3842_v49 = vshrl.u32 %v3613_v44, 16  ;;  %v4698_v11 = vunpack.c.l.b16 %v4571_v51  ;;  %v3845_v28 = vshll.u32 %v3613_v44, 16  ;;  %v10068_v10 = vpack.c.b16 %v5615_v12, %v5614_v13  ;;  %v7730_v36 = vld [vmem:[#allocation2 + $0x80] sm:$0xf] }
 0x377   : > { %v3480_v32 = vadd.f32 %v3479_v53, %v3391_v40  ;;  %v4575_v16 = vrot.slane %v4573_v30, 4  ;;  %v4578_v0 = vrot.slane %v4576_v37, 5  ;;  %v8087_v40 = vld [vmem:[#allocation2 + $0x84] sm:$0xf0]  ;;  %v4582_v2 = vshll.u32 %v10066_v35, 16 }
 0x378   : > { %v3844_v20 = vrot.slane %v3842_v49, 7  ;;  %5214 = vmatmul.bf16.gmra.mxu2 %v7727_v39  ;;  %11129 = vst [vmem:[#allocation29_spill] sm:$0xff] %v10068_v10  ;;  %v4717_v6 = vpack.c.b16 %v4698_v11, %v4697_v21  ;;  %v10076_v49 = vld [vmem:[#allocation2 + $0xd0] sm:$0xe]  ;;  %v7858_v12 = vld [vmem:[#allocation10 + $0x100] sm:$0xf] }
 0x379   : > { %vm3517_vm7 = vcmp.ge.f32.partialorder %v3480_v32, 0.0  ;;  %v3550_v59 = vmul.f32 %v9547_v41, %v3480_v32  ;;  %v10071_v34 = vpop.f32.mrf.mxu0  ;;  %v10073_v56 = vpop.f32.mrf.mxu1  ;;  %5303 = vmatmul.bf16.gmra.mxu3 %v7727_v39  ;;  %v4579_v37 = vor.u32 %v4578_v0, %v4575_v16  ;;  %v8127_v10 = vld [vmem:[#allocation10 + $0x104] sm:$0xf]  ;;  %v4584_v38 = vrot.slane %v4582_v2, 5  ;;  %v4113_v0 = vld [vmem:[#allocation2 + $0xec] sm:$0x1] }
 0x37a   : > { %11130 = vst [vmem:[#allocation27_spill] sm:$0xff] %v10071_v34  ;;  %v3847_v44 = vor.u32 %v3845_v28, %v3844_v20  ;;  %v3848_v53 = vrot.slane %v3844_v20, 4  ;;  %v7850_v16 = vrot.slane %v10076_v49, 9 }
 0x37b   : > { %11131 = vst [vmem:[#allocation30_spill] sm:$0xff] %v10073_v56  ;;  %v3582_v23 = vsel %vm3517_vm7, %v3480_v32, %v3550_v59  ;;  %v8128_v32 = vld [vmem:[#allocation10 + $0x104] sm:$0xf0]  ;;  %v10083_v59 = vor.u32 %v8087_v40, %v7730_v36 }
 0x37c   : > { %v4105_v51 = vsel %vm8775_vm6, %v3847_v44, %v4104_v29  ;;  %v4108_v47 = vsel %vm8732_vm3, %v3848_v53, %v4107_v7  ;;  %v3614_v39 = vpack.c.bf16 %v3582_v23, %v3582_v23  ;;  %4885 = vmatmul.bf16.gmra.mxu0 %v4717_v6  ;;  %4974 = vmatmul.bf16.gmra.mxu1 %v4717_v6  ;;  %v3393_v21 = vpop.f32.mrf.mxu2  ;;  %v3482_v27 = vpop.f32.mrf.mxu3  ;;  %v4155_v13 = vld [vmem:[#allocation2 + $0xd8] sm:$0xf]  ;;  %v4110_v53 = vld [vmem:[#allocation2 + $0xe8] sm:$0xf]  ;;  %v4580_v23 = vrot.slane %v4579_v37, 4 }
 0x37d   : > { %4106 = vst [vmem:[#allocation2 + $0xe0] sm:$0xf] %v4105_v51  ;;  %v3394_v11 = vadd.f32 %v9980_v14, %v3393_v21  ;;  %v4203_v30 = vld [vmem:[#allocation2 + $0xdc] sm:$0x1]  ;;  %v4587_v20 = vshrl.u32 %v4155_v13, 16  ;;  %v4590_v28 = vshll.u32 %v4155_v13, 16  ;;  %v7859_v44 = vor.u32 %v8128_v32, %v7858_v12 }
 0x37e   : > { %4109 = vst [vmem:[#allocation2 + $0xe4] sm:$0x1] %v4108_v47  ;;  %v3850_v29 = vshrl.u32 %v3614_v39, 16  ;;  %v4596_v7 = vshll.u32 %v4203_v30, 16  ;;  %v3853_v51 = vshll.u32 %v3614_v39, 16  ;;  %v5551_v12 = vrot.slane %v10066_v35, 5 }
 0x37f   : > { %v3483_v6 = vadd.f32 %v3482_v27, %v3394_v11  ;;  %v4589_v56 = vrot.slane %v4587_v20, 4  ;;  %v4592_v34 = vrot.slane %v4590_v28, 5  ;;  %5741 = vmatpush.bf16.msrb.mxu0 %v7859_v44  ;;  %v7860_v21 = vld [vmem:[#allocation10 + $0x108] sm:$0xf0]  ;;  %v5376_v13 = vld [vmem:[#allocation2 + $0xd8] sm:$0xe]  ;;  %v4585_v49 = vsel %vm8812_vm9, %v4580_v23, %v4584_v38 }
 0x380   : > { %v3852_v57 = vrot.slane %v3850_v29, 7  ;;  %v4598_v39 = vrot.slane %v4596_v7, 5  ;;  %v7863_v2 = vor.u32 %v8127_v10, %v7860_v21  ;;  %v7851_v28 = vrot.slane %v5376_v13, 9  ;;  %v8147_v21 = vld [vmem:[#allocation11 + $0x20] sm:$0xff] }
 0x381   : > { %vm3518_vm8 = vcmp.ge.f32.partialorder %v3483_v6, 0.0  ;;  %v3551_v36 = vmul.f32 %v9547_v41, %v3483_v6  ;;  %v10087_v40 = vpop.f32.mrf.mxu0  ;;  %v10089_v47 = vpop.f32.mrf.mxu1  ;;  %v4593_v27 = vor.u32 %v4592_v34, %v4589_v56  ;;  %6143 = vmatpush.bf16.msrb.mxu2 %v8147_v21 }
 0x382   : > { %11132 = vst [vmem:[#allocation28_spill] sm:$0xff] %v10089_v47  ;;  %v3855_v32 = vor.u32 %v3853_v51, %v3852_v57  ;;  %v3856_v11 = vrot.slane %v3852_v57, 4  ;;  %5830 = vmatpush.bf16.msrb.mxu1 %v7863_v2  ;;  %v5555_v57 = vrot.slane %v4203_v30, 5  ;;  %v8155_v30 = vld [vmem:[#allocation11 + $0x60] sm:$0xff] }
 0x383   : > { %v3583_v37 = vsel %vm3518_vm8, %v3483_v6, %v3551_v36  ;;  %v4594_v20 = vrot.slane %v4593_v27, 4  ;;  %6232 = vmatpush.bf16.msrb.mxu3 %v8155_v30 }
 0x384   : > { %v4111_v29 = vsel %vm8775_vm6, %v3855_v32, %v4110_v53  ;;  %v4114_v44 = vsel %vm8732_vm3, %v3856_v11, %v4113_v0  ;;  %v3615_v34 = vpack.c.bf16 %v3583_v37, %v3583_v37  ;;  %v3395_v56 = vpop.f32.mrf.mxu2  ;;  %v3484_v47 = vpop.f32.mrf.mxu3  ;;  %v4156_v35 = vld [vmem:[#allocation2 + $0xe0] sm:$0xf]  ;;  %v4699_v53 = vunpack.c.l.b16 %v4585_v49  ;;  %v4119_v49 = vld [vmem:[#allocation2 + $0xf4] sm:$0x1] }
 0x385   : > { %4112 = vst [vmem:[#allocation2 + $0xe8] sm:$0xf] %v4111_v29  ;;  %v3396_v10 = vadd.f32 %v9980_v14, %v3395_v56  ;;  %v4599_v38 = vsel %vm8812_vm9, %v4594_v20, %v4598_v39  ;;  %v4601_v7 = vshrl.u32 %v4156_v35, 16  ;;  %v4604_v6 = vshll.u32 %v4156_v35, 16  ;;  %v4116_v39 = vld [vmem:[#allocation2 + $0xf0] sm:$0xf] }
 0x386   : > { %4115 = vst [vmem:[#allocation2 + $0xec] sm:$0x1] %v4114_v44  ;;  %v3858_v23 = vshrl.u32 %v3615_v34, 16  ;;  %v4700_v51 = vunpack.c.l.b16 %v4599_v38  ;;  %v5552_v0 = vsel %vm9305_vm12, %v7850_v16, %v5551_v12  ;;  %v5556_v14 = vsel %vm9305_vm12, %v7851_v28, %v5555_v57  ;;  %v5377_v37 = vld [vmem:[#allocation2 + $0xe0] sm:$0xe] }
 0x387   : > { %v3485_v36 = vadd.f32 %v3484_v47, %v3396_v10  ;;  %v4603_v27 = vrot.slane %v4601_v7, 4  ;;  %v4606_v13 = vrot.slane %v4604_v6, 5  ;;  %v3861_v11 = vshll.u32 %v3615_v34, 16  ;;  %v4204_v47 = vld [vmem:[#allocation2 + $0xe4] sm:$0x1] }
 0x388   : > { %v3860_v32 = vrot.slane %v3858_v23, 7  ;;  %5219 = vmatmul.bf16.gmra.mxu2 %v10083_v59  ;;  %v4718_v2 = vpack.c.b16 %v4700_v51, %v4699_v53  ;;  %v5616_v12 = vunpack.c.l.b16 %v5552_v0  ;;  %v5617_v28 = vunpack.c.l.b16 %v5556_v14 }
 0x389   : > { %vm3519_vm10 = vcmp.ge.f32.partialorder %v3485_v36, 0.0  ;;  %v3552_v20 = vmul.f32 %v9547_v41, %v3485_v36  ;;  %v10107_v29 = vpop.f32.mrf.mxu0  ;;  %v10109_v16 = vpop.f32.mrf.mxu1  ;;  %5308 = vmatmul.bf16.gmra.mxu3 %v10083_v59  ;;  %v4607_v35 = vor.u32 %v4606_v13, %v4603_v27  ;;  %v7852_v10 = vrot.slane %v5377_v37, 9 }
 0x38a   : > { %v3863_v44 = vor.u32 %v3861_v11, %v3860_v32  ;;  %v3864_v34 = vrot.slane %v3860_v32, 4  ;;  %v10112_v57 = vpack.c.b16 %v5617_v28, %v5616_v12  ;;  %v5559_v53 = vrot.slane %v4204_v47, 5  ;;  %v4125_v12 = vld [vmem:[#allocation2 + $0xfc] sm:$0x1] }
 0x38b   : > { %v3584_v56 = vsel %vm3519_vm10, %v3485_v36, %v3552_v20  ;;  %v4610_v21 = vshll.u32 %v4204_v47, 16  ;;  %v4608_v30 = vrot.slane %v4607_v35, 4  ;;  %v4122_v20 = vld [vmem:[#allocation2 + $0xf8] sm:$0xf] }
 0x38c   : > { %v4117_v41 = vsel %vm8775_vm6, %v3863_v44, %v4116_v39  ;;  %v4120_v38 = vsel %vm8732_vm3, %v3864_v34, %v4119_v49  ;;  %v3616_v7 = vpack.c.bf16 %v3584_v56, %v3584_v56  ;;  %4890 = vmatmul.bf16.gmra.mxu0 %v4718_v2  ;;  %4979 = vmatmul.bf16.gmra.mxu1 %v4718_v2  ;;  %v10118_v59 = vpop.f32.mrf.mxu2  ;;  %v10120_v6 = vpop.f32.mrf.mxu3  ;;  %v4157_v23 = vld [vmem:[#allocation2 + $0xe8] sm:$0xf] }
 0x38d   : > { %4118 = vst [vmem:[#allocation2 + $0xf0] sm:$0xf] %v4117_v41  ;;  %v4205_v51 = vld [vmem:[#allocation2 + $0xec] sm:$0x1]  ;;  %v4615_v0 = vshrl.u32 %v4157_v23, 16  ;;  %v4618_v27 = vshll.u32 %v4157_v23, 16  ;;  %v5560_v37 = vsel %vm9305_vm12, %v7852_v10, %v5559_v53 }
 0x38e   : > { %4121 = vst [vmem:[#allocation2 + $0xf4] sm:$0x1] %v4120_v38  ;;  %v3866_v36 = vshrl.u32 %v3616_v7, 16  ;;  %v3869_v13 = vshll.u32 %v3616_v7, 16  ;;  %v4624_v32 = vshll.u32 %v4205_v51, 16  ;;  %v4612_v44 = vrot.slane %v4610_v21, 5 }
 0x38f   : > { %v4617_v14 = vrot.slane %v4615_v0, 4  ;;  %v5378_v11 = vld [vmem:[#allocation2 + $0xe8] sm:$0xe]  ;;  %v4620_v2 = vrot.slane %v4618_v27, 5  ;;  %v5563_v34 = vrot.slane %v4205_v51, 5  ;;  %v5618_v53 = vunpack.c.l.b16 %v5560_v37 }
 0x390   : > { %v3868_v39 = vrot.slane %v3866_v36, 7  ;;  %v7853_v49 = vrot.slane %v5378_v11, 9  ;;  %v8088_v38 = vld [vmem:[#allocation2 + $0x94] sm:$0xf0]  ;;  %v4613_v7 = vsel %vm8812_vm9, %v4608_v30, %v4612_v44  ;;  %v4626_v23 = vrot.slane %v4624_v32, 5 }
 0x391   : > { %v10124_v28 = vpop.f32.mrf.mxu0  ;;  %v10126_v47 = vpop.f32.mrf.mxu1  ;;  %v4621_v35 = vor.u32 %v4620_v2, %v4617_v14  ;;  %v4701_v61 = vunpack.c.l.b16 %v4613_v7 }
 0x392   : > { %v3871_v56 = vor.u32 %v3869_v13, %v3868_v39  ;;  %v3872_v41 = vrot.slane %v3868_v39, 4  ;;  %v5564_v10 = vsel %vm9305_vm12, %v7853_v49, %v5563_v34  ;;  %v7734_v13 = vld [vmem:[#allocation2 + $0x90] sm:$0xf] }
 0x393   : > { %v4622_v21 = vrot.slane %v4621_v35, 4  ;;  %v5619_v27 = vunpack.c.l.b16 %v5564_v10  ;;  %v7735_v39 = vor.u32 %v8088_v38, %v7734_v13 }
 0x394   : > { %v4123_v0 = vsel %vm8775_vm6, %v3871_v56, %v4122_v20  ;;  %v4126_v36 = vsel %vm8732_vm3, %v3872_v41, %v4125_v12  ;;  %v4158_v51 = vld [vmem:[#allocation2 + $0xf0] sm:$0xf]  ;;  %v10136_v30 = vpop.f32.mrf.mxu2  ;;  %v10138_v32 = vpop.f32.mrf.mxu3  ;;  %vm6626_vm3 = vcmask 1041409   ;;  %vm6628_vm6 = vcmask 1042434  }
 0x395   : > { %4124 = vst [vmem:[#allocation2 + $0xf8] sm:$0xf] %v4123_v0  ;;  %v4629_v14 = vshrl.u32 %v4158_v51, 16  ;;  %v4632_v11 = vshll.u32 %v4158_v51, 16  ;;  %v4627_v33 = vsel %vm8812_vm9, %v4622_v21, %v4626_v23  ;;  %v10142_v2 = vpack.c.b16 %v5619_v27, %v5618_v53  ;;  %v4206_v49 = vld [vmem:[#allocation2 + $0xf4] sm:$0x1] }
 0x396   : > { %4127 = vst [vmem:[#allocation2 + $0xfc] sm:$0x1] %v4126_v36  ;;  %v4702_v37 = vunpack.c.l.b16 %v4627_v33  ;;  %v5379_v44 = vld [vmem:[#allocation2 + $0xf0] sm:$0xe]  ;;  %v5567_v38 = vrot.slane %v4206_v49, 5  ;;  %v4638_v0 = vshll.u32 %v4206_v49, 16 }
 0x397   : > { %v4631_v20 = vrot.slane %v4629_v14, 4  ;;  %v4634_v12 = vrot.slane %v4632_v11, 5  ;;  %v7854_v35 = vrot.slane %v5379_v44, 9 }
 0x398   : > { %5224 = vmatmul.bf16.gmra.mxu2 %v7735_v39  ;;  %v4719_v41 = vpack.c.b16 %v4702_v37, %v4701_v61 }
 0x399   : > { %v10144_v34 = vpop.f32.mrf.mxu0  ;;  %v10146_v56 = vpop.f32.mrf.mxu1  ;;  %5313 = vmatmul.bf16.gmra.mxu3 %v7735_v39  ;;  %v4635_v10 = vor.u32 %v4634_v12, %v4631_v20  ;;  %v5568_v27 = vsel %vm9305_vm12, %v7854_v35, %v5567_v38  ;;  %v4640_v12 = vrot.slane %v4638_v0, 5  ;;  %v8089_v38 = vld [vmem:[#allocation2 + $0xa4] sm:$0xf0] }
 0x39a   : > { %11133 = vst [vmem:[#allocation25_spill] sm:$0xff] %v10144_v34 }
 0x39b   : > { %11134 = vst [vmem:[#allocation26_spill] sm:$0xff] %v10146_v56  ;;  %v4636_v33 = vrot.slane %v4635_v10, 4 }
 0x39c   : > { %4895 = vmatmul.bf16.gmra.mxu0 %v4719_v41  ;;  %4984 = vmatmul.bf16.gmra.mxu1 %v4719_v41  ;;  %v4159_v23 = vld [vmem:[#allocation2 + $0xf8] sm:$0xf]  ;;  %v10150_v11 = vpop.f32.mrf.mxu2  ;;  %v10152_v39 = vpop.f32.mrf.mxu3 }
 0x39d   : > { %v4207_v53 = vld [vmem:[#allocation2 + $0xfc] sm:$0x1]  ;;  %v4643_v7 = vshrl.u32 %v4159_v23, 16  ;;  %v4646_v36 = vshll.u32 %v4159_v23, 16  ;;  %v5380_v21 = vld [vmem:[#allocation2 + $0xf8] sm:$0xe]  ;;  %v5620_v23 = vunpack.c.l.b16 %v5568_v27 }
 0x39e   : > { %v7855_v13 = vrot.slane %v5380_v21, 9  ;;  %v5571_v14 = vrot.slane %v4207_v53, 5  ;;  %v4652_v37 = vshll.u32 %v4207_v53, 16  ;;  %v7738_v53 = vld [vmem:[#allocation2 + $0xa0] sm:$0xf] }
 0x39f   : > { %v4645_v51 = vrot.slane %v4643_v7, 4  ;;  %v4648_v61 = vrot.slane %v4646_v36, 5  ;;  %v4641_v7 = vsel %vm8812_vm9, %v4636_v33, %v4640_v12  ;;  %v8146_v36 = vld [vmem:[#allocation11 + $0x18] sm:$0xff]  ;;  %v7739_v34 = vor.u32 %v8089_v38, %v7738_v53  ;;  %v7742_v12 = vld [vmem:[#allocation2 + $0xb0] sm:$0xf] }
 0x3a0   : > { %v5572_v49 = vsel %vm9305_vm12, %v7855_v13, %v5571_v14  ;;  %v4654_v56 = vrot.slane %v4652_v37, 5  ;;  %v4703_v13 = vunpack.c.l.b16 %v4641_v7  ;;  %6144 = vmatpush.bf16.msrb.mxu2 %v8146_v36  ;;  %v8091_v53 = vld [vmem:[#allocation2 + $0xc4] sm:$0xf0]  ;;  %v7746_v36 = vld [vmem:[#allocation2 + $0xc0] sm:$0xf]  ;;  %vm6632_vm12 = vcmask 1044484  }
 0x3a1   : > { %v10154_v44 = vpop.f32.mrf.mxu0  ;;  %v10156_v20 = vpop.f32.mrf.mxu1  ;;  %v4649_v41 = vor.u32 %v4648_v61, %v4645_v51  ;;  %v5621_v35 = vunpack.c.l.b16 %v5572_v49 }
 0x3a2   : > { %11135 = vst [vmem:[#allocation35_spill] sm:$0xff] %v10154_v44  ;;  %v8154_v44 = vld [vmem:[#allocation11 + $0x58] sm:$0xff] }
 0x3a3   : > { %11136 = vst [vmem:[#allocation33_spill] sm:$0xff] %v10156_v20  ;;  %v4650_v21 = vrot.slane %v4649_v41, 4  ;;  %v10162_v10 = vpack.c.b16 %v5621_v35, %v5620_v23  ;;  %6233 = vmatpush.bf16.msrb.mxu3 %v8154_v44 }
 0x3a4   : > { %v10170_v33 = vpop.f32.mrf.mxu2  ;;  %v10172_v61 = vpop.f32.mrf.mxu3 }
 0x3a5   : > { %11137 = vst [vmem:[#allocation36_spill] sm:$0xff] %v10162_v10  ;;  %v4655_v52 = vsel %vm8812_vm9, %v4650_v21, %v4654_v56  ;;  %v8090_v56 = vld [vmem:[#allocation2 + $0xb4] sm:$0xf0]  ;;  %vm6630_vm9 = vcmask 1043459  }
 0x3a6   : > { %v4704_v0 = vunpack.c.l.b16 %v4655_v52  ;;  %v7743_v41 = vor.u32 %v8090_v56, %v7742_v12  ;;  %v8145_v52 = vld [vmem:[#allocation11 + $0x10] sm:$0xff] }
 0x3a7   : > { %6145 = vmatpush.bf16.msrb.mxu2 %v8145_v52  ;;  %v8092_v52 = vld [vmem:[#allocation2 + $0xd4] sm:$0xf0] }
 0x3a8   : > { %5229 = vmatmul.bf16.gmra.mxu2 %v7739_v34  ;;  %v4720_v14 = vpack.c.b16 %v4704_v0, %v4703_v13  ;;  %v8153_v13 = vld [vmem:[#allocation11 + $0x50] sm:$0xff]  ;;  %v7747_v0 = vor.u32 %v8091_v53, %v7746_v36 }
 0x3a9   : > { %v10166_v51 = vpop.f32.mrf.mxu0  ;;  %v10168_v27 = vpop.f32.mrf.mxu1  ;;  %5318 = vmatmul.bf16.gmra.mxu3 %v7739_v34 }
 0x3aa   : > { %11138 = vst [vmem:[#allocation34_spill] sm:$0xff] %v10166_v51  ;;  %6234 = vmatpush.bf16.msrb.mxu3 %v8153_v13  ;;  %v7750_v13 = vld [vmem:[#allocation2 + $0xd0] sm:$0xf] }
 0x3ab   : > { %11139 = vst [vmem:[#allocation31_spill] sm:$0xff] %v10168_v27 }
 0x3ac   : > { %4900 = vmatmul.bf16.gmra.mxu0 %v4720_v14  ;;  %4989 = vmatmul.bf16.gmra.mxu1 %v4720_v14  ;;  %v10178_v49 = vpop.f32.mrf.mxu2  ;;  %v10180_v44 = vpop.f32.mrf.mxu3 }
 0x3b1   : > { %v10174_v37 = vpop.f32.mrf.mxu0  ;;  %v10176_v1 = vpop.f32.mrf.mxu1 }
 0x3b2   : > { %11140 = vst [vmem:[#allocation32_spill] sm:$0xff] %v10174_v37 }
 0x3b3   : > { %11141 = vst [vmem:[#allocation21_spill] sm:$0xff] %v10176_v1 }
 0x3b4   : > { %v10188_v35 = vpop.f32.mrf.mxu2  ;;  %v10190_v38 = vpop.f32.mrf.mxu3 }
 0x3b8   : > { %5234 = vmatmul.bf16.gmra.mxu2 %v7743_v41 }
 0x3b9   : > { %v10182_v34 = vpop.f32.mrf.mxu0  ;;  %v10184_v23 = vpop.f32.mrf.mxu1  ;;  %5323 = vmatmul.bf16.gmra.mxu3 %v7743_v41 }
 0x3ba   : > { %11142 = vst [vmem:[#allocation20_spill] sm:$0xff] %v10182_v34  ;;  %v8152_v34 = vld [vmem:[#allocation11 + $0x48] sm:$0xff] }
 0x3bb   : > { %11143 = vst [vmem:[#allocation41_spill] sm:$0xff] %v10184_v23  ;;  %v8093_v23 = vld [vmem:[#allocation2 + $0xe4] sm:$0xf0]  ;;  %6235 = vmatpush.bf16.msrb.mxu3 %v8152_v34  ;;  %v7758_v34 = vld [vmem:[#allocation2 + $0xf0] sm:$0xf] }
 0x3bc   : > { %5742 = vmatmul.bf16.vlgmr.msrb.gmra.mxu0 %v9636_v3  ;;  %5831 = vmatmul.bf16.vlgmr.msrb.gmra.mxu1 %v9636_v3  ;;  %v10196_v14 = vpop.f32.mrf.mxu2  ;;  %v10198_v56 = vpop.f32.mrf.mxu3 }
 0x3c1   : > { %v10192_v7 = vpop.f32.mrf.mxu0  ;;  %v10194_v21 = vpop.f32.mrf.mxu1 }
 0x3c2   : > { %11144 = vst [vmem:[#allocation39_spill] sm:$0xff] %v10192_v7  ;;  %v7751_v7 = vor.u32 %v8092_v52, %v7750_v13  ;;  %v7754_v52 = vld [vmem:[#allocation2 + $0xe0] sm:$0xf]  ;;  %v8144_v13 = vld [vmem:[#allocation11 + $0x8] sm:$0xff] }
 0x3c3   : > { %11145 = vst [vmem:[#allocation42_spill] sm:$0xff] %v10194_v21  ;;  %6146 = vmatpush.bf16.msrb.mxu2 %v8144_v13 }
 0x3c4   : > { %v10210_v53 = vpop.f32.mrf.mxu2  ;;  %v10212_v36 = vpop.f32.mrf.mxu3 }
 0x3c8   : > { %5239 = vmatmul.bf16.gmra.mxu2 %v7747_v0 }
 0x3c9   : > { %v10200_v3 = vpop.f32.mrf.mxu0  ;;  %v10202_v12 = vpop.f32.mrf.mxu1  ;;  %5328 = vmatmul.bf16.gmra.mxu3 %v7747_v0 }
 0x3ca   : > { %11146 = vst [vmem:[#allocation40_spill] sm:$0xff] %v10200_v3 }
 0x3cb   : > { %11147 = vst [vmem:[#allocation37_spill] sm:$0xff] %v10202_v12 }
 0x3cc   : > { %5747 = vmatmul.bf16.gmra.mxu0 %v9705_v9  ;;  %5836 = vmatmul.bf16.gmra.mxu1 %v9705_v9  ;;  %v10218_v0 = vpop.f32.mrf.mxu2  ;;  %v10220_v9 = vpop.f32.mrf.mxu3 }
 0x3d1   : > { %v10206_v41 = vpop.f32.mrf.mxu0  ;;  %v10208_v21 = vpop.f32.mrf.mxu1 }
 0x3d2   : > { %11148 = vst [vmem:[#allocation38_spill] sm:$0xff] %v10206_v41 }
 0x3d3   : > { %11149 = vst [vmem:[#allocation47_spill] sm:$0xff] %v10208_v21 }
 0x3d8   : > { %5244 = vmatmul.bf16.gmra.mxu2 %v7751_v7 }
 0x3d9   : > { %v10214_v3 = vpop.f32.mrf.mxu0  ;;  %v10216_v12 = vpop.f32.mrf.mxu1  ;;  %5333 = vmatmul.bf16.gmra.mxu3 %v7751_v7  ;;  %v7755_v7 = vor.u32 %v8093_v23, %v7754_v52  ;;  %v8094_v23 = vld [vmem:[#allocation2 + $0xf4] sm:$0xf0] }
 0x3da   : > { %11150 = vst [vmem:[#allocation45_spill] sm:$0xff] %v10214_v3  ;;  %v10228_v3 = vpop.f32.mrf.mxu2  ;;  %v7759_v52 = vor.u32 %v8094_v23, %v7758_v34  ;;  %v8143_v34 = vld [vmem:[#allocation11] sm:$0xff] }
 0x3db   : > { %11151 = vst [vmem:[#allocation48_spill] sm:$0xff] %v10216_v12  ;;  %v10230_v12 = vpop.f32.mrf.mxu3  ;;  %6147 = vmatpush.bf16.msrb.mxu2 %v8143_v34 }
 0x3dc   : > { %5752 = vmatmul.bf16.gmra.mxu0 %v9763_v19  ;;  %5841 = vmatmul.bf16.gmra.mxu1 %v9763_v19 }
 0x3e1   : > { %v10224_v21 = vpop.f32.mrf.mxu0  ;;  %v10226_v41 = vpop.f32.mrf.mxu1 }
 0x3e2   : > { %11152 = vst [vmem:[#allocation46_spill] sm:$0xff] %v10224_v21  ;;  %v10238_v19 = vpop.f32.mrf.mxu2 }
 0x3e3   : > { %11153 = vst [vmem:[#allocation53_spill] sm:$0xff] %v10226_v41  ;;  %v10240_v41 = vpop.f32.mrf.mxu3 }
 0x3e8   : > { %5249 = vmatmul.bf16.gmra.mxu2 %v7755_v7 }
 0x3e9   : > { %v10232_v1 = vpop.f32.mrf.mxu0  ;;  %v10234_v37 = vpop.f32.mrf.mxu1  ;;  %5338 = vmatmul.bf16.gmra.mxu3 %v7755_v7 }
 0x3ea   : > { %11154 = vst [vmem:[#allocation51_spill] sm:$0xff] %v10232_v1  ;;  %v10250_v7 = vpop.f32.mrf.mxu2 }
 0x3eb   : > { %11155 = vst [vmem:[#allocation54_spill] sm:$0xff] %v10234_v37 }
 0x3ec   : > { %5757 = vmatmul.bf16.gmra.mxu0 %v9811_v55  ;;  %5846 = vmatmul.bf16.gmra.mxu1 %v9811_v55  ;;  %v10252_v55 = vpop.f32.mrf.mxu3 }
 0x3f1   : > { %v10242_v21 = vpop.f32.mrf.mxu0  ;;  %v10244_v27 = vpop.f32.mrf.mxu1 }
 0x3f2   : > { %11156 = vst [vmem:[#allocation52_spill] sm:$0xff] %v10242_v21  ;;  %v10260_v1 = vpop.f32.mrf.mxu2 }
 0x3f3   : > { %11157 = vst [vmem:[#allocation59_spill] sm:$0xff] %v10244_v27 }
 0x3f4   : > { %v10262_v23 = vpop.f32.mrf.mxu3 }
 0x3f8   : > { %5254 = vmatmul.bf16.gmra.mxu2 %v7759_v52 }
 0x3f9   : > { %v10246_v13 = vpop.f32.mrf.mxu0  ;;  %v10248_v37 = vpop.f32.mrf.mxu1  ;;  %5343 = vmatmul.bf16.gmra.mxu3 %v7759_v52 }
 0x3fa   : > { %11158 = vst [vmem:[#allocation57_spill] sm:$0xff] %v10246_v13  ;;  %v8151_v13 = vld [vmem:[#allocation11 + $0x40] sm:$0xff] }
 0x3fb   : > { %11159 = vst [vmem:[#allocation60_spill] sm:$0xff] %v10248_v37  ;;  %6236 = vmatpush.bf16.msrb.mxu3 %v8151_v13 }
 0x3fc   : > { %5762 = vmatmul.bf16.gmra.mxu0 %v9842_v5  ;;  %5851 = vmatmul.bf16.gmra.mxu1 %v9842_v5  ;;  %v10270_v5 = vpop.f32.mrf.mxu2 }
 0x3fd   : > { %11164 = vst [vmem:[#allocation65_spill] sm:$0xff] %v10270_v5 }
 0x401   : > { %v10256_v21 = vpop.f32.mrf.mxu0  ;;  %v10258_v27 = vpop.f32.mrf.mxu1 }
 0x402   : > { %11160 = vst [vmem:[#allocation58_spill] sm:$0xff] %v10256_v21  ;;  %v10272_v21 = vpop.f32.mrf.mxu3 }
 0x403   : > { %11161 = vst [vmem:[#allocation43_spill] sm:$0xff] %v10258_v27 }
 0x404   : > { %11165 = vst [vmem:[#allocation63_spill] sm:$0xff] %v10272_v21  ;;  %v10278_v10 = vpop.f32.mrf.mxu2 }
 0x405   : > { %11168 = vst [vmem:[#allocation49_spill] sm:$0xff] %v10278_v10 }
 0x409   : > { %v10264_v52 = vpop.f32.mrf.mxu0  ;;  %v10266_v37 = vpop.f32.mrf.mxu1 }
 0x40a   : > { %11162 = vst [vmem:[#allocation22_spill] sm:$0xff] %v10264_v52  ;;  %v10280_v34 = vpop.f32.mrf.mxu3 }
 0x40b   : > { %11163 = vst [vmem:[#allocation44_spill] sm:$0xff] %v10266_v37 }
 0x40c   : > { %5767 = vmatmul.bf16.gmra.mxu0 %v9872_v26  ;;  %5856 = vmatmul.bf16.gmra.mxu1 %v9872_v26  ;;  %11169 = vst [vmem:[#allocation50_spill] sm:$0xff] %v10280_v34  ;;  %v10292_v21 = vpop.f32.mrf.mxu2 }
 0x40d   : > { %11174 = vst [vmem:[#allocation61_spill] sm:$0xff] %v10292_v21 }
 0x411   : > { %v10274_v27 = vpop.f32.mrf.mxu0  ;;  %v10276_v51 = vpop.f32.mrf.mxu1 }
 0x412   : > { %11166 = vst [vmem:[#allocation66_spill] sm:$0xff] %v10274_v27  ;;  %v10294_v27 = vpop.f32.mrf.mxu3 }
 0x413   : > { %11167 = vst [vmem:[#allocation64_spill] sm:$0xff] %v10276_v51 }
 0x414   : > { %11175 = vst [vmem:[#allocation62_spill] sm:$0xff] %v10294_v27  ;;  %v10300_v34 = vpop.f32.mrf.mxu2 }
 0x415   : > { %11178 = vst [vmem:[#allocation71_spill] sm:$0xff] %v10300_v34 }
 0x419   : > { %v10282_v13 = vpop.f32.mrf.mxu0  ;;  %v10284_v52 = vpop.f32.mrf.mxu1 }
 0x41a   : > { %11170 = vst [vmem:[#allocation69_spill] sm:$0xff] %v10282_v13  ;;  %v10302_v13 = vpop.f32.mrf.mxu3 }
 0x41b   : > { %11171 = vst [vmem:[#allocation70_spill] sm:$0xff] %v10284_v52 }
 0x41c   : > { %5772 = vmatmul.bf16.gmra.mxu0 %v9891_v24  ;;  %5861 = vmatmul.bf16.gmra.mxu1 %v9891_v24  ;;  %11179 = vst [vmem:[#allocation72_spill] sm:$0xff] %v10302_v13 }
 0x421   : > { %v10288_v26 = vpop.f32.mrf.mxu0  ;;  %v10290_v37 = vpop.f32.mrf.mxu1 }
 0x422   : > { %11172 = vst [vmem:[#allocation55_spill] sm:$0xff] %v10288_v26  ;;  %v10312_v52 = vpop.f32.mrf.mxu3 }
 0x423   : > { %11173 = vst [vmem:[#allocation56_spill] sm:$0xff] %v10290_v37  ;;  %v10310_v37 = vpop.f32.mrf.mxu2 }
 0x424   : > { %11182 = vst [vmem:[#allocation75_spill] sm:$0xff] %v10310_v37 }
 0x425   : > { %11183 = vst [vmem:[#allocation76_spill] sm:$0xff] %v10312_v52 }
 0x429   : > { %v10296_v51 = vpop.f32.mrf.mxu0  ;;  %v10298_v10 = vpop.f32.mrf.mxu1 }
 0x42a   : > { %11176 = vst [vmem:[#allocation67_spill] sm:$0xff] %v10296_v51  ;;  %v10326_v52 = vpop.f32.mrf.mxu3 }
 0x42b   : > { %11177 = vst [vmem:[#allocation68_spill] sm:$0xff] %v10298_v10  ;;  %v5181_v10 = vadd.f32 %v10118_v59, %v9936_v17  ;;  %v10324_v37 = vpop.f32.mrf.mxu2 }
 0x42c   : > { %5777 = vmatmul.bf16.gmra.mxu0 %v9911_v31  ;;  %5866 = vmatmul.bf16.gmra.mxu1 %v9911_v31  ;;  %v5270_v31 = vadd.f32 %v10120_v6, %v9938_v54 }
 0x431   : > { %v10306_v24 = vpop.f32.mrf.mxu0  ;;  %v10308_v26 = vpop.f32.mrf.mxu1 }
 0x432   : > { %11180 = vst [vmem:[#allocation73_spill] sm:$0xff] %v10306_v24  ;;  %v5183_v24 = vadd.f32 %v10136_v30, %v9946_v25  ;;  %v10330_v30 = vpop.f32.mrf.mxu3 }
 0x433   : > { %11181 = vst [vmem:[#allocation74_spill] sm:$0xff] %v10308_v26  ;;  %v5272_v26 = vadd.f32 %v10138_v32, %v9948_v58  ;;  %v10328_v25 = vpop.f32.mrf.mxu2  ;;  %v5186_v58 = vadd.f32 %v10150_v11, %v9968_v18  ;;  %v5275_v32 = vadd.f32 %v10152_v39, %v9970_v62 }
 0x439   : > { %v5743_v27 = vpop.f32.mrf.mxu0  ;;  %v5832_v51 = vpop.f32.mrf.mxu1 }
 0x43a   : > { %v5912_v21 = vadd.f32 %v5743_v27, %v5181_v10  ;;  %v5277_v10 = vadd.f32 %v10172_v61, %v9989_v22  ;;  %v5280_v61 = vadd.f32 %v10180_v44, %v10007_v60 }
 0x43c   : > { %5782 = vmatmul.bf16.gmra.mxu0 %v9933_v48  ;;  %5871 = vmatmul.bf16.gmra.mxu1 %v9933_v48  ;;  %v5913_v48 = vadd.f32 %v5832_v51, %v5270_v31  ;;  %v5282_v31 = vadd.f32 %v10190_v38, %v10017_v45  ;;  %v5285_v45 = vadd.f32 %v10198_v56, %v10039_v15 }
 0x441   : > { %v5745_v13 = vpop.f32.mrf.mxu0  ;;  %v5834_v34 = vpop.f32.mrf.mxu1 }
 0x442   : > { %v5914_v20 = vadd.f32 %v5745_v13, %v5183_v24  ;;  %v5915_v5 = vadd.f32 %v5834_v34, %v5272_v26  ;;  %v10342_v26 = vpop.f32.mrf.mxu2  ;;  %v5193_v24 = vadd.f32 %v10188_v35, %v10015_v46  ;;  %v5196_v46 = vadd.f32 %v10196_v14, %v10037_v43  ;;  %v11184_v35 = vld [vmem:[#allocation23_spill] sm:$0xff] }
 0x443   : > { %v5198_v38 = vadd.f32 %v10210_v53, %v11184_v35 }
 0x444   : > { %v5976_v17 = vpack.c.bf16 %v5914_v20, %v5912_v21  ;;  %v5977_v59 = vpack.c.bf16 %v5915_v5, %v5913_v48  ;;  %v5188_v20 = vadd.f32 %v10170_v33, %v9987_v50  ;;  %v5191_v33 = vadd.f32 %v10178_v49, %v10005_v4 }
 0x446   : > { %6148 = vmatmul.bf16.vlgmr.msrb.gmra.mxu2 %v5976_v17  ;;  %6237 = vmatmul.bf16.vlgmr.msrb.gmra.mxu3 %v5977_v59 }
 0x449   : > { %v5748_v54 = vpop.f32.mrf.mxu0  ;;  %v5837_v6 = vpop.f32.mrf.mxu1 }
 0x44a   : > { %v5916_v21 = vadd.f32 %v5748_v54, %v5186_v58  ;;  %v5917_v5 = vadd.f32 %v5837_v6, %v5275_v32  ;;  %v10348_v50 = vpop.f32.mrf.mxu2 }
 0x44c   : > { %5787 = vmatmul.bf16.gmra.mxu0 %v9965_v8  ;;  %5876 = vmatmul.bf16.gmra.mxu1 %v9965_v8  ;;  %v10344_v8 = vpop.f32.mrf.mxu3 }
 0x451   : > { %v5750_v51 = vpop.f32.mrf.mxu0  ;;  %v5839_v27 = vpop.f32.mrf.mxu1 }
 0x452   : > { %v5918_v34 = vadd.f32 %v5750_v51, %v5188_v20  ;;  %v5919_v13 = vadd.f32 %v5839_v27, %v5277_v10  ;;  %v10360_v4 = vpop.f32.mrf.mxu2  ;;  %v11185_v20 = vld [vmem:[#allocation24_spill] sm:$0xff] }
 0x453   : > { %v5287_v10 = vadd.f32 %v10212_v36, %v11185_v20  ;;  %v11186_v36 = vld [vmem:[#allocation29_spill] sm:$0xff] }
 0x454   : > { %v5978_v18 = vpack.c.bf16 %v5918_v34, %v5916_v21  ;;  %v5979_v11 = vpack.c.bf16 %v5919_v13, %v5917_v5  ;;  %v10350_v22 = vpop.f32.mrf.mxu3 }
 0x456   : > { %6153 = vmatmul.bf16.gmra.mxu2 %v5978_v18  ;;  %6242 = vmatmul.bf16.gmra.mxu3 %v5979_v11 }
 0x459   : > { %v5753_v62 = vpop.f32.mrf.mxu0  ;;  %v5842_v39 = vpop.f32.mrf.mxu1 }
 0x45a   : > { %v5920_v59 = vadd.f32 %v5753_v62, %v5191_v33  ;;  %v10374_v21 = vpop.f32.mrf.mxu2  ;;  %v11187_v62 = vld [vmem:[#allocation27_spill] sm:$0xff]  ;;  %v11188_v33 = vld [vmem:[#allocation30_spill] sm:$0xff] }
 0x45c   : > { %5792 = vmatmul.bf16.gmra.mxu0 %v10002_v63  ;;  %5881 = vmatmul.bf16.gmra.mxu1 %v10002_v63  ;;  %v5921_v63 = vadd.f32 %v5842_v39, %v5280_v61  ;;  %v10362_v49 = vpop.f32.mrf.mxu3  ;;  %v5201_v39 = vadd.f32 %v10218_v0, %v11187_v62  ;;  %v5290_v61 = vadd.f32 %v10220_v9, %v11188_v33 }
 0x461   : > { %v5755_v48 = vpop.f32.mrf.mxu0  ;;  %v5844_v17 = vpop.f32.mrf.mxu1 }
 0x462   : > { %v5922_v54 = vadd.f32 %v5755_v48, %v5193_v24  ;;  %v5923_v6 = vadd.f32 %v5844_v17, %v5282_v31  ;;  %v10378_v53 = vpop.f32.mrf.mxu2  ;;  %v5203_v24 = vadd.f32 %v10228_v3, %v10087_v40  ;;  %v11189_v31 = vld [vmem:[#allocation28_spill] sm:$0xff]  ;;  %v5206_v40 = vadd.f32 %v10238_v19, %v10107_v29 }
 0x463   : > { %v5292_v48 = vadd.f32 %v10230_v12, %v11189_v31  ;;  %v5295_v3 = vadd.f32 %v10240_v41, %v10109_v16  ;;  %v5208_v12 = vadd.f32 %v10250_v7, %v10124_v28 }
 0x464   : > { %v5980_v58 = vpack.c.bf16 %v5922_v54, %v5920_v59  ;;  %v5981_v32 = vpack.c.bf16 %v5923_v6, %v5921_v63  ;;  %v10376_v5 = vpop.f32.mrf.mxu3 }
 0x466   : > { %6158 = vmatmul.bf16.gmra.mxu2 %v5980_v58  ;;  %6247 = vmatmul.bf16.gmra.mxu3 %v5981_v32 }
 0x469   : > { %v5758_v60 = vpop.f32.mrf.mxu0  ;;  %v5847_v44 = vpop.f32.mrf.mxu1 }
 0x46a   : > { %v5924_v34 = vadd.f32 %v5758_v60, %v5196_v46 }
 0x46c   : > { %5797 = vmatmul.bf16.gmra.mxu0 %v10034_v42  ;;  %5886 = vmatmul.bf16.gmra.mxu1 %v10034_v42  ;;  %v5925_v42 = vadd.f32 %v5847_v44, %v5285_v45  ;;  %v10380_v11 = vpop.f32.mrf.mxu3  ;;  %v10392_v44 = vpop.f32.mrf.mxu2  ;;  %v5297_v45 = vadd.f32 %v10252_v55, %v10126_v47  ;;  %v11190_v47 = vld [vmem:[#allocation25_spill] sm:$0xff] }
 0x46d   : > { %v5211_v55 = vadd.f32 %v10260_v1, %v11190_v47 }
 0x471   : > { %v5760_v51 = vpop.f32.mrf.mxu0  ;;  %v5849_v27 = vpop.f32.mrf.mxu1 }
 0x472   : > { %v5926_v13 = vadd.f32 %v5760_v51, %v5198_v38  ;;  %v5927_v18 = vadd.f32 %v5849_v27, %v5287_v10 }
 0x474   : > { %v5982_v43 = vpack.c.bf16 %v5926_v13, %v5924_v34  ;;  %v5983_v14 = vpack.c.bf16 %v5927_v18, %v5925_v42  ;;  %v10394_v0 = vpop.f32.mrf.mxu3  ;;  %v10406_v35 = vpop.f32.mrf.mxu2  ;;  %v11191_v42 = vld [vmem:[#allocation26_spill] sm:$0xff]  ;;  %v11192_v18 = vld [vmem:[#allocation35_spill] sm:$0xff] }
 0x475   : > { %v5300_v13 = vadd.f32 %v10262_v23, %v11191_v42 }
 0x476   : > { %6163 = vmatmul.bf16.gmra.mxu2 %v5982_v43  ;;  %6252 = vmatmul.bf16.gmra.mxu3 %v5983_v14  ;;  %v11193_v43 = vld [vmem:[#allocation65_spill] sm:$0xff] }
 0x477   : > { %v5213_v14 = vadd.f32 %v11193_v43, %v11192_v18 }
 0x479   : > { %v5763_v15 = vpop.f32.mrf.mxu0  ;;  %v5852_v56 = vpop.f32.mrf.mxu1 }
 0x47a   : > { %v5928_v63 = vadd.f32 %v5763_v15, %v5201_v39  ;;  %v5929_v54 = vadd.f32 %v5852_v56, %v5290_v61  ;;  %v11194_v15 = vld [vmem:[#allocation33_spill] sm:$0xff]  ;;  %v11195_v56 = vld [vmem:[#allocation63_spill] sm:$0xff] }
 0x47c   : > { %5802 = vmatmul.bf16.gmra.mxu0 %v11186_v36  ;;  %5891 = vmatmul.bf16.gmra.mxu1 %v11186_v36  ;;  %v10408_v38 = vpop.f32.mrf.mxu3  ;;  %v10410_v28 = vpop.f32.mrf.mxu2  ;;  %v5302_v36 = vadd.f32 %v11195_v56, %v11194_v15  ;;  %v11206_v15 = vld [vmem:[#allocation71_spill] sm:$0xff] }
 0x481   : > { %v5765_v17 = vpop.f32.mrf.mxu0  ;;  %v5854_v59 = vpop.f32.mrf.mxu1 }
 0x482   : > { %v5930_v6 = vadd.f32 %v5765_v17, %v5203_v24  ;;  %v5931_v58 = vadd.f32 %v5854_v59, %v5292_v48 }
 0x484   : > { %v5984_v32 = vpack.c.bf16 %v5930_v6, %v5928_v63  ;;  %v5985_v60 = vpack.c.bf16 %v5931_v58, %v5929_v54  ;;  %v10412_v7 = vpop.f32.mrf.mxu3  ;;  %v10424_v48 = vpop.f32.mrf.mxu2  ;;  %v11196_v63 = vld [vmem:[#allocation36_spill] sm:$0xff]  ;;  %v11197_v58 = vld [vmem:[#allocation34_spill] sm:$0xff] }
 0x486   : > { %6168 = vmatmul.bf16.gmra.mxu2 %v5984_v32  ;;  %6257 = vmatmul.bf16.gmra.mxu3 %v5985_v60  ;;  %v11198_v32 = vld [vmem:[#allocation49_spill] sm:$0xff] }
 0x487   : > { %v5216_v60 = vadd.f32 %v11198_v32, %v11197_v58 }
 0x489   : > { %v5768_v9 = vpop.f32.mrf.mxu0  ;;  %v5857_v46 = vpop.f32.mrf.mxu1 }
 0x48a   : > { %v5932_v51 = vadd.f32 %v5768_v9, %v5206_v40  ;;  %v11199_v9 = vld [vmem:[#allocation31_spill] sm:$0xff] }
 0x48c   : > { %5807 = vmatmul.bf16.gmra.mxu0 %v10112_v57  ;;  %5896 = vmatmul.bf16.gmra.mxu1 %v10112_v57  ;;  %v5933_v57 = vadd.f32 %v5857_v46, %v5295_v3  ;;  %v10430_v54 = vpop.f32.mrf.mxu2  ;;  %v11200_v46 = vld [vmem:[#allocation50_spill] sm:$0xff]  ;;  %v11201_v3 = vld [vmem:[#allocation32_spill] sm:$0xff] }
 0x48d   : > { %v5305_v40 = vadd.f32 %v11200_v46, %v11199_v9 }
 0x491   : > { %v5770_v20 = vpop.f32.mrf.mxu0  ;;  %v5859_v10 = vpop.f32.mrf.mxu1 }
 0x492   : > { %v5934_v27 = vadd.f32 %v5770_v20, %v5208_v12  ;;  %v5935_v34 = vadd.f32 %v5859_v10, %v5297_v45  ;;  %v11202_v12 = vld [vmem:[#allocation61_spill] sm:$0xff]  ;;  %v11204_v10 = vld [vmem:[#allocation62_spill] sm:$0xff] }
 0x493   : > { %v5218_v45 = vadd.f32 %v11202_v12, %v11201_v3  ;;  %v11203_v20 = vld [vmem:[#allocation21_spill] sm:$0xff]  ;;  %v6588_v12 = vld [vmem:[%s10982_s8 + $0x70] sm:$0xff] }
 0x494   : > { %v5986_v29 = vpack.c.bf16 %v5934_v27, %v5932_v51  ;;  %v5987_v19 = vpack.c.bf16 %v5935_v34, %v5933_v57  ;;  %v5307_v51 = vadd.f32 %v11204_v10, %v11203_v20  ;;  %v10445_v42 = vpop.f32.mrf.mxu2 }
 0x496   : > { %6173 = vmatmul.bf16.gmra.mxu2 %v5986_v29  ;;  %6262 = vmatmul.bf16.gmra.mxu3 %v5987_v19 }
 0x499   : > { %v5773_v16 = vpop.f32.mrf.mxu0  ;;  %v5862_v41 = vpop.f32.mrf.mxu1 }
 0x49a   : > { %v5936_v33 = vadd.f32 %v5773_v16, %v5211_v55  ;;  %v5937_v61 = vadd.f32 %v5862_v41, %v5300_v13  ;;  %v6589_v55 = vld [vmem:[%s10982_s8 + $0x78] sm:$0xff] }
 0x49b   : > { %8160 = vmatpush.msra.mxu2 %v6589_v55  ;;  %6665 = vmatpush.msra.mxu0 %v6589_v55 }
 0x49c   : > { %5812 = vmatmul.bf16.gmra.mxu0 %v10142_v2  ;;  %5901 = vmatmul.bf16.gmra.mxu1 %v10142_v2  ;;  %v10426_v2 = vpop.f32.mrf.mxu3 }
 0x49d   : > { %8161 = vmatpush.msra.mxu2 %v6588_v12  ;;  %6666 = vmatpush.msra.mxu0 %v6588_v12 }
 0x4a1   : > { %v5775_v62 = vpop.f32.mrf.mxu0  ;;  %v5864_v39 = vpop.f32.mrf.mxu1 }
 0x4a2   : > { %v5938_v24 = vadd.f32 %v5775_v62, %v5213_v14  ;;  %v5939_v31 = vadd.f32 %v5864_v39, %v5302_v36  ;;  %v11205_v14 = vld [vmem:[#allocation20_spill] sm:$0xff]  ;;  %v11207_v36 = vld [vmem:[#allocation41_spill] sm:$0xff] }
 0x4a3   : > { %v5221_v56 = vadd.f32 %v11206_v15, %v11205_v14  ;;  %v11208_v62 = vld [vmem:[#allocation72_spill] sm:$0xff] }
 0x4a4   : > { %v5988_v1 = vpack.c.bf16 %v5938_v24, %v5936_v33  ;;  %v5989_v17 = vpack.c.bf16 %v5939_v31, %v5937_v61  ;;  %v10432_v6 = vpop.f32.mrf.mxu3  ;;  %v5310_v39 = vadd.f32 %v11208_v62, %v11207_v36  ;;  %v11209_v33 = vld [vmem:[#allocation39_spill] sm:$0xff]  ;;  %v11211_v31 = vld [vmem:[#allocation42_spill] sm:$0xff] }
 0x4a5   : > { %v11210_v61 = vld [vmem:[#allocation75_spill] sm:$0xff] }
 0x4a6   : > { %6178 = vmatmul.bf16.gmra.mxu2 %v5988_v1  ;;  %6267 = vmatmul.bf16.gmra.mxu3 %v5989_v17  ;;  %v5223_v24 = vadd.f32 %v11210_v61, %v11209_v33  ;;  %v11212_v1 = vld [vmem:[#allocation76_spill] sm:$0xff] }
 0x4a7   : > { %v5312_v17 = vadd.f32 %v11212_v1, %v11211_v31  ;;  %v11218_v1 = vld [vmem:[#allocation48_spill] sm:$0xff] }
 0x4a9   : > { %v5778_v23 = vpop.f32.mrf.mxu0  ;;  %v5867_v59 = vpop.f32.mrf.mxu1 }
 0x4aa   : > { %v5940_v34 = vadd.f32 %v5778_v23, %v5216_v60  ;;  %v5941_v29 = vadd.f32 %v5867_v59, %v5305_v40 }
 0x4ac   : > { %5817 = vmatmul.bf16.gmra.mxu0 %v11196_v63  ;;  %5906 = vmatmul.bf16.gmra.mxu1 %v11196_v63  ;;  %v10447_v13 = vpop.f32.mrf.mxu3  ;;  %v10457_v63 = vpop.f32.mrf.mxu2 }
 0x4b1   : > { %v5780_v57 = vpop.f32.mrf.mxu0  ;;  %v5869_v27 = vpop.f32.mrf.mxu1 }
 0x4b2   : > { %v5942_v19 = vadd.f32 %v5780_v57, %v5218_v45  ;;  %v5943_v16 = vadd.f32 %v5869_v27, %v5307_v51  ;;  %v11213_v57 = vld [vmem:[#allocation40_spill] sm:$0xff] }
 0x4b3   : > { %v5226_v27 = vadd.f32 %v10324_v37, %v11213_v57  ;;  %v6587_v37 = vld [vmem:[%s10982_s8 + $0x68] sm:$0xff] }
 0x4b4   : > { %v5990_v41 = vpack.c.bf16 %v5942_v19, %v5940_v34  ;;  %v5991_v47 = vpack.c.bf16 %v5943_v16, %v5941_v29  ;;  %v10459_v58 = vpop.f32.mrf.mxu3  ;;  %v11214_v34 = vld [vmem:[#allocation37_spill] sm:$0xff]  ;;  %v11215_v19 = vld [vmem:[#allocation38_spill] sm:$0xff]  ;;  %8162 = vmatpush.msra.mxu2 %v6587_v37  ;;  %6667 = vmatpush.msra.mxu0 %v6587_v37 }
 0x4b5   : > { %v5315_v29 = vadd.f32 %v10326_v52, %v11214_v34  ;;  %v5228_v16 = vadd.f32 %v10328_v25, %v11215_v19 }
 0x4b6   : > { %6183 = vmatmul.bf16.gmra.mxu2 %v5990_v41  ;;  %6272 = vmatmul.bf16.gmra.mxu3 %v5991_v47  ;;  %v11216_v41 = vld [vmem:[#allocation47_spill] sm:$0xff] }
 0x4b7   : > { %v5317_v47 = vadd.f32 %v10330_v30, %v11216_v41  ;;  %v6583_v41 = vld [vmem:[%s10982_s8 + $0x48] sm:$0xff] }
 0x4b9   : > { %v5783_v18 = vpop.f32.mrf.mxu0  ;;  %v5872_v43 = vpop.f32.mrf.mxu1 }
 0x4ba   : > { %v5944_v32 = vadd.f32 %v5783_v18, %v5221_v56  ;;  %v5945_v60 = vadd.f32 %v5872_v43, %v5310_v39 }
 0x4c1   : > { %v5785_v23 = vpop.f32.mrf.mxu0  ;;  %v5874_v59 = vpop.f32.mrf.mxu1 }
 0x4c2   : > { %v5946_v9 = vadd.f32 %v5785_v23, %v5223_v24  ;;  %v5947_v46 = vadd.f32 %v5874_v59, %v5312_v17  ;;  %v11217_v24 = vld [vmem:[#allocation45_spill] sm:$0xff]  ;;  %v5320_v17 = vadd.f32 %v10344_v8, %v11218_v1  ;;  %v11219_v23 = vld [vmem:[#allocation46_spill] sm:$0xff]  ;;  %v6585_v8 = vld [vmem:[%s10982_s8 + $0x58] sm:$0xff] }
 0x4c3   : > { %v5231_v31 = vadd.f32 %v10342_v26, %v11217_v24  ;;  %v5233_v59 = vadd.f32 %v10348_v50, %v11219_v23  ;;  %v6586_v26 = vld [vmem:[%s10982_s8 + $0x60] sm:$0xff]  ;;  %v6584_v50 = vld [vmem:[%s10982_s8 + $0x50] sm:$0xff] }
 0x4c4   : > { %v5992_v40 = vpack.c.bf16 %v5946_v9, %v5944_v32  ;;  %v5993_v3 = vpack.c.bf16 %v5947_v46, %v5945_v60  ;;  %v11220_v32 = vld [vmem:[#allocation53_spill] sm:$0xff]  ;;  %6668 = vmatpush.msra.mxu0 %v6586_v26  ;;  %8163 = vmatpush.msra.mxu2 %v6586_v26 }
 0x4c5   : > { %v5322_v60 = vadd.f32 %v10350_v22, %v11220_v32 }
 0x4c6   : > { %6188 = vmatmul.bf16.gmra.mxu2 %v5992_v40  ;;  %6277 = vmatmul.bf16.gmra.mxu3 %v5993_v3 }
 0x4c7   : > { %6669 = vmatpush.msra.mxu0 %v6585_v8  ;;  %8164 = vmatpush.msra.mxu2 %v6585_v8  ;;  %v6576_v8 = vld [vmem:[%s10982_s8 + $0x10] sm:$0xff] }
 0x4c9   : > { %v5788_v45 = vpop.f32.mrf.mxu0  ;;  %v5877_v20 = vpop.f32.mrf.mxu1  ;;  %6670 = vmatpush.msra.mxu0 %v6584_v50  ;;  %8165 = vmatpush.msra.mxu2 %v6584_v50 }
 0x4ca   : > { %v10464_v10 = vpop.f32.mrf.mxu2  ;;  %v10466_v51 = vpop.f32.mrf.mxu3  ;;  %v5948_v43 = vadd.f32 %v5788_v45, %v5226_v27  ;;  %v5949_v14 = vadd.f32 %v5877_v20, %v5315_v29 }
 0x4cb   : > { %6671 = vmatpush.msra.mxu0 %v6583_v41  ;;  %8166 = vmatpush.msra.mxu2 %v6583_v41 }
 0x4d1   : > { %v5790_v55 = vpop.f32.mrf.mxu0  ;;  %v5879_v18 = vpop.f32.mrf.mxu1 }
 0x4d2   : > { %v5950_v15 = vadd.f32 %v5790_v55, %v5228_v16  ;;  %v5951_v56 = vadd.f32 %v5879_v18, %v5317_v47  ;;  %v6151_v36 = vpop.f32.mrf.mxu2  ;;  %v6240_v62 = vpop.f32.mrf.mxu3  ;;  %v10502_v47 = vld [vmem:[%s10981_s7] ss:$0 sm:$0xff] }
 0x4d3   : > { %v6152_v55 = vadd.f32 %v10502_v47, %v6151_v36 }
 0x4d4   : > { %v5994_v39 = vpack.c.bf16 %v5950_v15, %v5948_v43  ;;  %v5995_v33 = vpack.c.bf16 %v5951_v56, %v5949_v14  ;;  %v6582_v43 = vld [vmem:[%s10982_s8 + $0x40] sm:$0xff]  ;;  %v6581_v14 = vld [vmem:[%s10982_s8 + $0x38] sm:$0xff] }
 0x4d5   : > { %v11221_v15 = vld [vmem:[#allocation51_spill] sm:$0xff]  ;;  %6672 = vmatpush.msra.mxu0 %v6582_v43  ;;  %8167 = vmatpush.msra.mxu2 %v6582_v43  ;;  %v6575_v43 = vld [vmem:[%s10982_s8 + $0x8] sm:$0xff] }
 0x4d6   : > { %6193 = vmatmul.bf16.gmra.mxu2 %v5994_v39  ;;  %6282 = vmatmul.bf16.gmra.mxu3 %v5995_v33  ;;  %v5236_v56 = vadd.f32 %v10360_v4, %v11221_v15  ;;  %v6150_v39 = vadd.f32 %v10502_v47, %v10464_v10  ;;  %v11222_v33 = vld [vmem:[#allocation54_spill] sm:$0xff]  ;;  %v10527_v10 = vadd.f32 %v6240_v62, %v6152_v55 }
 0x4d7   : > { %v5325_v37 = vadd.f32 %v10362_v49, %v11222_v33  ;;  %v6580_v4 = vld [vmem:[%s10982_s8 + $0x30] sm:$0xff]  ;;  %6673 = vmatpush.msra.mxu0 %v6581_v14  ;;  %8168 = vmatpush.msra.mxu2 %v6581_v14  ;;  %v6574_v33 = vld [vmem:[%s10982_s8] sm:$0xff] }
 0x4d9   : > { %v5793_v52 = vpop.f32.mrf.mxu0  ;;  %v5882_v25 = vpop.f32.mrf.mxu1  ;;  %6674 = vmatpush.msra.mxu0 %v6580_v4  ;;  %8169 = vmatpush.msra.mxu2 %v6580_v4 }
 0x4da   : > { %v6154_v30 = vpop.f32.mrf.mxu2  ;;  %v6243_v61 = vpop.f32.mrf.mxu3  ;;  %v5952_v40 = vadd.f32 %v5793_v52, %v5231_v31  ;;  %v5953_v3 = vadd.f32 %v5882_v25, %v5320_v17  ;;  %v11223_v52 = vld [vmem:[#allocation52_spill] sm:$0xff] }
 0x4db   : > { %v6155_v18 = vadd.f32 %v10502_v47, %v6154_v30  ;;  %v5238_v25 = vadd.f32 %v10374_v21, %v11223_v52  ;;  %v11224_v30 = vld [vmem:[#allocation59_spill] sm:$0xff] }
 0x4dc   : > { %v5327_v24 = vadd.f32 %v10376_v5, %v11224_v30  ;;  %v11225_v30 = vld [vmem:[#allocation57_spill] sm:$0xff] }
 0x4dd   : > { %v10529_v1 = vadd.f32 %v6243_v61, %v6155_v18 }
 0x4e1   : > { %v5795_v9 = vpop.f32.mrf.mxu0  ;;  %v5884_v46 = vpop.f32.mrf.mxu1 }
 0x4e2   : > { %v5954_v12 = vadd.f32 %v5795_v9, %v5233_v59  ;;  %v5955_v45 = vadd.f32 %v5884_v46, %v5322_v60  ;;  %v6156_v20 = vpop.f32.mrf.mxu2  ;;  %v6245_v57 = vpop.f32.mrf.mxu3  ;;  %v6579_v9 = vld [vmem:[%s10982_s8 + $0x28] sm:$0xff]  ;;  %v10535_v46 = vadd.f32 %v10466_v51, %v6150_v39  ;;  %v6388_v51 = vrot.slane %v10527_v10, 4 }
 0x4e3   : > { %v6157_v36 = vadd.f32 %v10502_v47, %v6156_v20  ;;  %6675 = vmatpush.msra.mxu0 %v6579_v9  ;;  %v6578_v20 = vld [vmem:[%s10982_s8 + $0x20] sm:$0xff]  ;;  %8170 = vmatpush.msra.mxu2 %v6579_v9 }
 0x4e4   : > { %v5996_v27 = vpack.c.bf16 %v5954_v12, %v5952_v40  ;;  %v5997_v34 = vpack.c.bf16 %v5955_v45, %v5953_v3 }
 0x4e5   : > { %v10537_v62 = vadd.f32 %v6245_v57, %v6157_v36  ;;  %v6394_v57 = vrot.slane %v10529_v1, 4  ;;  %6676 = vmatpush.msra.mxu0 %v6578_v20  ;;  %8171 = vmatpush.msra.mxu2 %v6578_v20 }
 0x4e6   : > { %6198 = vmatmul.bf16.gmra.mxu2 %v5996_v27  ;;  %6287 = vmatmul.bf16.gmra.mxu3 %v5997_v34  ;;  %v6577_v27 = vld [vmem:[%s10982_s8 + $0x18] sm:$0xff]  ;;  %v6382_v34 = vrot.slane %v10535_v46, 4 }
 0x4e7   : > { %v6400_v26 = vrot.slane %v10537_v62, 4  ;;  %6677 = vmatpush.msra.mxu0 %v6577_v27  ;;  %8172 = vmatpush.msra.mxu2 %v6577_v27 }
 0x4e8   : > { %v6383_v15 = vadd.f32 %v6382_v34, %v10535_v46 }
 0x4e9   : > { %v5798_v22 = vpop.f32.mrf.mxu0  ;;  %v5887_v29 = vpop.f32.mrf.mxu1  ;;  %6678 = vmatpush.msra.mxu0 %v6576_v8  ;;  %8173 = vmatpush.msra.mxu2 %v6576_v8 }
 0x4ea   : > { %v6159_v19 = vpop.f32.mrf.mxu2  ;;  %v6248_v16 = vpop.f32.mrf.mxu3  ;;  %v5956_v49 = vadd.f32 %v5798_v22, %v5236_v56  ;;  %v5957_v59 = vadd.f32 %v5887_v29, %v5325_v37  ;;  %v6401_v56 = vadd.f32 %v6400_v26, %v10537_v62 }
 0x4eb   : > { %v6160_v31 = vadd.f32 %v10502_v47, %v6159_v19  ;;  %v6389_v19 = vadd.f32 %v6388_v51, %v10527_v10  ;;  %6679 = vmatpush.msra.mxu0 %v6575_v43  ;;  %8174 = vmatpush.msra.mxu2 %v6575_v43 }
 0x4ec   : > { %v6402_v4 = vrot.slane %v6401_v56, 2 }
 0x4ed   : > { %v10540_v40 = vadd.f32 %v6248_v16, %v6160_v31  ;;  %v6395_v16 = vadd.f32 %v6394_v57, %v10529_v1  ;;  %v6390_v37 = vrot.slane %v6389_v19, 2  ;;  %6680 = vmatpush.msra.mxu0 %v6574_v33  ;;  %v6384_v31 = vrot.slane %v6383_v15, 2  ;;  %8175 = vmatpush.msra.mxu2 %v6574_v33 }
 0x4ef   : > { %v6406_v50 = vrot.slane %v10540_v40, 4  ;;  %v6396_v52 = vrot.slane %v6395_v16, 2 }
 0x4f1   : > { %v5800_v17 = vpop.f32.mrf.mxu0  ;;  %v5889_v23 = vpop.f32.mrf.mxu1  ;;  %v6407_v39 = vadd.f32 %v6406_v50, %v10540_v40  ;;  %v6403_v50 = vadd.f32 %v6402_v4, %v6401_v56 }
 0x4f2   : > { %v5958_v21 = vadd.f32 %v5800_v17, %v5238_v25  ;;  %v5959_v32 = vadd.f32 %v5889_v23, %v5327_v24  ;;  %v6161_v60 = vpop.f32.mrf.mxu2  ;;  %v6250_v5 = vpop.f32.mrf.mxu3  ;;  %v5241_v24 = vadd.f32 %v10378_v53, %v11225_v30  ;;  %v11226_v23 = vld [vmem:[#allocation60_spill] sm:$0xff]  ;;  %v6397_v53 = vadd.f32 %v6396_v52, %v6395_v16 }
 0x4f3   : > { %v6162_v61 = vadd.f32 %v10502_v47, %v6161_v60  ;;  %v6404_v33 = vrot.slane %v6403_v50, 1 }
 0x4f4   : > { %v5998_v3 = vpack.c.bf16 %v5958_v21, %v5956_v49  ;;  %v5999_v12 = vpack.c.bf16 %v5959_v32, %v5957_v59  ;;  %v5330_v49 = vadd.f32 %v10380_v11, %v11226_v23  ;;  %v11227_v59 = vld [vmem:[#allocation58_spill] sm:$0xff]  ;;  %v11228_v32 = vld [vmem:[#allocation43_spill] sm:$0xff] }
 0x4f5   : > { %v10542_v45 = vadd.f32 %v6250_v5, %v6162_v61  ;;  %v5243_v21 = vadd.f32 %v10392_v44, %v11227_v59  ;;  %v5332_v60 = vadd.f32 %v10394_v0, %v11228_v32  ;;  %v6408_v5 = vrot.slane %v6407_v39, 2 }
 0x4f6   : > { %6203 = vmatmul.bf16.gmra.mxu2 %v5998_v3  ;;  %6292 = vmatmul.bf16.gmra.mxu3 %v5999_v12  ;;  %v6391_v3 = vadd.f32 %v6390_v37, %v6389_v19  ;;  %v6385_v44 = vadd.f32 %v6384_v31, %v6383_v15 }
 0x4f7   : > { %v6412_v41 = vrot.slane %v10542_v45, 4 }
 0x4f8   : > { %v6392_v19 = vrot.slane %v6391_v3, 1 }
 0x4f9   : > { %v5803_v22 = vpop.f32.mrf.mxu0  ;;  %v5892_v29 = vpop.f32.mrf.mxu1  ;;  %v6413_v25 = vadd.f32 %v6412_v41, %v10542_v45 }
 0x4fa   : > { %v6164_v55 = vpop.f32.mrf.mxu2  ;;  %v6253_v18 = vpop.f32.mrf.mxu3  ;;  %v5960_v51 = vadd.f32 %v5803_v22, %v5241_v24  ;;  %v5961_v57 = vadd.f32 %v5892_v29, %v5330_v49  ;;  %v6398_v22 = vrot.slane %v6397_v53, 1  ;;  %v6393_v56 = vadd.f32 %v6392_v19, %v6391_v3 }
 0x4fb   : > { %v6165_v14 = vadd.f32 %v10502_v47, %v6164_v55  ;;  %v6414_v12 = vrot.slane %v6413_v25, 2  ;;  %v6405_v49 = vadd.f32 %v6404_v33, %v6403_v50 }
 0x4fd   : > { %v10568_v36 = vadd.f32 %v6253_v18, %v6165_v14  ;;  %v6409_v18 = vadd.f32 %v6408_v5, %v6407_v39  ;;  %v6415_v16 = vadd.f32 %v6414_v12, %v6413_v25  ;;  %v6386_v14 = vrot.slane %v6385_v44, 1 }
 0x4fe   : > { %v6399_v25 = vadd.f32 %v6398_v22, %v6397_v53  ;;  %v11230_v53 = vld [vmem:[#allocation44_spill] sm:$0xff] }
 0x4ff   : > { %v6418_v17 = vrot.slane %v10568_v36, 4  ;;  %v6410_v52 = vrot.slane %v6409_v18, 1  ;;  %v6416_v24 = vrot.slane %v6415_v16, 1  ;;  %v6387_v23 = vadd.f32 %v6386_v14, %v6385_v44 }
 0x501   : > { %v5805_v9 = vpop.f32.mrf.mxu0  ;;  %v5894_v61 = vpop.f32.mrf.mxu1  ;;  %v6419_v20 = vadd.f32 %v6418_v17, %v10568_v36  ;;  %v6417_v32 = vadd.f32 %v6416_v24, %v6415_v16  ;;  %v6627_v5 = vsel %vm6626_vm3, %v6393_v56, %v6387_v23  ;;  %v11234_v56 = vld [vmem:[#allocation70_spill] sm:$0xff] }
 0x502   : > { %v5962_v27 = vadd.f32 %v5805_v9, %v5243_v21  ;;  %v5963_v34 = vadd.f32 %v5894_v61, %v5332_v60  ;;  %v6166_v26 = vpop.f32.mrf.mxu2  ;;  %v6255_v11 = vpop.f32.mrf.mxu3  ;;  %v6411_v21 = vadd.f32 %v6410_v52, %v6409_v18  ;;  %v11229_v9 = vld [vmem:[#allocation22_spill] sm:$0xff]  ;;  %v6629_v12 = vsel %vm6628_vm6, %v6399_v25, %v6627_v5 }
 0x503   : > { %v6167_v8 = vadd.f32 %v10502_v47, %v6166_v26  ;;  %v6420_v41 = vrot.slane %v6419_v20, 2  ;;  %v5246_v61 = vadd.f32 %v10406_v35, %v11229_v9  ;;  %v11232_v26 = vld [vmem:[#allocation64_spill] sm:$0xff]  ;;  %v5340_v24 = vadd.f32 %v10426_v2, %v11234_v56 }
 0x504   : > { %v6000_v0 = vpack.c.bf16 %v5962_v27, %v5960_v51  ;;  %v6001_v55 = vpack.c.bf16 %v5963_v34, %v5961_v57  ;;  %v6631_v57 = vsel %vm6630_vm9, %v6405_v49, %v6629_v12  ;;  %v11231_v27 = vld [vmem:[#allocation66_spill] sm:$0xff] }
 0x505   : > { %v10585_v43 = vadd.f32 %v6255_v11, %v6167_v8  ;;  %v6421_v29 = vadd.f32 %v6420_v41, %v6419_v20  ;;  %v5335_v20 = vadd.f32 %v10408_v38, %v11230_v53  ;;  %v5248_v34 = vadd.f32 %v10410_v28, %v11231_v27 }
 0x506   : > { %6208 = vmatmul.bf16.gmra.mxu2 %v6000_v0  ;;  %6297 = vmatmul.bf16.gmra.mxu3 %v6001_v55  ;;  %v5337_v11 = vadd.f32 %v10412_v7, %v11232_v26  ;;  %v6633_v8 = vsel %vm6632_vm12, %v6411_v21, %v6631_v57  ;;  %v11238_v26 = vld [vmem:[#allocation68_spill] sm:$0xff] }
 0x507   : > { %v6424_v37 = vrot.slane %v10585_v43, 4  ;;  %v6422_v17 = vrot.slane %v6421_v29, 1  ;;  %v6635_v0 = vsel %vm6634_vm11, %v6417_v32, %v6633_v8  ;;  %v11239_v8 = vld [vmem:[#allocation73_spill] sm:$0xff] }
 0x509   : > { %v5808_v30 = vpop.f32.mrf.mxu0  ;;  %v5897_v15 = vpop.f32.mrf.mxu1  ;;  %v6425_v31 = vadd.f32 %v6424_v37, %v10585_v43  ;;  %v6423_v3 = vadd.f32 %v6422_v17, %v6421_v29  ;;  %v11236_v17 = vld [vmem:[#allocation56_spill] sm:$0xff] }
 0x50a   : > { %v10589_v39 = vpop.f32.mrf.mxu2  ;;  %v10591_v4 = vpop.f32.mrf.mxu3  ;;  %v5964_v35 = vadd.f32 %v5808_v30, %v5246_v61  ;;  %v5965_v38 = vadd.f32 %v5897_v15, %v5335_v20  ;;  %v11233_v30 = vld [vmem:[#allocation69_spill] sm:$0xff]  ;;  %v5342_v23 = vadd.f32 %v10432_v6, %v11236_v17 }
 0x50b   : > { %v6426_v59 = vrot.slane %v6425_v31, 2  ;;  %v6637_v22 = vsel %vm6636_vm13, %v6423_v3, %v6635_v0  ;;  %v5251_v15 = vadd.f32 %v10424_v48, %v11233_v30  ;;  %v6170_v27 = vadd.f32 %v10502_v47, %v10589_v39 }
 0x50d   : > { %v6427_v60 = vadd.f32 %v6426_v59, %v6425_v31  ;;  %v11235_v31 = vld [vmem:[#allocation55_spill] sm:$0xff] }
 0x50e   : > { %v5253_v25 = vadd.f32 %v10430_v54, %v11235_v31 }
 0x50f   : > { %v6428_v51 = vrot.slane %v6427_v60, 1 }
 0x511   : > { %v5810_v44 = vpop.f32.mrf.mxu0  ;;  %v5899_v50 = vpop.f32.mrf.mxu1  ;;  %v6429_v41 = vadd.f32 %v6428_v51, %v6427_v60  ;;  %v11237_v51 = vld [vmem:[#allocation67_spill] sm:$0xff] }
 0x512   : > { %v5966_v55 = vadd.f32 %v5810_v44, %v5248_v34  ;;  %v5967_v18 = vadd.f32 %v5899_v50, %v5337_v11  ;;  %v6171_v19 = vpop.f32.mrf.mxu2  ;;  %v6260_v16 = vpop.f32.mrf.mxu3  ;;  %v5256_v57 = vadd.f32 %v10445_v42, %v11237_v51  ;;  %v5345_v11 = vadd.f32 %v10447_v13, %v11238_v26  ;;  %v11240_v44 = vld [vmem:[#allocation74_spill] sm:$0xff] }
 0x513   : > { %v6639_v28 = vsel %vm6638_vm14, %v6429_v41, %v6637_v22  ;;  %v6172_v54 = vadd.f32 %v10502_v47, %v6171_v19  ;;  %v5347_v50 = vadd.f32 %v10459_v58, %v11240_v44 }
 0x514   : > { %v6002_v29 = vpack.c.bf16 %v5966_v55, %v5964_v35  ;;  %v6003_v7 = vpack.c.bf16 %v5967_v18, %v5965_v38  ;;  %6681 = vmatmul.f32.vlgmr.msra.gmra.mxu0 %v6639_v28  ;;  %v5258_v35 = vadd.f32 %v10457_v63, %v11239_v8 }
 0x515   : > { %v10630_v0 = vadd.f32 %v6260_v16, %v6172_v54 }
 0x516   : > { %6213 = vmatmul.bf16.gmra.mxu2 %v6002_v29  ;;  %6302 = vmatmul.bf16.gmra.mxu3 %v6003_v7  ;;  %v10635_v29 = vadd.f32 %v10591_v4, %v6170_v27 }
 0x518   : > { %v6430_v30 = vrot.slane %v10635_v29, 4 }
 0x519   : > { %v5813_v14 = vpop.f32.mrf.mxu0  ;;  %v5902_v33 = vpop.f32.mrf.mxu1 }
 0x51a   : > { %v6174_v37 = vpop.f32.mrf.mxu2  ;;  %v6263_v52 = vpop.f32.mrf.mxu3  ;;  %v5968_v21 = vadd.f32 %v5813_v14, %v5251_v15  ;;  %v5969_v32 = vadd.f32 %v5902_v33, %v5340_v24 }
 0x51b   : > { %v6175_v6 = vadd.f32 %v10502_v47, %v6174_v37  ;;  %v6436_v37 = vrot.slane %v10630_v0, 4 }
 0x51d   : > { %v10632_v38 = vadd.f32 %v6263_v52, %v6175_v6  ;;  %v6437_v56 = vadd.f32 %v6436_v37, %v10630_v0 }
 0x51f   : > { %v6442_v52 = vrot.slane %v10632_v38, 4 }
 0x521   : > { %v5815_v49 = vpop.f32.mrf.mxu0  ;;  %v5904_v59 = vpop.f32.mrf.mxu1  ;;  %v6443_v17 = vadd.f32 %v6442_v52, %v10632_v38 }
 0x522   : > { %v5970_v60 = vadd.f32 %v5815_v49, %v5253_v25  ;;  %v5971_v5 = vadd.f32 %v5904_v59, %v5342_v23  ;;  %v6176_v9 = vpop.f32.mrf.mxu2  ;;  %v6265_v61 = vpop.f32.mrf.mxu3  ;;  %v6431_v49 = vadd.f32 %v6430_v30, %v10635_v29 }
 0x523   : > { %v6177_v34 = vadd.f32 %v10502_v47, %v6176_v9  ;;  %v6698_v9 = vld [vmem:[%s10984_s10] sm:$0xf] }
 0x524   : > { %v6004_v3 = vpack.c.bf16 %v5970_v60, %v5968_v21  ;;  %v6005_v12 = vpack.c.bf16 %v5971_v5, %v5969_v32  ;;  %v6438_v60 = vrot.slane %v6437_v56, 2  ;;  %8176 = vmatpush.msk.msra.mxu3 %vm1097_vm5, %v6698_v9  ;;  %7984 = vmatpush.msk.msra.mxu1 %vm1097_vm5, %v6698_v9  ;;  %vm6703_vm5 = vcmask 31744  }
 0x525   : > { %v10637_v63 = vadd.f32 %v6265_v61, %v6177_v34  ;;  %v6444_v61 = vrot.slane %v6443_v17, 2 }
 0x526   : > { %6218 = vmatmul.bf16.gmra.mxu2 %v6004_v3  ;;  %6307 = vmatmul.bf16.gmra.mxu3 %v6005_v12  ;;  %v6432_v3 = vrot.slane %v6431_v49, 2 }
 0x527   : > { %v6448_v4 = vrot.slane %v10637_v63, 4 }
 0x528   : > { %v6433_v34 = vadd.f32 %v6432_v3, %v6431_v49 }
 0x529   : > { %v5818_v48 = vpop.f32.mrf.mxu0  ;;  %v5907_v2 = vpop.f32.mrf.mxu1  ;;  %v6449_v59 = vadd.f32 %v6448_v4, %v10637_v63 }
 0x52a   : > { %v6179_v53 = vpop.f32.mrf.mxu2  ;;  %v6268_v20 = vpop.f32.mrf.mxu3  ;;  %v5972_v39 = vadd.f32 %v5818_v48, %v5256_v57  ;;  %v5973_v18 = vadd.f32 %v5907_v2, %v5345_v11  ;;  %v6445_v57 = vadd.f32 %v6444_v61, %v6443_v17 }
 0x52b   : > { %v6180_v41 = vadd.f32 %v10502_v47, %v6179_v53  ;;  %v6450_v12 = vrot.slane %v6449_v59, 2  ;;  %v6439_v53 = vadd.f32 %v6438_v60, %v6437_v56 }
 0x52d   : > { %v10640_v7 = vadd.f32 %v6268_v20, %v6180_v41  ;;  %v6451_v26 = vadd.f32 %v6450_v12, %v6449_v59  ;;  %v6440_v44 = vrot.slane %v6439_v53, 1  ;;  %v6446_v41 = vrot.slane %v6445_v57, 1 }
 0x52f   : > { %v6454_v15 = vrot.slane %v10640_v7, 4 }
 0x531   : > { %v5820_v42 = vpop.f32.mrf.mxu0  ;;  %v5909_v55 = vpop.f32.mrf.mxu1  ;;  %v6455_v21 = vadd.f32 %v6454_v15, %v10640_v7 }
 0x532   : > { %v5974_v19 = vadd.f32 %v5820_v42, %v5258_v35  ;;  %v5975_v22 = vadd.f32 %v5909_v55, %v5347_v50  ;;  %v6181_v28 = vpop.f32.mrf.mxu2  ;;  %v6270_v13 = vpop.f32.mrf.mxu3  ;;  %v6434_v55 = vrot.slane %v6433_v34, 1 }
 0x533   : > { %v6182_v58 = vadd.f32 %v10502_v47, %v6181_v28  ;;  %v6456_v2 = vrot.slane %v6455_v21, 2 }
 0x534   : > { %v6006_v16 = vpack.c.bf16 %v5974_v19, %v5972_v39  ;;  %v6007_v14 = vpack.c.bf16 %v5975_v22, %v5973_v18  ;;  %v6452_v39 = vrot.slane %v6451_v26, 1  ;;  %v6441_v22 = vadd.f32 %v6440_v44, %v6439_v53 }
 0x535   : > { %v10642_v33 = vadd.f32 %v6270_v13, %v6182_v58  ;;  %v6457_v8 = vadd.f32 %v6456_v2, %v6455_v21  ;;  %v6435_v52 = vadd.f32 %v6434_v55, %v6433_v34 }
 0x536   : > { %6223 = vmatmul.bf16.gmra.mxu2 %v6006_v16  ;;  %6312 = vmatmul.bf16.gmra.mxu3 %v6007_v14  ;;  %v6447_v14 = vadd.f32 %v6446_v41, %v6445_v57  ;;  %v6453_v30 = vadd.f32 %v6452_v39, %v6451_v26 }
 0x537   : > { %v6460_v24 = vrot.slane %v10642_v33, 4  ;;  %v6458_v19 = vrot.slane %v6457_v8, 1 }
 0x539   : > { %v6461_v5 = vadd.f32 %v6460_v24, %v10642_v33  ;;  %v6459_v15 = vadd.f32 %v6458_v19, %v6457_v8 }
 0x53a   : > { %v6184_v31 = vpop.f32.mrf.mxu2  ;;  %v6273_v25 = vpop.f32.mrf.mxu3 }
 0x53b   : > { %v6185_v23 = vadd.f32 %v10502_v47, %v6184_v31  ;;  %v6462_v20 = vrot.slane %v6461_v5, 2  ;;  %v6640_v31 = vsel %vm6626_vm3, %v6441_v22, %v6435_v52 }
 0x53c   : > { %v6641_v17 = vsel %vm6628_vm6, %v6447_v14, %v6640_v31 }
 0x53d   : > { %v10656_v32 = vadd.f32 %v6273_v25, %v6185_v23  ;;  %v6463_v50 = vadd.f32 %v6462_v20, %v6461_v5  ;;  %v6642_v49 = vsel %vm6630_vm9, %v6453_v30, %v6641_v17 }
 0x53e   : > { %v6643_v59 = vsel %vm6632_vm12, %v6459_v15, %v6642_v49 }
 0x53f   : > { %v6466_v48 = vrot.slane %v10656_v32, 4  ;;  %v6464_v28 = vrot.slane %v6463_v50, 1 }
 0x541   : > { %v6467_v54 = vadd.f32 %v6466_v48, %v10656_v32  ;;  %v6465_v56 = vadd.f32 %v6464_v28, %v6463_v50 }
 0x542   : > { %v6186_v6 = vpop.f32.mrf.mxu2  ;;  %v6275_v51 = vpop.f32.mrf.mxu3 }
 0x543   : > { %v6187_v27 = vadd.f32 %v10502_v47, %v6186_v6  ;;  %v6468_v11 = vrot.slane %v6467_v54, 2  ;;  %v6644_v60 = vsel %vm6634_vm11, %v6465_v56, %v6643_v59 }
 0x545   : > { %v10667_v35 = vadd.f32 %v6275_v51, %v6187_v27  ;;  %v6469_v42 = vadd.f32 %v6468_v11, %v6467_v54 }
 0x547   : > { %v6472_v18 = vrot.slane %v10667_v35, 4  ;;  %v6470_v37 = vrot.slane %v6469_v42, 1 }
 0x549   : > { %v6473_v13 = vadd.f32 %v6472_v18, %v10667_v35  ;;  %v6471_v25 = vadd.f32 %v6470_v37, %v6469_v42 }
 0x54a   : > { %v6189_v58 = vpop.f32.mrf.mxu2  ;;  %v6278_v16 = vpop.f32.mrf.mxu3 }
 0x54b   : > { %v6474_v4 = vrot.slane %v6473_v13, 2  ;;  %v6645_v61 = vsel %vm6636_vm13, %v6471_v25, %v6644_v60  ;;  %v6190_v57 = vadd.f32 %v10502_v47, %v6189_v58 }
 0x54d   : > { %v6475_v24 = vadd.f32 %v6474_v4, %v6473_v13  ;;  %v10687_v50 = vadd.f32 %v6278_v16, %v6190_v57 }
 0x54f   : > { %v6476_v23 = vrot.slane %v6475_v24, 1  ;;  %v6478_v22 = vrot.slane %v10687_v50, 4 }
 0x551   : > { %v6477_v21 = vadd.f32 %v6476_v23, %v6475_v24  ;;  %v6479_v4 = vadd.f32 %v6478_v22, %v10687_v50 }
 0x552   : > { %v6191_v5 = vpop.f32.mrf.mxu2  ;;  %v6280_v9 = vpop.f32.mrf.mxu3 }
 0x553   : > { %v6646_v3 = vsel %vm6638_vm14, %v6477_v21, %v6645_v61  ;;  %v6192_v6 = vadd.f32 %v10502_v47, %v6191_v5  ;;  %v6480_v23 = vrot.slane %v6479_v4, 2 }
 0x554   : > { %6684 = vmatmul.f32.gmra.mxu0 %v6646_v3 }
 0x555   : > { %v10683_v26 = vadd.f32 %v6280_v9, %v6192_v6 }
 0x557   : > { %v6484_v18 = vrot.slane %v10683_v26, 4 }
 0x559   : > { %v6485_v58 = vadd.f32 %v6484_v18, %v10683_v26 }
 0x55a   : > { %v6194_v12 = vpop.f32.mrf.mxu2  ;;  %v6283_v48 = vpop.f32.mrf.mxu3 }
 0x55b   : > { %v6195_v51 = vadd.f32 %v10502_v47, %v6194_v12  ;;  %v6486_v31 = vrot.slane %v6485_v58, 2 }
 0x55d   : > { %v10685_v11 = vadd.f32 %v6283_v48, %v6195_v51  ;;  %v6487_v60 = vadd.f32 %v6486_v31, %v6485_v58 }
 0x55f   : > { %v6490_v19 = vrot.slane %v10685_v11, 4  ;;  %v6488_v51 = vrot.slane %v6487_v60, 1 }
 0x561   : > { %v6491_v52 = vadd.f32 %v6490_v19, %v10685_v11  ;;  %v6489_v19 = vadd.f32 %v6488_v51, %v6487_v60 }
 0x562   : > { %v6196_v2 = vpop.f32.mrf.mxu2  ;;  %v6285_v53 = vpop.f32.mrf.mxu3 }
 0x563   : > { %v6197_v27 = vadd.f32 %v10502_v47, %v6196_v2  ;;  %v6492_v17 = vrot.slane %v6491_v52, 2  ;;  %v6481_v2 = vadd.f32 %v6480_v23, %v6479_v4 }
 0x565   : > { %v10689_v41 = vadd.f32 %v6285_v53, %v6197_v27  ;;  %v6493_v12 = vadd.f32 %v6492_v17, %v6491_v52 }
 0x567   : > { %v6496_v28 = vrot.slane %v10689_v41, 4  ;;  %v6494_v27 = vrot.slane %v6493_v12, 1 }
 0x569   : > { %v6497_v15 = vadd.f32 %v6496_v28, %v10689_v41 }
 0x56a   : > { %v6199_v20 = vpop.f32.mrf.mxu2  ;;  %v6288_v54 = vpop.f32.mrf.mxu3 }
 0x56b   : > { %v6200_v34 = vadd.f32 %v10502_v47, %v6199_v20  ;;  %v6498_v49 = vrot.slane %v6497_v15, 2 }
 0x56d   : > { %v10692_v55 = vadd.f32 %v6288_v54, %v6200_v34  ;;  %v6499_v53 = vadd.f32 %v6498_v49, %v6497_v15 }
 0x56f   : > { %v6502_v13 = vrot.slane %v10692_v55, 4 }
 0x571   : > { %v6503_v56 = vadd.f32 %v6502_v13, %v10692_v55 }
 0x572   : > { %v6201_v8 = vpop.f32.mrf.mxu2  ;;  %v6290_v44 = vpop.f32.mrf.mxu3 }
 0x573   : > { %v6202_v42 = vadd.f32 %v10502_v47, %v6201_v8  ;;  %v6504_v21 = vrot.slane %v6503_v56, 2  ;;  %v6482_v8 = vrot.slane %v6481_v2, 1 }
 0x575   : > { %v10694_v39 = vadd.f32 %v6290_v44, %v6202_v42  ;;  %v6505_v54 = vadd.f32 %v6504_v21, %v6503_v56  ;;  %v6500_v44 = vrot.slane %v6499_v53, 1 }
 0x577   : > { %v6508_v16 = vrot.slane %v10694_v39, 4  ;;  %v6506_v18 = vrot.slane %v6505_v54, 1  ;;  %v6501_v52 = vadd.f32 %v6500_v44, %v6499_v53 }
 0x579   : > { %v6509_v25 = vadd.f32 %v6508_v16, %v10694_v39  ;;  %v6495_v16 = vadd.f32 %v6494_v27, %v6493_v12  ;;  %v6507_v4 = vadd.f32 %v6506_v18, %v6505_v54 }
 0x57a   : > { %v6204_v14 = vpop.f32.mrf.mxu2  ;;  %v6293_v37 = vpop.f32.mrf.mxu3 }
 0x57b   : > { %v6205_v30 = vadd.f32 %v10502_v47, %v6204_v14  ;;  %v6510_v5 = vrot.slane %v6509_v25, 2 }
 0x57d   : > { %v10708_v24 = vadd.f32 %v6293_v37, %v6205_v30  ;;  %v6511_v57 = vadd.f32 %v6510_v5, %v6509_v25  ;;  %v6483_v37 = vadd.f32 %v6482_v8, %v6481_v2  ;;  %v10722_v25 = vld [vmem:[%s10983_s9] ss:$0 sm:$0xff] }
 0x57f   : > { %v6514_v59 = vrot.slane %v10708_v24, 4  ;;  %v6512_v22 = vrot.slane %v6511_v57, 1  ;;  %v6647_v31 = vsel %vm6626_vm3, %v6489_v19, %v6483_v37 }
 0x580   : > { %v6648_v23 = vsel %vm6628_vm6, %v6495_v16, %v6647_v31 }
 0x581   : > { %v6515_v9 = vadd.f32 %v6514_v59, %v10708_v24  ;;  %v6513_v15 = vadd.f32 %v6512_v22, %v6511_v57  ;;  %v6649_v59 = vsel %vm6630_vm9, %v6501_v52, %v6648_v23 }
 0x582   : > { %v6206_v61 = vpop.f32.mrf.mxu2  ;;  %v6295_v3 = vpop.f32.mrf.mxu3  ;;  %v6650_v21 = vsel %vm6632_vm12, %v6507_v4, %v6649_v59 }
 0x583   : > { %v6207_v48 = vadd.f32 %v10502_v47, %v6206_v61  ;;  %v6516_v20 = vrot.slane %v6515_v9, 2 }
 0x585   : > { %v10714_v6 = vadd.f32 %v6295_v3, %v6207_v48  ;;  %v6517_v34 = vadd.f32 %v6516_v20, %v6515_v9  ;;  %v6651_v9 = vsel %vm6634_vm11, %v6513_v15, %v6650_v21 }
 0x587   : > { %v6520_v42 = vrot.slane %v10714_v6, 4  ;;  %v6518_v14 = vrot.slane %v6517_v34, 1 }
 0x589   : > { %v6521_v28 = vadd.f32 %v6520_v42, %v10714_v6  ;;  %v6519_v17 = vadd.f32 %v6518_v14, %v6517_v34 }
 0x58a   : > { %v6209_v13 = vpop.f32.mrf.mxu2  ;;  %v6298_v58 = vpop.f32.mrf.mxu3 }
 0x58b   : > { %v6522_v30 = vrot.slane %v6521_v28, 2  ;;  %v6652_v48 = vsel %vm6636_vm13, %v6519_v17, %v6651_v9  ;;  %v6210_v42 = vadd.f32 %v10502_v47, %v6209_v13 }
 0x58d   : > { %v6523_v56 = vadd.f32 %v6522_v30, %v6521_v28  ;;  %v10741_v37 = vadd.f32 %v6298_v58, %v6210_v42 }
 0x58f   : > { %v6524_v49 = vrot.slane %v6523_v56, 1  ;;  %v6526_v31 = vrot.slane %v10741_v37, 4 }
 0x591   : > { %v6682_v60 = vpop.f32.mrf.mxu0  ;;  %v6525_v5 = vadd.f32 %v6524_v49, %v6523_v56  ;;  %v6527_v9 = vadd.f32 %v6526_v31, %v10741_v37 }
 0x592   : > { %v6211_v61 = vpop.f32.mrf.mxu2  ;;  %v6300_v3 = vpop.f32.mrf.mxu3  ;;  %v6683_v12 = vadd.f32 %v10722_v25, %v6682_v60 }
 0x593   : > { %v6653_v2 = vsel %vm6638_vm14, %v6525_v5, %v6652_v48  ;;  %v6212_v8 = vadd.f32 %v10502_v47, %v6211_v61 }
 0x594   : > { %v6694_v53 = vmax.f32 %v6683_v12, 0.0  ;;  %6687 = vmatmul.f32.vlgmr.msra.gmra.mxu2 %v6653_v2 }
 0x595   : > { %v10737_v22 = vadd.f32 %v6300_v3, %v6212_v8 }
 0x596   : > { %7985 = vmatmul.msk.f32.vlgmr.msra.gmra.mxu1 %vm6703_vm5, %v6694_v53 }
 0x597   : > { %v6532_v13 = vrot.slane %v10737_v22, 4 }
 0x599   : > { %v6533_v58 = vadd.f32 %v6532_v13, %v10737_v22 }
 0x59a   : > { %v6214_v20 = vpop.f32.mrf.mxu2  ;;  %v6303_v54 = vpop.f32.mrf.mxu3 }
 0x59b   : > { %v6215_v44 = vadd.f32 %v10502_v47, %v6214_v20  ;;  %v6534_v48 = vrot.slane %v6533_v58, 2  ;;  %v6528_v20 = vrot.slane %v6527_v9, 2 }
 0x59d   : > { %v10739_v28 = vadd.f32 %v6303_v54, %v6215_v44 }
 0x59f   : > { %v6538_v56 = vrot.slane %v10739_v28, 4 }
 0x5a1   : > { %v6539_v60 = vadd.f32 %v6538_v56, %v10739_v28 }
 0x5a2   : > { %v6216_v51 = vpop.f32.mrf.mxu2  ;;  %v6305_v57 = vpop.f32.mrf.mxu3 }
 0x5a3   : > { %v6217_v18 = vadd.f32 %v10502_v47, %v6216_v51  ;;  %v6540_v53 = vrot.slane %v6539_v60, 2 }
 0x5a5   : > { %v10743_v52 = vadd.f32 %v6305_v57, %v6217_v18  ;;  %v6541_v42 = vadd.f32 %v6540_v53, %v6539_v60 }
 0x5a7   : > { %v6544_v17 = vrot.slane %v10743_v52, 4 }
 0x5a9   : > { %v6545_v61 = vadd.f32 %v6544_v17, %v10743_v52 }
 0x5aa   : > { %v6219_v27 = vpop.f32.mrf.mxu2  ;;  %v6308_v34 = vpop.f32.mrf.mxu3 }
 0x5ab   : > { %v6220_v19 = vadd.f32 %v10502_v47, %v6219_v27  ;;  %v6546_v54 = vrot.slane %v6545_v61, 2  ;;  %v6535_v27 = vadd.f32 %v6534_v48, %v6533_v58 }
 0x5ad   : > { %v10746_v4 = vadd.f32 %v6308_v34, %v6220_v19  ;;  %v6529_v19 = vadd.f32 %v6528_v20, %v6527_v9  ;;  %v6536_v31 = vrot.slane %v6535_v27, 1 }
 0x5af   : > { %v6550_v23 = vrot.slane %v10746_v4, 4  ;;  %v6537_v48 = vadd.f32 %v6536_v31, %v6535_v27 }
 0x5b1   : > { %v6551_v3 = vadd.f32 %v6550_v23, %v10746_v4  ;;  %v6542_v23 = vrot.slane %v6541_v42, 1 }
 0x5b2   : > { %v6221_v16 = vpop.f32.mrf.mxu2  ;;  %v6310_v14 = vpop.f32.mrf.mxu3 }
 0x5b3   : > { %v6222_v30 = vadd.f32 %v10502_v47, %v6221_v16  ;;  %v6552_v57 = vrot.slane %v6551_v3, 2  ;;  %v6547_v16 = vadd.f32 %v6546_v54, %v6545_v61  ;;  %v6543_v9 = vadd.f32 %v6542_v23, %v6541_v42 }
 0x5b5   : > { %v10748_v15 = vadd.f32 %v6310_v14, %v6222_v30  ;;  %v6553_v13 = vadd.f32 %v6552_v57, %v6551_v3  ;;  %v6548_v58 = vrot.slane %v6547_v16, 1 }
 0x5b7   : > { %v6556_v49 = vrot.slane %v10748_v15, 4  ;;  %v6549_v20 = vadd.f32 %v6548_v58, %v6547_v16 }
 0x5b9   : > { %v6557_v2 = vadd.f32 %v6556_v49, %v10748_v15 }
 0x5ba   : > { %v6224_v59 = vpop.f32.mrf.mxu2  ;;  %v6313_v21 = vpop.f32.mrf.mxu3 }
 0x5bb   : > { %v6225_v5 = vadd.f32 %v10502_v47, %v6224_v59  ;;  %v6558_v34 = vrot.slane %v6557_v2, 2  ;;  %v6530_v59 = vrot.slane %v6529_v19, 1 }
 0x5bd   : > { %v10762_v12 = vadd.f32 %v6313_v21, %v6225_v5  ;;  %v6559_v17 = vadd.f32 %v6558_v34, %v6557_v2  ;;  %v6554_v5 = vrot.slane %v6553_v13, 1  ;;  %v6531_v53 = vadd.f32 %v6530_v59, %v6529_v19 }
 0x5bf   : > { %v6562_v51 = vrot.slane %v10762_v12, 4  ;;  %v6560_v60 = vrot.slane %v6559_v17, 1  ;;  %v6555_v54 = vadd.f32 %v6554_v5, %v6553_v13  ;;  %v6654_v2 = vsel %vm6626_vm3, %v6537_v48, %v6531_v53 }
 0x5c1   : > { %v6563_v8 = vadd.f32 %v6562_v51, %v10762_v12  ;;  %v6561_v51 = vadd.f32 %v6560_v60, %v6559_v17  ;;  %v10784_v17 = vld [vmem:[%s10985_s11] ss:$0 sm:$0xff] }
 0x5c2   : > { %v6226_v44 = vpop.f32.mrf.mxu2  ;;  %v6315_v30 = vpop.f32.mrf.mxu3 }
 0x5c3   : > { %v6227_v18 = vadd.f32 %v10502_v47, %v6226_v44  ;;  %v6564_v14 = vrot.slane %v6563_v8, 2 }
 0x5c5   : > { %v10768_v56 = vadd.f32 %v6315_v30, %v6227_v18  ;;  %v6565_v49 = vadd.f32 %v6564_v14, %v6563_v8  ;;  %v6655_v8 = vsel %vm6628_vm6, %v6543_v9, %v6654_v2 }
 0x5c6   : > { %v6656_v18 = vsel %vm6630_vm9, %v6549_v20, %v6655_v8 }
 0x5c7   : > { %v6568_v21 = vrot.slane %v10768_v56, 4  ;;  %v6566_v61 = vrot.slane %v6565_v49, 1  ;;  %v6657_v27 = vsel %vm6632_vm12, %v6555_v54, %v6656_v18 }
 0x5c8   : > { %v6658_v42 = vsel %vm6634_vm11, %v6561_v51, %v6657_v27 }
 0x5c9   : > { %v6569_v47 = vadd.f32 %v6568_v21, %v10768_v56  ;;  %v6567_v34 = vadd.f32 %v6566_v61, %v6565_v49 }
 0x5cb   : > { %v6570_v3 = vrot.slane %v6569_v47, 2  ;;  %v6659_v16 = vsel %vm6636_vm13, %v6567_v34, %v6658_v42  ;;  %v10789_v34 = vstv %s7017_s23 }
 0x5cd   : > { %v6571_v57 = vadd.f32 %v6570_v3, %v6569_v47 }
 0x5cf   : > { %v6572_v44 = vrot.slane %v6571_v57, 1 }
 0x5d1   : > { %v6685_v14 = vpop.f32.mrf.mxu0  ;;  %v6573_v30 = vadd.f32 %v6572_v44, %v6571_v57 }
 0x5d2   : > { %v6686_v19 = vadd.f32 %v10722_v25, %v6685_v14 }
 0x5d3   : > { %v6660_v13 = vsel %vm6638_vm14, %v6573_v30, %v6659_v16 }
 0x5d4   : > { %v6695_v31 = vmax.f32 %v6686_v19, 0.0  ;;  %6690 = vmatmul.f32.gmra.mxu2 %v6660_v13 }
 0x5d6   : > { %7986 = vmatmul.msk.f32.gmra.mxu1 %vm6703_vm5, %v6695_v31 }
 0x613   : > { %v6737_v23 = vpop.f32.mrf.mxu1 }
 0x614   : > { %v6738_v49 = vadd.f32 %v10784_v17, %v6737_v23 }
 0x616   : > { %v7989_v59 = vmul.f32 -1.442695, %v6738_v49  ;;  %v6953_v49 = vld [vmem:[%s8716_s25] sm:$0xff] }
 0x617   : > { %v6688_v58 = vpop.f32.mrf.mxu2 }
 0x618   : > { %8264 = vpow2.f32 %v7989_v59  ;;  %v6689_v21 = vadd.f32 %v10722_v25, %v6688_v58  ;;  %v6954_v59 = vld [vmem:[%s8716_s25 + $0x8] sm:$0xff] }
 0x61a   : > { %v6696_v5 = vmax.f32 %v6689_v21, 0.0 }
 0x61c   : > { %7987 = vmatmul.msk.f32.vlgmr.msra.gmra.mxu3 %vm6703_vm5, %v6696_v5 }
 0x61e   : > { %v8265_v48 = vpop.eup %8264 }
 0x61f   : > { %v6761_v60 = vadd.f32 1.0, %v8265_v48 }
 0x621   : > { %8266 = vrcp.f32 %v6761_v60  ;;  %v6776_v53 = vand.u32 2147483648, %v6761_v60  ;;  %v6774_v3 = vand.u32 2147483647, %v6761_v60  ;;  %vm6770_vm0 = vweird.f32 %v6761_v60 }
 0x623   : > { %v6777_v51 = vor.u32 1.1754944e-38, %v6776_v53  ;;  %vm6775_vm2 = vcmp.eq.f32.partialorder %v6774_v3, 8.507059e+37 }
 0x627   : > { %v8267_v47 = vpop.eup %8266 }
 0x628   : > { %v6766_v9 = vmul.f32 %v8267_v47, %v6761_v60  ;;  %vm6771_vm15 = vweird.f32 %v8267_v47  ;;  %v6955_v60 = vld [vmem:[%s8716_s25 + $0x10] sm:$0xff] }
 0x629   : > { %vm6772_vm1 = vmor %vm6770_vm0, %vm6771_vm15 }
 0x62a   : > { %v6767_v61 = vsub.f32 1.0, %v6766_v9  ;;  %v6957_v9 = vld [vmem:[%s8716_s25 + $0x20] sm:$0xff] }
 0x62c   : > { %v6768_v20 = vmul.f32 %v8267_v47, %v6767_v61 }
 0x62e   : > { %v6769_v54 = vadd.f32 %v8267_v47, %v6768_v20 }
 0x630   : > { %v6773_v57 = vsel %vm6772_vm1, %v8267_v47, %v6769_v54  ;;  %v6956_v47 = vld [vmem:[%s8716_s25 + $0x18] sm:$0xff]  ;;  %v6958_v54 = vld [vmem:[%s8716_s25 + $0x28] sm:$0xff] }
 0x631   : > { %v6778_v2 = vsel %vm6775_vm2, %v6777_v51, %v6773_v57  ;;  %v6959_v51 = vld [vmem:[%s8716_s25 + $0x30] sm:$0xff] }
 0x632   : > { %v6829_v8 = vrot.slane %v6778_v2, 1  ;;  %v6830_v44 = vrot.slane %v6778_v2, 2  ;;  %v6831_v18 = vrot.slane %v6778_v2, 3  ;;  %v6832_v27 = vrot.slane %v6778_v2, 4 }
 0x633   : > { %v6833_v14 = vrot.slane %v6778_v2, 5  ;;  %v6834_v30 = vrot.slane %v6778_v2, 6  ;;  %v6835_v42 = vrot.slane %v6778_v2, 7  ;;  %v6857_v19 = vperm.slane %v6778_v2, 0 }
 0x634   : > { %v6858_v16 = vperm.slane %v6829_v8, 0  ;;  %v6859_v13 = vperm.slane %v6830_v44, 0  ;;  %v6860_v31 = vperm.slane %v6831_v18, 0  ;;  %v6861_v23 = vperm.slane %v6832_v27, 0 }
 0x635   : > { %v6862_v58 = vperm.slane %v6833_v14, 0  ;;  %v6863_v21 = vperm.slane %v6834_v30, 0  ;;  %v6864_v5 = vperm.slane %v6835_v42, 0  ;;  %v6921_v48 = vmul.f32 %v6857_v19, %v10535_v46  ;;  %v6960_v46 = vld [vmem:[%s8716_s25 + $0x38] sm:$0xff] }
 0x636   : > { %v6922_v61 = vmul.f32 %v6858_v16, %v10527_v10  ;;  %v6923_v53 = vmul.f32 %v6859_v13, %v10529_v1  ;;  %v6924_v20 = vmul.f32 %v6860_v31, %v10537_v62  ;;  %v6925_v3 = vmul.f32 %v6861_v23, %v10540_v40 }
 0x637   : > { %v6926_v57 = vmul.f32 %v6862_v58, %v10542_v45  ;;  %v6927_v2 = vmul.f32 %v6863_v21, %v10568_v36  ;;  %v6928_v8 = vmul.f32 %v6864_v5, %v10585_v43  ;;  %v6985_v44 = vadd.f32 %v6953_v49, %v6921_v48 }
 0x638   : > { %v6986_v18 = vadd.f32 %v6954_v59, %v6922_v61  ;;  %v6987_v27 = vadd.f32 %v6955_v60, %v6923_v53  ;;  %v6988_v14 = vadd.f32 %v6956_v47, %v6924_v20  ;;  %v6989_v10 = vadd.f32 %v6957_v9, %v6925_v3 }
 0x639   : > { %v6990_v30 = vadd.f32 %v6958_v54, %v6926_v57  ;;  %v6991_v1 = vadd.f32 %v6959_v51, %v6927_v2  ;;  %v6992_v42 = vadd.f32 %v6960_v46, %v6928_v8  ;;  %vm7018_vm4 = vcmp.ge.f32.partialorder %v6985_v44, 0.0 }
 0x63a   : > { %vm7019_vm7 = vcmp.ge.f32.partialorder %v6986_v18, 0.0  ;;  %vm7020_vm8 = vcmp.ge.f32.partialorder %v6987_v27, 0.0  ;;  %vm7021_vm10 = vcmp.ge.f32.partialorder %v6988_v14, 0.0  ;;  %vm7022_vm3 = vcmp.ge.f32.partialorder %v6989_v10, 0.0 }
 0x63b   : > { %vm7023_vm6 = vcmp.ge.f32.partialorder %v6990_v30, 0.0  ;;  %v7051_v62 = vmul.f32 %v10789_v34, %v6985_v44  ;;  %v7052_v40 = vmul.f32 %v10789_v34, %v6986_v18  ;;  %v7053_v45 = vmul.f32 %v10789_v34, %v6987_v27 }
 0x63c   : > { %v7054_v36 = vmul.f32 %v10789_v34, %v6988_v14  ;;  %v7055_v43 = vmul.f32 %v10789_v34, %v6989_v10  ;;  %vm7024_vm9 = vcmp.ge.f32.partialorder %v6991_v1, 0.0  ;;  %v7056_v19 = vmul.f32 %v10789_v34, %v6990_v30 }
 0x63d   : > { %v7057_v16 = vmul.f32 %v10789_v34, %v6991_v1  ;;  %v7083_v13 = vsel %vm7018_vm4, %v6985_v44, %v7051_v62  ;;  %v7058_v31 = vmul.f32 %v10789_v34, %v6992_v42  ;;  %v7084_v23 = vsel %vm7019_vm7, %v6986_v18, %v7052_v40 }
 0x63e   : > { %v7085_v49 = vsel %vm7020_vm8, %v6987_v27, %v7053_v45  ;;  %v7086_v59 = vsel %vm7021_vm10, %v6988_v14, %v7054_v36  ;;  %7115 = vst [vmem:[%s10817_s26] sm:$0xff] %v7083_v13  ;;  %vm7025_vm12 = vcmp.ge.f32.partialorder %v6992_v42, 0.0  ;;  %v7087_v58 = vsel %vm7022_vm3, %v6989_v10, %v7055_v43 }
 0x63f   : > { %7116 = vst [vmem:[%s10817_s26 + $0x8] sm:$0xff] %v7084_v23  ;;  %v7088_v21 = vsel %vm7023_vm6, %v6990_v30, %v7056_v19  ;;  %v7089_v5 = vsel %vm7024_vm9, %v6991_v1, %v7057_v16  ;;  %v7090_v48 = vsel %vm7025_vm12, %v6992_v42, %v7058_v31  ;;  %v6961_v31 = vld [vmem:[%s8716_s25 + $0x40] sm:$0xff]  ;;  %v6962_v23 = vld [vmem:[%s8716_s25 + $0x48] sm:$0xff] }
 0x640   : > { %7117 = vst [vmem:[%s10817_s26 + $0x10] sm:$0xff] %v7085_v49 }
 0x641   : > { %7118 = vst [vmem:[%s10817_s26 + $0x18] sm:$0xff] %v7086_v59 }
 0x642   : > { %7119 = vst [vmem:[%s10817_s26 + $0x20] sm:$0xff] %v7087_v58 }
 0x643   : > { %7120 = vst [vmem:[%s10817_s26 + $0x28] sm:$0xff] %v7088_v21 }
 0x644   : > { %7121 = vst [vmem:[%s10817_s26 + $0x30] sm:$0xff] %v7089_v5  ;;  %v6963_v5 = vld [vmem:[%s8716_s25 + $0x50] sm:$0xff] }
 0x645   : > { %7122 = vst [vmem:[%s10817_s26 + $0x38] sm:$0xff] %v7090_v48  ;;  %v6964_v48 = vld [vmem:[%s8716_s25 + $0x58] sm:$0xff] }
 0x653   : > { %v6740_v60 = vpop.f32.mrf.mxu1 }
 0x654   : > { %v6741_v47 = vadd.f32 %v10784_v17, %v6740_v60  ;;  %v6965_v60 = vld [vmem:[%s8716_s25 + $0x60] sm:$0xff] }
 0x656   : > { %v7990_v9 = vmul.f32 -1.442695, %v6741_v47 }
 0x657   : > { %v6691_v61 = vpop.f32.mrf.mxu2 }
 0x658   : > { %8268 = vpow2.f32 %v7990_v9  ;;  %v6692_v53 = vadd.f32 %v10722_v25, %v6691_v61 }
 0x65a   : > { %v6697_v20 = vmax.f32 %v6692_v53, 0.0 }
 0x65c   : > { %7988 = vmatmul.msk.f32.gmra.mxu3 %vm6703_vm5, %v6697_v20  ;;  %v6966_v20 = vld [vmem:[%s8716_s25 + $0x68] sm:$0xff] }
 0x65e   : > { %v8269_v3 = vpop.eup %8268 }
 0x65f   : > { %v6762_v54 = vadd.f32 1.0, %v8269_v3  ;;  %v6967_v3 = vld [vmem:[%s8716_s25 + $0x70] sm:$0xff] }
 0x661   : > { %8270 = vrcp.f32 %v6762_v54  ;;  %v6791_v8 = vand.u32 2147483648, %v6762_v54  ;;  %v6789_v44 = vand.u32 2147483647, %v6762_v54  ;;  %vm6785_vm13 = vweird.f32 %v6762_v54 }
 0x663   : > { %v6792_v27 = vor.u32 1.1754944e-38, %v6791_v8  ;;  %vm6790_vm15 = vcmp.eq.f32.partialorder %v6789_v44, 8.507059e+37 }
 0x667   : > { %v8271_v51 = vpop.eup %8270 }
 0x668   : > { %v6781_v57 = vmul.f32 %v8271_v51, %v6762_v54  ;;  %vm6786_vm11 = vweird.f32 %v8271_v51 }
 0x669   : > { %vm6787_vm14 = vmor %vm6785_vm13, %vm6786_vm11 }
 0x66a   : > { %v6782_v2 = vsub.f32 1.0, %v6781_v57 }
 0x66c   : > { %v6783_v46 = vmul.f32 %v8271_v51, %v6782_v2 }
 0x66e   : > { %v6784_v18 = vadd.f32 %v8271_v51, %v6783_v46 }
 0x670   : > { %v6788_v14 = vsel %vm6787_vm14, %v8271_v51, %v6784_v18 }
 0x671   : > { %v6793_v25 = vsel %vm6790_vm15, %v6792_v27, %v6788_v14 }
 0x672   : > { %v6836_v10 = vrot.slane %v6793_v25, 1  ;;  %v6837_v30 = vrot.slane %v6793_v25, 2  ;;  %v6838_v1 = vrot.slane %v6793_v25, 3  ;;  %v6839_v42 = vrot.slane %v6793_v25, 4 }
 0x673   : > { %v6840_v62 = vrot.slane %v6793_v25, 5  ;;  %v6841_v40 = vrot.slane %v6793_v25, 6  ;;  %v6842_v45 = vrot.slane %v6793_v25, 7  ;;  %v6865_v36 = vperm.slane %v6793_v25, 0 }
 0x674   : > { %v6866_v43 = vperm.slane %v6836_v10, 0  ;;  %v6867_v19 = vperm.slane %v6837_v30, 0  ;;  %v6868_v16 = vperm.slane %v6838_v1, 0  ;;  %v6869_v13 = vperm.slane %v6839_v42, 0 }
 0x675   : > { %v6870_v49 = vperm.slane %v6840_v62, 0  ;;  %v6871_v59 = vperm.slane %v6841_v40, 0  ;;  %v6872_v58 = vperm.slane %v6842_v45, 0  ;;  %v6929_v21 = vmul.f32 %v6865_v36, %v10635_v29  ;;  %v6968_v29 = vld [vmem:[%s8716_s25 + $0x78] sm:$0xff] }
 0x676   : > { %v6930_v47 = vmul.f32 %v6866_v43, %v10630_v0  ;;  %v6931_v9 = vmul.f32 %v6867_v19, %v10632_v38  ;;  %v6932_v61 = vmul.f32 %v6868_v16, %v10637_v63  ;;  %v6933_v53 = vmul.f32 %v6869_v13, %v10640_v7 }
 0x677   : > { %v6934_v54 = vmul.f32 %v6870_v49, %v10642_v33  ;;  %v6935_v51 = vmul.f32 %v6871_v59, %v10656_v32  ;;  %v6936_v57 = vmul.f32 %v6872_v58, %v10667_v35  ;;  %v6993_v2 = vadd.f32 %v6961_v31, %v6929_v21 }
 0x678   : > { %v6994_v8 = vadd.f32 %v6962_v23, %v6930_v47  ;;  %v6995_v46 = vadd.f32 %v6963_v5, %v6931_v9  ;;  %v6996_v44 = vadd.f32 %v6964_v48, %v6932_v61  ;;  %v6997_v0 = vadd.f32 %v6965_v60, %v6933_v53 }
 0x679   : > { %v6998_v18 = vadd.f32 %v6966_v20, %v6934_v54  ;;  %v6999_v38 = vadd.f32 %v6967_v3, %v6935_v51  ;;  %v7000_v27 = vadd.f32 %v6968_v29, %v6936_v57  ;;  %vm7026_vm5 = vcmp.ge.f32.partialorder %v6993_v2, 0.0 }
 0x67a   : > { %vm7027_vm0 = vcmp.ge.f32.partialorder %v6994_v8, 0.0  ;;  %vm7028_vm1 = vcmp.ge.f32.partialorder %v6995_v46, 0.0  ;;  %vm7029_vm2 = vcmp.ge.f32.partialorder %v6996_v44, 0.0  ;;  %vm7030_vm4 = vcmp.ge.f32.partialorder %v6997_v0, 0.0 }
 0x67b   : > { %vm7031_vm7 = vcmp.ge.f32.partialorder %v6998_v18, 0.0  ;;  %v7059_v63 = vmul.f32 %v10789_v34, %v6993_v2  ;;  %v7060_v7 = vmul.f32 %v10789_v34, %v6994_v8  ;;  %v7061_v33 = vmul.f32 %v10789_v34, %v6995_v46 }
 0x67c   : > { %v7062_v32 = vmul.f32 %v10789_v34, %v6996_v44  ;;  %v7063_v35 = vmul.f32 %v10789_v34, %v6997_v0  ;;  %vm7032_vm8 = vcmp.ge.f32.partialorder %v6999_v38, 0.0  ;;  %v7064_v14 = vmul.f32 %v10789_v34, %v6998_v18 }
 0x67d   : > { %v7065_v25 = vmul.f32 %v10789_v34, %v6999_v38  ;;  %v7091_v10 = vsel %vm7026_vm5, %v6993_v2, %v7059_v63  ;;  %v7066_v30 = vmul.f32 %v10789_v34, %v7000_v27  ;;  %v7092_v1 = vsel %vm7027_vm0, %v6994_v8, %v7060_v7 }
 0x67e   : > { %v7093_v42 = vsel %vm7028_vm1, %v6995_v46, %v7061_v33  ;;  %v7094_v62 = vsel %vm7029_vm2, %v6996_v44, %v7062_v32  ;;  %7123 = vst [vmem:[%s10817_s26 + $0x40] sm:$0xff] %v7091_v10  ;;  %vm7033_vm10 = vcmp.ge.f32.partialorder %v7000_v27, 0.0  ;;  %v7095_v40 = vsel %vm7030_vm4, %v6997_v0, %v7063_v35  ;;  %v6971_v32 = vld [vmem:[%s8716_s25 + $0x90] sm:$0xff]  ;;  %v6972_v35 = vld [vmem:[%s8716_s25 + $0x98] sm:$0xff] }
 0x67f   : > { %7124 = vst [vmem:[%s10817_s26 + $0x48] sm:$0xff] %v7092_v1  ;;  %v7096_v45 = vsel %vm7031_vm7, %v6998_v18, %v7064_v14  ;;  %v7097_v36 = vsel %vm7032_vm8, %v6999_v38, %v7065_v25  ;;  %v7098_v43 = vsel %vm7033_vm10, %v7000_v27, %v7066_v30  ;;  %v6969_v18 = vld [vmem:[%s8716_s25 + $0x80] sm:$0xff]  ;;  %v6970_v38 = vld [vmem:[%s8716_s25 + $0x88] sm:$0xff] }
 0x680   : > { %7125 = vst [vmem:[%s10817_s26 + $0x50] sm:$0xff] %v7093_v42  ;;  %v6973_v14 = vld [vmem:[%s8716_s25 + $0xa0] sm:$0xff]  ;;  %v6974_v42 = vld [vmem:[%s8716_s25 + $0xa8] sm:$0xff] }
 0x681   : > { %7126 = vst [vmem:[%s10817_s26 + $0x58] sm:$0xff] %v7094_v62  ;;  %v6975_v62 = vld [vmem:[%s8716_s25 + $0xb0] sm:$0xff] }
 0x682   : > { %7127 = vst [vmem:[%s10817_s26 + $0x60] sm:$0xff] %v7095_v40 }
 0x683   : > { %7128 = vst [vmem:[%s10817_s26 + $0x68] sm:$0xff] %v7096_v45 }
 0x684   : > { %7129 = vst [vmem:[%s10817_s26 + $0x70] sm:$0xff] %v7097_v36 }
 0x685   : > { %7130 = vst [vmem:[%s10817_s26 + $0x78] sm:$0xff] %v7098_v43 }
 0x69f   : > { %v6743_v19 = vpop.f32.mrf.mxu3 }
 0x6a0   : > { %v6744_v16 = vadd.f32 %v10784_v17, %v6743_v19 }
 0x6a2   : > { %v7991_v13 = vmul.f32 -1.442695, %v6744_v16 }
 0x6a4   : > { %8272 = vpow2.f32 %v7991_v13 }
 0x6aa   : > { %v8273_v31 = vpop.eup %8272 }
 0x6ab   : > { %v6763_v23 = vadd.f32 1.0, %v8273_v31 }
 0x6ad   : > { %8274 = vrcp.f32 %v6763_v23  ;;  %v6806_v21 = vand.u32 2147483648, %v6763_v23  ;;  %v6804_v48 = vand.u32 2147483647, %v6763_v23  ;;  %vm6800_vm6 = vweird.f32 %v6763_v23 }
 0x6af   : > { %v6807_v47 = vor.u32 1.1754944e-38, %v6806_v21  ;;  %vm6805_vm12 = vcmp.eq.f32.partialorder %v6804_v48, 8.507059e+37 }
 0x6b3   : > { %v8275_v49 = vpop.eup %8274 }
 0x6b4   : > { %v6796_v59 = vmul.f32 %v8275_v49, %v6763_v23  ;;  %vm6801_vm3 = vweird.f32 %v8275_v49 }
 0x6b5   : > { %vm6802_vm9 = vmor %vm6800_vm6, %vm6801_vm3 }
 0x6b6   : > { %v6797_v58 = vsub.f32 1.0, %v6796_v59 }
 0x6b8   : > { %v6798_v5 = vmul.f32 %v8275_v49, %v6797_v58 }
 0x6ba   : > { %v6799_v60 = vadd.f32 %v8275_v49, %v6798_v5 }
 0x6bc   : > { %v6803_v9 = vsel %vm6802_vm9, %v8275_v49, %v6799_v60 }
 0x6bd   : > { %v6808_v61 = vsel %vm6805_vm12, %v6807_v47, %v6803_v9 }
 0x6be   : > { %v6843_v53 = vrot.slane %v6808_v61, 1  ;;  %v6844_v20 = vrot.slane %v6808_v61, 2  ;;  %v6845_v3 = vrot.slane %v6808_v61, 3  ;;  %v6846_v54 = vrot.slane %v6808_v61, 4 }
 0x6bf   : > { %v6847_v51 = vrot.slane %v6808_v61, 5  ;;  %v6848_v57 = vrot.slane %v6808_v61, 6  ;;  %v6849_v29 = vrot.slane %v6808_v61, 7  ;;  %v6873_v2 = vperm.slane %v6808_v61, 0 }
 0x6c0   : > { %v6874_v8 = vperm.slane %v6843_v53, 0  ;;  %v6875_v46 = vperm.slane %v6844_v20, 0  ;;  %v6876_v44 = vperm.slane %v6845_v3, 0  ;;  %v6877_v0 = vperm.slane %v6846_v54, 0 }
 0x6c1   : > { %v6878_v27 = vperm.slane %v6847_v51, 0  ;;  %v6879_v63 = vperm.slane %v6848_v57, 0  ;;  %v6880_v7 = vperm.slane %v6849_v29, 0  ;;  %v6937_v33 = vmul.f32 %v6873_v2, %v10687_v50  ;;  %v6976_v50 = vld [vmem:[%s8716_s25 + $0xb8] sm:$0xff] }
 0x6c2   : > { %v6938_v25 = vmul.f32 %v6874_v8, %v10683_v26  ;;  %v6939_v10 = vmul.f32 %v6875_v46, %v10685_v11  ;;  %v6940_v30 = vmul.f32 %v6876_v44, %v10689_v41  ;;  %v6941_v1 = vmul.f32 %v6877_v0, %v10692_v55 }
 0x6c3   : > { %v6942_v40 = vmul.f32 %v6878_v27, %v10694_v39  ;;  %v6943_v45 = vmul.f32 %v6879_v63, %v10708_v24  ;;  %v6944_v36 = vmul.f32 %v6880_v7, %v10714_v6  ;;  %v7001_v43 = vadd.f32 %v6969_v18, %v6937_v33 }
 0x6c4   : > { %v7002_v19 = vadd.f32 %v6970_v38, %v6938_v25  ;;  %v7003_v16 = vadd.f32 %v6971_v32, %v6939_v10  ;;  %v7004_v13 = vadd.f32 %v6972_v35, %v6940_v30  ;;  %v7005_v26 = vadd.f32 %v6973_v14, %v6941_v1 }
 0x6c5   : > { %v7006_v31 = vadd.f32 %v6974_v42, %v6942_v40  ;;  %v7007_v11 = vadd.f32 %v6975_v62, %v6943_v45  ;;  %v7008_v23 = vadd.f32 %v6976_v50, %v6944_v36  ;;  %vm7034_vm11 = vcmp.ge.f32.partialorder %v7001_v43, 0.0  ;;  %v6977_v40 = vld [vmem:[%s8716_s25 + $0xc0] sm:$0xff]  ;;  %v6978_v45 = vld [vmem:[%s8716_s25 + $0xc8] sm:$0xff] }
 0x6c6   : > { %vm7035_vm13 = vcmp.ge.f32.partialorder %v7002_v19, 0.0  ;;  %vm7036_vm14 = vcmp.ge.f32.partialorder %v7003_v16, 0.0  ;;  %vm7037_vm15 = vcmp.ge.f32.partialorder %v7004_v13, 0.0  ;;  %vm7038_vm5 = vcmp.ge.f32.partialorder %v7005_v26, 0.0 }
 0x6c7   : > { %vm7039_vm0 = vcmp.ge.f32.partialorder %v7006_v31, 0.0  ;;  %v7067_v41 = vmul.f32 %v10789_v34, %v7001_v43  ;;  %v7068_v55 = vmul.f32 %v10789_v34, %v7002_v19  ;;  %v7069_v39 = vmul.f32 %v10789_v34, %v7003_v16 }
 0x6c8   : > { %v7070_v24 = vmul.f32 %v10789_v34, %v7004_v13  ;;  %v7071_v6 = vmul.f32 %v10789_v34, %v7005_v26  ;;  %vm7040_vm1 = vcmp.ge.f32.partialorder %v7007_v11, 0.0  ;;  %v7072_v49 = vmul.f32 %v10789_v34, %v7006_v31 }
 0x6c9   : > { %v7073_v59 = vmul.f32 %v10789_v34, %v7007_v11  ;;  %v7099_v58 = vsel %vm7034_vm11, %v7001_v43, %v7067_v41  ;;  %v7074_v21 = vmul.f32 %v10789_v34, %v7008_v23  ;;  %v7100_v5 = vsel %vm7035_vm13, %v7002_v19, %v7068_v55  ;;  %v6982_v55 = vld [vmem:[%s8716_s25 + $0xe8] sm:$0xff] }
 0x6ca   : > { %v7101_v48 = vsel %vm7036_vm14, %v7003_v16, %v7069_v39  ;;  %v7102_v60 = vsel %vm7037_vm15, %v7004_v13, %v7070_v24  ;;  %7131 = vst [vmem:[%s10817_s26 + $0x80] sm:$0xff] %v7099_v58  ;;  %vm7041_vm2 = vcmp.ge.f32.partialorder %v7008_v23, 0.0  ;;  %v7103_v47 = vsel %vm7038_vm5, %v7005_v26, %v7071_v6  ;;  %v6979_v16 = vld [vmem:[%s8716_s25 + $0xd0] sm:$0xff]  ;;  %v6980_v13 = vld [vmem:[%s8716_s25 + $0xd8] sm:$0xff]  ;;  %v6981_v26 = vld [vmem:[%s8716_s25 + $0xe0] sm:$0xff] }
 0x6cb   : > { %7132 = vst [vmem:[%s10817_s26 + $0x88] sm:$0xff] %v7100_v5  ;;  %v7104_v9 = vsel %vm7039_vm0, %v7006_v31, %v7072_v49  ;;  %v7105_v61 = vsel %vm7040_vm1, %v7007_v11, %v7073_v59  ;;  %v7106_v53 = vsel %vm7041_vm2, %v7008_v23, %v7074_v21  ;;  %v6983_v39 = vld [vmem:[%s8716_s25 + $0xf0] sm:$0xff]  ;;  %v6984_v49 = vld [vmem:[%s8716_s25 + $0xf8] sm:$0xff] }
 0x6cc   : > { %7133 = vst [vmem:[%s10817_s26 + $0x90] sm:$0xff] %v7101_v48 }
 0x6cd   : > { %7134 = vst [vmem:[%s10817_s26 + $0x98] sm:$0xff] %v7102_v60 }
 0x6ce   : > { %7135 = vst [vmem:[%s10817_s26 + $0xa0] sm:$0xff] %v7103_v47 }
 0x6cf   : > { %7136 = vst [vmem:[%s10817_s26 + $0xa8] sm:$0xff] %v7104_v9 }
 0x6d0   : > { %7137 = vst [vmem:[%s10817_s26 + $0xb0] sm:$0xff] %v7105_v61 }
 0x6d1   : > { %7138 = vst [vmem:[%s10817_s26 + $0xb8] sm:$0xff] %v7106_v53 }
 0x6df   : > { %v6746_v20 = vpop.f32.mrf.mxu3 }
 0x6e0   : > { %v6747_v3 = vadd.f32 %v10784_v17, %v6746_v20 }
 0x6e2   : > { %v7992_v54 = vmul.f32 -1.442695, %v6747_v3 }
 0x6e4   : > { %8276 = vpow2.f32 %v7992_v54 }
 0x6ea   : > { %v8277_v51 = vpop.eup %8276 }
 0x6eb   : > { %v6764_v57 = vadd.f32 1.0, %v8277_v51 }
 0x6ed   : > { %8278 = vrcp.f32 %v6764_v57  ;;  %v6821_v46 = vand.u32 2147483648, %v6764_v57  ;;  %v6819_v0 = vand.u32 2147483647, %v6764_v57  ;;  %vm6815_vm7 = vweird.f32 %v6764_v57 }
 0x6ef   : > { %v6822_v38 = vor.u32 1.1754944e-38, %v6821_v46  ;;  %vm6820_vm10 = vcmp.eq.f32.partialorder %v6819_v0, 8.507059e+37 }
 0x6f3   : > { %v8279_v29 = vpop.eup %8278 }
 0x6f4   : > { %v6811_v2 = vmul.f32 %v8279_v29, %v6764_v57  ;;  %vm6816_vm4 = vweird.f32 %v8279_v29 }
 0x6f5   : > { %vm6817_vm8 = vmor %vm6815_vm7, %vm6816_vm4 }
 0x6f6   : > { %v6812_v8 = vsub.f32 1.0, %v6811_v2 }
 0x6f8   : > { %v6813_v44 = vmul.f32 %v8279_v29, %v6812_v8 }
 0x6fa   : > { %v6814_v18 = vadd.f32 %v8279_v29, %v6813_v44 }
 0x6fc   : > { %v6818_v27 = vsel %vm6817_vm8, %v8279_v29, %v6814_v18 }
 0x6fd   : > { %v6823_v17 = vsel %vm6820_vm10, %v6822_v38, %v6818_v27 }
 0x6fe   : > { %v6850_v63 = vrot.slane %v6823_v17, 1  ;;  %v6851_v7 = vrot.slane %v6823_v17, 2  ;;  %v6852_v33 = vrot.slane %v6823_v17, 3  ;;  %v6853_v32 = vrot.slane %v6823_v17, 4 }
 0x6ff   : > { %v6854_v35 = vrot.slane %v6823_v17, 5  ;;  %v6855_v14 = vrot.slane %v6823_v17, 6  ;;  %v6856_v25 = vrot.slane %v6823_v17, 7  ;;  %v6881_v10 = vperm.slane %v6823_v17, 0 }
 0x700   : > { %v6882_v30 = vperm.slane %v6850_v63, 0  ;;  %v6883_v1 = vperm.slane %v6851_v7, 0  ;;  %v6884_v42 = vperm.slane %v6852_v33, 0  ;;  %v6885_v62 = vperm.slane %v6853_v32, 0 }
 0x701   : > { %v6886_v36 = vperm.slane %v6854_v35, 0  ;;  %v6887_v50 = vperm.slane %v6855_v14, 0  ;;  %v6888_v43 = vperm.slane %v6856_v25, 0  ;;  %v6945_v19 = vmul.f32 %v6881_v10, %v10741_v37 }
 0x702   : > { %v6946_v31 = vmul.f32 %v6882_v30, %v10737_v22  ;;  %v6947_v11 = vmul.f32 %v6883_v1, %v10739_v28  ;;  %v6948_v23 = vmul.f32 %v6884_v42, %v10743_v52  ;;  %v6949_v41 = vmul.f32 %v6885_v62, %v10746_v4 }
 0x703   : > { %v6950_v24 = vmul.f32 %v6886_v36, %v10748_v15  ;;  %v6951_v6 = vmul.f32 %v6887_v50, %v10762_v12  ;;  %v6952_v37 = vmul.f32 %v6888_v43, %v10768_v56  ;;  %v7009_v59 = vadd.f32 %v6977_v40, %v6945_v19 }
 0x704   : > { %v7010_v58 = vadd.f32 %v6978_v45, %v6946_v31  ;;  %v7011_v21 = vadd.f32 %v6979_v16, %v6947_v11  ;;  %v7012_v22 = vadd.f32 %v6980_v13, %v6948_v23  ;;  %v7013_v5 = vadd.f32 %v6981_v26, %v6949_v41 }
 0x705   : > { %v7014_v28 = vadd.f32 %v6982_v55, %v6950_v24  ;;  %v7015_v48 = vadd.f32 %v6983_v39, %v6951_v6  ;;  %v7016_v52 = vadd.f32 %v6984_v49, %v6952_v37  ;;  %vm7042_vm3 = vcmp.ge.f32.partialorder %v7009_v59, 0.0 }
 0x706   : > { %vm7043_vm6 = vcmp.ge.f32.partialorder %v7010_v58, 0.0  ;;  %vm7044_vm9 = vcmp.ge.f32.partialorder %v7011_v21, 0.0  ;;  %vm7045_vm12 = vcmp.ge.f32.partialorder %v7012_v22, 0.0  ;;  %vm7046_vm11 = vcmp.ge.f32.partialorder %v7013_v5, 0.0 }
 0x707   : > { %vm7047_vm13 = vcmp.ge.f32.partialorder %v7014_v28, 0.0  ;;  %v7075_v4 = vmul.f32 %v10789_v34, %v7009_v59  ;;  %v7076_v15 = vmul.f32 %v10789_v34, %v7010_v58  ;;  %v7077_v12 = vmul.f32 %v10789_v34, %v7011_v21 }
 0x708   : > { %v7078_v56 = vmul.f32 %v10789_v34, %v7012_v22  ;;  %v7079_v60 = vmul.f32 %v10789_v34, %v7013_v5  ;;  %vm7048_vm14 = vcmp.ge.f32.partialorder %v7015_v48, 0.0  ;;  %v7080_v47 = vmul.f32 %v10789_v34, %v7014_v28 }
 0x709   : > { %v7081_v9 = vmul.f32 %v10789_v34, %v7015_v48  ;;  %v7107_v61 = vsel %vm7042_vm3, %v7009_v59, %v7075_v4  ;;  %v7082_v53 = vmul.f32 %v10789_v34, %v7016_v52  ;;  %v7108_v20 = vsel %vm7043_vm6, %v7010_v58, %v7076_v15 }
 0x70a   : > { %v7109_v3 = vsel %vm7044_vm9, %v7011_v21, %v7077_v12  ;;  %v7110_v54 = vsel %vm7045_vm12, %v7012_v22, %v7078_v56  ;;  %7139 = vst [vmem:[%s10817_s26 + $0xc0] sm:$0xff] %v7107_v61  ;;  %vm7049_vm15 = vcmp.ge.f32.partialorder %v7016_v52, 0.0  ;;  %v7111_v51 = vsel %vm7046_vm11, %v7013_v5, %v7079_v60 }
 0x70b   : > { %7140 = vst [vmem:[%s10817_s26 + $0xc8] sm:$0xff] %v7108_v20  ;;  %v7112_v57 = vsel %vm7047_vm13, %v7014_v28, %v7080_v47  ;;  %v7113_v34 = vsel %vm7048_vm14, %v7015_v48, %v7081_v9  ;;  %v7114_v29 = vsel %vm7049_vm15, %v7016_v52, %v7082_v53 }
 0x70c   : > { %7141 = vst [vmem:[%s10817_s26 + $0xd0] sm:$0xff] %v7109_v3 }
 0x70d   : > { %7142 = vst [vmem:[%s10817_s26 + $0xd8] sm:$0xff] %v7110_v54 }
 0x70e   : > { %7143 = vst [vmem:[%s10817_s26 + $0xe0] sm:$0xff] %v7111_v51 }
 0x70f   : > { %7144 = vst [vmem:[%s10817_s26 + $0xe8] sm:$0xff] %v7112_v57 }
 0x710   : > { %7145 = vst [vmem:[%s10817_s26 + $0xf0] sm:$0xff] %v7113_v34 }
 0x711   : > { %7146 = vst [vmem:[%s10817_s26 + $0xf8] sm:$0xff] %v7114_v29 }
 0x712   : > { %8458 = shalt.err (!%p8455_p10)
}
 0x713   : > { %s8514_s20 = smov 128   ;;  %s8515_s26 = smov 8  }
 0x714   : > { %8191 = dma.vmem_to_hbm [thread:$0]  (%p8680_p3), %s7161_s22, 4096, %s7163_s14, %s7148_s16, %s8514_s20, %s8514_s20, %s8515_s26  }
 0x715 PF: > { %s7177_s6 = sand.u32 1, %s8493_s29   ;;  %p11241_p12 = scmp.ge.s32.totalorder %s8505_s15, 2 }
 0x716   : > { %s7178_s4 = scalar_lea.sflag [#allocation7], %s7177_s6 }
 0x717   : > { %p8208_p13 = pnand %p11241_p12, %p8627_p6 }
 0x719   : > { %p8209_p0 = pneg %p8208_p13 }
 0x71b   : > { %8488 = dma.done.wait (%p8209_p0), %s7178_s4, 4096  }
 0x71c   : > { %8490 = vsyncadd (%p8209_p0), %s7178_s4, 4294963200  ;;  %s11242_s25 = sld [smem:[#allocation18_spill]]  ;;  %p30_p5 = scmp.ge.s32.totalorder %s8667_s1, 4  }
 0x71d   : > { %s11243_s14 = sld [smem:[#allocation19_spill]]  ;;  %s11244_s29 = smov %s8497_s30 }
 0x71e   : > { %s11246_s15 = smov %s8667_s1  ;;  %32 = sbr.rel (!%p30_p5) target bundleno = 13 (0xd), region = 133 }
 0x722   : > { %s11245_s30 = smov %s11242_s25 }
 0x723   :  { %7184 = vsyncpa [#allocation6], 1 }
 0x724   :  { %7186 = vsyncpa [#allocation6 + $0x1], 1 }
 0x725   :  { %7187 = vsyncpa [#allocation9], 1 }
 0x726   :  { %7188 = vsyncpa [#allocation12], 1 }
 0x727   :  { %7189 = vsyncpa [#allocation7], 1 }
 0x728   :  { %7191 = vsyncpa [#allocation7 + $0x1], 1 }

</bundles_post_ra>
